<compile_context>
chip_gen: v5e
topology: v5e:2x2
jax: 0.10.0
libtpu: 0.0.40
codegen_flags: <defaults>
</compile_context>

<pallas_src>
import functools

import jax
import jax.numpy as jnp
from jax import lax
from jax.experimental import pallas as pl
from jax.experimental.pallas import tpu as pltpu

INPUT_SIZE = 1
HIDDEN = 50
OUTPUT = 1

HP = 128          # lane-padded hidden size
OP = 128          # lane-padded fc output width

# PyTorch fused-gate order is (i, f, g, o); kernel column order is (i, f, o, g)
# so the three sigmoids act on one contiguous (BP, 3*HP) slab.
_GATE_ORDER = (0, 1, 3, 2)


# --------------------------------- kernel ---------------------------------

def _make_lstm_kernel(seq_len, chunk, mask_tail, unroll):
    def kernel(x_ref, wih0_ref, whh0_ref, b0_ref, w1_ref, b1_ref,
               wfc_ref, bfc_ref, out_ref,
               h0_ref, c0_ref, h1_ref, c1_ref):
        ci = pl.program_id(0)
        nc = pl.num_programs(0)
        H = HP

        @pl.when(ci == 0)
        def _():
            h0_ref[...] = jnp.zeros_like(h0_ref)
            c0_ref[...] = jnp.zeros_like(c0_ref)
            h1_ref[...] = jnp.zeros_like(h1_ref)
            c1_ref[...] = jnp.zeros_like(c1_ref)

        wih0 = wih0_ref[...]          # (1, 4H)  f32 (K=1, VPU broadcast)
        b0 = b0_ref[...]              # (1, 4H)  f32
        whh0 = whh0_ref[...]          # (H, 4H)  mxu dtype
        w1 = w1_ref[...]              # (2H, 4H) mxu dtype
        b1 = b1_ref[...]              # (1, 4H)  f32
        mxu = whh0.dtype

        def act(gates):
            # gate layout: [i | f | o | g]
            s = jax.nn.sigmoid(gates[:, :3 * H])
            g = jnp.tanh(gates[:, 3 * H:])
            return s[:, 0 * H:1 * H], s[:, 1 * H:2 * H], s[:, 2 * H:3 * H], g

        def body(t, carry):
            h0, c0, h1, c1 = carry

            # ---- layer 0: per-step input projection (VPU) + recurrent matmul (MXU)
            x_t = x_ref[t]                                     # (BP, 1) f32
            g0 = (x_t * wih0 + b0
                  + jnp.dot(h0.astype(mxu), whh0,
                            preferred_element_type=jnp.float32))
            i0, f0, o0, gg0 = act(g0)
            c0n = f0 * c0 + i0 * gg0
            h0n = o0 * jnp.tanh(c0n)

            # ---- layer 1: one matmul with concatenated [h0_t ; h1_{t-1}]
            lhs = jnp.concatenate([h0n.astype(mxu), h1.astype(mxu)], axis=1)
            g1 = jnp.dot(lhs, w1, preferred_element_type=jnp.float32) + b1
            i1, f1, o1, gg1 = act(g1)
            c1n = f1 * c1 + i1 * gg1
            h1n = o1 * jnp.tanh(c1n)

            if mask_tail:  # only emitted when T % chunk != 0
                valid = (ci * chunk + t) < seq_len
                h0n = jnp.where(valid, h0n, h0)
                c0n = jnp.where(valid, c0n, c0)
                h1n = jnp.where(valid, h1n, h1)
                c1n = jnp.where(valid, c1n, c1)
            return h0n, c0n, h1n, c1n

        h0, c0, h1, c1 = lax.fori_loop(
            0, chunk, body,
            (h0_ref[...], c0_ref[...], h1_ref[...], c1_ref[...]),
            unroll=unroll)

        h0_ref[...] = h0
        c0_ref[...] = c0
        h1_ref[...] = h1
        c1_ref[...] = c1

        @pl.when(ci == nc - 1)
        def _():
            out_ref[...] = (jnp.dot(h1.astype(mxu), wfc_ref[...],
                                    preferred_element_type=jnp.float32)
                            + bfc_ref[...])

    return kernel


# --------------------------- weight padding helpers ---------------------------

def _pad_gate_weight(w, rows_pad):
    """(rows, 4*HIDDEN) PyTorch (i,f,g,o) -> (rows_pad, 4*HP) kernel (i,f,o,g)."""
    rows = w.shape[0]
    out = jnp.zeros((rows_pad, 4 * HP), jnp.float32)
    for dst, src in enumerate(_GATE_ORDER):
        out = out.at[:rows, dst * HP:dst * HP + HIDDEN].set(
            w[:, src * HIDDEN:(src + 1) * HIDDEN])
    return out


def _pad_gate_bias(b):
    out = jnp.zeros((1, 4 * HP), jnp.float32)
    for dst, src in enumerate(_GATE_ORDER):
        out = out.at[0, dst * HP:dst * HP + HIDDEN].set(
            b[src * HIDDEN:(src + 1) * HIDDEN])
    return out


# --------------------------------- wrapper ---------------------------------

def lstm_model_forward(x, params, mxu_dtype=jnp.bfloat16):
    """x: (B, T, INPUT_SIZE) float32 -> (B, OUTPUT) float32."""
    wih0, whh0, b0, wih1, whh1, b1, wfc, bfc = params
    B, T, _ = x.shape
    BP = max(8, ((B + 7) // 8) * 8)                 # sublane-pad batch

    # time chunking: small T runs in one grid step fully unrolled; long T uses
    # 64-step chunks with unroll=8 so IMEM / compile time stay bounded.
    chunk = T if T <= 64 else 64
    nchunks = (T + chunk - 1) // chunk
    t_pad = nchunks * chunk
    mask_tail = (t_pad != T)
    unroll = True if chunk <= 16 else 8

    # ---- pad / reorder / cast weights ----
    wih0_p = _pad_gate_weight(wih0, INPUT_SIZE)                      # (1, 4HP)  f32
    whh0_p = _pad_gate_weight(whh0, HP).astype(mxu_dtype)            # (HP, 4HP)
    b0_p = _pad_gate_bias(b0)                                        # (1, 4HP)  f32 (b_ih+b_hh)
    w1cat_p = jnp.concatenate(
        [_pad_gate_weight(wih1, HP), _pad_gate_weight(whh1, HP)],
        axis=0).astype(mxu_dtype)                                    # (2HP, 4HP)
    b1_p = _pad_gate_bias(b1)                                        # (1, 4HP)  f32
    wfc_p = (jnp.zeros((HP, OP), jnp.float32)
             .at[:HIDDEN, :OUTPUT].set(wfc).astype(mxu_dtype))       # (HP, OP)
    bfc_p = jnp.zeros((1, OP), jnp.float32).at[0, :OUTPUT].set(bfc)  # (1, OP)   f32

    # ---- pad input: batch -> BP sublanes, time -> t_pad, time-major for the loop ----
    x_p = jnp.zeros((BP, t_pad, INPUT_SIZE), jnp.float32).at[:B, :T].set(x)
    x_tbi = jnp.transpose(x_p, (1, 0, 2))                            # (t_pad, BP, 1)

    full = lambda shape: pl.BlockSpec(shape, lambda i: (0,) * len(shape))

    out = pl.pallas_call(
        _make_lstm_kernel(T, chunk, mask_tail, unroll),
        out_shape=jax.ShapeDtypeStruct((BP, OP), jnp.float32),
        grid=(nchunks,),
        in_specs=[
            pl.BlockSpec((chunk, BP, INPUT_SIZE), lambda i: (i, 0, 0)),  # x chunk
            full((INPUT_SIZE, 4 * HP)),   # W_ih layer0 (fused gates, f32)
            full((HP, 4 * HP)),           # W_hh layer0
            full((1, 4 * HP)),            # b layer0
            full((2 * HP, 4 * HP)),       # [W_ih1 ; W_hh1]
            full((1, 4 * HP)),            # b layer1
            full((HP, OP)),               # fc weight
            full((1, OP)),                # fc bias
        ],
        out_specs=pl.BlockSpec((BP, OP), lambda i: (0, 0)),
        scratch_shapes=[
            pltpu.VMEM((BP, HP), jnp.float32),   # h0
            pltpu.VMEM((BP, HP), jnp.float32),   # c0
            pltpu.VMEM((BP, HP), jnp.float32),   # h1
            pltpu.VMEM((BP, HP), jnp.float32),   # c1
        ],
        compiler_params=pltpu.CompilerParams(
            dimension_semantics=("arbitrary",)),
    )(x_tbi, wih0_p, whh0_p, b0_p, w1cat_p, b1_p, wfc_p, bfc_p)

    return out[:B, :OUTPUT]


# ------------------------------- params & reference -------------------------------

def init_params(key):
    """Deterministic init mirroring PyTorch's U(-1/sqrt(H), 1/sqrt(H)); (in, 4H) layout."""
    stdv = 1.0 / float(HIDDEN) ** 0.5
    ks = jax.random.split(key, 10)
    u = lambda k, shape: jax.random.uniform(k, shape, jnp.float32, -stdv, stdv)
    wih0 = u(ks[0], (INPUT_SIZE, 4 * HIDDEN))
    whh0 = u(ks[1], (HIDDEN, 4 * HIDDEN))
    b0 = u(ks[2], (4 * HIDDEN,)) + u(ks[3], (4 * HIDDEN,))      # b_ih + b_hh
    wih1 = u(ks[4], (HIDDEN, 4 * HIDDEN))
    whh1 = u(ks[5], (HIDDEN, 4 * HIDDEN))
    b1 = u(ks[6], (4 * HIDDEN,)) + u(ks[7], (4 * HIDDEN,))
    wfc = u(ks[8], (HIDDEN, OUTPUT))
    bfc = u(ks[9], (OUTPUT,))
    return (wih0, whh0, b0, wih1, whh1, b1, wfc, bfc)


def lstm_model_ref(x, params):
    """Pure-JAX f32 reference (PyTorch gate order i,f,g,o)."""
    wih0, whh0, b0, wih1, whh1, b1, wfc, bfc = params
    B = x.shape[0]

    def cell(inp, h, c, wih, whh, b):
        gates = inp @ wih + h @ whh + b
        i = jax.nn.sigmoid(gates[:, 0 * HIDDEN:1 * HIDDEN])
        f = jax.nn.sigmoid(gates[:, 1 * HIDDEN:2 * HIDDEN])
        g = jnp.tanh(gates[:, 2 * HIDDEN:3 * HIDDEN])
        o = jax.nn.sigmoid(gates[:, 3 * HIDDEN:4 * HIDDEN])
        c = f * c + i * g
        h = o * jnp.tanh(c)
        return h, c

    z = jnp.zeros((B, HIDDEN), jnp.float32)

    def step(carry, x_t):
        h0, c0, h1, c1 = carry
        h0, c0 = cell(x_t, h0, c0, wih0, whh0, b0)
        h1, c1 = cell(h0, h1, c1, wih1, whh1, b1)
        return (h0, c0, h1, c1), None

    (h0, c0, h1, c1), _ = jax.lax.scan(step, (z, z, z, z), jnp.transpose(x, (1, 0, 2)))
    return h1 @ wfc + bfc


if __name__ == "__main__":
    key = jax.random.PRNGKey(0)
    k_x, k_p = jax.random.split(key)

    B, T = 2, 8
    x = jax.random.normal(k_x, (B, T, INPUT_SIZE), jnp.float32)
    params = init_params(k_p)

    ref = jax.block_until_ready(lstm_model_ref(x, params))

    # f32 MXU path: bit-level comparable to the reference.
    out_f32 = jax.block_until_ready(
        lstm_model_forward(x, params, mxu_dtype=jnp.float32))
    assert out_f32.shape == (B, OUTPUT), out_f32.shape
    assert jnp.allclose(out_f32, ref, atol=1e-5, rtol=1e-5), (out_f32, ref)

    # bf16 MXU operands (recommended for v6e/v7x), f32 accumulation + elementwise.
    out_bf16 = jax.block_until_ready(
        lstm_model_forward(x, params, mxu_dtype=jnp.bfloat16))
    assert out_bf16.shape == (B, OUTPUT), out_bf16.shape
    assert jnp.allclose(out_bf16, ref, atol=5e-2, rtol=5e-2), (out_bf16, ref)

    print("KERNEL_OK")
</pallas_src>

<mosaic_0001>
module attributes {stable_mosaic.version = 11 : i64} {
  func.func @kernel(%arg0: i32, %arg1: memref<8x8x1xf32, #tpu.memory_space<vmem>>, %arg2: memref<1x512xf32, #tpu.memory_space<vmem>>, %arg3: memref<128x512xf32, #tpu.memory_space<vmem>>, %arg4: memref<1x512xf32, #tpu.memory_space<vmem>>, %arg5: memref<256x512xf32, #tpu.memory_space<vmem>>, %arg6: memref<1x512xf32, #tpu.memory_space<vmem>>, %arg7: memref<128x128xf32, #tpu.memory_space<vmem>>, %arg8: memref<1x128xf32, #tpu.memory_space<vmem>>, %arg9: memref<8x128xf32, #tpu.memory_space<vmem>>, %arg10: memref<8x128xf32, #tpu.memory_space<vmem>>, %arg11: memref<8x128xf32, #tpu.memory_space<vmem>>, %arg12: memref<8x128xf32, #tpu.memory_space<vmem>>, %arg13: memref<8x128xf32, #tpu.memory_space<vmem>>) attributes {dimension_semantics = [#tpu.dimension_semantics<arbitrary>], iteration_bounds = array<i64: 1>, scalar_prefetch = 0 : i64, scratch_operands = 4 : i64, tpu.core_type = #tpu.core_type<tc>, window_params = [{transform_indices = @transform_0, window_bounds = array<i64: 8, 8, 1>}, {pipeline_mode = #tpu.pipeline_mode<synchronous>, transform_indices = @transform_1, window_bounds = array<i64: 1, 512>}, {pipeline_mode = #tpu.pipeline_mode<synchronous>, transform_indices = @transform_2, window_bounds = array<i64: 128, 512>}, {pipeline_mode = #tpu.pipeline_mode<synchronous>, transform_indices = @transform_3, window_bounds = array<i64: 1, 512>}, {pipeline_mode = #tpu.pipeline_mode<synchronous>, transform_indices = @transform_4, window_bounds = array<i64: 256, 512>}, {pipeline_mode = #tpu.pipeline_mode<synchronous>, transform_indices = @transform_5, window_bounds = array<i64: 1, 512>}, {pipeline_mode = #tpu.pipeline_mode<synchronous>, transform_indices = @transform_6, window_bounds = array<i64: 128, 128>}, {pipeline_mode = #tpu.pipeline_mode<synchronous>, transform_indices = @transform_7, window_bounds = array<i64: 1, 128>}, {pipeline_mode = #tpu.pipeline_mode<synchronous>, transform_indices = @transform_8, window_bounds = array<i64: 8, 128>}]} {
    %c0_i32 = arith.constant 0 : i32
    %0 = arith.cmpi eq, %arg0, %c0_i32 : i32
    %1 = arith.extui %0 : i1 to i32
    %c0_i32_0 = arith.constant 0 : i32
    %2 = arith.cmpi ne, %1, %c0_i32_0 : i32
    scf.if %2 {
      %cst_76 = arith.constant 0.000000e+00 : f32
      %387 = vector.broadcast %cst_76 : f32 to vector<8x128xf32>
      %c0_77 = arith.constant 0 : index
      %c0_78 = arith.constant 0 : index
      %388 = vector.load %arg10[%c0_77, %c0_78] : memref<8x128xf32, #tpu.memory_space<vmem>>, vector<8x128xf32>
      tpu.vector_store %arg10[%c0_77, %c0_78], %387 {strides = array<i32>} : memref<8x128xf32, #tpu.memory_space<vmem>>, vector<8x128xf32>,
      %cst_79 = arith.constant 0.000000e+00 : f32
      %389 = vector.broadcast %cst_79 : f32 to vector<8x128xf32>
      %c0_80 = arith.constant 0 : index
      %c0_81 = arith.constant 0 : index
      %390 = vector.load %arg11[%c0_80, %c0_81] : memref<8x128xf32, #tpu.memory_space<vmem>>, vector<8x128xf32>
      tpu.vector_store %arg11[%c0_80, %c0_81], %389 {strides = array<i32>} : memref<8x128xf32, #tpu.memory_space<vmem>>, vector<8x128xf32>,
      %cst_82 = arith.constant 0.000000e+00 : f32
      %391 = vector.broadcast %cst_82 : f32 to vector<8x128xf32>
      %c0_83 = arith.constant 0 : index
      %c0_84 = arith.constant 0 : index
      %392 = vector.load %arg12[%c0_83, %c0_84] : memref<8x128xf32, #tpu.memory_space<vmem>>, vector<8x128xf32>
      tpu.vector_store %arg12[%c0_83, %c0_84], %391 {strides = array<i32>} : memref<8x128xf32, #tpu.memory_space<vmem>>, vector<8x128xf32>,
      %cst_85 = arith.constant 0.000000e+00 : f32
      %393 = vector.broadcast %cst_85 : f32 to vector<8x128xf32>
      %c0_86 = arith.constant 0 : index
      %c0_87 = arith.constant 0 : index
      %394 = vector.load %arg13[%c0_86, %c0_87] : memref<8x128xf32, #tpu.memory_space<vmem>>, vector<8x128xf32>
      tpu.vector_store %arg13[%c0_86, %c0_87], %393 {strides = array<i32>} : memref<8x128xf32, #tpu.memory_space<vmem>>, vector<8x128xf32>,
    } else {
    }
    %c0 = arith.constant 0 : index
    %c0_1 = arith.constant 0 : index
    %3 = vector.load %arg2[%c0, %c0_1] : memref<1x512xf32, #tpu.memory_space<vmem>>, vector<1x512xf32>
    %c0_2 = arith.constant 0 : index
    %c0_3 = arith.constant 0 : index
    %4 = vector.load %arg4[%c0_2, %c0_3] : memref<1x512xf32, #tpu.memory_space<vmem>>, vector<1x512xf32>
    %c0_4 = arith.constant 0 : index
    %c0_5 = arith.constant 0 : index
    %5 = vector.load %arg3[%c0_4, %c0_5] : memref<128x512xf32, #tpu.memory_space<vmem>>, vector<128x512xf32>
    %c0_6 = arith.constant 0 : index
    %c0_7 = arith.constant 0 : index
    %6 = vector.load %arg5[%c0_6, %c0_7] : memref<256x512xf32, #tpu.memory_space<vmem>>, vector<256x512xf32>
    %c0_8 = arith.constant 0 : index
    %c0_9 = arith.constant 0 : index
    %7 = vector.load %arg6[%c0_8, %c0_9] : memref<1x512xf32, #tpu.memory_space<vmem>>, vector<1x512xf32>
    %c0_10 = arith.constant 0 : index
    %c0_11 = arith.constant 0 : index
    %8 = vector.load %arg10[%c0_10, %c0_11] : memref<8x128xf32, #tpu.memory_space<vmem>>, vector<8x128xf32>
    %c0_12 = arith.constant 0 : index
    %c0_13 = arith.constant 0 : index
    %9 = vector.load %arg11[%c0_12, %c0_13] : memref<8x128xf32, #tpu.memory_space<vmem>>, vector<8x128xf32>
    %c0_14 = arith.constant 0 : index
    %c0_15 = arith.constant 0 : index
    %10 = vector.load %arg12[%c0_14, %c0_15] : memref<8x128xf32, #tpu.memory_space<vmem>>, vector<8x128xf32>
    %c0_16 = arith.constant 0 : index
    %c0_17 = arith.constant 0 : index
    %11 = vector.load %arg13[%c0_16, %c0_17] : memref<8x128xf32, #tpu.memory_space<vmem>>, vector<8x128xf32>
    %c0_i32_18 = arith.constant 0 : i32
    %12 = arith.index_cast %c0_i32_18 : i32 to index
    %c0_19 = arith.constant 0 : index
    %c0_20 = arith.constant 0 : index
    %13 = vector.load %arg1[%12, %c0_19, %c0_20] : memref<8x8x1xf32, #tpu.memory_space<vmem>>, vector<1x8x1xf32>
    %14 = vector.shape_cast %13 : vector<1x8x1xf32> to vector<8x1xf32>
    %15 = vector.broadcast %14 : vector<8x1xf32> to vector<8x512xf32>
    %16 = vector.broadcast %3 : vector<1x512xf32> to vector<8x512xf32>
    %17 = arith.mulf %15, %16 : vector<8x512xf32>
    %18 = vector.broadcast %4 : vector<1x512xf32> to vector<8x512xf32>
    %19 = arith.addf %17, %18 : vector<8x512xf32>
    %cst = arith.constant dense<0.000000e+00> : vector<8x512xf32>
    %20 = tpu.matmul %8, %5, %cst {dimension_numbers = #tpu.dot_dimension_numbers<[1], [0], [0], [1], [0, 0, 1, 1], [], []>} : vector<8x128xf32>, vector<128x512xf32>, vector<8x512xf32> -> vector<8x512xf32>
    %21 = arith.addf %19, %20 : vector<8x512xf32>
    %22 = vector.extract_strided_slice %21 {offsets = [0, 0], sizes = [8, 384], strides = [1, 1]} : vector<8x512xf32> to vector<8x384xf32>
    %23 = arith.negf %22 : vector<8x384xf32>
    %24 = math.exp %23 : vector<8x384xf32>
    %cst_21 = arith.constant 1.000000e+00 : f32
    %25 = vector.broadcast %cst_21 : f32 to vector<8x384xf32>
    %26 = arith.addf %25, %24 : vector<8x384xf32>
    %27 = arith.divf %25, %26 : vector<8x384xf32>
    %28 = vector.extract_strided_slice %21 {offsets = [0, 384], sizes = [8, 128], strides = [1, 1]} : vector<8x512xf32> to vector<8x128xf32>
    %29 = math.tanh %28 : vector<8x128xf32>
    %30 = vector.extract_strided_slice %27 {offsets = [0, 0], sizes = [8, 128], strides = [1, 1]} : vector<8x384xf32> to vector<8x128xf32>
    %31 = vector.extract_strided_slice %27 {offsets = [0, 128], sizes = [8, 128], strides = [1, 1]} : vector<8x384xf32> to vector<8x128xf32>
    %32 = vector.extract_strided_slice %27 {offsets = [0, 256], sizes = [8, 128], strides = [1, 1]} : vector<8x384xf32> to vector<8x128xf32>
    %33 = arith.mulf %31, %9 : vector<8x128xf32>
    %34 = arith.mulf %30, %29 : vector<8x128xf32>
    %35 = arith.addf %33, %34 : vector<8x128xf32>
    %36 = math.tanh %35 : vector<8x128xf32>
    %37 = arith.mulf %32, %36 : vector<8x128xf32>
    %38 = tpu.concatenate %37, %10 in 1 : vector<8x128xf32>, vector<8x128xf32> -> vector<8x256xf32>
    %cst_22 = arith.constant dense<0.000000e+00> : vector<8x512xf32>
    %39 = tpu.matmul %38, %6, %cst_22 {dimension_numbers = #tpu.dot_dimension_numbers<[1], [0], [0], [1], [0, 0, 1, 1], [], []>} : vector<8x256xf32>, vector<256x512xf32>, vector<8x512xf32> -> vector<8x512xf32>
    %40 = vector.broadcast %7 : vector<1x512xf32> to vector<8x512xf32>
    %41 = arith.addf %39, %40 : vector<8x512xf32>
    %42 = vector.extract_strided_slice %41 {offsets = [0, 0], sizes = [8, 384], strides = [1, 1]} : vector<8x512xf32> to vector<8x384xf32>
    %43 = arith.negf %42 : vector<8x384xf32>
    %44 = math.exp %43 : vector<8x384xf32>
    %cst_23 = arith.constant 1.000000e+00 : f32
    %45 = vector.broadcast %cst_23 : f32 to vector<8x384xf32>
    %46 = arith.addf %45, %44 : vector<8x384xf32>
    %47 = arith.divf %45, %46 : vector<8x384xf32>
    %48 = vector.extract_strided_slice %41 {offsets = [0, 384], sizes = [8, 128], strides = [1, 1]} : vector<8x512xf32> to vector<8x128xf32>
    %49 = math.tanh %48 : vector<8x128xf32>
    %50 = vector.extract_strided_slice %47 {offsets = [0, 0], sizes = [8, 128], strides = [1, 1]} : vector<8x384xf32> to vector<8x128xf32>
    %51 = vector.extract_strided_slice %47 {offsets = [0, 128], sizes = [8, 128], strides = [1, 1]} : vector<8x384xf32> to vector<8x128xf32>
    %52 = vector.extract_strided_slice %47 {offsets = [0, 256], sizes = [8, 128], strides = [1, 1]} : vector<8x384xf32> to vector<8x128xf32>
    %53 = arith.mulf %51, %11 : vector<8x128xf32>
    %54 = arith.mulf %50, %49 : vector<8x128xf32>
    %55 = arith.addf %53, %54 : vector<8x128xf32>
    %56 = math.tanh %55 : vector<8x128xf32>
    %57 = arith.mulf %52, %56 : vector<8x128xf32>
    %c1_i32 = arith.constant 1 : i32
    %58 = arith.index_cast %c1_i32 : i32 to index
    %c0_24 = arith.constant 0 : index
    %c0_25 = arith.constant 0 : index
    %59 = vector.load %arg1[%58, %c0_24, %c0_25] : memref<8x8x1xf32, #tpu.memory_space<vmem>>, vector<1x8x1xf32>
    %60 = vector.shape_cast %59 : vector<1x8x1xf32> to vector<8x1xf32>
    %61 = vector.broadcast %60 : vector<8x1xf32> to vector<8x512xf32>
    %62 = vector.broadcast %3 : vector<1x512xf32> to vector<8x512xf32>
    %63 = arith.mulf %61, %62 : vector<8x512xf32>
    %64 = vector.broadcast %4 : vector<1x512xf32> to vector<8x512xf32>
    %65 = arith.addf %63, %64 : vector<8x512xf32>
    %cst_26 = arith.constant dense<0.000000e+00> : vector<8x512xf32>
    %66 = tpu.matmul %37, %5, %cst_26 {dimension_numbers = #tpu.dot_dimension_numbers<[1], [0], [0], [1], [0, 0, 1, 1], [], []>} : vector<8x128xf32>, vector<128x512xf32>, vector<8x512xf32> -> vector<8x512xf32>
    %67 = arith.addf %65, %66 : vector<8x512xf32>
    %68 = vector.extract_strided_slice %67 {offsets = [0, 0], sizes = [8, 384], strides = [1, 1]} : vector<8x512xf32> to vector<8x384xf32>
    %69 = arith.negf %68 : vector<8x384xf32>
    %70 = math.exp %69 : vector<8x384xf32>
    %cst_27 = arith.constant 1.000000e+00 : f32
    %71 = vector.broadcast %cst_27 : f32 to vector<8x384xf32>
    %72 = arith.addf %71, %70 : vector<8x384xf32>
    %73 = arith.divf %71, %72 : vector<8x384xf32>
    %74 = vector.extract_strided_slice %67 {offsets = [0, 384], sizes = [8, 128], strides = [1, 1]} : vector<8x512xf32> to vector<8x128xf32>
    %75 = math.tanh %74 : vector<8x128xf32>
    %76 = vector.extract_strided_slice %73 {offsets = [0, 0], sizes = [8, 128], strides = [1, 1]} : vector<8x384xf32> to vector<8x128xf32>
    %77 = vector.extract_strided_slice %73 {offsets = [0, 128], sizes = [8, 128], strides = [1, 1]} : vector<8x384xf32> to vector<8x128xf32>
    %78 = vector.extract_strided_slice %73 {offsets = [0, 256], sizes = [8, 128], strides = [1, 1]} : vector<8x384xf32> to vector<8x128xf32>
    %79 = arith.mulf %77, %35 : vector<8x128xf32>
    %80 = arith.mulf %76, %75 : vector<8x128xf32>
    %81 = arith.addf %79, %80 : vector<8x128xf32>
    %82 = math.tanh %81 : vector<8x128xf32>
    %83 = arith.mulf %78, %82 : vector<8x128xf32>
    %84 = tpu.concatenate %83, %57 in 1 : vector<8x128xf32>, vector<8x128xf32> -> vector<8x256xf32>
    %cst_28 = arith.constant dense<0.000000e+00> : vector<8x512xf32>
    %85 = tpu.matmul %84, %6, %cst_28 {dimension_numbers = #tpu.dot_dimension_numbers<[1], [0], [0], [1], [0, 0, 1, 1], [], []>} : vector<8x256xf32>, vector<256x512xf32>, vector<8x512xf32> -> vector<8x512xf32>
    %86 = vector.broadcast %7 : vector<1x512xf32> to vector<8x512xf32>
    %87 = arith.addf %85, %86 : vector<8x512xf32>
    %88 = vector.extract_strided_slice %87 {offsets = [0, 0], sizes = [8, 384], strides = [1, 1]} : vector<8x512xf32> to vector<8x384xf32>
    %89 = arith.negf %88 : vector<8x384xf32>
    %90 = math.exp %89 : vector<8x384xf32>
    %cst_29 = arith.constant 1.000000e+00 : f32
    %91 = vector.broadcast %cst_29 : f32 to vector<8x384xf32>
    %92 = arith.addf %91, %90 : vector<8x384xf32>
    %93 = arith.divf %91, %92 : vector<8x384xf32>
    %94 = vector.extract_strided_slice %87 {offsets = [0, 384], sizes = [8, 128], strides = [1, 1]} : vector<8x512xf32> to vector<8x128xf32>
    %95 = math.tanh %94 : vector<8x128xf32>
    %96 = vector.extract_strided_slice %93 {offsets = [0, 0], sizes = [8, 128], strides = [1, 1]} : vector<8x384xf32> to vector<8x128xf32>
    %97 = vector.extract_strided_slice %93 {offsets = [0, 128], sizes = [8, 128], strides = [1, 1]} : vector<8x384xf32> to vector<8x128xf32>
    %98 = vector.extract_strided_slice %93 {offsets = [0, 256], sizes = [8, 128], strides = [1, 1]} : vector<8x384xf32> to vector<8x128xf32>
    %99 = arith.mulf %97, %55 : vector<8x128xf32>
    %100 = arith.mulf %96, %95 : vector<8x128xf32>
    %101 = arith.addf %99, %100 : vector<8x128xf32>
    %102 = math.tanh %101 : vector<8x128xf32>
    %103 = arith.mulf %98, %102 : vector<8x128xf32>
    %c2_i32 = arith.constant 2 : i32
    %104 = arith.index_cast %c2_i32 : i32 to index
    %c0_30 = arith.constant 0 : index
    %c0_31 = arith.constant 0 : index
    %105 = vector.load %arg1[%104, %c0_30, %c0_31] : memref<8x8x1xf32, #tpu.memory_space<vmem>>, vector<1x8x1xf32>
    %106 = vector.shape_cast %105 : vector<1x8x1xf32> to vector<8x1xf32>
    %107 = vector.broadcast %106 : vector<8x1xf32> to vector<8x512xf32>
    %108 = vector.broadcast %3 : vector<1x512xf32> to vector<8x512xf32>
    %109 = arith.mulf %107, %108 : vector<8x512xf32>
    %110 = vector.broadcast %4 : vector<1x512xf32> to vector<8x512xf32>
    %111 = arith.addf %109, %110 : vector<8x512xf32>
    %cst_32 = arith.constant dense<0.000000e+00> : vector<8x512xf32>
    %112 = tpu.matmul %83, %5, %cst_32 {dimension_numbers = #tpu.dot_dimension_numbers<[1], [0], [0], [1], [0, 0, 1, 1], [], []>} : vector<8x128xf32>, vector<128x512xf32>, vector<8x512xf32> -> vector<8x512xf32>
    %113 = arith.addf %111, %112 : vector<8x512xf32>
    %114 = vector.extract_strided_slice %113 {offsets = [0, 0], sizes = [8, 384], strides = [1, 1]} : vector<8x512xf32> to vector<8x384xf32>
    %115 = arith.negf %114 : vector<8x384xf32>
    %116 = math.exp %115 : vector<8x384xf32>
    %cst_33 = arith.constant 1.000000e+00 : f32
    %117 = vector.broadcast %cst_33 : f32 to vector<8x384xf32>
    %118 = arith.addf %117, %116 : vector<8x384xf32>
    %119 = arith.divf %117, %118 : vector<8x384xf32>
    %120 = vector.extract_strided_slice %113 {offsets = [0, 384], sizes = [8, 128], strides = [1, 1]} : vector<8x512xf32> to vector<8x128xf32>
    %121 = math.tanh %120 : vector<8x128xf32>
    %122 = vector.extract_strided_slice %119 {offsets = [0, 0], sizes = [8, 128], strides = [1, 1]} : vector<8x384xf32> to vector<8x128xf32>
    %123 = vector.extract_strided_slice %119 {offsets = [0, 128], sizes = [8, 128], strides = [1, 1]} : vector<8x384xf32> to vector<8x128xf32>
    %124 = vector.extract_strided_slice %119 {offsets = [0, 256], sizes = [8, 128], strides = [1, 1]} : vector<8x384xf32> to vector<8x128xf32>
    %125 = arith.mulf %123, %81 : vector<8x128xf32>
    %126 = arith.mulf %122, %121 : vector<8x128xf32>
    %127 = arith.addf %125, %126 : vector<8x128xf32>
    %128 = math.tanh %127 : vector<8x128xf32>
    %129 = arith.mulf %124, %128 : vector<8x128xf32>
    %130 = tpu.concatenate %129, %103 in 1 : vector<8x128xf32>, vector<8x128xf32> -> vector<8x256xf32>
    %cst_34 = arith.constant dense<0.000000e+00> : vector<8x512xf32>
    %131 = tpu.matmul %130, %6, %cst_34 {dimension_numbers = #tpu.dot_dimension_numbers<[1], [0], [0], [1], [0, 0, 1, 1], [], []>} : vector<8x256xf32>, vector<256x512xf32>, vector<8x512xf32> -> vector<8x512xf32>
    %132 = vector.broadcast %7 : vector<1x512xf32> to vector<8x512xf32>
    %133 = arith.addf %131, %132 : vector<8x512xf32>
    %134 = vector.extract_strided_slice %133 {offsets = [0, 0], sizes = [8, 384], strides = [1, 1]} : vector<8x512xf32> to vector<8x384xf32>
    %135 = arith.negf %134 : vector<8x384xf32>
    %136 = math.exp %135 : vector<8x384xf32>
    %cst_35 = arith.constant 1.000000e+00 : f32
    %137 = vector.broadcast %cst_35 : f32 to vector<8x384xf32>
    %138 = arith.addf %137, %136 : vector<8x384xf32>
    %139 = arith.divf %137, %138 : vector<8x384xf32>
    %140 = vector.extract_strided_slice %133 {offsets = [0, 384], sizes = [8, 128], strides = [1, 1]} : vector<8x512xf32> to vector<8x128xf32>
    %141 = math.tanh %140 : vector<8x128xf32>
    %142 = vector.extract_strided_slice %139 {offsets = [0, 0], sizes = [8, 128], strides = [1, 1]} : vector<8x384xf32> to vector<8x128xf32>
    %143 = vector.extract_strided_slice %139 {offsets = [0, 128], sizes = [8, 128], strides = [1, 1]} : vector<8x384xf32> to vector<8x128xf32>
    %144 = vector.extract_strided_slice %139 {offsets = [0, 256], sizes = [8, 128], strides = [1, 1]} : vector<8x384xf32> to vector<8x128xf32>
    %145 = arith.mulf %143, %101 : vector<8x128xf32>
    %146 = arith.mulf %142, %141 : vector<8x128xf32>
    %147 = arith.addf %145, %146 : vector<8x128xf32>
    %148 = math.tanh %147 : vector<8x128xf32>
    %149 = arith.mulf %144, %148 : vector<8x128xf32>
    %c3_i32 = arith.constant 3 : i32
    %150 = arith.index_cast %c3_i32 : i32 to index
    %c0_36 = arith.constant 0 : index
    %c0_37 = arith.constant 0 : index
    %151 = vector.load %arg1[%150, %c0_36, %c0_37] : memref<8x8x1xf32, #tpu.memory_space<vmem>>, vector<1x8x1xf32>
    %152 = vector.shape_cast %151 : vector<1x8x1xf32> to vector<8x1xf32>
    %153 = vector.broadcast %152 : vector<8x1xf32> to vector<8x512xf32>
    %154 = vector.broadcast %3 : vector<1x512xf32> to vector<8x512xf32>
    %155 = arith.mulf %153, %154 : vector<8x512xf32>
    %156 = vector.broadcast %4 : vector<1x512xf32> to vector<8x512xf32>
    %157 = arith.addf %155, %156 : vector<8x512xf32>
    %cst_38 = arith.constant dense<0.000000e+00> : vector<8x512xf32>
    %158 = tpu.matmul %129, %5, %cst_38 {dimension_numbers = #tpu.dot_dimension_numbers<[1], [0], [0], [1], [0, 0, 1, 1], [], []>} : vector<8x128xf32>, vector<128x512xf32>, vector<8x512xf32> -> vector<8x512xf32>
    %159 = arith.addf %157, %158 : vector<8x512xf32>
    %160 = vector.extract_strided_slice %159 {offsets = [0, 0], sizes = [8, 384], strides = [1, 1]} : vector<8x512xf32> to vector<8x384xf32>
    %161 = arith.negf %160 : vector<8x384xf32>
    %162 = math.exp %161 : vector<8x384xf32>
    %cst_39 = arith.constant 1.000000e+00 : f32
    %163 = vector.broadcast %cst_39 : f32 to vector<8x384xf32>
    %164 = arith.addf %163, %162 : vector<8x384xf32>
    %165 = arith.divf %163, %164 : vector<8x384xf32>
    %166 = vector.extract_strided_slice %159 {offsets = [0, 384], sizes = [8, 128], strides = [1, 1]} : vector<8x512xf32> to vector<8x128xf32>
    %167 = math.tanh %166 : vector<8x128xf32>
    %168 = vector.extract_strided_slice %165 {offsets = [0, 0], sizes = [8, 128], strides = [1, 1]} : vector<8x384xf32> to vector<8x128xf32>
    %169 = vector.extract_strided_slice %165 {offsets = [0, 128], sizes = [8, 128], strides = [1, 1]} : vector<8x384xf32> to vector<8x128xf32>
    %170 = vector.extract_strided_slice %165 {offsets = [0, 256], sizes = [8, 128], strides = [1, 1]} : vector<8x384xf32> to vector<8x128xf32>
    %171 = arith.mulf %169, %127 : vector<8x128xf32>
    %172 = arith.mulf %168, %167 : vector<8x128xf32>
    %173 = arith.addf %171, %172 : vector<8x128xf32>
    %174 = math.tanh %173 : vector<8x128xf32>
    %175 = arith.mulf %170, %174 : vector<8x128xf32>
    %176 = tpu.concatenate %175, %149 in 1 : vector<8x128xf32>, vector<8x128xf32> -> vector<8x256xf32>
    %cst_40 = arith.constant dense<0.000000e+00> : vector<8x512xf32>
    %177 = tpu.matmul %176, %6, %cst_40 {dimension_numbers = #tpu.dot_dimension_numbers<[1], [0], [0], [1], [0, 0, 1, 1], [], []>} : vector<8x256xf32>, vector<256x512xf32>, vector<8x512xf32> -> vector<8x512xf32>
    %178 = vector.broadcast %7 : vector<1x512xf32> to vector<8x512xf32>
    %179 = arith.addf %177, %178 : vector<8x512xf32>
    %180 = vector.extract_strided_slice %179 {offsets = [0, 0], sizes = [8, 384], strides = [1, 1]} : vector<8x512xf32> to vector<8x384xf32>
    %181 = arith.negf %180 : vector<8x384xf32>
    %182 = math.exp %181 : vector<8x384xf32>
    %cst_41 = arith.constant 1.000000e+00 : f32
    %183 = vector.broadcast %cst_41 : f32 to vector<8x384xf32>
    %184 = arith.addf %183, %182 : vector<8x384xf32>
    %185 = arith.divf %183, %184 : vector<8x384xf32>
    %186 = vector.extract_strided_slice %179 {offsets = [0, 384], sizes = [8, 128], strides = [1, 1]} : vector<8x512xf32> to vector<8x128xf32>
    %187 = math.tanh %186 : vector<8x128xf32>
    %188 = vector.extract_strided_slice %185 {offsets = [0, 0], sizes = [8, 128], strides = [1, 1]} : vector<8x384xf32> to vector<8x128xf32>
    %189 = vector.extract_strided_slice %185 {offsets = [0, 128], sizes = [8, 128], strides = [1, 1]} : vector<8x384xf32> to vector<8x128xf32>
    %190 = vector.extract_strided_slice %185 {offsets = [0, 256], sizes = [8, 128], strides = [1, 1]} : vector<8x384xf32> to vector<8x128xf32>
    %191 = arith.mulf %189, %147 : vector<8x128xf32>
    %192 = arith.mulf %188, %187 : vector<8x128xf32>
    %193 = arith.addf %191, %192 : vector<8x128xf32>
    %194 = math.tanh %193 : vector<8x128xf32>
    %195 = arith.mulf %190, %194 : vector<8x128xf32>
    %c4_i32 = arith.constant 4 : i32
    %196 = arith.index_cast %c4_i32 : i32 to index
    %c0_42 = arith.constant 0 : index
    %c0_43 = arith.constant 0 : index
    %197 = vector.load %arg1[%196, %c0_42, %c0_43] : memref<8x8x1xf32, #tpu.memory_space<vmem>>, vector<1x8x1xf32>
    %198 = vector.shape_cast %197 : vector<1x8x1xf32> to vector<8x1xf32>
    %199 = vector.broadcast %198 : vector<8x1xf32> to vector<8x512xf32>
    %200 = vector.broadcast %3 : vector<1x512xf32> to vector<8x512xf32>
    %201 = arith.mulf %199, %200 : vector<8x512xf32>
    %202 = vector.broadcast %4 : vector<1x512xf32> to vector<8x512xf32>
    %203 = arith.addf %201, %202 : vector<8x512xf32>
    %cst_44 = arith.constant dense<0.000000e+00> : vector<8x512xf32>
    %204 = tpu.matmul %175, %5, %cst_44 {dimension_numbers = #tpu.dot_dimension_numbers<[1], [0], [0], [1], [0, 0, 1, 1], [], []>} : vector<8x128xf32>, vector<128x512xf32>, vector<8x512xf32> -> vector<8x512xf32>
    %205 = arith.addf %203, %204 : vector<8x512xf32>
    %206 = vector.extract_strided_slice %205 {offsets = [0, 0], sizes = [8, 384], strides = [1, 1]} : vector<8x512xf32> to vector<8x384xf32>
    %207 = arith.negf %206 : vector<8x384xf32>
    %208 = math.exp %207 : vector<8x384xf32>
    %cst_45 = arith.constant 1.000000e+00 : f32
    %209 = vector.broadcast %cst_45 : f32 to vector<8x384xf32>
    %210 = arith.addf %209, %208 : vector<8x384xf32>
    %211 = arith.divf %209, %210 : vector<8x384xf32>
    %212 = vector.extract_strided_slice %205 {offsets = [0, 384], sizes = [8, 128], strides = [1, 1]} : vector<8x512xf32> to vector<8x128xf32>
    %213 = math.tanh %212 : vector<8x128xf32>
    %214 = vector.extract_strided_slice %211 {offsets = [0, 0], sizes = [8, 128], strides = [1, 1]} : vector<8x384xf32> to vector<8x128xf32>
    %215 = vector.extract_strided_slice %211 {offsets = [0, 128], sizes = [8, 128], strides = [1, 1]} : vector<8x384xf32> to vector<8x128xf32>
    %216 = vector.extract_strided_slice %211 {offsets = [0, 256], sizes = [8, 128], strides = [1, 1]} : vector<8x384xf32> to vector<8x128xf32>
    %217 = arith.mulf %215, %173 : vector<8x128xf32>
    %218 = arith.mulf %214, %213 : vector<8x128xf32>
    %219 = arith.addf %217, %218 : vector<8x128xf32>
    %220 = math.tanh %219 : vector<8x128xf32>
    %221 = arith.mulf %216, %220 : vector<8x128xf32>
    %222 = tpu.concatenate %221, %195 in 1 : vector<8x128xf32>, vector<8x128xf32> -> vector<8x256xf32>
    %cst_46 = arith.constant dense<0.000000e+00> : vector<8x512xf32>
    %223 = tpu.matmul %222, %6, %cst_46 {dimension_numbers = #tpu.dot_dimension_numbers<[1], [0], [0], [1], [0, 0, 1, 1], [], []>} : vector<8x256xf32>, vector<256x512xf32>, vector<8x512xf32> -> vector<8x512xf32>
    %224 = vector.broadcast %7 : vector<1x512xf32> to vector<8x512xf32>
    %225 = arith.addf %223, %224 : vector<8x512xf32>
    %226 = vector.extract_strided_slice %225 {offsets = [0, 0], sizes = [8, 384], strides = [1, 1]} : vector<8x512xf32> to vector<8x384xf32>
    %227 = arith.negf %226 : vector<8x384xf32>
    %228 = math.exp %227 : vector<8x384xf32>
    %cst_47 = arith.constant 1.000000e+00 : f32
    %229 = vector.broadcast %cst_47 : f32 to vector<8x384xf32>
    %230 = arith.addf %229, %228 : vector<8x384xf32>
    %231 = arith.divf %229, %230 : vector<8x384xf32>
    %232 = vector.extract_strided_slice %225 {offsets = [0, 384], sizes = [8, 128], strides = [1, 1]} : vector<8x512xf32> to vector<8x128xf32>
    %233 = math.tanh %232 : vector<8x128xf32>
    %234 = vector.extract_strided_slice %231 {offsets = [0, 0], sizes = [8, 128], strides = [1, 1]} : vector<8x384xf32> to vector<8x128xf32>
    %235 = vector.extract_strided_slice %231 {offsets = [0, 128], sizes = [8, 128], strides = [1, 1]} : vector<8x384xf32> to vector<8x128xf32>
    %236 = vector.extract_strided_slice %231 {offsets = [0, 256], sizes = [8, 128], strides = [1, 1]} : vector<8x384xf32> to vector<8x128xf32>
    %237 = arith.mulf %235, %193 : vector<8x128xf32>
    %238 = arith.mulf %234, %233 : vector<8x128xf32>
    %239 = arith.addf %237, %238 : vector<8x128xf32>
    %240 = math.tanh %239 : vector<8x128xf32>
    %241 = arith.mulf %236, %240 : vector<8x128xf32>
    %c5_i32 = arith.constant 5 : i32
    %242 = arith.index_cast %c5_i32 : i32 to index
    %c0_48 = arith.constant 0 : index
    %c0_49 = arith.constant 0 : index
    %243 = vector.load %arg1[%242, %c0_48, %c0_49] : memref<8x8x1xf32, #tpu.memory_space<vmem>>, vector<1x8x1xf32>
    %244 = vector.shape_cast %243 : vector<1x8x1xf32> to vector<8x1xf32>
    %245 = vector.broadcast %244 : vector<8x1xf32> to vector<8x512xf32>
    %246 = vector.broadcast %3 : vector<1x512xf32> to vector<8x512xf32>
    %247 = arith.mulf %245, %246 : vector<8x512xf32>
    %248 = vector.broadcast %4 : vector<1x512xf32> to vector<8x512xf32>
    %249 = arith.addf %247, %248 : vector<8x512xf32>
    %cst_50 = arith.constant dense<0.000000e+00> : vector<8x512xf32>
    %250 = tpu.matmul %221, %5, %cst_50 {dimension_numbers = #tpu.dot_dimension_numbers<[1], [0], [0], [1], [0, 0, 1, 1], [], []>} : vector<8x128xf32>, vector<128x512xf32>, vector<8x512xf32> -> vector<8x512xf32>
    %251 = arith.addf %249, %250 : vector<8x512xf32>
    %252 = vector.extract_strided_slice %251 {offsets = [0, 0], sizes = [8, 384], strides = [1, 1]} : vector<8x512xf32> to vector<8x384xf32>
    %253 = arith.negf %252 : vector<8x384xf32>
    %254 = math.exp %253 : vector<8x384xf32>
    %cst_51 = arith.constant 1.000000e+00 : f32
    %255 = vector.broadcast %cst_51 : f32 to vector<8x384xf32>
    %256 = arith.addf %255, %254 : vector<8x384xf32>
    %257 = arith.divf %255, %256 : vector<8x384xf32>
    %258 = vector.extract_strided_slice %251 {offsets = [0, 384], sizes = [8, 128], strides = [1, 1]} : vector<8x512xf32> to vector<8x128xf32>
    %259 = math.tanh %258 : vector<8x128xf32>
    %260 = vector.extract_strided_slice %257 {offsets = [0, 0], sizes = [8, 128], strides = [1, 1]} : vector<8x384xf32> to vector<8x128xf32>
    %261 = vector.extract_strided_slice %257 {offsets = [0, 128], sizes = [8, 128], strides = [1, 1]} : vector<8x384xf32> to vector<8x128xf32>
    %262 = vector.extract_strided_slice %257 {offsets = [0, 256], sizes = [8, 128], strides = [1, 1]} : vector<8x384xf32> to vector<8x128xf32>
    %263 = arith.mulf %261, %219 : vector<8x128xf32>
    %264 = arith.mulf %260, %259 : vector<8x128xf32>
    %265 = arith.addf %263, %264 : vector<8x128xf32>
    %266 = math.tanh %265 : vector<8x128xf32>
    %267 = arith.mulf %262, %266 : vector<8x128xf32>
    %268 = tpu.concatenate %267, %241 in 1 : vector<8x128xf32>, vector<8x128xf32> -> vector<8x256xf32>
    %cst_52 = arith.constant dense<0.000000e+00> : vector<8x512xf32>
    %269 = tpu.matmul %268, %6, %cst_52 {dimension_numbers = #tpu.dot_dimension_numbers<[1], [0], [0], [1], [0, 0, 1, 1], [], []>} : vector<8x256xf32>, vector<256x512xf32>, vector<8x512xf32> -> vector<8x512xf32>
    %270 = vector.broadcast %7 : vector<1x512xf32> to vector<8x512xf32>
    %271 = arith.addf %269, %270 : vector<8x512xf32>
    %272 = vector.extract_strided_slice %271 {offsets = [0, 0], sizes = [8, 384], strides = [1, 1]} : vector<8x512xf32> to vector<8x384xf32>
    %273 = arith.negf %272 : vector<8x384xf32>
    %274 = math.exp %273 : vector<8x384xf32>
    %cst_53 = arith.constant 1.000000e+00 : f32
    %275 = vector.broadcast %cst_53 : f32 to vector<8x384xf32>
    %276 = arith.addf %275, %274 : vector<8x384xf32>
    %277 = arith.divf %275, %276 : vector<8x384xf32>
    %278 = vector.extract_strided_slice %271 {offsets = [0, 384], sizes = [8, 128], strides = [1, 1]} : vector<8x512xf32> to vector<8x128xf32>
    %279 = math.tanh %278 : vector<8x128xf32>
    %280 = vector.extract_strided_slice %277 {offsets = [0, 0], sizes = [8, 128], strides = [1, 1]} : vector<8x384xf32> to vector<8x128xf32>
    %281 = vector.extract_strided_slice %277 {offsets = [0, 128], sizes = [8, 128], strides = [1, 1]} : vector<8x384xf32> to vector<8x128xf32>
    %282 = vector.extract_strided_slice %277 {offsets = [0, 256], sizes = [8, 128], strides = [1, 1]} : vector<8x384xf32> to vector<8x128xf32>
    %283 = arith.mulf %281, %239 : vector<8x128xf32>
    %284 = arith.mulf %280, %279 : vector<8x128xf32>
    %285 = arith.addf %283, %284 : vector<8x128xf32>
    %286 = math.tanh %285 : vector<8x128xf32>
    %287 = arith.mulf %282, %286 : vector<8x128xf32>
    %c6_i32 = arith.constant 6 : i32
    %288 = arith.index_cast %c6_i32 : i32 to index
    %c0_54 = arith.constant 0 : index
    %c0_55 = arith.constant 0 : index
    %289 = vector.load %arg1[%288, %c0_54, %c0_55] : memref<8x8x1xf32, #tpu.memory_space<vmem>>, vector<1x8x1xf32>
    %290 = vector.shape_cast %289 : vector<1x8x1xf32> to vector<8x1xf32>
    %291 = vector.broadcast %290 : vector<8x1xf32> to vector<8x512xf32>
    %292 = vector.broadcast %3 : vector<1x512xf32> to vector<8x512xf32>
    %293 = arith.mulf %291, %292 : vector<8x512xf32>
    %294 = vector.broadcast %4 : vector<1x512xf32> to vector<8x512xf32>
    %295 = arith.addf %293, %294 : vector<8x512xf32>
    %cst_56 = arith.constant dense<0.000000e+00> : vector<8x512xf32>
    %296 = tpu.matmul %267, %5, %cst_56 {dimension_numbers = #tpu.dot_dimension_numbers<[1], [0], [0], [1], [0, 0, 1, 1], [], []>} : vector<8x128xf32>, vector<128x512xf32>, vector<8x512xf32> -> vector<8x512xf32>
    %297 = arith.addf %295, %296 : vector<8x512xf32>
    %298 = vector.extract_strided_slice %297 {offsets = [0, 0], sizes = [8, 384], strides = [1, 1]} : vector<8x512xf32> to vector<8x384xf32>
    %299 = arith.negf %298 : vector<8x384xf32>
    %300 = math.exp %299 : vector<8x384xf32>
    %cst_57 = arith.constant 1.000000e+00 : f32
    %301 = vector.broadcast %cst_57 : f32 to vector<8x384xf32>
    %302 = arith.addf %301, %300 : vector<8x384xf32>
    %303 = arith.divf %301, %302 : vector<8x384xf32>
    %304 = vector.extract_strided_slice %297 {offsets = [0, 384], sizes = [8, 128], strides = [1, 1]} : vector<8x512xf32> to vector<8x128xf32>
    %305 = math.tanh %304 : vector<8x128xf32>
    %306 = vector.extract_strided_slice %303 {offsets = [0, 0], sizes = [8, 128], strides = [1, 1]} : vector<8x384xf32> to vector<8x128xf32>
    %307 = vector.extract_strided_slice %303 {offsets = [0, 128], sizes = [8, 128], strides = [1, 1]} : vector<8x384xf32> to vector<8x128xf32>
    %308 = vector.extract_strided_slice %303 {offsets = [0, 256], sizes = [8, 128], strides = [1, 1]} : vector<8x384xf32> to vector<8x128xf32>
    %309 = arith.mulf %307, %265 : vector<8x128xf32>
    %310 = arith.mulf %306, %305 : vector<8x128xf32>
    %311 = arith.addf %309, %310 : vector<8x128xf32>
    %312 = math.tanh %311 : vector<8x128xf32>
    %313 = arith.mulf %308, %312 : vector<8x128xf32>
    %314 = tpu.concatenate %313, %287 in 1 : vector<8x128xf32>, vector<8x128xf32> -> vector<8x256xf32>
    %cst_58 = arith.constant dense<0.000000e+00> : vector<8x512xf32>
    %315 = tpu.matmul %314, %6, %cst_58 {dimension_numbers = #tpu.dot_dimension_numbers<[1], [0], [0], [1], [0, 0, 1, 1], [], []>} : vector<8x256xf32>, vector<256x512xf32>, vector<8x512xf32> -> vector<8x512xf32>
    %316 = vector.broadcast %7 : vector<1x512xf32> to vector<8x512xf32>
    %317 = arith.addf %315, %316 : vector<8x512xf32>
    %318 = vector.extract_strided_slice %317 {offsets = [0, 0], sizes = [8, 384], strides = [1, 1]} : vector<8x512xf32> to vector<8x384xf32>
    %319 = arith.negf %318 : vector<8x384xf32>
    %320 = math.exp %319 : vector<8x384xf32>
    %cst_59 = arith.constant 1.000000e+00 : f32
    %321 = vector.broadcast %cst_59 : f32 to vector<8x384xf32>
    %322 = arith.addf %321, %320 : vector<8x384xf32>
    %323 = arith.divf %321, %322 : vector<8x384xf32>
    %324 = vector.extract_strided_slice %317 {offsets = [0, 384], sizes = [8, 128], strides = [1, 1]} : vector<8x512xf32> to vector<8x128xf32>
    %325 = math.tanh %324 : vector<8x128xf32>
    %326 = vector.extract_strided_slice %323 {offsets = [0, 0], sizes = [8, 128], strides = [1, 1]} : vector<8x384xf32> to vector<8x128xf32>
    %327 = vector.extract_strided_slice %323 {offsets = [0, 128], sizes = [8, 128], strides = [1, 1]} : vector<8x384xf32> to vector<8x128xf32>
    %328 = vector.extract_strided_slice %323 {offsets = [0, 256], sizes = [8, 128], strides = [1, 1]} : vector<8x384xf32> to vector<8x128xf32>
    %329 = arith.mulf %327, %285 : vector<8x128xf32>
    %330 = arith.mulf %326, %325 : vector<8x128xf32>
    %331 = arith.addf %329, %330 : vector<8x128xf32>
    %332 = math.tanh %331 : vector<8x128xf32>
    %333 = arith.mulf %328, %332 : vector<8x128xf32>
    %c7_i32 = arith.constant 7 : i32
    %334 = arith.index_cast %c7_i32 : i32 to index
    %c0_60 = arith.constant 0 : index
    %c0_61 = arith.constant 0 : index
    %335 = vector.load %arg1[%334, %c0_60, %c0_61] : memref<8x8x1xf32, #tpu.memory_space<vmem>>, vector<1x8x1xf32>
    %336 = vector.shape_cast %335 : vector<1x8x1xf32> to vector<8x1xf32>
    %337 = vector.broadcast %336 : vector<8x1xf32> to vector<8x512xf32>
    %338 = vector.broadcast %3 : vector<1x512xf32> to vector<8x512xf32>
    %339 = arith.mulf %337, %338 : vector<8x512xf32>
    %340 = vector.broadcast %4 : vector<1x512xf32> to vector<8x512xf32>
    %341 = arith.addf %339, %340 : vector<8x512xf32>
    %cst_62 = arith.constant dense<0.000000e+00> : vector<8x512xf32>
    %342 = tpu.matmul %313, %5, %cst_62 {dimension_numbers = #tpu.dot_dimension_numbers<[1], [0], [0], [1], [0, 0, 1, 1], [], []>} : vector<8x128xf32>, vector<128x512xf32>, vector<8x512xf32> -> vector<8x512xf32>
    %343 = arith.addf %341, %342 : vector<8x512xf32>
    %344 = vector.extract_strided_slice %343 {offsets = [0, 0], sizes = [8, 384], strides = [1, 1]} : vector<8x512xf32> to vector<8x384xf32>
    %345 = arith.negf %344 : vector<8x384xf32>
    %346 = math.exp %345 : vector<8x384xf32>
    %cst_63 = arith.constant 1.000000e+00 : f32
    %347 = vector.broadcast %cst_63 : f32 to vector<8x384xf32>
    %348 = arith.addf %347, %346 : vector<8x384xf32>
    %349 = arith.divf %347, %348 : vector<8x384xf32>
    %350 = vector.extract_strided_slice %343 {offsets = [0, 384], sizes = [8, 128], strides = [1, 1]} : vector<8x512xf32> to vector<8x128xf32>
    %351 = math.tanh %350 : vector<8x128xf32>
    %352 = vector.extract_strided_slice %349 {offsets = [0, 0], sizes = [8, 128], strides = [1, 1]} : vector<8x384xf32> to vector<8x128xf32>
    %353 = vector.extract_strided_slice %349 {offsets = [0, 128], sizes = [8, 128], strides = [1, 1]} : vector<8x384xf32> to vector<8x128xf32>
    %354 = vector.extract_strided_slice %349 {offsets = [0, 256], sizes = [8, 128], strides = [1, 1]} : vector<8x384xf32> to vector<8x128xf32>
    %355 = arith.mulf %353, %311 : vector<8x128xf32>
    %356 = arith.mulf %352, %351 : vector<8x128xf32>
    %357 = arith.addf %355, %356 : vector<8x128xf32>
    %358 = math.tanh %357 : vector<8x128xf32>
    %359 = arith.mulf %354, %358 : vector<8x128xf32>
    %360 = tpu.concatenate %359, %333 in 1 : vector<8x128xf32>, vector<8x128xf32> -> vector<8x256xf32>
    %cst_64 = arith.constant dense<0.000000e+00> : vector<8x512xf32>
    %361 = tpu.matmul %360, %6, %cst_64 {dimension_numbers = #tpu.dot_dimension_numbers<[1], [0], [0], [1], [0, 0, 1, 1], [], []>} : vector<8x256xf32>, vector<256x512xf32>, vector<8x512xf32> -> vector<8x512xf32>
    %362 = vector.broadcast %7 : vector<1x512xf32> to vector<8x512xf32>
    %363 = arith.addf %361, %362 : vector<8x512xf32>
    %364 = vector.extract_strided_slice %363 {offsets = [0, 0], sizes = [8, 384], strides = [1, 1]} : vector<8x512xf32> to vector<8x384xf32>
    %365 = arith.negf %364 : vector<8x384xf32>
    %366 = math.exp %365 : vector<8x384xf32>
    %cst_65 = arith.constant 1.000000e+00 : f32
    %367 = vector.broadcast %cst_65 : f32 to vector<8x384xf32>
    %368 = arith.addf %367, %366 : vector<8x384xf32>
    %369 = arith.divf %367, %368 : vector<8x384xf32>
    %370 = vector.extract_strided_slice %363 {offsets = [0, 384], sizes = [8, 128], strides = [1, 1]} : vector<8x512xf32> to vector<8x128xf32>
    %371 = math.tanh %370 : vector<8x128xf32>
    %372 = vector.extract_strided_slice %369 {offsets = [0, 0], sizes = [8, 128], strides = [1, 1]} : vector<8x384xf32> to vector<8x128xf32>
    %373 = vector.extract_strided_slice %369 {offsets = [0, 128], sizes = [8, 128], strides = [1, 1]} : vector<8x384xf32> to vector<8x128xf32>
    %374 = vector.extract_strided_slice %369 {offsets = [0, 256], sizes = [8, 128], strides = [1, 1]} : vector<8x384xf32> to vector<8x128xf32>
    %375 = arith.mulf %373, %331 : vector<8x128xf32>
    %376 = arith.mulf %372, %371 : vector<8x128xf32>
    %377 = arith.addf %375, %376 : vector<8x128xf32>
    %378 = math.tanh %377 : vector<8x128xf32>
    %379 = arith.mulf %374, %378 : vector<8x128xf32>
    %c8_i32 = arith.constant 8 : i32
    %c0_66 = arith.constant 0 : index
    %c0_67 = arith.constant 0 : index
    %380 = vector.load %arg10[%c0_66, %c0_67] : memref<8x128xf32, #tpu.memory_space<vmem>>, vector<8x128xf32>
    tpu.vector_store %arg10[%c0_66, %c0_67], %359 {strides = array<i32>} : memref<8x128xf32, #tpu.memory_space<vmem>>, vector<8x128xf32>,
    %c0_68 = arith.constant 0 : index
    %c0_69 = arith.constant 0 : index
    %381 = vector.load %arg11[%c0_68, %c0_69] : memref<8x128xf32, #tpu.memory_space<vmem>>, vector<8x128xf32>
    tpu.vector_store %arg11[%c0_68, %c0_69], %357 {strides = array<i32>} : memref<8x128xf32, #tpu.memory_space<vmem>>, vector<8x128xf32>,
    %c0_70 = arith.constant 0 : index
    %c0_71 = arith.constant 0 : index
    %382 = vector.load %arg12[%c0_70, %c0_71] : memref<8x128xf32, #tpu.memory_space<vmem>>, vector<8x128xf32>
    tpu.vector_store %arg12[%c0_70, %c0_71], %379 {strides = array<i32>} : memref<8x128xf32, #tpu.memory_space<vmem>>, vector<8x128xf32>,
    %c0_72 = arith.constant 0 : index
    %c0_73 = arith.constant 0 : index
    %383 = vector.load %arg13[%c0_72, %c0_73] : memref<8x128xf32, #tpu.memory_space<vmem>>, vector<8x128xf32>
    tpu.vector_store %arg13[%c0_72, %c0_73], %377 {strides = array<i32>} : memref<8x128xf32, #tpu.memory_space<vmem>>, vector<8x128xf32>,
    %c0_i32_74 = arith.constant 0 : i32
    %384 = arith.cmpi eq, %arg0, %c0_i32_74 : i32
    %385 = arith.extui %384 : i1 to i32
    %c0_i32_75 = arith.constant 0 : i32
    %386 = arith.cmpi ne, %385, %c0_i32_75 : i32
    scf.if %386 {
      %c0_76 = arith.constant 0 : index
      %c0_77 = arith.constant 0 : index
      %387 = vector.load %arg7[%c0_76, %c0_77] : memref<128x128xf32, #tpu.memory_space<vmem>>, vector<128x128xf32>
      %cst_78 = arith.constant dense<0.000000e+00> : vector<8x128xf32>
      %388 = tpu.matmul %379, %387, %cst_78 {dimension_numbers = #tpu.dot_dimension_numbers<[1], [0], [0], [1], [0, 0, 1, 1], [], []>} : vector<8x128xf32>, vector<128x128xf32>, vector<8x128xf32> -> vector<8x128xf32>
      %c0_79 = arith.constant 0 : index
      %c0_80 = arith.constant 0 : index
      %389 = vector.load %arg8[%c0_79, %c0_80] : memref<1x128xf32, #tpu.memory_space<vmem>>, vector<1x128xf32>
      %390 = vector.broadcast %389 : vector<1x128xf32> to vector<8x128xf32>
      %391 = arith.addf %388, %390 : vector<8x128xf32>
      %c0_81 = arith.constant 0 : index
      %c0_82 = arith.constant 0 : index
      %392 = vector.load %arg9[%c0_81, %c0_82] : memref<8x128xf32, #tpu.memory_space<vmem>>, vector<8x128xf32>
      tpu.vector_store %arg9[%c0_81, %c0_82], %391 {strides = array<i32>} : memref<8x128xf32, #tpu.memory_space<vmem>>, vector<8x128xf32>,
    } else {
    }
    return
  }
  func.func @transform_0(%arg0: i32) -> (i32, i32, i32) {
    %c0_i32 = arith.constant 0 : i32
    %c0_i32_0 = arith.constant 0 : i32
    %c0_i32_1 = arith.constant 0 : i32
    return %arg0, %c0_i32, %c0_i32_0 : i32, i32, i32
  }
  func.func @transform_1(%arg0: i32) -> (i32, i32) {
    %c0_i32 = arith.constant 0 : i32
    %c0_i32_0 = arith.constant 0 : i32
    %c0_i32_1 = arith.constant 0 : i32
    return %c0_i32, %c0_i32_0 : i32, i32
  }
  func.func @transform_2(%arg0: i32) -> (i32, i32) {
    %c0_i32 = arith.constant 0 : i32
    %c0_i32_0 = arith.constant 0 : i32
    %c0_i32_1 = arith.constant 0 : i32
    return %c0_i32, %c0_i32_0 : i32, i32
  }
  func.func @transform_3(%arg0: i32) -> (i32, i32) {
    %c0_i32 = arith.constant 0 : i32
    %c0_i32_0 = arith.constant 0 : i32
    %c0_i32_1 = arith.constant 0 : i32
    return %c0_i32, %c0_i32_0 : i32, i32
  }
  func.func @transform_4(%arg0: i32) -> (i32, i32) {
    %c0_i32 = arith.constant 0 : i32
    %c0_i32_0 = arith.constant 0 : i32
    %c0_i32_1 = arith.constant 0 : i32
    return %c0_i32, %c0_i32_0 : i32, i32
  }
  func.func @transform_5(%arg0: i32) -> (i32, i32) {
    %c0_i32 = arith.constant 0 : i32
    %c0_i32_0 = arith.constant 0 : i32
    %c0_i32_1 = arith.constant 0 : i32
    return %c0_i32, %c0_i32_0 : i32, i32
  }
  func.func @transform_6(%arg0: i32) -> (i32, i32) {
    %c0_i32 = arith.constant 0 : i32
    %c0_i32_0 = arith.constant 0 : i32
    %c0_i32_1 = arith.constant 0 : i32
    return %c0_i32, %c0_i32_0 : i32, i32
  }
  func.func @transform_7(%arg0: i32) -> (i32, i32) {
    %c0_i32 = arith.constant 0 : i32
    %c0_i32_0 = arith.constant 0 : i32
    %c0_i32_1 = arith.constant 0 : i32
    return %c0_i32, %c0_i32_0 : i32, i32
  }
  func.func @transform_8(%arg0: i32) -> (i32, i32) {
    %c0_i32 = arith.constant 0 : i32
    %c0_i32_0 = arith.constant 0 : i32
    %c0_i32_1 = arith.constant 0 : i32
    return %c0_i32, %c0_i32_0 : i32, i32
  }
}

</mosaic_0001>

<bundles_post_ra>
// kernel: tpu_custom_call.1
= control target key start
LH: loop header
LB: loop body
LE: loop exit
PB: predicated region body
PF: predicated region fallthrough
CT: control target
= control target key end

     0   :  { %13 = vsyncpa [#allocation7], 0  ;;  %s8199_s0 = inlined_call_operand.vmem [shape: f32[8,8,1], index: 0, kind: input, shape index: {}]   ;;  %s8200_s1 = inlined_call_operand.vmem [shape: f32[1,512], index: 1, kind: input, shape index: {}]   ;;  %s8201_s2 = inlined_call_operand.hbm [shape: f32[128,512], index: 2, kind: input, shape index: {}]   ;;  %s8202_s3 = inlined_call_operand.vmem [shape: f32[1,512], index: 3, kind: input, shape index: {}]   ;;  %s8203_s4 = inlined_call_operand.hbm [shape: f32[256,512], index: 4, kind: input, shape index: {}]   ;;  %s8204_s5 = inlined_call_operand.vmem [shape: f32[1,512], index: 5, kind: input, shape index: {}]   ;;  %s8205_s6 = inlined_call_operand.hbm [shape: f32[128,128], index: 6, kind: input, shape index: {}]   ;;  %s8206_s7 = inlined_call_operand.vmem [shape: f32[1,128], index: 7, kind: input, shape index: {}]   ;;  %s8207_s8 = inlined_call_operand.hbm [shape: f32[8,128], index: 8, kind: output, shape index: {}]  }
   0x1   :  { %14 = vsyncpa [#allocation10], 0 }
   0x2   :  { %15 = vsyncpa [#allocation8], 0  ;;  %s39_s29 = sshll.u32 %s8203_s4, 4  ;;  %s4482_s30 = smov [#allocation9]   ;;  %s40_s29 = int_to_ptr.hbm [resolvable:$true] %s39_s29 }
   0x3   :  { %s41_s9 = sshll.u32 %s4482_s30, 4  ;;  %s24_s12 = sshll.u32 %s8201_s2, 4  ;;  %s42_s9 = int_to_ptr.vmem [resolvable:$true] %s41_s9  ;;  %s25_s12 = int_to_ptr.hbm [resolvable:$true] %s24_s12 }
   0x4   :  { %s4483_s13 = smov 512   ;;  %s4484_s14 = smov 32  }
   0x5   :  { %47 = dma.hbm_to_vmem [thread:$0]  %s40_s29, 16384, %s42_s9, [#allocation10], %s4483_s13, %s4483_s13, %s4484_s14  }
   0x6   :  { %s4485_s15 = smov [#allocation6]   ;;  %s54_s19 = sshll.u32 %s8205_s6, 4  ;;  %s55_s19 = int_to_ptr.hbm [resolvable:$true] %s54_s19 }
   0x7   :  { %s26_s16 = sshll.u32 %s4485_s15, 4  ;;  %s4486_s4 = smov [#allocation11]   ;;  %s27_s16 = int_to_ptr.vmem [resolvable:$true] %s26_s16 }
   0x8   :  { %32 = dma.hbm_to_vmem [thread:$0]  %s25_s12, 8192, %s27_s16, [#allocation7], %s4483_s13, %s4483_s13, %s4484_s14  }
   0x9   :  { %s56_s20 = sshll.u32 %s4486_s4, 4  ;;  %s4487_s21 = smov 128   ;;  %s57_s20 = int_to_ptr.vmem [resolvable:$true] %s56_s20 }
   0xa   :  { %s4488_s22 = smov 8  }
   0xb   :  { %62 = dma.hbm_to_vmem [thread:$0]  %s55_s19, 2048, %s57_s20, [#allocation10], %s4487_s21, %s4487_s21, %s4488_s22  }
   0xc   :  { %4476 = dma.done.wait [#allocation7], 8192  }
   0xd   :  { %4477 = vsyncadd [#allocation7], 4294959104 }
   0xe   :  { %4478 = dma.done.wait [#allocation10], 18432  }
   0xf   :  { %4479 = vsyncadd [#allocation10], 4294948864  ;;  %v4489_v0 = vmov 0   ;;  %v147_v1 = vld [vmem:[#allocation6 + $0x1e0] sm:$0xff]  ;;  %v4546_v2 = vld [vmem:[#allocation6 + $0x1e8] sm:$0xff]  ;;  %s4491_s19 = smov [#allocation12]  }
  0x10   :  { %3521 = vset.pattern.permute.xlu0 %v4489_v0  ;;  %3522 = vset.pattern.permute.xlu1 %v4489_v0  ;;  %v149_v3 = vld [vmem:[#allocation6 + $0x1f0] sm:$0xff]  ;;  %v4549_v4 = vld [vmem:[#allocation6 + $0x1f8] sm:$0xff]  ;;  %v143_v5 = vld [vmem:[#allocation6 + $0x1c0] sm:$0xff]  ;;  %s3443_s4 = sshll.u32 %s4491_s19, 4  ;;  %s3445_s22 = sshll.u32 %s8207_s8, 4  ;;  %s3444_s4 = int_to_ptr.vmem [resolvable:$true] %s3443_s4  ;;  %s3446_s22 = int_to_ptr.hbm [resolvable:$true] %s3445_s22 }
  0x11   :  { %3523 = vset.pattern.permute.xlu2 %v4489_v0  ;;  %316 = vmatpush.msra.mxu0 %v147_v1  ;;  %v4551_v6 = vld [vmem:[#allocation6 + $0x1c8] sm:$0xff]  ;;  %v145_v7 = vld [vmem:[#allocation6 + $0x1d0] sm:$0xff]  ;;  %v4554_v8 = vld [vmem:[#allocation6 + $0x1d8] sm:$0xff] }
  0x12   :  { %336 = vmatpush.msra.mxu1 %v4546_v2  ;;  %356 = vmatpush.msra.mxu2 %v149_v3  ;;  %v139_v9 = vld [vmem:[#allocation6 + $0x1a0] sm:$0xff]  ;;  %v4557_v10 = vld [vmem:[#allocation6 + $0x1a8] sm:$0xff]  ;;  %v141_v11 = vld [vmem:[#allocation6 + $0x1b0] sm:$0xff] }
  0x13   :  { %376 = vmatpush.msra.mxu3 %v4549_v4  ;;  %317 = vmatpush.msra.mxu0 %v143_v5  ;;  %v4559_v12 = vld [vmem:[#allocation6 + $0x1b8] sm:$0xff]  ;;  %v135_v13 = vld [vmem:[#allocation6 + $0x180] sm:$0xff]  ;;  %v4562_v14 = vld [vmem:[#allocation6 + $0x188] sm:$0xff] }
  0x14   :  { %337 = vmatpush.msra.mxu1 %v4551_v6  ;;  %357 = vmatpush.msra.mxu2 %v145_v7  ;;  %v137_v15 = vld [vmem:[#allocation6 + $0x190] sm:$0xff]  ;;  %v4565_v16 = vld [vmem:[#allocation6 + $0x198] sm:$0xff]  ;;  %v131_v17 = vld [vmem:[#allocation6 + $0x160] sm:$0xff] }
  0x15   :  { %377 = vmatpush.msra.mxu3 %v4554_v8  ;;  %318 = vmatpush.msra.mxu0 %v139_v9  ;;  %v4568_v18 = vld [vmem:[#allocation6 + $0x168] sm:$0xff]  ;;  %v133_v19 = vld [vmem:[#allocation6 + $0x170] sm:$0xff]  ;;  %v4571_v20 = vld [vmem:[#allocation6 + $0x178] sm:$0xff]  ;;  %v8208_v9 = vmov 0.0  }
  0x16   :  { %338 = vmatpush.msra.mxu1 %v4557_v10  ;;  %358 = vmatpush.msra.mxu2 %v141_v11  ;;  %v127_v21 = vld [vmem:[#allocation6 + $0x140] sm:$0xff]  ;;  %v4574_v22 = vld [vmem:[#allocation6 + $0x148] sm:$0xff]  ;;  %v129_v23 = vld [vmem:[#allocation6 + $0x150] sm:$0xff] }
  0x17   :  { %378 = vmatpush.msra.mxu3 %v4559_v12  ;;  %319 = vmatpush.msra.mxu0 %v135_v13  ;;  %v4577_v24 = vld [vmem:[#allocation6 + $0x158] sm:$0xff]  ;;  %v123_v25 = vld [vmem:[#allocation6 + $0x120] sm:$0xff]  ;;  %v4580_v26 = vld [vmem:[#allocation6 + $0x128] sm:$0xff] }
  0x18   :  { %339 = vmatpush.msra.mxu1 %v4562_v14  ;;  %359 = vmatpush.msra.mxu2 %v137_v15  ;;  %v125_v27 = vld [vmem:[#allocation6 + $0x130] sm:$0xff]  ;;  %v4583_v28 = vld [vmem:[#allocation6 + $0x138] sm:$0xff]  ;;  %v119_v29 = vld [vmem:[#allocation6 + $0x100] sm:$0xff] }
  0x19   :  { %379 = vmatpush.msra.mxu3 %v4565_v16  ;;  %320 = vmatpush.msra.mxu0 %v131_v17  ;;  %v4586_v30 = vld [vmem:[#allocation6 + $0x108] sm:$0xff]  ;;  %v121_v31 = vld [vmem:[#allocation6 + $0x110] sm:$0xff]  ;;  %v4589_v32 = vld [vmem:[#allocation6 + $0x118] sm:$0xff] }
  0x1a   :  { %340 = vmatpush.msra.mxu1 %v4568_v18  ;;  %360 = vmatpush.msra.mxu2 %v133_v19  ;;  %v115_v33 = vld [vmem:[#allocation6 + $0xe0] sm:$0xff]  ;;  %v4592_v34 = vld [vmem:[#allocation6 + $0xe8] sm:$0xff]  ;;  %v117_v35 = vld [vmem:[#allocation6 + $0xf0] sm:$0xff] }
  0x1b   :  { %380 = vmatpush.msra.mxu3 %v4571_v20  ;;  %321 = vmatpush.msra.mxu0 %v127_v21  ;;  %v4595_v36 = vld [vmem:[#allocation6 + $0xf8] sm:$0xff]  ;;  %v111_v37 = vld [vmem:[#allocation6 + $0xc0] sm:$0xff]  ;;  %v4598_v38 = vld [vmem:[#allocation6 + $0xc8] sm:$0xff] }
  0x1c   :  { %341 = vmatpush.msra.mxu1 %v4574_v22  ;;  %361 = vmatpush.msra.mxu2 %v129_v23  ;;  %v113_v39 = vld [vmem:[#allocation6 + $0xd0] sm:$0xff]  ;;  %v4601_v40 = vld [vmem:[#allocation6 + $0xd8] sm:$0xff]  ;;  %v107_v41 = vld [vmem:[#allocation6 + $0xa0] sm:$0xff] }
  0x1d   :  { %381 = vmatpush.msra.mxu3 %v4577_v24  ;;  %322 = vmatpush.msra.mxu0 %v123_v25  ;;  %v4604_v42 = vld [vmem:[#allocation6 + $0xa8] sm:$0xff]  ;;  %v109_v43 = vld [vmem:[#allocation6 + $0xb0] sm:$0xff]  ;;  %v4607_v44 = vld [vmem:[#allocation6 + $0xb8] sm:$0xff] }
  0x1e   :  { %342 = vmatpush.msra.mxu1 %v4580_v26  ;;  %362 = vmatpush.msra.mxu2 %v125_v27  ;;  %v284_v45 = vld [vmem:[%s8199_s0] sm:$0xff]  ;;  %v4614_v47 = vld [vmem:[#allocation6 + $0x88] sm:$0xff]  ;;  %v4616_v48 = vld [vmem:[#allocation6 + $0x90] sm:$0xff] }
  0x1f   :  { %382 = vmatpush.msra.mxu3 %v4583_v28  ;;  %323 = vmatpush.msra.mxu0 %v119_v29  ;;  %v103_v46 = vld [vmem:[#allocation6 + $0x80] sm:$0xff]  ;;  %8754 = vst [vmem:[#allocation16_spill] sm:$0xff] %v4616_v48  ;;  %v4619_v49 = vld [vmem:[#allocation6 + $0x98] sm:$0xff]  ;;  %v4623_v51 = vld [vmem:[#allocation6 + $0x68] sm:$0xff] }
  0x20   :  { %343 = vmatpush.msra.mxu1 %v4586_v30  ;;  %363 = vmatpush.msra.mxu2 %v121_v31  ;;  %v4621_v50 = vld [vmem:[#allocation6 + $0x60] sm:$0xff]  ;;  %v4625_v52 = vld [vmem:[#allocation6 + $0x70] sm:$0xff]  ;;  %v4629_v53 = vld [vmem:[#allocation6 + $0x78] sm:$0xff] }
  0x21   :  { %383 = vmatpush.msra.mxu3 %v4589_v32  ;;  %324 = vmatpush.msra.mxu0 %v115_v33  ;;  %8755 = vst [vmem:[#allocation17_spill] sm:$0xff] %v4621_v50  ;;  %v4631_v54 = vld [vmem:[#allocation6 + $0x40] sm:$0xff]  ;;  %v4635_v55 = vld [vmem:[#allocation6 + $0x48] sm:$0xff]  ;;  %v4637_v56 = vld [vmem:[#allocation6 + $0x50] sm:$0xff] }
  0x22   :  { %344 = vmatpush.msra.mxu1 %v4592_v34  ;;  %364 = vmatpush.msra.mxu2 %v117_v35  ;;  %8756 = vst [vmem:[#allocation18_spill] sm:$0xff] %v4625_v52  ;;  %v4641_v57 = vld [vmem:[#allocation6 + $0x58] sm:$0xff]  ;;  %v4643_v58 = vld [vmem:[#allocation6 + $0x20] sm:$0xff]  ;;  %v4647_v59 = vld [vmem:[#allocation6 + $0x28] sm:$0xff] }
  0x23   :  { %384 = vmatpush.msra.mxu3 %v4595_v36  ;;  %325 = vmatpush.msra.mxu0 %v111_v37  ;;  %8757 = vst [vmem:[#allocation19_spill] sm:$0xff] %v4631_v54  ;;  %v4649_v60 = vld [vmem:[#allocation6 + $0x30] sm:$0xff]  ;;  %v4653_v61 = vld [vmem:[#allocation6 + $0x38] sm:$0xff]  ;;  %v3462_v62 = vld [vmem:[%s8199_s0 + $0x8] sm:$0xff] }
  0x24   :  { %345 = vmatpush.msra.mxu1 %v4598_v38  ;;  %365 = vmatpush.msra.mxu2 %v113_v39  ;;  %8758 = vst [vmem:[#allocation20_spill] sm:$0xff] %v4637_v56  ;;  %v4660_v63 = vld [vmem:[#allocation6] sm:$0xff]  ;;  %v4662_v0 = vld [vmem:[#allocation6 + $0x8] sm:$0xff]  ;;  %v4666_v1 = vld [vmem:[#allocation6 + $0x10] sm:$0xff] }
  0x25   :  { %385 = vmatpush.msra.mxu3 %v4601_v40  ;;  %326 = vmatpush.msra.mxu0 %v107_v41  ;;  %8759 = vst [vmem:[#allocation21_spill] sm:$0xff] %v4643_v58  ;;  %v4668_v3 = vld [vmem:[#allocation6 + $0x18] sm:$0xff]  ;;  %v4675_v5 = vld [vmem:[#allocation9 + $0x3e0] sm:$0xff]  ;;  %v4677_v7 = vld [vmem:[#allocation9 + $0x3e8] sm:$0xff] }
  0x26   :  { %346 = vmatpush.msra.mxu1 %v4604_v42  ;;  %366 = vmatpush.msra.mxu2 %v109_v43  ;;  %8760 = vst [vmem:[#allocation22_spill] sm:$0xff] %v4649_v60  ;;  %v4683_v11 = vld [vmem:[#allocation9 + $0x3c0] sm:$0xff]  ;;  %v4685_v13 = vld [vmem:[#allocation9 + $0x3c8] sm:$0xff]  ;;  %v3497_v15 = vld [vmem:[%s8199_s0 + $0x30] sm:$0xff] }
  0x27   :  { %386 = vmatpush.msra.mxu3 %v4607_v44  ;;  %287 = vperm.xlu0 %3521, %v284_v45   ;;  %8761 = vst [vmem:[#allocation23_spill] sm:$0xff] %v4660_v63  ;;  %v4692_v17 = vld [vmem:[#allocation9 + $0x3a0] sm:$0xff]  ;;  %v4694_v19 = vld [vmem:[#allocation9 + $0x3a8] sm:$0xff] }
  0x28   :  { %327 = vmatpush.msra.mxu0 %v103_v46  ;;  %347 = vmatpush.msra.mxu1 %v4614_v47  ;;  %8762 = vst [vmem:[#allocation24_spill] sm:$0xff] %v4666_v1  ;;  %v4698_v21 = vld [vmem:[#allocation9 + $0x380] sm:$0xff]  ;;  %v4700_v23 = vld [vmem:[#allocation9 + $0x388] sm:$0xff] }
  0x29   :  { %367 = vmatpush.msra.mxu2 %v4616_v48  ;;  %387 = vmatpush.msra.mxu3 %v4619_v49  ;;  %v4704_v25 = vld [vmem:[#allocation9 + $0x360] sm:$0xff]  ;;  %v4706_v27 = vld [vmem:[#allocation9 + $0x368] sm:$0xff] }
  0x2a   :  { %328 = vmatpush.msra.mxu0 %v4621_v50  ;;  %348 = vmatpush.msra.mxu1 %v4623_v51  ;;  %v4710_v29 = vld [vmem:[#allocation9 + $0x340] sm:$0xff]  ;;  %v4712_v31 = vld [vmem:[#allocation9 + $0x348] sm:$0xff] }
  0x2b   :  { %368 = vmatpush.msra.mxu2 %v4625_v52  ;;  %388 = vmatpush.msra.mxu3 %v4629_v53  ;;  %v4716_v33 = vld [vmem:[#allocation9 + $0x320] sm:$0xff]  ;;  %v4718_v35 = vld [vmem:[#allocation9 + $0x328] sm:$0xff] }
  0x2c   :  { %329 = vmatpush.msra.mxu0 %v4631_v54  ;;  %349 = vmatpush.msra.mxu1 %v4635_v55  ;;  %v4722_v37 = vld [vmem:[#allocation9 + $0x300] sm:$0xff]  ;;  %v4724_v39 = vld [vmem:[#allocation9 + $0x308] sm:$0xff] }
  0x2d   :  { %369 = vmatpush.msra.mxu2 %v4637_v56  ;;  %389 = vmatpush.msra.mxu3 %v4641_v57  ;;  %v4728_v41 = vld [vmem:[#allocation9 + $0x2e0] sm:$0xff]  ;;  %v4730_v43 = vld [vmem:[#allocation9 + $0x2e8] sm:$0xff] }
  0x2e   :  { %330 = vmatpush.msra.mxu0 %v4643_v58  ;;  %350 = vmatpush.msra.mxu1 %v4647_v59  ;;  %v4734_v45 = vld [vmem:[#allocation9 + $0x2c0] sm:$0xff]  ;;  %v4736_v46 = vld [vmem:[#allocation9 + $0x2c8] sm:$0xff] }
  0x2f   :  { %370 = vmatpush.msra.mxu2 %v4649_v60  ;;  %390 = vmatpush.msra.mxu3 %v4653_v61  ;;  %v4754_v60 = vld [vmem:[#allocation9 + $0x268] sm:$0xff]  ;;  %v4758_v58 = vld [vmem:[#allocation9 + $0x240] sm:$0xff] }
  0x30   :  { %699 = vperm.xlu0 %3521, %v3462_v62   ;;  %331 = vmatpush.msra.mxu0 %v4660_v63  ;;  %v4740_v62 = vld [vmem:[#allocation9 + $0x2a0] sm:$0xff]  ;;  %8767 = vst [vmem:[#allocation29_spill] sm:$0xff] %v4754_v60  ;;  %v4760_v56 = vld [vmem:[#allocation9 + $0x248] sm:$0xff] }
  0x31   :  { %351 = vmatpush.msra.mxu1 %v4662_v0  ;;  %371 = vmatpush.msra.mxu2 %v4666_v1  ;;  %v4748_v1 = vld [vmem:[#allocation9 + $0x288] sm:$0xff]  ;;  %v4752_v63 = vld [vmem:[#allocation9 + $0x260] sm:$0xff]  ;;  %8768 = vst [vmem:[#allocation30_spill] sm:$0xff] %v4758_v58 }
  0x32   :  { %391 = vmatpush.msra.mxu3 %v4668_v3  ;;  %332 = vmatmul.f32.vlgmr.msra.gmra.mxu0 %v8208_v9  ;;  %8765 = vst [vmem:[#allocation27_spill] sm:$0xff] %v4748_v1  ;;  %v4764_v54 = vld [vmem:[#allocation9 + $0x220] sm:$0xff]  ;;  %v4766_v52 = vld [vmem:[#allocation9 + $0x228] sm:$0xff] }
  0x33   :  { %352 = vmatmul.f32.vlgmr.msra.gmra.mxu1 %v8208_v9  ;;  %372 = vmatmul.f32.vlgmr.msra.gmra.mxu2 %v8208_v9  ;;  %8766 = vst [vmem:[#allocation28_spill] sm:$0xff] %v4752_v63  ;;  %v4772_v50 = vld [vmem:[#allocation9 + $0x200] sm:$0xff]  ;;  %v4774_v48 = vld [vmem:[#allocation9 + $0x208] sm:$0xff] }
  0x34   :  { %392 = vmatmul.f32.vlgmr.msra.gmra.mxu3 %v8208_v9  ;;  %492 = vmatpush.msrb.mxu1 %v4675_v5  ;;  %v4746_v9 = vld [vmem:[#allocation9 + $0x280] sm:$0xff]  ;;  %8769 = vst [vmem:[#allocation31_spill] sm:$0xff] %v4760_v56 }
  0x35   :  { %532 = vmatpush.msrb.mxu3 %v4677_v7  ;;  %8764 = vst [vmem:[#allocation26_spill] sm:$0xff] %v4746_v9 }
  0x36   :  { %493 = vmatpush.msrb.mxu1 %v4683_v11  ;;  %8770 = vst [vmem:[#allocation32_spill] sm:$0xff] %v4764_v54 }
  0x37   :  { %533 = vmatpush.msrb.mxu3 %v4685_v13  ;;  %8771 = vst [vmem:[#allocation33_spill] sm:$0xff] %v4766_v52 }
  0x38   :  { %2624 = vperm.xlu0 %3521, %v3497_v15   ;;  %494 = vmatpush.msrb.mxu1 %v4692_v17  ;;  %v4742_v15 = vld [vmem:[#allocation9 + $0x2a8] sm:$0xff]  ;;  %8772 = vst [vmem:[#allocation34_spill] sm:$0xff] %v4772_v50 }
  0x39   :  { %534 = vmatpush.msrb.mxu3 %v4694_v19  ;;  %8763 = vst [vmem:[#allocation25_spill] sm:$0xff] %v4742_v15 }
  0x3a   :  { %495 = vmatpush.msrb.mxu1 %v4698_v21  ;;  %8773 = vst [vmem:[#allocation35_spill] sm:$0xff] %v4774_v48 }
  0x3b   :  { %535 = vmatpush.msrb.mxu3 %v4700_v23 }
  0x3c   :  { %496 = vmatpush.msrb.mxu1 %v4704_v25 }
  0x3d   :  { %536 = vmatpush.msrb.mxu3 %v4706_v27 }
  0x3e   :  { %497 = vmatpush.msrb.mxu1 %v4710_v29 }
  0x3f   :  { %537 = vmatpush.msrb.mxu3 %v4712_v31 }
  0x40   :  { %498 = vmatpush.msrb.mxu1 %v4716_v33 }
  0x41   :  { %538 = vmatpush.msrb.mxu3 %v4718_v35 }
  0x42   :  { %499 = vmatpush.msrb.mxu1 %v4722_v37 }
  0x43   :  { %539 = vmatpush.msrb.mxu3 %v4724_v39 }
  0x44   :  { %500 = vmatpush.msrb.mxu1 %v4728_v41 }
  0x45   :  { %540 = vmatpush.msrb.mxu3 %v4730_v43 }
  0x46   :  { %501 = vmatpush.msrb.mxu1 %v4734_v45 }
  0x47   :  { %541 = vmatpush.msrb.mxu3 %v4736_v46 }
  0x48   :  { %502 = vmatpush.msrb.mxu1 %v4740_v62 }
  0x49   :  { %542 = vmatpush.msrb.mxu3 %v4742_v15  ;;  %v4844_v15 = vld [vmem:[#allocation9 + $0x358] sm:$0xff] }
  0x4a   :  { %503 = vmatpush.msrb.mxu1 %v4746_v9  ;;  %v4800_v9 = vld [vmem:[#allocation9 + $0x1a8] sm:$0xff]  ;;  %8798 = vst [vmem:[#allocation59_spill] sm:$0xff] %v4844_v15 }
  0x4b   :  { %543 = vmatpush.msrb.mxu3 %v4748_v1  ;;  %v4776_v1 = vld [vmem:[#allocation9 + $0x1e0] sm:$0xff]  ;;  %8783 = vst [vmem:[#allocation45_spill] sm:$0xff] %v4800_v9 }
  0x4c   :  { %504 = vmatpush.msrb.mxu1 %v4752_v63  ;;  %8774 = vst [vmem:[#allocation36_spill] sm:$0xff] %v4776_v1  ;;  %v4782_v63 = vld [vmem:[#allocation9 + $0x3f0] sm:$0xff]  ;;  %472 = vmatpush.msrb.mxu0 %v4776_v1  ;;  %v4806_v1 = vld [vmem:[#allocation9 + $0x3b8] sm:$0xff] }
  0x4d   :  { %544 = vmatpush.msrb.mxu3 %v4754_v60  ;;  %v4780_v60 = vld [vmem:[#allocation9 + $0x1e8] sm:$0xff]  ;;  %8776 = vst [vmem:[#allocation38_spill] sm:$0xff] %v4782_v63 }
  0x4e   :  { %505 = vmatpush.msrb.mxu1 %v4758_v58  ;;  %8775 = vst [vmem:[#allocation37_spill] sm:$0xff] %v4780_v60  ;;  %v4784_v58 = vld [vmem:[#allocation9 + $0x3f8] sm:$0xff]  ;;  %512 = vmatpush.msrb.mxu2 %v4780_v60  ;;  %v4804_v60 = vld [vmem:[#allocation9 + $0x3b0] sm:$0xff] }
  0x4f   :  { %545 = vmatpush.msrb.mxu3 %v4760_v56  ;;  %8777 = vst [vmem:[#allocation39_spill] sm:$0xff] %v4784_v58  ;;  %v4792_v56 = vld [vmem:[#allocation9 + $0x3d0] sm:$0xff] }
  0x50   :  { %506 = vmatpush.msrb.mxu1 %v4764_v54  ;;  %v4790_v54 = vld [vmem:[#allocation9 + $0x1c8] sm:$0xff]  ;;  %8780 = vst [vmem:[#allocation42_spill] sm:$0xff] %v4792_v56 }
  0x51   :  { %546 = vmatpush.msrb.mxu3 %v4766_v52  ;;  %v4788_v52 = vld [vmem:[#allocation9 + $0x1c0] sm:$0xff]  ;;  %8779 = vst [vmem:[#allocation41_spill] sm:$0xff] %v4790_v54  ;;  %513 = vmatpush.msrb.mxu2 %v4790_v54  ;;  %v4818_v54 = vld [vmem:[#allocation9 + $0x390] sm:$0xff] }
  0x52   :  { %507 = vmatpush.msrb.mxu1 %v4772_v50  ;;  %8778 = vst [vmem:[#allocation40_spill] sm:$0xff] %v4788_v52  ;;  %v4798_v50 = vld [vmem:[#allocation9 + $0x1a0] sm:$0xff]  ;;  %473 = vmatpush.msrb.mxu0 %v4788_v52  ;;  %v4816_v52 = vld [vmem:[#allocation9 + $0x188] sm:$0xff] }
  0x53   :  { %547 = vmatpush.msrb.mxu3 %v4774_v48  ;;  %v4796_v48 = vld [vmem:[#allocation9 + $0x3d8] sm:$0xff]  ;;  %8782 = vst [vmem:[#allocation44_spill] sm:$0xff] %v4798_v50  ;;  %514 = vmatpush.msrb.mxu2 %v4800_v9  ;;  %v4826_v9 = vld [vmem:[#allocation9 + $0x160] sm:$0xff] }
  0x54   :  { %572 = vmatpush.msra.mxu1 %v4782_v63  ;;  %8781 = vst [vmem:[#allocation43_spill] sm:$0xff] %v4796_v48  ;;  %474 = vmatpush.msrb.mxu0 %v4798_v50  ;;  %v8789_v63 = vmov 0.0   ;;  %v4824_v50 = vld [vmem:[#allocation9 + $0x398] sm:$0xff] }
  0x55   :  { %612 = vmatpush.msra.mxu3 %v4784_v58  ;;  %8784 = vst [vmem:[#allocation46_spill] sm:$0xff] %v4804_v60  ;;  %v4814_v58 = vld [vmem:[#allocation9 + $0x180] sm:$0xff]  ;;  %508 = vmatmul.f32.vlgmr.msrb.gmra.mxu1 %v8789_v63 }
  0x56   :  { %8785 = vst [vmem:[#allocation47_spill] sm:$0xff] %v4806_v1  ;;  %573 = vmatpush.msra.mxu1 %v4792_v56  ;;  %548 = vmatmul.f32.vlgmr.msrb.gmra.mxu3 %v8789_v63  ;;  %v4836_v56 = vld [vmem:[#allocation9 + $0x140] sm:$0xff] }
  0x57   :  { %613 = vmatpush.msra.mxu3 %v4796_v48  ;;  %8786 = vst [vmem:[#allocation48_spill] sm:$0xff] %v4814_v58  ;;  %475 = vmatpush.msrb.mxu0 %v4814_v58  ;;  %v4834_v48 = vld [vmem:[#allocation9 + $0x378] sm:$0xff]  ;;  %v4842_v58 = vld [vmem:[#allocation9 + $0x350] sm:$0xff] }
  0x58   :  { %574 = vmatpush.msra.mxu1 %v4804_v60  ;;  %8787 = vst [vmem:[#allocation49_spill] sm:$0xff] %v4816_v52  ;;  %515 = vmatpush.msrb.mxu2 %v4816_v52  ;;  %v4828_v60 = vld [vmem:[#allocation9 + $0x168] sm:$0xff] }
  0x59   :  { %614 = vmatpush.msra.mxu3 %v4806_v1  ;;  %8788 = vst [vmem:[#allocation50_spill] sm:$0xff] %v4818_v54  ;;  %v4832_v1 = vld [vmem:[#allocation9 + $0x370] sm:$0xff]  ;;  %476 = vmatpush.msrb.mxu0 %v4826_v9  ;;  %v4840_v52 = vld [vmem:[#allocation9 + $0x148] sm:$0xff] }
  0x5a   :  { %8790 = vst [vmem:[#allocation51_spill] sm:$0xff] %v4824_v50  ;;  %575 = vmatpush.msra.mxu1 %v4818_v54  ;;  %516 = vmatpush.msrb.mxu2 %v4828_v60  ;;  %v4850_v54 = vld [vmem:[#allocation9 + $0x128] sm:$0xff] }
  0x5b   :  { %8791 = vst [vmem:[#allocation52_spill] sm:$0xff] %v4826_v9  ;;  %615 = vmatpush.msra.mxu3 %v4824_v50  ;;  %v4848_v50 = vld [vmem:[#allocation9 + $0x120] sm:$0xff]  ;;  %477 = vmatpush.msrb.mxu0 %v4836_v56  ;;  %v4854_v9 = vld [vmem:[#allocation9 + $0x330] sm:$0xff] }
  0x5c   :  { %8792 = vst [vmem:[#allocation53_spill] sm:$0xff] %v4828_v60  ;;  %576 = vmatpush.msra.mxu1 %v4832_v1  ;;  %517 = vmatpush.msrb.mxu2 %v4840_v52  ;;  %v4856_v60 = vld [vmem:[#allocation9 + $0x338] sm:$0xff] }
  0x5d   :  { %8793 = vst [vmem:[#allocation54_spill] sm:$0xff] %v4832_v1  ;;  %616 = vmatpush.msra.mxu3 %v4834_v48  ;;  %478 = vmatpush.msrb.mxu0 %v4848_v50  ;;  %v4968_v1 = vld [vmem:[#allocation9 + $0x1f0] sm:$0xff] }
  0x5e   :  { %8794 = vst [vmem:[#allocation55_spill] sm:$0xff] %v4834_v48  ;;  %577 = vmatpush.msra.mxu1 %v4842_v58  ;;  %518 = vmatpush.msrb.mxu2 %v4850_v54  ;;  %v4864_v48 = vld [vmem:[#allocation9 + $0x100] sm:$0xff] }
  0x5f   :  { %8795 = vst [vmem:[#allocation56_spill] sm:$0xff] %v4836_v56  ;;  %617 = vmatpush.msra.mxu3 %v4844_v15  ;;  %v4866_v56 = vld [vmem:[#allocation9 + $0x108] sm:$0xff]  ;;  %479 = vmatpush.msrb.mxu0 %v4864_v48  ;;  %v4874_v15 = vld [vmem:[#allocation9 + $0xe0] sm:$0xff] }
  0x60   :  { %8796 = vst [vmem:[#allocation57_spill] sm:$0xff] %v4840_v52  ;;  %578 = vmatpush.msra.mxu1 %v4854_v9  ;;  %519 = vmatpush.msrb.mxu2 %v4866_v56  ;;  %v4870_v52 = vld [vmem:[#allocation9 + $0x310] sm:$0xff] }
  0x61   :  { %8797 = vst [vmem:[#allocation58_spill] sm:$0xff] %v4842_v58  ;;  %618 = vmatpush.msra.mxu3 %v4856_v60  ;;  %v4872_v58 = vld [vmem:[#allocation9 + $0x318] sm:$0xff]  ;;  %480 = vmatpush.msrb.mxu0 %v4874_v15 }
  0x62   :  { %8799 = vst [vmem:[#allocation60_spill] sm:$0xff] %v4848_v50  ;;  %579 = vmatpush.msra.mxu1 %v4870_v52  ;;  %v4880_v50 = vld [vmem:[#allocation9 + $0x2f0] sm:$0xff] }
  0x63   :  { %8800 = vst [vmem:[#allocation61_spill] sm:$0xff] %v4850_v54  ;;  %619 = vmatpush.msra.mxu3 %v4872_v58  ;;  %v4878_v54 = vld [vmem:[#allocation9 + $0xe8] sm:$0xff] }
  0x64   :  { %8801 = vst [vmem:[#allocation62_spill] sm:$0xff] %v4854_v9  ;;  %520 = vmatpush.msrb.mxu2 %v4878_v54  ;;  %580 = vmatpush.msra.mxu1 %v4880_v50  ;;  %v4962_v9 = vld [vmem:[#allocation9 + $0x210] sm:$0xff] }
  0x65   :  { %8802 = vst [vmem:[#allocation63_spill] sm:$0xff] %v4856_v60  ;;  %v4882_v60 = vld [vmem:[#allocation9 + $0x2f8] sm:$0xff] }
  0x66   :  { %8803 = vst [vmem:[#allocation64_spill] sm:$0xff] %v4864_v48  ;;  %620 = vmatpush.msra.mxu3 %v4882_v60  ;;  %v4890_v48 = vld [vmem:[#allocation9 + $0xc8] sm:$0xff] }
  0x67   :  { %8804 = vst [vmem:[#allocation65_spill] sm:$0xff] %v4866_v56  ;;  %v4888_v56 = vld [vmem:[#allocation9 + $0xc0] sm:$0xff]  ;;  %521 = vmatpush.msrb.mxu2 %v4890_v48 }
  0x68   :  { %8805 = vst [vmem:[#allocation66_spill] sm:$0xff] %v4870_v52  ;;  %v4892_v52 = vld [vmem:[#allocation9 + $0x2d0] sm:$0xff]  ;;  %481 = vmatpush.msrb.mxu0 %v4888_v56 }
  0x69   :  { %8806 = vst [vmem:[#allocation67_spill] sm:$0xff] %v4872_v58  ;;  %v4896_v58 = vld [vmem:[#allocation9 + $0x2d8] sm:$0xff]  ;;  %581 = vmatpush.msra.mxu1 %v4892_v52 }
  0x6a   :  { %8807 = vst [vmem:[#allocation68_spill] sm:$0xff] %v4874_v15  ;;  %621 = vmatpush.msra.mxu3 %v4896_v58  ;;  %v4902_v15 = vld [vmem:[#allocation9 + $0xa8] sm:$0xff] }
  0x6b   :  { %8808 = vst [vmem:[#allocation69_spill] sm:$0xff] %v4878_v54  ;;  %v4900_v54 = vld [vmem:[#allocation9 + $0xa0] sm:$0xff]  ;;  %522 = vmatpush.msrb.mxu2 %v4902_v15 }
  0x6c   :  { %8809 = vst [vmem:[#allocation70_spill] sm:$0xff] %v4880_v50  ;;  %482 = vmatpush.msrb.mxu0 %v4900_v54  ;;  %v4908_v50 = vld [vmem:[#allocation9 + $0x2b8] sm:$0xff] }
  0x6d   :  { %8810 = vst [vmem:[#allocation71_spill] sm:$0xff] %v4882_v60  ;;  %v4904_v60 = vld [vmem:[#allocation9 + $0x2b0] sm:$0xff]  ;;  %622 = vmatpush.msra.mxu3 %v4908_v50 }
  0x6e   :  { %8811 = vst [vmem:[#allocation72_spill] sm:$0xff] %v4888_v56  ;;  %582 = vmatpush.msra.mxu1 %v4904_v60  ;;  %v4914_v56 = vld [vmem:[#allocation9 + $0x88] sm:$0xff] }
  0x6f   :  { %8812 = vst [vmem:[#allocation73_spill] sm:$0xff] %v4890_v48  ;;  %v4912_v48 = vld [vmem:[#allocation9 + $0x80] sm:$0xff]  ;;  %523 = vmatpush.msrb.mxu2 %v4914_v56 }
  0x70   :  { %8813 = vst [vmem:[#allocation74_spill] sm:$0xff] %v4892_v52  ;;  %483 = vmatpush.msrb.mxu0 %v4912_v48  ;;  %v4920_v52 = vld [vmem:[#allocation9 + $0x298] sm:$0xff] }
  0x71   :  { %8814 = vst [vmem:[#allocation75_spill] sm:$0xff] %v4896_v58  ;;  %v4916_v58 = vld [vmem:[#allocation9 + $0x290] sm:$0xff]  ;;  %623 = vmatpush.msra.mxu3 %v4920_v52 }
  0x72   :  { %8815 = vst [vmem:[#allocation76_spill] sm:$0xff] %v4900_v54  ;;  %583 = vmatpush.msra.mxu1 %v4916_v58  ;;  %v4926_v54 = vld [vmem:[#allocation9 + $0x68] sm:$0xff] }
  0x73   :  { %8816 = vst [vmem:[#allocation77_spill] sm:$0xff] %v4902_v15  ;;  %v4924_v15 = vld [vmem:[#allocation9 + $0x60] sm:$0xff]  ;;  %524 = vmatpush.msrb.mxu2 %v4926_v54 }
  0x74   :  { %8817 = vst [vmem:[#allocation78_spill] sm:$0xff] %v4904_v60  ;;  %484 = vmatpush.msrb.mxu0 %v4924_v15  ;;  %v4932_v60 = vld [vmem:[#allocation9 + $0x278] sm:$0xff] }
  0x75   :  { %8818 = vst [vmem:[#allocation79_spill] sm:$0xff] %v4908_v50  ;;  %v4928_v50 = vld [vmem:[#allocation9 + $0x270] sm:$0xff]  ;;  %624 = vmatpush.msra.mxu3 %v4932_v60 }
  0x76   :  { %8819 = vst [vmem:[#allocation80_spill] sm:$0xff] %v4912_v48  ;;  %584 = vmatpush.msra.mxu1 %v4928_v50  ;;  %v4938_v48 = vld [vmem:[#allocation9 + $0x48] sm:$0xff] }
  0x77   :  { %8820 = vst [vmem:[#allocation81_spill] sm:$0xff] %v4914_v56  ;;  %v4936_v56 = vld [vmem:[#allocation9 + $0x40] sm:$0xff]  ;;  %525 = vmatpush.msrb.mxu2 %v4938_v48 }
  0x78   :  { %8821 = vst [vmem:[#allocation82_spill] sm:$0xff] %v4916_v58  ;;  %485 = vmatpush.msrb.mxu0 %v4936_v56  ;;  %v4944_v58 = vld [vmem:[#allocation9 + $0x258] sm:$0xff] }
  0x79   :  { %8822 = vst [vmem:[#allocation83_spill] sm:$0xff] %v4920_v52  ;;  %v4940_v52 = vld [vmem:[#allocation9 + $0x250] sm:$0xff]  ;;  %625 = vmatpush.msra.mxu3 %v4944_v58 }
  0x7a   :  { %8823 = vst [vmem:[#allocation84_spill] sm:$0xff] %v4924_v15  ;;  %585 = vmatpush.msra.mxu1 %v4940_v52  ;;  %v4949_v15 = vld [vmem:[#allocation9 + $0x28] sm:$0xff] }
  0x7b   :  { %8824 = vst [vmem:[#allocation85_spill] sm:$0xff] %v4926_v54  ;;  %v4947_v54 = vld [vmem:[#allocation9 + $0x20] sm:$0xff]  ;;  %526 = vmatpush.msrb.mxu2 %v4949_v15 }
  0x7c   :  { %8825 = vst [vmem:[#allocation86_spill] sm:$0xff] %v4928_v50  ;;  %v4951_v50 = vld [vmem:[#allocation9 + $0x230] sm:$0xff]  ;;  %486 = vmatpush.msrb.mxu0 %v4947_v54 }
  0x7d   :  { %8826 = vst [vmem:[#allocation87_spill] sm:$0xff] %v4932_v60  ;;  %v4955_v60 = vld [vmem:[#allocation9 + $0x238] sm:$0xff]  ;;  %586 = vmatpush.msra.mxu1 %v4951_v50 }
  0x7e   :  { %8827 = vst [vmem:[#allocation88_spill] sm:$0xff] %v4936_v56  ;;  %v4958_v56 = vld [vmem:[#allocation9] sm:$0xff]  ;;  %626 = vmatpush.msra.mxu3 %v4955_v60 }
  0x7f   :  { %8828 = vst [vmem:[#allocation89_spill] sm:$0xff] %v4938_v48  ;;  %v4960_v48 = vld [vmem:[#allocation9 + $0x8] sm:$0xff]  ;;  %487 = vmatpush.msrb.mxu0 %v4958_v56  ;;  %587 = vmatpush.msra.mxu1 %v4962_v9 }
  0x80   :  { %8829 = vst [vmem:[#allocation90_spill] sm:$0xff] %v4940_v52  ;;  %v4966_v52 = vld [vmem:[#allocation9 + $0x218] sm:$0xff]  ;;  %527 = vmatpush.msrb.mxu2 %v4960_v48  ;;  %588 = vmatmul.f32.vlgmr.msra.gmra.mxu1 %v8789_v63 }
  0x81   :  { %8830 = vst [vmem:[#allocation91_spill] sm:$0xff] %v4944_v58  ;;  %v4970_v58 = vld [vmem:[#allocation9 + $0x1f8] sm:$0xff]  ;;  %627 = vmatpush.msra.mxu3 %v4966_v52  ;;  %552 = vmatpush.msra.mxu0 %v4968_v1 }
  0x82   :  { %8831 = vst [vmem:[#allocation92_spill] sm:$0xff] %v4947_v54  ;;  %v4978_v54 = vld [vmem:[#allocation9 + $0x1d8] sm:$0xff]  ;;  %592 = vmatpush.msra.mxu2 %v4970_v58  ;;  %730 = vmatpush.msrb.mxu1 %v4546_v2 }
  0x83   :  { %8832 = vst [vmem:[#allocation93_spill] sm:$0xff] %v4949_v15  ;;  %v4976_v15 = vld [vmem:[#allocation9 + $0x1d0] sm:$0xff]  ;;  %770 = vmatpush.msrb.mxu3 %v4549_v4 }
  0x84   :  { %8833 = vst [vmem:[#allocation94_spill] sm:$0xff] %v4955_v60  ;;  %v4985_v60 = vld [vmem:[%s8200_s1] sm:$0xf]  ;;  %553 = vmatpush.msra.mxu0 %v4976_v15  ;;  %593 = vmatpush.msra.mxu2 %v4978_v54 }
  0x85   :  { %8834 = vst [vmem:[#allocation95_spill] sm:$0xff] %v4958_v56  ;;  %v4991_v56 = vld [vmem:[#allocation9 + $0x1b8] sm:$0xff]  ;;  %731 = vmatpush.msrb.mxu1 %v4551_v6  ;;  %771 = vmatpush.msrb.mxu3 %v4554_v8  ;;  %v5002_v2 = vperm.slane %v4985_v60, 0  ;;  %v5005_v4 = vperm.slane %v4985_v60, 1  ;;  %v5012_v6 = vld [vmem:[%s8202_s3] sm:$0xf] }
  0x86   :  { %8835 = vst [vmem:[#allocation96_spill] sm:$0xff] %v4960_v48  ;;  %v4989_v48 = vld [vmem:[#allocation9 + $0x1b0] sm:$0xff]  ;;  %594 = vmatpush.msra.mxu2 %v4991_v56  ;;  %628 = vmatmul.f32.vlgmr.msra.gmra.mxu3 %v8789_v63 }
  0x87   :  { %8836 = vst [vmem:[#allocation97_spill] sm:$0xff] %v4968_v1  ;;  %v4999_v1 = vld [vmem:[#allocation9 + $0x198] sm:$0xff]  ;;  %554 = vmatpush.msra.mxu0 %v4989_v48  ;;  %732 = vmatpush.msrb.mxu1 %v4557_v10  ;;  %v5016_v8 = vld [vmem:[#allocation9 + $0x170] sm:$0xff] }
  0x88   :  { %8837 = vst [vmem:[#allocation98_spill] sm:$0xff] %v4970_v58  ;;  %v4997_v58 = vld [vmem:[#allocation9 + $0x190] sm:$0xff]  ;;  %772 = vmatpush.msrb.mxu3 %v4559_v12  ;;  %595 = vmatpush.msra.mxu2 %v4999_v1  ;;  %v5031_v12 = vperm.slane %v5012_v6, 0 }
  0x89   :  { %8838 = vst [vmem:[#allocation99_spill] sm:$0xff] %v4976_v15  ;;  %555 = vmatpush.msra.mxu0 %v4997_v58  ;;  %733 = vmatpush.msrb.mxu1 %v4562_v14  ;;  %v5040_v14 = vld [vmem:[#allocation9 + $0x158] sm:$0xff] }
  0x8a   :  { %8839 = vst [vmem:[#allocation100_spill] sm:$0xff] %v4978_v54  ;;  %v5018_v54 = vld [vmem:[#allocation9 + $0x178] sm:$0xff]  ;;  %773 = vmatpush.msrb.mxu3 %v4565_v16  ;;  %v5044_v16 = vld [vmem:[#allocation9 + $0x130] sm:$0xff] }
  0x8b   :  { %8840 = vst [vmem:[#allocation101_spill] sm:$0xff] %v4989_v48  ;;  %556 = vmatpush.msra.mxu0 %v5016_v8  ;;  %596 = vmatpush.msra.mxu2 %v5018_v54 }
  0x8c   :  { %8841 = vst [vmem:[#allocation102_spill] sm:$0xff] %v4991_v56  ;;  %v5026_v56 = vld [vmem:[#allocation9 + $0x150] sm:$0xff]  ;;  %734 = vmatpush.msrb.mxu1 %v4568_v18  ;;  %774 = vmatpush.msrb.mxu3 %v4571_v20  ;;  %v5057_v18 = vld [vmem:[#allocation9 + $0x118] sm:$0xff]  ;;  %v5060_v20 = vperm.slane %v4985_v60, 2 }
  0x8d   :  { %8842 = vst [vmem:[#allocation103_spill] sm:$0xff] %v4997_v58  ;;  %v5036_v58 = vperm.slane %v5012_v6, 1  ;;  %557 = vmatpush.msra.mxu0 %v5026_v56  ;;  %597 = vmatpush.msra.mxu2 %v5040_v14 }
  0x8e   :  { %8843 = vst [vmem:[#allocation104_spill] sm:$0xff] %v5002_v2  ;;  %735 = vmatpush.msrb.mxu1 %v4574_v22  ;;  %775 = vmatpush.msrb.mxu3 %v4577_v24  ;;  %v5064_v22 = vld [vmem:[#allocation9 + $0xf0] sm:$0xff] }
  0x8f   :  { %8844 = vst [vmem:[#allocation105_spill] sm:$0xff] %v5005_v4  ;;  %558 = vmatpush.msra.mxu0 %v5044_v16 }
  0x90   :  { %8845 = vst [vmem:[#allocation106_spill] sm:$0xff] %v5016_v8  ;;  %736 = vmatpush.msrb.mxu1 %v4580_v26  ;;  %776 = vmatpush.msrb.mxu3 %v4583_v28  ;;  %v5076_v26 = vld [vmem:[#allocation9 + $0xd8] sm:$0xff] }
  0x91   :  { %8846 = vst [vmem:[#allocation107_spill] sm:$0xff] %v5018_v54 }
  0x92   :  { %8847 = vst [vmem:[#allocation108_spill] sm:$0xff] %v5031_v12  ;;  %737 = vmatpush.msrb.mxu1 %v4586_v30  ;;  %777 = vmatpush.msrb.mxu3 %v4589_v32  ;;  %v5085_v30 = vld [vmem:[#allocation9 + $0xb0] sm:$0xff]  ;;  %v5089_v32 = vld [vmem:[#allocation9 + $0xb8] sm:$0xff] }
  0x93   :  { %8848 = vst [vmem:[#allocation109_spill] sm:$0xff] %v5036_v58 }
  0x94   :  { %738 = vmatpush.msrb.mxu1 %v4592_v34  ;;  %778 = vmatpush.msrb.mxu3 %v4595_v36  ;;  %v5097_v34 = vld [vmem:[#allocation9 + $0x98] sm:$0xff] }
  0x96   :  { %739 = vmatpush.msrb.mxu1 %v4598_v38  ;;  %779 = vmatpush.msrb.mxu3 %v4601_v40  ;;  %v5104_v38 = vld [vmem:[#allocation9 + $0x70] sm:$0xff]  ;;  %v5108_v40 = vld [vmem:[#allocation9 + $0x78] sm:$0xff] }
  0x98   :  { %740 = vmatpush.msrb.mxu1 %v4604_v42  ;;  %780 = vmatpush.msrb.mxu3 %v4607_v44  ;;  %v5115_v42 = vperm.slane %v4985_v60, 3  ;;  %v5129_v60 = vld [vmem:[#allocation9 + $0x38] sm:$0xff] }
  0x99   :  { %v5022_v48 = vpop.permute.xlu0 %287 }
  0x9a   :  { %v299_v10 = vmul.f32 %v5002_v2, %v5022_v48  ;;  %v300_v15 = vmul.f32 %v5005_v4, %v5022_v48  ;;  %v5047_v2 = vld [vmem:[#allocation9 + $0x138] sm:$0xff]  ;;  %v5051_v4 = vld [vmem:[#allocation9 + $0x110] sm:$0xff]  ;;  %v301_v28 = vmul.f32 %v5060_v20, %v5022_v48  ;;  %741 = vmatpush.msrb.mxu1 %v4614_v47  ;;  %781 = vmatpush.msrb.mxu3 %v4619_v49 }
  0x9b   :  { %8849 = vst [vmem:[#allocation110_spill] sm:$0xff] %v5047_v2  ;;  %598 = vmatpush.msra.mxu2 %v5047_v2  ;;  %559 = vmatpush.msra.mxu0 %v5051_v4  ;;  %v5123_v47 = vld [vmem:[#allocation9 + $0x30] sm:$0xff] }
  0x9c   :  { %8850 = vst [vmem:[#allocation111_spill] sm:$0xff] %v5051_v4  ;;  %v312_v54 = vadd.f32 %v5031_v12, %v299_v10  ;;  %v313_v8 = vadd.f32 %v5036_v58, %v300_v15  ;;  %v5068_v15 = vld [vmem:[#allocation9 + $0xf8] sm:$0xff]  ;;  %v5072_v12 = vld [vmem:[#allocation9 + $0xd0] sm:$0xff]  ;;  %v5081_v4 = vperm.slane %v5012_v6, 2  ;;  %742 = vmatpush.msrb.mxu1 %v4623_v51  ;;  %782 = vmatpush.msrb.mxu3 %v4629_v53 }
  0x9d   :  { %599 = vmatpush.msra.mxu2 %v5057_v18  ;;  %560 = vmatpush.msra.mxu0 %v5064_v22  ;;  %v302_v51 = vmul.f32 %v5115_v42, %v5022_v48  ;;  %v5145_v53 = vld [vmem:[#allocation9 + $0x18] sm:$0xff] }
  0x9e   :  { %v314_v36 = vadd.f32 %v5081_v4, %v301_v28  ;;  %v5119_v28 = vld [vmem:[#allocation9 + $0x58] sm:$0xff]  ;;  %743 = vmatpush.msrb.mxu1 %v4635_v55  ;;  %783 = vmatpush.msrb.mxu3 %v4641_v57 }
  0x9f   :  { %600 = vmatpush.msra.mxu2 %v5068_v15  ;;  %561 = vmatpush.msra.mxu0 %v5072_v12 }
  0xa0   :  { %744 = vmatpush.msrb.mxu1 %v4647_v59  ;;  %784 = vmatpush.msrb.mxu3 %v4653_v61 }
  0xa1   :  { %601 = vmatpush.msra.mxu2 %v5076_v26  ;;  %562 = vmatpush.msra.mxu0 %v5085_v30 }
  0xa2   :  { %745 = vmatpush.msrb.mxu1 %v4662_v0  ;;  %785 = vmatpush.msrb.mxu3 %v4668_v3 }
  0xa3   :  { %602 = vmatpush.msra.mxu2 %v5089_v32 }
  0xa4   :  { %877 = vmatpush.msra.mxu1 %v4675_v5  ;;  %917 = vmatpush.msra.mxu3 %v4677_v7 }
  0xa5   :  { %603 = vmatpush.msra.mxu2 %v5097_v34 }
  0xa6   :  { %878 = vmatpush.msra.mxu1 %v4683_v11  ;;  %918 = vmatpush.msra.mxu3 %v4685_v13 }
  0xa7   :  { %604 = vmatpush.msra.mxu2 %v5108_v40 }
  0xa8   :  { %879 = vmatpush.msra.mxu1 %v4692_v17  ;;  %919 = vmatpush.msra.mxu3 %v4694_v19 }
  0xa9   :  { %605 = vmatpush.msra.mxu2 %v5119_v28 }
  0xaa   :  { %880 = vmatpush.msra.mxu1 %v4698_v21  ;;  %920 = vmatpush.msra.mxu3 %v4700_v23 }
  0xab   :  { %606 = vmatpush.msra.mxu2 %v5129_v60 }
  0xac   :  { %881 = vmatpush.msra.mxu1 %v4704_v25  ;;  %921 = vmatpush.msra.mxu3 %v4706_v27 }
  0xad   :  { %607 = vmatpush.msra.mxu2 %v5145_v53 }
  0xae   :  { %882 = vmatpush.msra.mxu1 %v4710_v29  ;;  %922 = vmatpush.msra.mxu3 %v4712_v31 }
  0xaf   :  { %v333_v24 = vpop.f32.mrf.mxu0 }
  0xb0   :  { %v353_v10 = vpop.f32.mrf.mxu1  ;;  %v396_v58 = vadd.f32 %v333_v24, %v312_v54  ;;  %v5093_v24 = vld [vmem:[#allocation9 + $0x90] sm:$0xff]  ;;  %883 = vmatpush.msra.mxu1 %v4716_v33  ;;  %923 = vmatpush.msra.mxu3 %v4718_v35 }
  0xb1   :  { %v397_v2 = vadd.f32 %v353_v10, %v313_v8  ;;  %563 = vmatpush.msra.mxu0 %v5093_v24  ;;  %v5112_v10 = vld [vmem:[#allocation9 + $0x50] sm:$0xff] }
  0xb2   :  { %v3456_v54 = vmul.f32 -1.442695, %v396_v58  ;;  %884 = vmatpush.msra.mxu1 %v4722_v37  ;;  %924 = vmatpush.msra.mxu3 %v4724_v39  ;;  %v8851_v39 = vld [vmem:[#allocation25_spill] sm:$0xff] }
  0xb3   :  { %v3457_v8 = vmul.f32 -1.442695, %v397_v2  ;;  %564 = vmatpush.msra.mxu0 %v5104_v38 }
  0xb4   :  { %3525 = vpow2.f32 %v3456_v54  ;;  %885 = vmatpush.msra.mxu1 %v4728_v41  ;;  %925 = vmatpush.msra.mxu3 %v4730_v43  ;;  %v8852_v43 = vld [vmem:[#allocation26_spill] sm:$0xff] }
  0xb5   :  { %3527 = vpow2.f32 %v3457_v8  ;;  %565 = vmatpush.msra.mxu0 %v5112_v10 }
  0xb6   :  { %v373_v58 = vpop.f32.mrf.mxu2  ;;  %886 = vmatpush.msra.mxu1 %v4734_v45  ;;  %926 = vmatpush.msra.mxu3 %v4736_v46  ;;  %v8856_v46 = vld [vmem:[#allocation30_spill] sm:$0xff] }
  0xb7   :  { %v398_v2 = vadd.f32 %v373_v58, %v314_v36  ;;  %v5135_v36 = vld [vmem:[#allocation9 + $0x10] sm:$0xff]  ;;  %v5141_v58 = vperm.slane %v5012_v6, 3  ;;  %566 = vmatpush.msra.mxu0 %v5123_v47  ;;  %v393_v48 = vpop.f32.mrf.mxu3 }
  0xb8   :  { %887 = vmatpush.msra.mxu1 %v4740_v62  ;;  %927 = vmatpush.msra.mxu3 %v8851_v39  ;;  %v5206_v62 = vld [vmem:[#allocation6 + $0x1e0] sm:$0xff] }
  0xb9   :  { %v3458_v44 = vmul.f32 -1.442695, %v398_v2  ;;  %567 = vmatpush.msra.mxu0 %v5135_v36  ;;  %v315_v57 = vadd.f32 %v5141_v58, %v302_v51  ;;  %v8867_v39 = vld [vmem:[#allocation47_spill] sm:$0xff] }
  0xba   :  { %v3526_v54 = vpop.eup %3525  ;;  %888 = vmatpush.msra.mxu1 %v8852_v43  ;;  %v8868_v43 = vld [vmem:[#allocation50_spill] sm:$0xff] }
  0xbb   :  { %v3528_v49 = vpop.eup %3527  ;;  %v5125_v8 = vadd.f32 1.0, %v3526_v54  ;;  %3529 = vpow2.f32 %v3458_v44  ;;  %v399_v61 = vadd.f32 %v393_v48, %v315_v57 }
  0xbc   :  { %v5131_v63 = vadd.f32 1.0, %v3528_v49 }
  0xbd   :  { %3531 = vrcp.f32 %v5125_v8  ;;  %v423_v7 = vand.u32 2147483648, %v5125_v8  ;;  %v421_v49 = vand.u32 2147483647, %v5125_v8  ;;  %vm417_vm2 = vweird.f32 %v5125_v8 }
  0xbe   :  { %3533 = vrcp.f32 %v5131_v63  ;;  %v438_v11 = vand.u32 2147483648, %v5131_v63  ;;  %v436_v17 = vand.u32 2147483647, %v5131_v63  ;;  %vm432_vm3 = vweird.f32 %v5131_v63 }
  0xbf   :  { %v424_v48 = vor.u32 1.1754944e-38, %v423_v7  ;;  %vm422_vm5 = vcmp.eq.f32.partialorder %v421_v49, 8.507059e+37  ;;  %v8857_v49 = vld [vmem:[#allocation31_spill] sm:$0xff] }
  0xc0   :  { %v439_v23 = vor.u32 1.1754944e-38, %v438_v11  ;;  %vm437_vm7 = vcmp.eq.f32.partialorder %v436_v17, 8.507059e+37  ;;  %v5210_v11 = vld [vmem:[#allocation6 + $0x1f0] sm:$0xff]  ;;  %v8858_v17 = vld [vmem:[#allocation32_spill] sm:$0xff] }
  0xc1   :  { %v3530_v55 = vpop.eup %3529 }
  0xc2   :  { %v5157_v6 = vadd.f32 1.0, %v3530_v55 }
  0xc3   :  { %v3532_v59 = vpop.eup %3531 }
  0xc4   :  { %v3534_v2 = vpop.eup %3533  ;;  %v413_v44 = vmul.f32 %v3532_v59, %v5125_v8  ;;  %3535 = vrcp.f32 %v5157_v6  ;;  %vm418_vm0 = vweird.f32 %v3532_v59  ;;  %v453_v33 = vand.u32 2147483648, %v5157_v6 }
  0xc5   :  { %v428_v0 = vmul.f32 %v3534_v2, %v5131_v63  ;;  %3537 = vtanh.f32 %v399_v61  ;;  %vm433_vm1 = vweird.f32 %v3534_v2  ;;  %vm419_vm4 = vmor %vm417_vm2, %vm418_vm0  ;;  %vm447_vm9 = vweird.f32 %v5157_v6 }
  0xc6   :  { %v414_v3 = vsub.f32 1.0, %v413_v44  ;;  %vm434_vm6 = vmor %vm432_vm3, %vm433_vm1  ;;  %v451_v35 = vand.u32 2147483647, %v5157_v6  ;;  %v454_v41 = vor.u32 1.1754944e-38, %v453_v33  ;;  %v5258_v33 = vld [vmem:[#allocation6 + $0x130] sm:$0xff] }
  0xc7   :  { %v429_v5 = vsub.f32 1.0, %v428_v0 }
  0xc8   :  { %v415_v54 = vmul.f32 %v3532_v59, %v414_v3  ;;  %vm452_vm11 = vcmp.eq.f32.partialorder %v451_v35, 8.507059e+37  ;;  %v8866_v35 = vld [vmem:[#allocation46_spill] sm:$0xff] }
  0xc9   :  { %v430_v13 = vmul.f32 %v3534_v2, %v429_v5  ;;  %v8854_v5 = vld [vmem:[#allocation28_spill] sm:$0xff] }
  0xca   :  { %v3536_v19 = vpop.eup %3535  ;;  %v416_v51 = vadd.f32 %v3532_v59, %v415_v54  ;;  %889 = vmatpush.msra.mxu1 %v8854_v5  ;;  %v5214_v54 = vld [vmem:[#allocation6 + $0x1c0] sm:$0xff]  ;;  %v8870_v5 = vld [vmem:[#allocation54_spill] sm:$0xff] }
  0xcb   :  { %v443_v21 = vmul.f32 %v3536_v19, %v5157_v6  ;;  %v431_v55 = vadd.f32 %v3534_v2, %v430_v13  ;;  %v3538_v25 = vpop.eup %3537  ;;  %vm448_vm8 = vweird.f32 %v3536_v19  ;;  %v8855_v6 = vld [vmem:[#allocation29_spill] sm:$0xff] }
  0xcc   :  { %v420_v57 = vsel %vm419_vm4, %v3532_v59, %v416_v51  ;;  %vm449_vm10 = vmor %vm447_vm9, %vm448_vm8  ;;  %890 = vmatpush.msra.mxu1 %v8856_v46  ;;  %v5218_v13 = vld [vmem:[#allocation6 + $0x1d0] sm:$0xff]  ;;  %v8871_v46 = vld [vmem:[#allocation55_spill] sm:$0xff] }
  0xcd   :  { %v444_v8 = vsub.f32 1.0, %v443_v21  ;;  %v425_v61 = vsel %vm422_vm5, %v424_v48, %v420_v57  ;;  %v435_v27 = vsel %vm434_vm6, %v3534_v2, %v431_v55  ;;  %v8853_v2 = vld [vmem:[#allocation27_spill] sm:$0xff]  ;;  %v8859_v51 = vld [vmem:[#allocation33_spill] sm:$0xff]  ;;  %v8860_v48 = vld [vmem:[#allocation34_spill] sm:$0xff] }
  0xce   :  { %v440_v63 = vsel %vm437_vm7, %v439_v23, %v435_v27  ;;  %v459_v44 = vmul.f32 %v3538_v25, %v425_v61  ;;  %928 = vmatpush.msra.mxu3 %v8853_v2  ;;  %891 = vmatpush.msra.mxu1 %v8858_v17  ;;  %v5226_v21 = vld [vmem:[#allocation6 + $0x1b0] sm:$0xff]  ;;  %v5230_v55 = vld [vmem:[#allocation6 + $0x180] sm:$0xff]  ;;  %v8862_v61 = vld [vmem:[#allocation38_spill] sm:$0xff] }
  0xcf   :  { %v445_v0 = vmul.f32 %v3536_v19, %v444_v8  ;;  %v458_v29 = vmul.f32 0.0, %v440_v63  ;;  %v8861_v23 = vld [vmem:[#allocation35_spill] sm:$0xff]  ;;  %v5234_v57 = vld [vmem:[#allocation6 + $0x190] sm:$0xff]  ;;  %v8872_v17 = vld [vmem:[#allocation58_spill] sm:$0xff] }
  0xd0   :  { %929 = vmatpush.msra.mxu3 %v8855_v6  ;;  %892 = vmatpush.msra.mxu1 %v8860_v48  ;;  %v5239_v25 = vld [vmem:[#allocation6 + $0x160] sm:$0xff]  ;;  %v5242_v8 = vld [vmem:[#allocation6 + $0x170] sm:$0xff] }
  0xd1   :  { %v5185_v59 = vadd.f32 %v459_v44, %v458_v29  ;;  %v446_v31 = vadd.f32 %v3536_v19, %v445_v0  ;;  %v5246_v27 = vld [vmem:[#allocation6 + $0x140] sm:$0xff]  ;;  %v5250_v44 = vld [vmem:[#allocation6 + $0x150] sm:$0xff]  ;;  %v8864_v0 = vld [vmem:[#allocation42_spill] sm:$0xff] }
  0xd2   :  { %930 = vmatpush.msra.mxu3 %v8857_v49  ;;  %v8863_v63 = vld [vmem:[#allocation39_spill] sm:$0xff]  ;;  %v5282_v49 = vld [vmem:[#allocation6 + $0xd0] sm:$0xff] }
  0xd3   :  { %3539 = vtanh.f32 %v5185_v59  ;;  %v450_v37 = vsel %vm449_vm10, %v3536_v19, %v446_v31  ;;  %v5222_v19 = vld [vmem:[#allocation6 + $0x1a0] sm:$0xff] }
  0xd4   :  { %v455_v45 = vsel %vm452_vm11, %v454_v41, %v450_v37  ;;  %931 = vmatpush.msra.mxu3 %v8859_v51  ;;  %v5254_v29 = vld [vmem:[#allocation6 + $0x120] sm:$0xff]  ;;  %v5266_v41 = vld [vmem:[#allocation6 + $0x110] sm:$0xff] }
  0xd5   :  { %v8865_v31 = vld [vmem:[#allocation43_spill] sm:$0xff] }
  0xd6   :  { %932 = vmatpush.msra.mxu3 %v8861_v23  ;;  %v5262_v37 = vld [vmem:[#allocation6 + $0x100] sm:$0xff]  ;;  %v5290_v23 = vld [vmem:[#allocation6 + $0xb0] sm:$0xff] }
  0xd7   :  { %v5270_v2 = vld [vmem:[#allocation6 + $0xe0] sm:$0xff] }
  0xd8   :  { %v5278_v6 = vld [vmem:[#allocation6 + $0xc0] sm:$0xff] }
  0xd9   :  { %v3540_v3 = vpop.eup %3539  ;;  %v5286_v51 = vld [vmem:[#allocation6 + $0xa0] sm:$0xff] }
  0xda   :  { %v5200_v7 = vmul.f32 %v3540_v3, %v455_v45  ;;  %v8869_v3 = vld [vmem:[#allocation51_spill] sm:$0xff]  ;;  %v5274_v45 = vld [vmem:[#allocation6 + $0xf0] sm:$0xff] }
  0xdb   :  { %v8873_v48 = vld [vmem:[#allocation59_spill] sm:$0xff] }
  0xdc   :  { %488 = vmatmul.f32.vlgmr.msrb.gmra.mxu0 %v5200_v7  ;;  %528 = vmatmul.f32.vlgmr.msrb.gmra.mxu2 %v5200_v7 }
  0xdd   :  { %710 = vmatpush.msrb.mxu0 %v5206_v62  ;;  %746 = vmatmul.f32.vlgmr.msrb.gmra.mxu1 %v5200_v7 }
  0xde   :  { %750 = vmatpush.msrb.mxu2 %v5210_v11  ;;  %786 = vmatmul.f32.vlgmr.msrb.gmra.mxu3 %v5200_v7 }
  0xdf   :  { %711 = vmatpush.msrb.mxu0 %v5214_v54  ;;  %957 = vmatpush.msrb.mxu1 %v8862_v61  ;;  %v8874_v61 = vld [vmem:[#allocation62_spill] sm:$0xff] }
  0xe0   :  { %751 = vmatpush.msrb.mxu2 %v5218_v13  ;;  %997 = vmatpush.msrb.mxu3 %v8863_v63  ;;  %v5294_v63 = vld [vmem:[#allocation6 + $0x80] sm:$0xff] }
  0xe1   :  { %712 = vmatpush.msrb.mxu0 %v5222_v19  ;;  %958 = vmatpush.msrb.mxu1 %v8864_v0  ;;  %v8875_v0 = vld [vmem:[#allocation63_spill] sm:$0xff] }
  0xe2   :  { %752 = vmatpush.msrb.mxu2 %v5226_v21  ;;  %998 = vmatpush.msrb.mxu3 %v8865_v31  ;;  %v8876_v31 = vld [vmem:[#allocation16_spill] sm:$0xff] }
  0xe3   :  { %713 = vmatpush.msrb.mxu0 %v5230_v55  ;;  %959 = vmatpush.msrb.mxu1 %v8866_v35  ;;  %v8877_v35 = vld [vmem:[#allocation66_spill] sm:$0xff] }
  0xe4   :  { %753 = vmatpush.msrb.mxu2 %v5234_v57  ;;  %568 = vmatmul.f32.vlgmr.msra.gmra.mxu0 %v5200_v7 }
  0xe5   :  { %608 = vmatmul.f32.vlgmr.msra.gmra.mxu2 %v5200_v7  ;;  %714 = vmatpush.msrb.mxu0 %v5239_v25 }
  0xe6   :  { %754 = vmatpush.msrb.mxu2 %v5242_v8  ;;  %999 = vmatpush.msrb.mxu3 %v8867_v39  ;;  %v8878_v39 = vld [vmem:[#allocation17_spill] sm:$0xff] }
  0xe7   :  { %715 = vmatpush.msrb.mxu0 %v5246_v27  ;;  %960 = vmatpush.msrb.mxu1 %v8868_v43  ;;  %v8879_v43 = vld [vmem:[#allocation67_spill] sm:$0xff] }
  0xe8   :  { %755 = vmatpush.msrb.mxu2 %v5250_v44  ;;  %1000 = vmatpush.msrb.mxu3 %v8869_v3  ;;  %v8880_v3 = vld [vmem:[#allocation18_spill] sm:$0xff] }
  0xe9   :  { %716 = vmatpush.msrb.mxu0 %v5254_v29  ;;  %961 = vmatpush.msrb.mxu1 %v8870_v5  ;;  %v8881_v5 = vld [vmem:[#allocation70_spill] sm:$0xff] }
  0xea   :  { %756 = vmatpush.msrb.mxu2 %v5258_v33  ;;  %1001 = vmatpush.msrb.mxu3 %v8871_v46  ;;  %v8882_v46 = vld [vmem:[#allocation19_spill] sm:$0xff] }
  0xeb   :  { %717 = vmatpush.msrb.mxu0 %v5262_v37  ;;  %962 = vmatpush.msrb.mxu1 %v8872_v17  ;;  %v8883_v17 = vld [vmem:[#allocation71_spill] sm:$0xff] }
  0xec   :  { %757 = vmatpush.msrb.mxu2 %v5266_v41  ;;  %1002 = vmatpush.msrb.mxu3 %v8873_v48  ;;  %v8884_v48 = vld [vmem:[#allocation20_spill] sm:$0xff] }
  0xed   :  { %718 = vmatpush.msrb.mxu0 %v5270_v2  ;;  %963 = vmatpush.msrb.mxu1 %v8874_v61  ;;  %v8885_v61 = vld [vmem:[#allocation74_spill] sm:$0xff] }
  0xee   :  { %758 = vmatpush.msrb.mxu2 %v5274_v45  ;;  %1003 = vmatpush.msrb.mxu3 %v8875_v0  ;;  %v8886_v0 = vld [vmem:[#allocation21_spill] sm:$0xff] }
  0xef   :  { %719 = vmatpush.msrb.mxu0 %v5278_v6  ;;  %964 = vmatpush.msrb.mxu1 %v8877_v35  ;;  %v8888_v35 = vld [vmem:[#allocation22_spill] sm:$0xff] }
  0xf0   :  { %759 = vmatpush.msrb.mxu2 %v5282_v49  ;;  %1004 = vmatpush.msrb.mxu3 %v8879_v43  ;;  %v8890_v43 = vld [vmem:[#allocation23_spill] sm:$0xff] }
  0xf1   :  { %720 = vmatpush.msrb.mxu0 %v5286_v51  ;;  %965 = vmatpush.msrb.mxu1 %v8881_v5  ;;  %v8892_v5 = vld [vmem:[#allocation24_spill] sm:$0xff] }
  0xf2   :  { %760 = vmatpush.msrb.mxu2 %v5290_v23  ;;  %1005 = vmatpush.msrb.mxu3 %v8883_v17  ;;  %v8894_v17 = vld [vmem:[#allocation37_spill] sm:$0xff] }
  0xf3   :  { %721 = vmatpush.msrb.mxu0 %v5294_v63  ;;  %966 = vmatpush.msrb.mxu1 %v8885_v61  ;;  %v8896_v61 = vld [vmem:[#allocation40_spill] sm:$0xff] }
  0xf4   :  { %761 = vmatpush.msrb.mxu2 %v8876_v31  ;;  %v8887_v31 = vld [vmem:[#allocation75_spill] sm:$0xff] }
  0xf5   :  { %722 = vmatpush.msrb.mxu0 %v8878_v39  ;;  %1006 = vmatpush.msrb.mxu3 %v8887_v31  ;;  %v8889_v39 = vld [vmem:[#allocation78_spill] sm:$0xff]  ;;  %v8898_v31 = vld [vmem:[#allocation41_spill] sm:$0xff] }
  0xf6   :  { %762 = vmatpush.msrb.mxu2 %v8880_v3  ;;  %967 = vmatpush.msrb.mxu1 %v8889_v39  ;;  %v8891_v3 = vld [vmem:[#allocation79_spill] sm:$0xff]  ;;  %v8900_v39 = vld [vmem:[#allocation44_spill] sm:$0xff] }
  0xf7   :  { %723 = vmatpush.msrb.mxu0 %v8882_v46  ;;  %1007 = vmatpush.msrb.mxu3 %v8891_v3  ;;  %v8893_v46 = vld [vmem:[#allocation36_spill] sm:$0xff]  ;;  %v8902_v3 = vld [vmem:[#allocation45_spill] sm:$0xff] }
  0xf8   :  { %763 = vmatpush.msrb.mxu2 %v8884_v48  ;;  %v8895_v48 = vld [vmem:[#allocation82_spill] sm:$0xff] }
  0xf9   :  { %724 = vmatpush.msrb.mxu0 %v8886_v0  ;;  %968 = vmatpush.msrb.mxu1 %v8895_v48  ;;  %v8897_v0 = vld [vmem:[#allocation83_spill] sm:$0xff]  ;;  %v8907_v48 = vld [vmem:[#allocation52_spill] sm:$0xff] }
  0xfa   :  { %764 = vmatpush.msrb.mxu2 %v8888_v35  ;;  %1008 = vmatpush.msrb.mxu3 %v8897_v0  ;;  %v8899_v35 = vld [vmem:[#allocation86_spill] sm:$0xff]  ;;  %v8909_v0 = vld [vmem:[#allocation53_spill] sm:$0xff] }
  0xfb   :  { %725 = vmatpush.msrb.mxu0 %v8890_v43  ;;  %969 = vmatpush.msrb.mxu1 %v8899_v35  ;;  %v8901_v43 = vld [vmem:[#allocation87_spill] sm:$0xff]  ;;  %v8911_v35 = vld [vmem:[#allocation57_spill] sm:$0xff] }
  0xfc   :  { %765 = vmatpush.msrb.mxu2 %v8892_v5  ;;  %726 = vmatmul.f32.vlgmr.msrb.gmra.mxu0 %v5200_v7  ;;  %v8904_v5 = vld [vmem:[#allocation48_spill] sm:$0xff] }
  0xfd   :  { %766 = vmatmul.f32.vlgmr.msrb.gmra.mxu2 %v5200_v7  ;;  %857 = vmatpush.msra.mxu0 %v8893_v46  ;;  %v8903_v7 = vld [vmem:[#allocation90_spill] sm:$0xff]  ;;  %v8905_v46 = vld [vmem:[#allocation91_spill] sm:$0xff] }
  0xfe   :  { %897 = vmatpush.msra.mxu2 %v8894_v17  ;;  %1009 = vmatpush.msrb.mxu3 %v8901_v43  ;;  %v8906_v17 = vld [vmem:[#allocation49_spill] sm:$0xff] }
  0xff   :  { %858 = vmatpush.msra.mxu0 %v8896_v61  ;;  %970 = vmatpush.msrb.mxu1 %v8903_v7  ;;  %v8908_v61 = vld [vmem:[#allocation94_spill] sm:$0xff]  ;;  %v8913_v43 = vld [vmem:[#allocation61_spill] sm:$0xff]  ;;  %v8916_v7 = vld [vmem:[#allocation68_spill] sm:$0xff] }
 0x100   :  { %898 = vmatpush.msra.mxu2 %v8898_v31  ;;  %1010 = vmatpush.msrb.mxu3 %v8905_v46  ;;  %v8910_v31 = vld [vmem:[#allocation56_spill] sm:$0xff] }
 0x101   :  { %859 = vmatpush.msra.mxu0 %v8900_v39  ;;  %971 = vmatpush.msrb.mxu1 %v4951_v50  ;;  %v8912_v39 = vld [vmem:[#allocation60_spill] sm:$0xff]  ;;  %v8915_v50 = vld [vmem:[#allocation65_spill] sm:$0xff] }
 0x102   :  { %899 = vmatpush.msra.mxu2 %v8902_v3  ;;  %1011 = vmatpush.msrb.mxu3 %v8908_v61  ;;  %v8914_v3 = vld [vmem:[#allocation64_spill] sm:$0xff]  ;;  %v8923_v61 = vld [vmem:[#allocation81_spill] sm:$0xff] }
 0x103   :  { %860 = vmatpush.msra.mxu0 %v8904_v5  ;;  %972 = vmatpush.msrb.mxu1 %v4962_v9  ;;  %v8917_v5 = vld [vmem:[#allocation69_spill] sm:$0xff]  ;;  %v8918_v46 = vld [vmem:[#allocation72_spill] sm:$0xff] }
 0x104   :  { %900 = vmatpush.msra.mxu2 %v8906_v17  ;;  %1012 = vmatpush.msrb.mxu3 %v4966_v52  ;;  %v8919_v9 = vld [vmem:[#allocation73_spill] sm:$0xff]  ;;  %v8920_v17 = vld [vmem:[#allocation76_spill] sm:$0xff] }
 0x105   :  { %861 = vmatpush.msra.mxu0 %v8907_v48  ;;  %v8921_v52 = vld [vmem:[#allocation77_spill] sm:$0xff]  ;;  %v8922_v48 = vld [vmem:[#allocation80_spill] sm:$0xff] }
 0x106   :  { %901 = vmatpush.msra.mxu2 %v8909_v0  ;;  %v8924_v0 = vld [vmem:[#allocation84_spill] sm:$0xff] }
 0x107   :  { %862 = vmatpush.msra.mxu0 %v8910_v31  ;;  %v8925_v31 = vld [vmem:[#allocation85_spill] sm:$0xff] }
 0x108   :  { %902 = vmatpush.msra.mxu2 %v8911_v35  ;;  %v8926_v35 = vld [vmem:[#allocation88_spill] sm:$0xff] }
 0x109   :  { %863 = vmatpush.msra.mxu0 %v8912_v39  ;;  %v8927_v39 = vld [vmem:[#allocation89_spill] sm:$0xff] }
 0x10a   :  { %903 = vmatpush.msra.mxu2 %v8913_v43  ;;  %v8928_v43 = vld [vmem:[#allocation92_spill] sm:$0xff] }
 0x10b   :  { %864 = vmatpush.msra.mxu0 %v8914_v3  ;;  %v8929_v3 = vld [vmem:[#allocation93_spill] sm:$0xff] }
 0x10c   :  { %904 = vmatpush.msra.mxu2 %v8915_v50  ;;  %v8930_v50 = vld [vmem:[#allocation95_spill] sm:$0xff] }
 0x10d   :  { %865 = vmatpush.msra.mxu0 %v8916_v7  ;;  %v8931_v7 = vld [vmem:[#allocation96_spill] sm:$0xff] }
 0x10e   :  { %905 = vmatpush.msra.mxu2 %v8917_v5  ;;  %v8932_v5 = vld [vmem:[#allocation97_spill] sm:$0xff] }
 0x10f   :  { %866 = vmatpush.msra.mxu0 %v8918_v46  ;;  %v8933_v46 = vld [vmem:[#allocation98_spill] sm:$0xff] }
 0x110   :  { %906 = vmatpush.msra.mxu2 %v8919_v9  ;;  %v8934_v9 = vld [vmem:[#allocation99_spill] sm:$0xff] }
 0x111   :  { %867 = vmatpush.msra.mxu0 %v8920_v17  ;;  %v8935_v17 = vld [vmem:[#allocation100_spill] sm:$0xff] }
 0x112   :  { %907 = vmatpush.msra.mxu2 %v8921_v52  ;;  %v8936_v52 = vld [vmem:[#allocation101_spill] sm:$0xff] }
 0x113   :  { %868 = vmatpush.msra.mxu0 %v8922_v48  ;;  %v8937_v48 = vld [vmem:[#allocation102_spill] sm:$0xff] }
 0x114   :  { %908 = vmatpush.msra.mxu2 %v8923_v61  ;;  %v8938_v61 = vld [vmem:[#allocation103_spill] sm:$0xff] }
 0x115   :  { %869 = vmatpush.msra.mxu0 %v8924_v0  ;;  %v8939_v0 = vld [vmem:[#allocation106_spill] sm:$0xff] }
 0x116   :  { %909 = vmatpush.msra.mxu2 %v8925_v31  ;;  %v8940_v31 = vld [vmem:[#allocation107_spill] sm:$0xff] }
 0x117   :  { %870 = vmatpush.msra.mxu0 %v8926_v35  ;;  %v8941_v35 = vld [vmem:[#allocation110_spill] sm:$0xff] }
 0x118   :  { %910 = vmatpush.msra.mxu2 %v8927_v39  ;;  %v8942_v39 = vld [vmem:[#allocation111_spill] sm:$0xff] }
 0x119   :  { %871 = vmatpush.msra.mxu0 %v8928_v43 }
 0x11a   :  { %911 = vmatpush.msra.mxu2 %v8929_v3 }
 0x11b   :  { %872 = vmatpush.msra.mxu0 %v8930_v50 }
 0x11c   :  { %912 = vmatpush.msra.mxu2 %v8931_v7 }
 0x11d   :  { %937 = vmatpush.msrb.mxu0 %v8932_v5 }
 0x11e   :  { %977 = vmatpush.msrb.mxu2 %v8933_v46 }
 0x11f   :  { %938 = vmatpush.msrb.mxu0 %v8934_v9 }
 0x120   :  { %978 = vmatpush.msrb.mxu2 %v8935_v17 }
 0x121   :  { %939 = vmatpush.msrb.mxu0 %v8936_v52 }
 0x122   :  { %979 = vmatpush.msrb.mxu2 %v8937_v48 }
 0x123   :  { %940 = vmatpush.msrb.mxu0 %v8938_v61 }
 0x124   :  { %980 = vmatpush.msrb.mxu2 %v4999_v1  ;;  %v279_v1 = vld [vmem:[%s8204_s5] sm:$0xf] }
 0x125   :  { %941 = vmatpush.msrb.mxu0 %v8939_v0  ;;  %v5408_v61 = vperm.slane %v279_v1, 3 }
 0x126   :  { %981 = vmatpush.msrb.mxu2 %v8940_v31 }
 0x127   :  { %942 = vmatpush.msrb.mxu0 %v5026_v56  ;;  %v509_v56 = vpop.f32.mrf.mxu1  ;;  %8948 = vst [vmem:[#allocation28_spill] sm:$0xff] %v5408_v61 }
 0x128   :  { %982 = vmatpush.msrb.mxu2 %v5040_v14  ;;  %v5394_v14 = vperm.slane %v279_v1, 0 }
 0x129   :  { %943 = vmatpush.msrb.mxu0 %v5044_v16 }
 0x12a   :  { %983 = vmatpush.msrb.mxu2 %v8941_v35  ;;  %8943 = vst [vmem:[#allocation25_spill] sm:$0xff] %v5394_v14 }
 0x12b   :  { %944 = vmatpush.msrb.mxu0 %v8942_v39 }
 0x12c   :  { %984 = vmatpush.msrb.mxu2 %v5057_v18 }
 0x12d   :  { %945 = vmatpush.msrb.mxu0 %v5064_v22  ;;  %v5397_v22 = vpop.permute.xlu0 %699 }
 0x12e   :  { %985 = vmatpush.msrb.mxu2 %v5068_v15 }
 0x12f   :  { %946 = vmatpush.msrb.mxu0 %v5072_v12  ;;  %v589_v12 = vpop.f32.mrf.mxu1 }
 0x130   :  { %986 = vmatpush.msrb.mxu2 %v5076_v26  ;;  %v5399_v26 = vperm.slane %v279_v1, 1 }
 0x131   :  { %947 = vmatpush.msrb.mxu0 %v5085_v30  ;;  %v8945_v30 = vld [vmem:[#allocation105_spill] sm:$0xff] }
 0x132   :  { %987 = vmatpush.msrb.mxu2 %v5089_v32  ;;  %8944 = vst [vmem:[#allocation26_spill] sm:$0xff] %v5399_v26  ;;  %v703_v32 = vmul.f32 %v5397_v22, %v8945_v30 }
 0x133   :  { %948 = vmatpush.msrb.mxu0 %v5093_v24 }
 0x134   :  { %988 = vmatpush.msrb.mxu2 %v5097_v34  ;;  %v5403_v34 = vperm.slane %v279_v1, 2 }
 0x135   :  { %949 = vmatpush.msrb.mxu0 %v5104_v38 }
 0x136   :  { %989 = vmatpush.msrb.mxu2 %v5108_v40  ;;  %8946 = vst [vmem:[#allocation27_spill] sm:$0xff] %v5403_v34 }
 0x137   :  { %950 = vmatpush.msrb.mxu0 %v5112_v10 }
 0x138   :  { %990 = vmatpush.msrb.mxu2 %v5119_v28  ;;  %v549_v28 = vpop.f32.mrf.mxu3 }
 0x139   :  { %951 = vmatpush.msrb.mxu0 %v5123_v47  ;;  %v8947_v47 = vld [vmem:[#allocation109_spill] sm:$0xff] }
 0x13a   :  { %991 = vmatpush.msrb.mxu2 %v5129_v60  ;;  %v707_v60 = vadd.f32 %v703_v32, %v8947_v47 }
 0x13b   :  { %952 = vmatpush.msrb.mxu0 %v5135_v36 }
 0x13c   :  { %992 = vmatpush.msrb.mxu2 %v5145_v53 }
 0x159   :  { %v489_v16 = vpop.f32.mrf.mxu0 }
 0x15a   :  { %v490_v18 = vadd.f32 %v489_v16, %v5394_v14  ;;  %v747_v40 = vpop.f32.mrf.mxu1 }
 0x15b   :  { %v791_v3 = vadd.f32 %v747_v40, %v707_v60 }
 0x15c   :  { %v510_v15 = vadd.f32 %v509_v56, %v490_v18 }
 0x15d   :  { %v3464_v17 = vmul.f32 -1.442695, %v791_v3  ;;  %v8950_v3 = vld [vmem:[#allocation108_spill] sm:$0xff] }
 0x15e   :  { %v3459_v24 = vmul.f32 -1.442695, %v510_v15  ;;  %v629_v15 = vpop.f32.mrf.mxu3 }
 0x15f   :  { %v529_v38 = vpop.f32.mrf.mxu2 }
 0x160   :  { %3541 = vpow2.f32 %v3459_v24  ;;  %v530_v10 = vadd.f32 %v529_v38, %v5399_v26  ;;  %v8949_v38 = vld [vmem:[#allocation104_spill] sm:$0xff] }
 0x161   :  { %v569_v36 = vpop.f32.mrf.mxu0  ;;  %v702_v1 = vmul.f32 %v5397_v22, %v8949_v38 }
 0x162   :  { %v550_v53 = vadd.f32 %v549_v28, %v530_v10  ;;  %v570_v43 = vadd.f32 %v569_v36, %v5403_v34 }
 0x164   :  { %v3460_v50 = vmul.f32 -1.442695, %v550_v53  ;;  %v590_v7 = vadd.f32 %v589_v12, %v570_v43 }
 0x166   :  { %v3542_v5 = vpop.eup %3541  ;;  %3543 = vpow2.f32 %v3460_v50  ;;  %v3461_v46 = vmul.f32 -1.442695, %v590_v7  ;;  %v706_v50 = vadd.f32 %v702_v1, %v8950_v3 }
 0x167   :  { %v641_v9 = vadd.f32 1.0, %v3542_v5 }
 0x168   :  { %v609_v0 = vpop.f32.mrf.mxu2 }
 0x169   :  { %3545 = vrcp.f32 %v641_v9  ;;  %v610_v12 = vadd.f32 %v609_v0, %v5408_v61  ;;  %v653_v36 = vand.u32 2147483647, %v641_v9  ;;  %v655_v53 = vand.u32 2147483648, %v641_v9 }
 0x16a   :  { %3547 = vpow2.f32 %v3461_v46  ;;  %vm649_vm13 = vweird.f32 %v641_v9 }
 0x16b   :  { %3549 = vpow2.f32 %v3464_v17  ;;  %v630_v10 = vadd.f32 %v629_v15, %v610_v12  ;;  %vm654_vm0 = vcmp.eq.f32.partialorder %v653_v36, 8.507059e+37  ;;  %v704_v12 = vmul.f32 %v5397_v22, %v5060_v20 }
 0x16c   :  { %v3544_v52 = vpop.eup %3543 }
 0x16d   :  { %v642_v48 = vadd.f32 1.0, %v3544_v52  ;;  %v708_v36 = vadd.f32 %v704_v12, %v5081_v4 }
 0x16f   :  { %v3546_v31 = vpop.eup %3545  ;;  %3551 = vrcp.f32 %v642_v48  ;;  %v670_v5 = vand.u32 2147483648, %v642_v48  ;;  %v668_v17 = vand.u32 2147483647, %v642_v48  ;;  %vm664_vm1 = vweird.f32 %v642_v48 }
 0x170   :  { %v3548_v35 = vpop.eup %3547  ;;  %v645_v39 = vmul.f32 %v3546_v31, %v641_v9  ;;  %vm650_vm12 = vweird.f32 %v3546_v31  ;;  %v656_v9 = vor.u32 1.1754944e-38, %v655_v53 }
 0x171   :  { %v3550_v56 = vpop.eup %3549  ;;  %v5410_v16 = vadd.f32 1.0, %v3548_v35  ;;  %vm5420_vm14 = vmor %vm649_vm13, %vm650_vm12  ;;  %v671_v1 = vor.u32 1.1754944e-38, %v670_v5  ;;  %vm669_vm3 = vcmp.eq.f32.partialorder %v668_v17, 8.507059e+37 }
 0x172   :  { %v646_v18 = vsub.f32 1.0, %v645_v39  ;;  %v5414_v32 = vadd.f32 1.0, %v3550_v56 }
 0x173   :  { %3553 = vrcp.f32 %v5410_v16  ;;  %v685_v17 = vand.u32 2147483648, %v5410_v16  ;;  %vm679_vm5 = vweird.f32 %v5410_v16 }
 0x174   :  { %v647_v24 = vmul.f32 %v3546_v31, %v646_v18  ;;  %3555 = vrcp.f32 %v5414_v32  ;;  %vm826_vm9 = vweird.f32 %v5414_v32 }
 0x175   :  { %v3552_v40 = vpop.eup %3551  ;;  %3557 = vtanh.f32 %v630_v10 }
 0x176   :  { %v660_v28 = vmul.f32 %v3552_v40, %v642_v48  ;;  %v648_v60 = vadd.f32 %v3546_v31, %v647_v24  ;;  %vm665_vm15 = vweird.f32 %v3552_v40 }
 0x177   :  { %vm666_vm2 = vmor %vm664_vm1, %vm665_vm15 }
 0x178   :  { %v661_v43 = vsub.f32 1.0, %v660_v28  ;;  %v652_v39 = vsel %vm5420_vm14, %v3546_v31, %v648_v60 }
 0x179   :  { %v3554_v7 = vpop.eup %3553  ;;  %v727_v52 = vpop.f32.mrf.mxu0  ;;  %v657_v28 = vsel %vm654_vm0, %v656_v9, %v652_v39  ;;  %v683_v9 = vand.u32 2147483647, %v5410_v16 }
 0x17a   :  { %v662_v0 = vmul.f32 %v3552_v40, %v661_v43  ;;  %v675_v35 = vmul.f32 %v3554_v7, %v5410_v16  ;;  %v790_v56 = vadd.f32 %v727_v52, %v706_v50  ;;  %v5430_v10 = vpop.eup %3555  ;;  %vm680_vm4 = vweird.f32 %v3554_v7 }
 0x17b   :  { %v3558_v31 = vpop.eup %3557  ;;  %v822_v5 = vmul.f32 %v5430_v10, %v5414_v32  ;;  %vm681_vm6 = vmor %vm679_vm5, %vm680_vm4  ;;  %vm684_vm7 = vcmp.eq.f32.partialorder %v683_v9, 8.507059e+37  ;;  %vm827_vm8 = vweird.f32 %v5430_v10 }
 0x17c   :  { %v676_v18 = vsub.f32 1.0, %v675_v35  ;;  %v663_v15 = vadd.f32 %v3552_v40, %v662_v0  ;;  %v3463_v24 = vmul.f32 -1.442695, %v790_v56  ;;  %v691_v46 = vmul.f32 %v3558_v31, %v657_v28  ;;  %vm5471_vm10 = vmor %vm826_vm9, %vm827_vm8 }
 0x17d   :  { %v823_v12 = vsub.f32 1.0, %v822_v5  ;;  %v832_v5 = vand.u32 2147483648, %v5414_v32 }
 0x17e   :  { %v667_v43 = vsel %vm666_vm2, %v3552_v40, %v663_v15  ;;  %3559 = vpow2.f32 %v3463_v24  ;;  %v677_v53 = vmul.f32 %v3554_v7, %v676_v18  ;;  %v705_v18 = vmul.f32 %v5397_v22, %v5115_v42 }
 0x17f   :  { %v672_v60 = vsel %vm669_vm3, %v671_v1, %v667_v43  ;;  %v686_v24 = vor.u32 1.1754944e-38, %v685_v17  ;;  %v824_v28 = vmul.f32 %v5430_v10, %v823_v12  ;;  %v787_v43 = vpop.f32.mrf.mxu3  ;;  %v5466_v17 = vld [vmem:[#allocation6 + $0x1d8] sm:$0xff] }
 0x180   :  { %v690_v50 = vmul.f32 0.0, %v672_v60  ;;  %v767_v48 = vpop.f32.mrf.mxu2  ;;  %v678_v39 = vadd.f32 %v3554_v7, %v677_v53 }
 0x181   :  { %v792_v52 = vadd.f32 %v767_v48, %v708_v36  ;;  %v709_v36 = vadd.f32 %v705_v18, %v5141_v58  ;;  %v825_v22 = vadd.f32 %v5430_v10, %v824_v28  ;;  %v5454_v48 = vld [vmem:[#allocation6 + $0x1e8] sm:$0xff]  ;;  %v833_v28 = vor.u32 1.1754944e-38, %v832_v5 }
 0x182   :  { %v5435_v0 = vadd.f32 %v691_v46, %v690_v50  ;;  %v682_v15 = vsel %vm681_vm6, %v3554_v7, %v678_v39  ;;  %v5495_v5 = vld [vmem:[#allocation6 + $0x168] sm:$0xff] }
 0x183   :  { %v3465_v35 = vmul.f32 -1.442695, %v792_v52  ;;  %v687_v31 = vsel %vm684_vm7, %v686_v24, %v682_v15  ;;  %v793_v46 = vadd.f32 %v787_v43, %v709_v36  ;;  %v5457_v52 = vld [vmem:[#allocation6 + $0x1f8] sm:$0xff]  ;;  %v5480_v24 = vld [vmem:[#allocation6 + $0x1a8] sm:$0xff] }
 0x184   :  { %v3560_v40 = vpop.eup %3559  ;;  %3561 = vtanh.f32 %v5435_v0 }
 0x185   :  { %v5439_v56 = vadd.f32 1.0, %v3560_v40  ;;  %3563 = vpow2.f32 %v3465_v35  ;;  %v830_v35 = vand.u32 2147483647, %v5414_v32  ;;  %v5463_v40 = vld [vmem:[#allocation6 + $0x1c8] sm:$0xff]  ;;  %v829_v32 = vsel %vm5471_vm10, %v5430_v10, %v825_v22  ;;  %v5490_v10 = vld [vmem:[#allocation6 + $0x198] sm:$0xff] }
 0x187   :  { %3565 = vrcp.f32 %v5439_v56  ;;  %v817_v12 = vand.u32 2147483648, %v5439_v56  ;;  %v815_v15 = vand.u32 2147483647, %v5439_v56  ;;  %vm831_vm12 = vcmp.eq.f32.partialorder %v830_v35, 8.507059e+37  ;;  %v3469_v35 = vld [vmem:[%s8199_s0 + $0x10] sm:$0xff] }
 0x188   :  { %vm811_vm13 = vweird.f32 %v5439_v56  ;;  %v834_v36 = vsel %vm831_vm12, %v833_v28, %v829_v32  ;;  %1084 = vperm.xlu1 %3522, %v3469_v35   ;;  %v5505_v32 = vld [vmem:[#allocation6 + $0x148] sm:$0xff] }
 0x189   :  { %vm816_vm15 = vcmp.eq.f32.partialorder %v815_v15, 8.507059e+37 }
 0x18a   :  { %v3562_v1 = vpop.eup %3561 }
 0x18b   :  { %v3564_v60 = vpop.eup %3563  ;;  %v694_v53 = vmul.f32 %v3562_v1, %v687_v31  ;;  %v5483_v1 = vld [vmem:[#allocation6 + $0x1b8] sm:$0xff] }
 0x18c   :  { %v5448_v16 = vadd.f32 1.0, %v3564_v60  ;;  %v5487_v60 = vld [vmem:[#allocation6 + $0x188] sm:$0xff] }
 0x18d   :  { %v3566_v50 = vpop.eup %3565  ;;  %893 = vmatmul.f32.vlgmr.msra.gmra.mxu1 %v694_v53  ;;  %933 = vmatmul.f32.vlgmr.msra.gmra.mxu3 %v694_v53 }
 0x18e   :  { %v807_v7 = vmul.f32 %v3566_v50, %v5439_v56  ;;  %3567 = vrcp.f32 %v5448_v16  ;;  %1115 = vmatpush.msra.mxu1 %v5454_v48  ;;  %1155 = vmatpush.msra.mxu3 %v5457_v52  ;;  %vm812_vm11 = vweird.f32 %v3566_v50  ;;  %v5498_v56 = vld [vmem:[#allocation6 + $0x178] sm:$0xff]  ;;  %vm841_vm1 = vweird.f32 %v5448_v16 }
 0x18f   :  { %3569 = vtanh.f32 %v793_v46  ;;  %vm813_vm14 = vmor %vm811_vm13, %vm812_vm11  ;;  %v818_v46 = vor.u32 1.1754944e-38, %v817_v12  ;;  %v845_v35 = vand.u32 2147483647, %v5448_v16 }
 0x190   :  { %v808_v39 = vsub.f32 1.0, %v807_v7  ;;  %1116 = vmatpush.msra.mxu1 %v5463_v40  ;;  %1156 = vmatpush.msra.mxu3 %v5466_v17 }
 0x191   :  { %vm846_vm3 = vcmp.eq.f32.partialorder %v845_v35, 8.507059e+37  ;;  %v5559_v35 = vld [vmem:[#allocation6 + $0x68] sm:$0xff] }
 0x192   :  { %v809_v18 = vmul.f32 %v3566_v50, %v808_v39  ;;  %1117 = vmatpush.msra.mxu1 %v5480_v24  ;;  %1157 = vmatpush.msra.mxu3 %v5483_v1 }
 0x194   :  { %v3568_v43 = vpop.eup %3567  ;;  %v810_v31 = vadd.f32 %v3566_v50, %v809_v18  ;;  %1118 = vmatpush.msra.mxu1 %v5487_v60  ;;  %1158 = vmatpush.msra.mxu3 %v5490_v10  ;;  %v5508_v18 = vld [vmem:[#allocation6 + $0x158] sm:$0xff] }
 0x195   :  { %v837_v22 = vmul.f32 %v3568_v43, %v5448_v16  ;;  %973 = vmatmul.f32.vlgmr.msrb.gmra.mxu1 %v694_v53  ;;  %1013 = vmatmul.f32.vlgmr.msrb.gmra.mxu3 %v694_v53  ;;  %v3570_v39 = vpop.eup %3569  ;;  %v852_v53 = vmul.f32 %v834_v36, %v5185_v59  ;;  %vm842_vm0 = vweird.f32 %v3568_v43  ;;  %v847_v36 = vand.u32 2147483648, %v5448_v16 }
 0x196   :  { %v814_v7 = vsel %vm813_vm14, %v3566_v50, %v810_v31  ;;  %1119 = vmatpush.msra.mxu1 %v5495_v5  ;;  %1159 = vmatpush.msra.mxu3 %v5498_v56  ;;  %v5513_v31 = vld [vmem:[#allocation6 + $0x128] sm:$0xff]  ;;  %vm843_vm2 = vmor %vm841_vm1, %vm842_vm0 }
 0x197   :  { %v819_v9 = vsel %vm816_vm15, %v818_v46, %v814_v7  ;;  %v838_v12 = vsub.f32 1.0, %v837_v22  ;;  %v5516_v46 = vld [vmem:[#allocation6 + $0x138] sm:$0xff]  ;;  %v5521_v22 = vld [vmem:[#allocation6 + $0x108] sm:$0xff] }
 0x198   :  { %v853_v50 = vmul.f32 %v3570_v39, %v819_v9  ;;  %1120 = vmatpush.msra.mxu1 %v5505_v32  ;;  %1160 = vmatpush.msra.mxu3 %v5508_v18  ;;  %8955 = vst [vmem:[#allocation29_spill] sm:$0xff] %v5521_v22  ;;  %v5524_v7 = vld [vmem:[#allocation6 + $0x118] sm:$0xff]  ;;  %v5529_v39 = vld [vmem:[#allocation6 + $0xe8] sm:$0xff] }
 0x199   :  { %v839_v15 = vmul.f32 %v3568_v43, %v838_v12  ;;  %8956 = vst [vmem:[#allocation30_spill] sm:$0xff] %v5524_v7  ;;  %v5532_v9 = vld [vmem:[#allocation6 + $0xf8] sm:$0xff] }
 0x19a   :  { %v5511_v28 = vadd.f32 %v853_v50, %v852_v53  ;;  %1121 = vmatpush.msra.mxu1 %v5513_v31  ;;  %1161 = vmatpush.msra.mxu3 %v5516_v46  ;;  %8957 = vst [vmem:[#allocation31_spill] sm:$0xff] %v5529_v39  ;;  %v848_v53 = vor.u32 1.1754944e-38, %v847_v36  ;;  %v5535_v50 = vld [vmem:[#allocation6 + $0xc8] sm:$0xff]  ;;  %v5552_v36 = vld [vmem:[#allocation6 + $0x98] sm:$0xff] }
 0x19b   :  { %v840_v59 = vadd.f32 %v3568_v43, %v839_v15  ;;  %v5538_v15 = vld [vmem:[#allocation6 + $0xd8] sm:$0xff] }
 0x19c   :  { %3571 = vtanh.f32 %v5511_v28  ;;  %1122 = vmatpush.msra.mxu1 %v5521_v22  ;;  %1162 = vmatpush.msra.mxu3 %v5524_v7  ;;  %v5541_v22 = vld [vmem:[#allocation6 + $0xa8] sm:$0xff] }
 0x19d   :  { %v844_v12 = vsel %vm843_vm2, %v3568_v43, %v840_v59  ;;  %v5549_v59 = vld [vmem:[#allocation6 + $0x88] sm:$0xff] }
 0x19e   :  { %1123 = vmatpush.msra.mxu1 %v5529_v39  ;;  %1163 = vmatpush.msra.mxu3 %v5532_v9  ;;  %v849_v7 = vsel %vm846_vm3, %v848_v53, %v844_v12  ;;  %v5544_v39 = vld [vmem:[#allocation6 + $0xb8] sm:$0xff]  ;;  %v5567_v12 = vld [vmem:[#allocation6 + $0x48] sm:$0xff] }
 0x19f   :  { %v5570_v53 = vld [vmem:[#allocation6 + $0x58] sm:$0xff] }
 0x1a0   :  { %1124 = vmatpush.msra.mxu1 %v5535_v50  ;;  %1164 = vmatpush.msra.mxu3 %v5538_v15 }
 0x1a2   :  { %v3572_v16 = vpop.eup %3571  ;;  %1125 = vmatpush.msra.mxu1 %v5541_v22  ;;  %1165 = vmatpush.msra.mxu3 %v5544_v39 }
 0x1a3   :  { %v5547_v43 = vmul.f32 %v3572_v16, %v849_v7  ;;  %v5562_v7 = vld [vmem:[#allocation6 + $0x78] sm:$0xff]  ;;  %v5665_v16 = vld [vmem:[#allocation6 + $0x40] sm:$0xff] }
 0x1a4   :  { %1126 = vmatpush.msra.mxu1 %v5549_v59  ;;  %1166 = vmatpush.msra.mxu3 %v5552_v36  ;;  %8975 = vst [vmem:[#allocation63_spill] sm:$0xff] %v5665_v16 }
 0x1a5   :  { %873 = vmatmul.f32.vlgmr.msra.gmra.mxu0 %v5547_v43  ;;  %913 = vmatmul.f32.vlgmr.msra.gmra.mxu2 %v5547_v43 }
 0x1a6   :  { %1095 = vmatpush.msra.mxu0 %v5206_v62  ;;  %1135 = vmatpush.msra.mxu2 %v5210_v11  ;;  %v5575_v62 = vld [vmem:[#allocation6 + $0x28] sm:$0xff]  ;;  %v5578_v11 = vld [vmem:[#allocation6 + $0x38] sm:$0xff] }
 0x1a7   :  { %1127 = vmatpush.msra.mxu1 %v5559_v35  ;;  %1167 = vmatpush.msra.mxu3 %v5562_v7 }
 0x1a8   :  { %1096 = vmatpush.msra.mxu0 %v5214_v54  ;;  %1136 = vmatpush.msra.mxu2 %v5218_v13  ;;  %v5583_v54 = vld [vmem:[#allocation6 + $0x8] sm:$0xff]  ;;  %v5586_v13 = vld [vmem:[#allocation6 + $0x18] sm:$0xff] }
 0x1a9   :  { %1128 = vmatpush.msra.mxu1 %v5567_v12  ;;  %1168 = vmatpush.msra.mxu3 %v5570_v53 }
 0x1aa   :  { %1097 = vmatpush.msra.mxu0 %v5222_v19  ;;  %1137 = vmatpush.msra.mxu2 %v5226_v21  ;;  %v3476_v19 = vld [vmem:[%s8199_s0 + $0x18] sm:$0xff]  ;;  %v5600_v21 = vld [vmem:[#allocation9 + $0x3e0] sm:$0xff] }
 0x1ab   :  { %1129 = vmatpush.msra.mxu1 %v5575_v62  ;;  %1169 = vmatpush.msra.mxu3 %v5578_v11  ;;  %8958 = vst [vmem:[#allocation32_spill] sm:$0xff] %v5600_v21 }
 0x1ac   :  { %1098 = vmatpush.msra.mxu0 %v5230_v55  ;;  %1138 = vmatpush.msra.mxu2 %v5234_v57  ;;  %v5604_v55 = vld [vmem:[#allocation9 + $0x3e8] sm:$0xff]  ;;  %v5608_v57 = vld [vmem:[#allocation9 + $0x3c0] sm:$0xff] }
 0x1ad   :  { %1130 = vmatpush.msra.mxu1 %v5583_v54  ;;  %1170 = vmatpush.msra.mxu3 %v5586_v13  ;;  %8959 = vst [vmem:[#allocation33_spill] sm:$0xff] %v5604_v55 }
 0x1ae   :  { %953 = vmatmul.f32.vlgmr.msrb.gmra.mxu0 %v5547_v43  ;;  %993 = vmatmul.f32.vlgmr.msrb.gmra.mxu2 %v5547_v43  ;;  %8960 = vst [vmem:[#allocation34_spill] sm:$0xff] %v5608_v57 }
 0x1af   :  { %1099 = vmatpush.msra.mxu0 %v5239_v25  ;;  %1131 = vmatmul.f32.vlgmr.msra.gmra.mxu1 %v5547_v43  ;;  %v5612_v25 = vld [vmem:[#allocation9 + $0x3c8] sm:$0xff] }
 0x1b0   :  { %1139 = vmatpush.msra.mxu2 %v5242_v8  ;;  %1171 = vmatmul.f32.vlgmr.msra.gmra.mxu3 %v5547_v43  ;;  %8961 = vst [vmem:[#allocation35_spill] sm:$0xff] %v5612_v25  ;;  %v3504_v8 = vld [vmem:[%s8199_s0 + $0x38] sm:$0xff] }
 0x1b1   :  { %1100 = vmatpush.msra.mxu0 %v5246_v27  ;;  %1469 = vperm.xlu1 %3522, %v3476_v19   ;;  %v5619_v27 = vld [vmem:[#allocation9 + $0x3a0] sm:$0xff] }
 0x1b2   :  { %1140 = vmatpush.msra.mxu2 %v5250_v44  ;;  %1262 = vmatpush.msrb.mxu1 %v5600_v21  ;;  %8962 = vst [vmem:[#allocation38_spill] sm:$0xff] %v5619_v27  ;;  %v5623_v44 = vld [vmem:[#allocation9 + $0x3a8] sm:$0xff]  ;;  %v5668_v19 = vld [vmem:[#allocation9 + $0x300] sm:$0xff] }
 0x1b3   :  { %1101 = vmatpush.msra.mxu0 %v5254_v29  ;;  %1302 = vmatpush.msrb.mxu3 %v5604_v55  ;;  %8963 = vst [vmem:[#allocation39_spill] sm:$0xff] %v5623_v44  ;;  %v5627_v29 = vld [vmem:[#allocation9 + $0x380] sm:$0xff] }
 0x1b4   :  { %1141 = vmatpush.msra.mxu2 %v5258_v33  ;;  %1263 = vmatpush.msrb.mxu1 %v5608_v57  ;;  %8964 = vst [vmem:[#allocation42_spill] sm:$0xff] %v5627_v29  ;;  %v5632_v33 = vld [vmem:[#allocation9 + $0x388] sm:$0xff] }
 0x1b5   :  { %1102 = vmatpush.msra.mxu0 %v5262_v37  ;;  %1303 = vmatpush.msrb.mxu3 %v5612_v25  ;;  %8965 = vst [vmem:[#allocation43_spill] sm:$0xff] %v5632_v33  ;;  %v5636_v37 = vld [vmem:[#allocation9 + $0x360] sm:$0xff] }
 0x1b6   :  { %1142 = vmatpush.msra.mxu2 %v5266_v41  ;;  %1264 = vmatpush.msrb.mxu1 %v5619_v27  ;;  %8966 = vst [vmem:[#allocation46_spill] sm:$0xff] %v5636_v37  ;;  %v5640_v41 = vld [vmem:[#allocation9 + $0x368] sm:$0xff] }
 0x1b7   :  { %1103 = vmatpush.msra.mxu0 %v5270_v2  ;;  %1304 = vmatpush.msrb.mxu3 %v5623_v44  ;;  %8967 = vst [vmem:[#allocation47_spill] sm:$0xff] %v5640_v41  ;;  %v5644_v2 = vld [vmem:[#allocation9 + $0x340] sm:$0xff] }
 0x1b8   :  { %1143 = vmatpush.msra.mxu2 %v5274_v45  ;;  %1265 = vmatpush.msrb.mxu1 %v5627_v29  ;;  %8968 = vst [vmem:[#allocation50_spill] sm:$0xff] %v5644_v2  ;;  %v5647_v45 = vld [vmem:[#allocation6 + $0x90] sm:$0xff] }
 0x1b9   :  { %1104 = vmatpush.msra.mxu0 %v5278_v6  ;;  %3009 = vperm.xlu1 %3522, %v3504_v8   ;;  %8969 = vst [vmem:[#allocation51_spill] sm:$0xff] %v5647_v45  ;;  %v5650_v6 = vld [vmem:[#allocation9 + $0x348] sm:$0xff]  ;;  %v5671_v8 = vld [vmem:[#allocation6 + $0x50] sm:$0xff] }
 0x1ba   :  { %1144 = vmatpush.msra.mxu2 %v5282_v49  ;;  %1305 = vmatpush.msrb.mxu3 %v5632_v33  ;;  %8970 = vst [vmem:[#allocation54_spill] sm:$0xff] %v5650_v6  ;;  %v5653_v49 = vld [vmem:[#allocation6 + $0x60] sm:$0xff] }
 0x1bb   :  { %1105 = vmatpush.msra.mxu0 %v5286_v51  ;;  %1266 = vmatpush.msrb.mxu1 %v5636_v37  ;;  %8971 = vst [vmem:[#allocation55_spill] sm:$0xff] %v5653_v49  ;;  %v5656_v51 = vld [vmem:[#allocation9 + $0x320] sm:$0xff] }
 0x1bc   :  { %1145 = vmatpush.msra.mxu2 %v5290_v23  ;;  %1306 = vmatpush.msrb.mxu3 %v5640_v41  ;;  %8972 = vst [vmem:[#allocation58_spill] sm:$0xff] %v5656_v51  ;;  %v5659_v23 = vld [vmem:[#allocation6 + $0x70] sm:$0xff] }
 0x1bd   :  { %1106 = vmatpush.msra.mxu0 %v5294_v63  ;;  %1267 = vmatpush.msrb.mxu1 %v5644_v2  ;;  %8973 = vst [vmem:[#allocation59_spill] sm:$0xff] %v5659_v23  ;;  %v5662_v63 = vld [vmem:[#allocation9 + $0x328] sm:$0xff] }
 0x1be   :  { %1146 = vmatpush.msra.mxu2 %v5647_v45  ;;  %1307 = vmatpush.msrb.mxu3 %v5650_v6  ;;  %8974 = vst [vmem:[#allocation62_spill] sm:$0xff] %v5662_v63 }
 0x1bf   :  { %1107 = vmatpush.msra.mxu0 %v5653_v49  ;;  %1268 = vmatpush.msrb.mxu1 %v5656_v51  ;;  %8976 = vst [vmem:[#allocation16_spill] sm:$0xff] %v5668_v19  ;;  %v5674_v49 = vld [vmem:[#allocation9 + $0x308] sm:$0xff] }
 0x1c0   :  { %1147 = vmatpush.msra.mxu2 %v5659_v23  ;;  %1308 = vmatpush.msrb.mxu3 %v5662_v63  ;;  %8977 = vst [vmem:[#allocation66_spill] sm:$0xff] %v5671_v8  ;;  %v5677_v23 = vld [vmem:[#allocation6 + $0x20] sm:$0xff] }
 0x1c1   :  { %1108 = vmatpush.msra.mxu0 %v5665_v16  ;;  %1269 = vmatpush.msrb.mxu1 %v5668_v19  ;;  %8978 = vst [vmem:[#allocation17_spill] sm:$0xff] %v5674_v49  ;;  %v5680_v63 = vld [vmem:[#allocation9 + $0x2e0] sm:$0xff]  ;;  %v5683_v16 = vld [vmem:[#allocation6 + $0x30] sm:$0xff]  ;;  %v5686_v19 = vld [vmem:[#allocation9 + $0x2e8] sm:$0xff] }
 0x1c2   :  { %1148 = vmatpush.msra.mxu2 %v5671_v8  ;;  %1309 = vmatpush.msrb.mxu3 %v5674_v49  ;;  %8979 = vst [vmem:[#allocation67_spill] sm:$0xff] %v5677_v23  ;;  %v5689_v8 = vld [vmem:[#allocation6] sm:$0xff] }
 0x1c3   :  { %1109 = vmatpush.msra.mxu0 %v5677_v23  ;;  %8980 = vst [vmem:[#allocation18_spill] sm:$0xff] %v5680_v63  ;;  %1270 = vmatpush.msrb.mxu1 %v5680_v63  ;;  %v5692_v49 = vld [vmem:[#allocation9 + $0x2c0] sm:$0xff]  ;;  %v5695_v23 = vld [vmem:[#allocation6 + $0x10] sm:$0xff] }
 0x1c4   :  { %8981 = vst [vmem:[#allocation70_spill] sm:$0xff] %v5683_v16  ;;  %1149 = vmatpush.msra.mxu2 %v5683_v16  ;;  %1310 = vmatpush.msrb.mxu3 %v5686_v19  ;;  %v5700_v16 = vld [vmem:[#allocation9 + $0x2c8] sm:$0xff] }
 0x1c5   :  { %8982 = vst [vmem:[#allocation19_spill] sm:$0xff] %v5686_v19  ;;  %1110 = vmatpush.msra.mxu0 %v5689_v8  ;;  %1271 = vmatpush.msrb.mxu1 %v5692_v49  ;;  %v5703_v19 = vld [vmem:[#allocation9 + $0x2a0] sm:$0xff] }
 0x1c6   :  { %8983 = vst [vmem:[#allocation71_spill] sm:$0xff] %v5689_v8  ;;  %1150 = vmatpush.msra.mxu2 %v5695_v23  ;;  %1111 = vmatmul.f32.vlgmr.msra.gmra.mxu0 %v5547_v43  ;;  %v5706_v8 = vld [vmem:[#allocation9 + $0x1e0] sm:$0xff] }
 0x1c7   :  { %8984 = vst [vmem:[#allocation20_spill] sm:$0xff] %v5692_v49  ;;  %1151 = vmatmul.f32.vlgmr.msra.gmra.mxu2 %v5547_v43  ;;  %1311 = vmatpush.msrb.mxu3 %v5700_v16  ;;  %v5709_v49 = vld [vmem:[#allocation9 + $0x2a8] sm:$0xff]  ;;  %v5715_v43 = vld [vmem:[#allocation9 + $0x280] sm:$0xff] }
 0x1c8   :  { %8985 = vst [vmem:[#allocation74_spill] sm:$0xff] %v5695_v23  ;;  %1272 = vmatpush.msrb.mxu1 %v5703_v19  ;;  %1242 = vmatpush.msrb.mxu0 %v5706_v8  ;;  %v5712_v23 = vld [vmem:[#allocation9 + $0x1e8] sm:$0xff] }
 0x1c9   :  { %8986 = vst [vmem:[#allocation21_spill] sm:$0xff] %v5700_v16  ;;  %1312 = vmatpush.msrb.mxu3 %v5709_v49  ;;  %1282 = vmatpush.msrb.mxu2 %v5712_v23  ;;  %v5718_v16 = vld [vmem:[#allocation9 + $0x1c0] sm:$0xff] }
 0x1ca   :  { %8987 = vst [vmem:[#allocation75_spill] sm:$0xff] %v5703_v19  ;;  %1273 = vmatpush.msrb.mxu1 %v5715_v43  ;;  %1243 = vmatpush.msrb.mxu0 %v5718_v16  ;;  %v5721_v19 = vld [vmem:[#allocation9 + $0x288] sm:$0xff] }
 0x1cb   :  { %8988 = vst [vmem:[#allocation22_spill] sm:$0xff] %v5706_v8  ;;  %1313 = vmatpush.msrb.mxu3 %v5721_v19  ;;  %v5724_v8 = vld [vmem:[#allocation9 + $0x1c8] sm:$0xff] }
 0x1cc   :  { %8989 = vst [vmem:[#allocation78_spill] sm:$0xff] %v5709_v49  ;;  %1283 = vmatpush.msrb.mxu2 %v5724_v8  ;;  %v5727_v49 = vld [vmem:[#allocation9 + $0x260] sm:$0xff] }
 0x1cd   :  { %8990 = vst [vmem:[#allocation23_spill] sm:$0xff] %v5712_v23  ;;  %1274 = vmatpush.msrb.mxu1 %v5727_v49  ;;  %v5730_v23 = vld [vmem:[#allocation9 + $0x1a0] sm:$0xff] }
 0x1ce   :  { %8991 = vst [vmem:[#allocation79_spill] sm:$0xff] %v5715_v43  ;;  %1244 = vmatpush.msrb.mxu0 %v5730_v23  ;;  %v5733_v43 = vld [vmem:[#allocation9 + $0x268] sm:$0xff] }
 0x1cf   :  { %8992 = vst [vmem:[#allocation24_spill] sm:$0xff] %v5718_v16  ;;  %1314 = vmatpush.msrb.mxu3 %v5733_v43  ;;  %v5736_v16 = vld [vmem:[#allocation9 + $0x1a8] sm:$0xff] }
 0x1d0   :  { %8993 = vst [vmem:[#allocation36_spill] sm:$0xff] %v5721_v19  ;;  %1284 = vmatpush.msrb.mxu2 %v5736_v16  ;;  %v5739_v19 = vld [vmem:[#allocation9 + $0x240] sm:$0xff] }
 0x1d1   :  { %8994 = vst [vmem:[#allocation37_spill] sm:$0xff] %v5724_v8  ;;  %1275 = vmatpush.msrb.mxu1 %v5739_v19  ;;  %v5742_v8 = vld [vmem:[#allocation9 + $0x180] sm:$0xff] }
 0x1d2   :  { %8995 = vst [vmem:[#allocation82_spill] sm:$0xff] %v5727_v49  ;;  %1245 = vmatpush.msrb.mxu0 %v5742_v8  ;;  %v5745_v49 = vld [vmem:[#allocation9 + $0x248] sm:$0xff] }
 0x1d3   :  { %8996 = vst [vmem:[#allocation40_spill] sm:$0xff] %v5730_v23  ;;  %1315 = vmatpush.msrb.mxu3 %v5745_v49  ;;  %v5748_v23 = vld [vmem:[#allocation9 + $0x188] sm:$0xff] }
 0x1d4   :  { %8997 = vst [vmem:[#allocation83_spill] sm:$0xff] %v5733_v43  ;;  %1285 = vmatpush.msrb.mxu2 %v5748_v23  ;;  %v5751_v43 = vld [vmem:[#allocation9 + $0x220] sm:$0xff] }
 0x1d5   :  { %8998 = vst [vmem:[#allocation41_spill] sm:$0xff] %v5736_v16  ;;  %1276 = vmatpush.msrb.mxu1 %v5751_v43  ;;  %v5754_v16 = vld [vmem:[#allocation9 + $0x160] sm:$0xff] }
 0x1d6   :  { %8999 = vst [vmem:[#allocation86_spill] sm:$0xff] %v5739_v19  ;;  %1246 = vmatpush.msrb.mxu0 %v5754_v16  ;;  %v5757_v19 = vld [vmem:[#allocation9 + $0x228] sm:$0xff] }
 0x1d7   :  { %9000 = vst [vmem:[#allocation44_spill] sm:$0xff] %v5742_v8  ;;  %1316 = vmatpush.msrb.mxu3 %v5757_v19  ;;  %v5760_v8 = vld [vmem:[#allocation9 + $0x168] sm:$0xff] }
 0x1d8   :  { %9001 = vst [vmem:[#allocation87_spill] sm:$0xff] %v5745_v49  ;;  %1286 = vmatpush.msrb.mxu2 %v5760_v8  ;;  %v5763_v49 = vld [vmem:[#allocation9 + $0x200] sm:$0xff] }
 0x1d9   :  { %9002 = vst [vmem:[#allocation45_spill] sm:$0xff] %v5748_v23  ;;  %1277 = vmatpush.msrb.mxu1 %v5763_v49  ;;  %v5766_v23 = vld [vmem:[#allocation9 + $0x140] sm:$0xff] }
 0x1da   :  { %9003 = vst [vmem:[#allocation90_spill] sm:$0xff] %v5751_v43  ;;  %1247 = vmatpush.msrb.mxu0 %v5766_v23  ;;  %v5769_v43 = vld [vmem:[#allocation9 + $0x208] sm:$0xff] }
 0x1db   :  { %9004 = vst [vmem:[#allocation48_spill] sm:$0xff] %v5754_v16  ;;  %1317 = vmatpush.msrb.mxu3 %v5769_v43  ;;  %v5772_v16 = vld [vmem:[#allocation9 + $0x3f0] sm:$0xff] }
 0x1dc   :  { %9005 = vst [vmem:[#allocation91_spill] sm:$0xff] %v5757_v19  ;;  %1342 = vmatpush.msra.mxu1 %v5772_v16  ;;  %v5775_v19 = vld [vmem:[#allocation9 + $0x3f8] sm:$0xff] }
 0x1dd   :  { %9006 = vst [vmem:[#allocation49_spill] sm:$0xff] %v5760_v8  ;;  %1382 = vmatpush.msra.mxu3 %v5775_v19  ;;  %v5778_v8 = vld [vmem:[#allocation9 + $0x148] sm:$0xff] }
 0x1de   :  { %9007 = vst [vmem:[#allocation52_spill] sm:$0xff] %v5763_v49  ;;  %1287 = vmatpush.msrb.mxu2 %v5778_v8  ;;  %v5781_v49 = vld [vmem:[#allocation9 + $0x3d0] sm:$0xff] }
 0x1df   :  { %9008 = vst [vmem:[#allocation94_spill] sm:$0xff] %v5766_v23  ;;  %1343 = vmatpush.msra.mxu1 %v5781_v49  ;;  %v5784_v23 = vld [vmem:[#allocation9 + $0x120] sm:$0xff] }
 0x1e0   :  { %9009 = vst [vmem:[#allocation53_spill] sm:$0xff] %v5769_v43  ;;  %1248 = vmatpush.msrb.mxu0 %v5784_v23  ;;  %v5787_v43 = vld [vmem:[#allocation9 + $0x3d8] sm:$0xff] }
 0x1e1   :  { %9010 = vst [vmem:[#allocation56_spill] sm:$0xff] %v5772_v16  ;;  %1383 = vmatpush.msra.mxu3 %v5787_v43  ;;  %v5790_v16 = vld [vmem:[#allocation9 + $0x128] sm:$0xff] }
 0x1e2   :  { %9011 = vst [vmem:[#allocation57_spill] sm:$0xff] %v5775_v19  ;;  %1288 = vmatpush.msrb.mxu2 %v5790_v16  ;;  %v5793_v19 = vld [vmem:[#allocation9 + $0x3b0] sm:$0xff] }
 0x1e3   :  { %9012 = vst [vmem:[#allocation60_spill] sm:$0xff] %v5778_v8  ;;  %1344 = vmatpush.msra.mxu1 %v5793_v19  ;;  %v5796_v8 = vld [vmem:[#allocation9 + $0x100] sm:$0xff] }
 0x1e4   :  { %9013 = vst [vmem:[#allocation61_spill] sm:$0xff] %v5781_v49  ;;  %1249 = vmatpush.msrb.mxu0 %v5796_v8  ;;  %v5799_v49 = vld [vmem:[#allocation9 + $0x3b8] sm:$0xff] }
 0x1e5   :  { %9014 = vst [vmem:[#allocation64_spill] sm:$0xff] %v5784_v23  ;;  %1384 = vmatpush.msra.mxu3 %v5799_v49  ;;  %v5802_v23 = vld [vmem:[#allocation9 + $0x108] sm:$0xff] }
 0x1e6   :  { %9015 = vst [vmem:[#allocation65_spill] sm:$0xff] %v5787_v43  ;;  %1289 = vmatpush.msrb.mxu2 %v5802_v23  ;;  %v5805_v43 = vld [vmem:[#allocation9 + $0x390] sm:$0xff] }
 0x1e7   :  { %9016 = vst [vmem:[#allocation68_spill] sm:$0xff] %v5790_v16  ;;  %1345 = vmatpush.msra.mxu1 %v5805_v43  ;;  %v5808_v16 = vld [vmem:[#allocation9 + $0xe0] sm:$0xff] }
 0x1e8   :  { %9017 = vst [vmem:[#allocation69_spill] sm:$0xff] %v5793_v19  ;;  %1250 = vmatpush.msrb.mxu0 %v5808_v16  ;;  %v5811_v19 = vld [vmem:[#allocation9 + $0x398] sm:$0xff] }
 0x1e9   :  { %9018 = vst [vmem:[#allocation72_spill] sm:$0xff] %v5796_v8  ;;  %1385 = vmatpush.msra.mxu3 %v5811_v19  ;;  %v5814_v8 = vld [vmem:[#allocation9 + $0xe8] sm:$0xff] }
 0x1ea   :  { %9019 = vst [vmem:[#allocation73_spill] sm:$0xff] %v5799_v49  ;;  %1290 = vmatpush.msrb.mxu2 %v5814_v8  ;;  %v5817_v49 = vld [vmem:[#allocation9 + $0x370] sm:$0xff] }
 0x1eb   :  { %9020 = vst [vmem:[#allocation76_spill] sm:$0xff] %v5802_v23  ;;  %1346 = vmatpush.msra.mxu1 %v5817_v49  ;;  %v5820_v23 = vld [vmem:[#allocation9 + $0xc0] sm:$0xff] }
 0x1ec   :  { %9021 = vst [vmem:[#allocation77_spill] sm:$0xff] %v5805_v43  ;;  %1251 = vmatpush.msrb.mxu0 %v5820_v23  ;;  %v5823_v43 = vld [vmem:[#allocation9 + $0x378] sm:$0xff] }
 0x1ed   :  { %9022 = vst [vmem:[#allocation80_spill] sm:$0xff] %v5808_v16  ;;  %1386 = vmatpush.msra.mxu3 %v5823_v43  ;;  %v5826_v16 = vld [vmem:[#allocation9 + $0xc8] sm:$0xff] }
 0x1ee   :  { %9023 = vst [vmem:[#allocation81_spill] sm:$0xff] %v5811_v19  ;;  %1291 = vmatpush.msrb.mxu2 %v5826_v16  ;;  %v5829_v19 = vld [vmem:[#allocation9 + $0x350] sm:$0xff] }
 0x1ef   :  { %9024 = vst [vmem:[#allocation84_spill] sm:$0xff] %v5814_v8  ;;  %1347 = vmatpush.msra.mxu1 %v5829_v19  ;;  %v5832_v8 = vld [vmem:[#allocation9 + $0xa0] sm:$0xff] }
 0x1f0   :  { %9025 = vst [vmem:[#allocation85_spill] sm:$0xff] %v5817_v49  ;;  %1252 = vmatpush.msrb.mxu0 %v5832_v8  ;;  %v5835_v49 = vld [vmem:[#allocation9 + $0x358] sm:$0xff] }
 0x1f1   :  { %9026 = vst [vmem:[#allocation88_spill] sm:$0xff] %v5820_v23  ;;  %1387 = vmatpush.msra.mxu3 %v5835_v49  ;;  %v5838_v23 = vld [vmem:[#allocation9 + $0xa8] sm:$0xff] }
 0x1f2   :  { %9027 = vst [vmem:[#allocation89_spill] sm:$0xff] %v5823_v43  ;;  %1292 = vmatpush.msrb.mxu2 %v5838_v23  ;;  %v5841_v43 = vld [vmem:[#allocation9 + $0x330] sm:$0xff] }
 0x1f3   :  { %9028 = vst [vmem:[#allocation92_spill] sm:$0xff] %v5826_v16  ;;  %1348 = vmatpush.msra.mxu1 %v5841_v43  ;;  %v5844_v16 = vld [vmem:[#allocation9 + $0x80] sm:$0xff] }
 0x1f4   :  { %9029 = vst [vmem:[#allocation93_spill] sm:$0xff] %v5829_v19  ;;  %1253 = vmatpush.msrb.mxu0 %v5844_v16  ;;  %v5847_v19 = vld [vmem:[#allocation9 + $0x338] sm:$0xff] }
 0x1f5   :  { %9030 = vst [vmem:[#allocation95_spill] sm:$0xff] %v5832_v8  ;;  %1388 = vmatpush.msra.mxu3 %v5847_v19  ;;  %v5850_v8 = vld [vmem:[#allocation9 + $0x88] sm:$0xff] }
 0x1f6   :  { %9031 = vst [vmem:[#allocation96_spill] sm:$0xff] %v5835_v49  ;;  %1293 = vmatpush.msrb.mxu2 %v5850_v8  ;;  %v5853_v49 = vld [vmem:[#allocation9 + $0x310] sm:$0xff] }
 0x1f7   :  { %9032 = vst [vmem:[#allocation97_spill] sm:$0xff] %v5838_v23  ;;  %1349 = vmatpush.msra.mxu1 %v5853_v49  ;;  %v5856_v23 = vld [vmem:[#allocation9 + $0x60] sm:$0xff] }
 0x1f8   :  { %9033 = vst [vmem:[#allocation98_spill] sm:$0xff] %v5841_v43  ;;  %1254 = vmatpush.msrb.mxu0 %v5856_v23  ;;  %v5859_v43 = vld [vmem:[#allocation9 + $0x318] sm:$0xff] }
 0x1f9   :  { %9034 = vst [vmem:[#allocation99_spill] sm:$0xff] %v5844_v16  ;;  %1389 = vmatpush.msra.mxu3 %v5859_v43  ;;  %v5862_v16 = vld [vmem:[#allocation9 + $0x68] sm:$0xff] }
 0x1fa   :  { %9035 = vst [vmem:[#allocation100_spill] sm:$0xff] %v5847_v19  ;;  %1294 = vmatpush.msrb.mxu2 %v5862_v16  ;;  %v5865_v19 = vld [vmem:[#allocation9 + $0x2f0] sm:$0xff]  ;;  %v6027_v45 = vpop.permute.xlu1 %1084 }
 0x1fb   :  { %9036 = vst [vmem:[#allocation101_spill] sm:$0xff] %v5850_v8  ;;  %1350 = vmatpush.msra.mxu1 %v5865_v19  ;;  %v5868_v8 = vld [vmem:[#allocation9 + $0x40] sm:$0xff]  ;;  %v1088_v6 = vmul.f32 %v6027_v45, %v8945_v30 }
 0x1fc   :  { %9037 = vst [vmem:[#allocation102_spill] sm:$0xff] %v5853_v49  ;;  %1255 = vmatpush.msrb.mxu0 %v5868_v8  ;;  %v5871_v49 = vld [vmem:[#allocation9 + $0x2f8] sm:$0xff] }
 0x1fd   :  { %9038 = vst [vmem:[#allocation103_spill] sm:$0xff] %v5856_v23  ;;  %1390 = vmatpush.msra.mxu3 %v5871_v49  ;;  %v5874_v23 = vld [vmem:[#allocation9 + $0x48] sm:$0xff]  ;;  %v1092_v41 = vadd.f32 %v1088_v6, %v8947_v47 }
 0x1fe   :  { %9039 = vst [vmem:[#allocation106_spill] sm:$0xff] %v5859_v43  ;;  %1295 = vmatpush.msrb.mxu2 %v5874_v23  ;;  %v5877_v43 = vld [vmem:[#allocation9 + $0x2d0] sm:$0xff] }
 0x1ff   :  { %9040 = vst [vmem:[#allocation107_spill] sm:$0xff] %v5862_v16  ;;  %1351 = vmatpush.msra.mxu1 %v5877_v43  ;;  %v5880_v16 = vld [vmem:[#allocation9 + $0x20] sm:$0xff] }
 0x200   :  { %9041 = vst [vmem:[#allocation110_spill] sm:$0xff] %v5865_v19  ;;  %1256 = vmatpush.msrb.mxu0 %v5880_v16  ;;  %v5883_v19 = vld [vmem:[#allocation9 + $0x2d8] sm:$0xff] }
 0x201   :  { %9042 = vst [vmem:[#allocation111_spill] sm:$0xff] %v5868_v8  ;;  %1391 = vmatpush.msra.mxu3 %v5883_v19  ;;  %v5886_v8 = vld [vmem:[#allocation9 + $0x28] sm:$0xff] }
 0x202   :  { %9043 = vst [vmem:[#allocation112_spill] sm:$0xff] %v5871_v49  ;;  %1296 = vmatpush.msrb.mxu2 %v5886_v8  ;;  %v5889_v49 = vld [vmem:[#allocation9 + $0x2b0] sm:$0xff] }
 0x203   :  { %9044 = vst [vmem:[#allocation113_spill] sm:$0xff] %v5874_v23  ;;  %1352 = vmatpush.msra.mxu1 %v5889_v49  ;;  %v5892_v23 = vld [vmem:[#allocation9] sm:$0xff] }
 0x204   :  { %9045 = vst [vmem:[#allocation114_spill] sm:$0xff] %v5877_v43  ;;  %1257 = vmatpush.msrb.mxu0 %v5892_v23  ;;  %v5895_v43 = vld [vmem:[#allocation9 + $0x2b8] sm:$0xff] }
 0x205   :  { %9046 = vst [vmem:[#allocation115_spill] sm:$0xff] %v5880_v16  ;;  %1392 = vmatpush.msra.mxu3 %v5895_v43  ;;  %v5898_v16 = vld [vmem:[#allocation9 + $0x8] sm:$0xff] }
 0x206   :  { %9047 = vst [vmem:[#allocation116_spill] sm:$0xff] %v5883_v19  ;;  %1297 = vmatpush.msrb.mxu2 %v5898_v16  ;;  %v5901_v19 = vld [vmem:[#allocation9 + $0x290] sm:$0xff] }
 0x207   :  { %9048 = vst [vmem:[#allocation117_spill] sm:$0xff] %v5886_v8  ;;  %1353 = vmatpush.msra.mxu1 %v5901_v19  ;;  %v5904_v8 = vld [vmem:[#allocation9 + $0x1f0] sm:$0xff] }
 0x208   :  { %9049 = vst [vmem:[#allocation118_spill] sm:$0xff] %v5889_v49  ;;  %1322 = vmatpush.msra.mxu0 %v5904_v8  ;;  %v5907_v49 = vld [vmem:[#allocation9 + $0x298] sm:$0xff] }
 0x209   :  { %9050 = vst [vmem:[#allocation119_spill] sm:$0xff] %v5892_v23  ;;  %1393 = vmatpush.msra.mxu3 %v5907_v49  ;;  %v5910_v23 = vld [vmem:[#allocation9 + $0x1f8] sm:$0xff] }
 0x20a   :  { %9051 = vst [vmem:[#allocation120_spill] sm:$0xff] %v5895_v43  ;;  %1362 = vmatpush.msra.mxu2 %v5910_v23  ;;  %v5913_v43 = vld [vmem:[#allocation9 + $0x270] sm:$0xff] }
 0x20b   :  { %9052 = vst [vmem:[#allocation121_spill] sm:$0xff] %v5898_v16  ;;  %1354 = vmatpush.msra.mxu1 %v5913_v43  ;;  %v5916_v16 = vld [vmem:[#allocation9 + $0x1d0] sm:$0xff] }
 0x20c   :  { %9053 = vst [vmem:[#allocation122_spill] sm:$0xff] %v5901_v19  ;;  %1323 = vmatpush.msra.mxu0 %v5916_v16  ;;  %v5919_v19 = vld [vmem:[#allocation9 + $0x278] sm:$0xff] }
 0x20d   :  { %9054 = vst [vmem:[#allocation123_spill] sm:$0xff] %v5904_v8  ;;  %1394 = vmatpush.msra.mxu3 %v5919_v19  ;;  %v5922_v8 = vld [vmem:[#allocation9 + $0x1d8] sm:$0xff] }
 0x20e   :  { %9055 = vst [vmem:[#allocation124_spill] sm:$0xff] %v5907_v49  ;;  %1363 = vmatpush.msra.mxu2 %v5922_v8  ;;  %v5925_v49 = vld [vmem:[#allocation9 + $0x250] sm:$0xff] }
 0x20f   :  { %9056 = vst [vmem:[#allocation125_spill] sm:$0xff] %v5910_v23  ;;  %1355 = vmatpush.msra.mxu1 %v5925_v49  ;;  %v5928_v23 = vld [vmem:[#allocation9 + $0x1b0] sm:$0xff] }
 0x210   :  { %9057 = vst [vmem:[#allocation126_spill] sm:$0xff] %v5913_v43  ;;  %1324 = vmatpush.msra.mxu0 %v5928_v23  ;;  %v5931_v43 = vld [vmem:[#allocation9 + $0x258] sm:$0xff]  ;;  %v934_v37 = vpop.f32.mrf.mxu3 }
 0x211   :  { %9058 = vst [vmem:[#allocation127_spill] sm:$0xff] %v5916_v16  ;;  %1395 = vmatpush.msra.mxu3 %v5931_v43  ;;  %v5934_v16 = vld [vmem:[#allocation9 + $0x1b8] sm:$0xff] }
 0x212   :  { %9059 = vst [vmem:[#allocation128_spill] sm:$0xff] %v5919_v19  ;;  %1364 = vmatpush.msra.mxu2 %v5934_v16  ;;  %v5937_v19 = vld [vmem:[#allocation9 + $0x230] sm:$0xff] }
 0x213   :  { %9060 = vst [vmem:[#allocation129_spill] sm:$0xff] %v5922_v8  ;;  %1356 = vmatpush.msra.mxu1 %v5937_v19  ;;  %v5940_v8 = vld [vmem:[#allocation9 + $0x190] sm:$0xff] }
 0x214   :  { %9061 = vst [vmem:[#allocation130_spill] sm:$0xff] %v5925_v49  ;;  %1325 = vmatpush.msra.mxu0 %v5940_v8  ;;  %v5943_v49 = vld [vmem:[#allocation9 + $0x238] sm:$0xff] }
 0x215   :  { %9062 = vst [vmem:[#allocation131_spill] sm:$0xff] %v5928_v23  ;;  %1396 = vmatpush.msra.mxu3 %v5943_v49  ;;  %v5946_v23 = vld [vmem:[#allocation9 + $0x198] sm:$0xff] }
 0x216   :  { %9063 = vst [vmem:[#allocation132_spill] sm:$0xff] %v5931_v43  ;;  %1365 = vmatpush.msra.mxu2 %v5946_v23  ;;  %v5949_v43 = vld [vmem:[#allocation9 + $0x210] sm:$0xff] }
 0x217   :  { %9064 = vst [vmem:[#allocation133_spill] sm:$0xff] %v5934_v16  ;;  %1357 = vmatpush.msra.mxu1 %v5949_v43  ;;  %v5952_v16 = vld [vmem:[#allocation9 + $0x170] sm:$0xff] }
 0x218   :  { %9065 = vst [vmem:[#allocation134_spill] sm:$0xff] %v5937_v19  ;;  %1326 = vmatpush.msra.mxu0 %v5952_v16  ;;  %v5955_v19 = vld [vmem:[#allocation9 + $0x218] sm:$0xff] }
 0x219   :  { %9066 = vst [vmem:[#allocation135_spill] sm:$0xff] %v5940_v8  ;;  %1397 = vmatpush.msra.mxu3 %v5955_v19  ;;  %v5958_v8 = vld [vmem:[#allocation9 + $0x178] sm:$0xff] }
 0x21a   :  { %9067 = vst [vmem:[#allocation136_spill] sm:$0xff] %v5943_v49  ;;  %1366 = vmatpush.msra.mxu2 %v5958_v8  ;;  %v5961_v49 = vld [vmem:[#allocation9 + $0x150] sm:$0xff] }
 0x21b   :  { %9068 = vst [vmem:[#allocation137_spill] sm:$0xff] %v5946_v23  ;;  %1327 = vmatpush.msra.mxu0 %v5961_v49  ;;  %v5964_v23 = vld [vmem:[#allocation9 + $0x158] sm:$0xff] }
 0x21c   :  { %9069 = vst [vmem:[#allocation138_spill] sm:$0xff] %v5949_v43  ;;  %1367 = vmatpush.msra.mxu2 %v5964_v23  ;;  %v5967_v43 = vld [vmem:[#allocation9 + $0x130] sm:$0xff] }
 0x21d   :  { %9070 = vst [vmem:[#allocation139_spill] sm:$0xff] %v5952_v16  ;;  %1328 = vmatpush.msra.mxu0 %v5967_v43  ;;  %v5970_v16 = vld [vmem:[#allocation9 + $0x138] sm:$0xff] }
 0x21e   :  { %9071 = vst [vmem:[#allocation140_spill] sm:$0xff] %v5955_v19  ;;  %1368 = vmatpush.msra.mxu2 %v5970_v16  ;;  %v5973_v19 = vld [vmem:[#allocation9 + $0x110] sm:$0xff] }
 0x21f   :  { %9072 = vst [vmem:[#allocation141_spill] sm:$0xff] %v5958_v8  ;;  %1329 = vmatpush.msra.mxu0 %v5973_v19  ;;  %v5976_v8 = vld [vmem:[#allocation9 + $0x118] sm:$0xff] }
 0x220   :  { %9073 = vst [vmem:[#allocation142_spill] sm:$0xff] %v5961_v49  ;;  %1369 = vmatpush.msra.mxu2 %v5976_v8  ;;  %v5979_v49 = vld [vmem:[#allocation9 + $0xf0] sm:$0xff] }
 0x221   :  { %9074 = vst [vmem:[#allocation143_spill] sm:$0xff] %v5964_v23  ;;  %1330 = vmatpush.msra.mxu0 %v5979_v49  ;;  %v5982_v23 = vld [vmem:[#allocation9 + $0xf8] sm:$0xff] }
 0x222   :  { %9075 = vst [vmem:[#allocation144_spill] sm:$0xff] %v5967_v43  ;;  %1370 = vmatpush.msra.mxu2 %v5982_v23  ;;  %v5985_v43 = vld [vmem:[#allocation9 + $0xd0] sm:$0xff]  ;;  %v874_v63 = vpop.f32.mrf.mxu0 }
 0x223   :  { %9076 = vst [vmem:[#allocation145_spill] sm:$0xff] %v5970_v16  ;;  %1331 = vmatpush.msra.mxu0 %v5985_v43  ;;  %v5988_v16 = vld [vmem:[#allocation9 + $0xd8] sm:$0xff] }
 0x224   :  { %9077 = vst [vmem:[#allocation146_spill] sm:$0xff] %v5973_v19  ;;  %1371 = vmatpush.msra.mxu2 %v5988_v16  ;;  %v5991_v19 = vld [vmem:[#allocation9 + $0xb0] sm:$0xff] }
 0x225   :  { %9078 = vst [vmem:[#allocation147_spill] sm:$0xff] %v5976_v8  ;;  %1332 = vmatpush.msra.mxu0 %v5991_v19  ;;  %v5994_v8 = vld [vmem:[#allocation9 + $0xb8] sm:$0xff] }
 0x226   :  { %9079 = vst [vmem:[#allocation148_spill] sm:$0xff] %v5979_v49  ;;  %1372 = vmatpush.msra.mxu2 %v5994_v8  ;;  %v5997_v49 = vld [vmem:[#allocation9 + $0x90] sm:$0xff] }
 0x227   :  { %9080 = vst [vmem:[#allocation149_spill] sm:$0xff] %v5982_v23  ;;  %1333 = vmatpush.msra.mxu0 %v5997_v49  ;;  %v6000_v23 = vld [vmem:[#allocation9 + $0x98] sm:$0xff] }
 0x228   :  { %9081 = vst [vmem:[#allocation150_spill] sm:$0xff] %v5985_v43  ;;  %1373 = vmatpush.msra.mxu2 %v6000_v23  ;;  %v6003_v43 = vld [vmem:[#allocation9 + $0x70] sm:$0xff]  ;;  %v914_v2 = vpop.f32.mrf.mxu2 }
 0x229   :  { %9082 = vst [vmem:[#allocation151_spill] sm:$0xff] %v5988_v16  ;;  %1334 = vmatpush.msra.mxu0 %v6003_v43  ;;  %v6006_v16 = vld [vmem:[#allocation9 + $0x78] sm:$0xff] }
 0x22a   :  { %9083 = vst [vmem:[#allocation152_spill] sm:$0xff] %v5991_v19  ;;  %1374 = vmatpush.msra.mxu2 %v6006_v16  ;;  %v6009_v19 = vld [vmem:[#allocation9 + $0x50] sm:$0xff] }
 0x22b   :  { %9084 = vst [vmem:[#allocation153_spill] sm:$0xff] %v5994_v8  ;;  %1335 = vmatpush.msra.mxu0 %v6009_v19  ;;  %v6012_v8 = vld [vmem:[#allocation9 + $0x58] sm:$0xff]  ;;  %v954_v33 = vpop.f32.mrf.mxu0 }
 0x22c   :  { %9085 = vst [vmem:[#allocation154_spill] sm:$0xff] %v5997_v49  ;;  %1375 = vmatpush.msra.mxu2 %v6012_v8  ;;  %v6015_v49 = vld [vmem:[#allocation9 + $0x30] sm:$0xff]  ;;  %v955_v29 = vadd.f32 %v954_v33, %v5403_v34 }
 0x22d   :  { %9086 = vst [vmem:[#allocation155_spill] sm:$0xff] %v6000_v23  ;;  %1336 = vmatpush.msra.mxu0 %v6015_v49  ;;  %v6018_v23 = vld [vmem:[#allocation9 + $0x38] sm:$0xff] }
 0x22e   :  { %9087 = vst [vmem:[#allocation156_spill] sm:$0xff] %v6003_v43  ;;  %1376 = vmatpush.msra.mxu2 %v6018_v23  ;;  %v6021_v43 = vld [vmem:[#allocation9 + $0x10] sm:$0xff] }
 0x22f   :  { %9088 = vst [vmem:[#allocation157_spill] sm:$0xff] %v6006_v16  ;;  %1337 = vmatpush.msra.mxu0 %v6021_v43  ;;  %v6024_v16 = vld [vmem:[#allocation9 + $0x18] sm:$0xff] }
 0x230   :  { %9089 = vst [vmem:[#allocation158_spill] sm:$0xff] %v6009_v19  ;;  %1377 = vmatpush.msra.mxu2 %v6024_v16  ;;  %v894_v19 = vpop.f32.mrf.mxu1 }
 0x231   :  { %9090 = vst [vmem:[#allocation159_spill] sm:$0xff] %v6012_v8  ;;  %v875_v8 = vadd.f32 %v874_v63, %v5394_v14  ;;  %v994_v6 = vpop.f32.mrf.mxu2 }
 0x232   :  { %9091 = vst [vmem:[#allocation160_spill] sm:$0xff] %v6015_v49  ;;  %v995_v33 = vadd.f32 %v994_v6, %v5408_v61 }
 0x233   :  { %9092 = vst [vmem:[#allocation161_spill] sm:$0xff] %v6018_v23  ;;  %v895_v49 = vadd.f32 %v894_v19, %v875_v8 }
 0x234   :  { %9093 = vst [vmem:[#allocation162_spill] sm:$0xff] %v6021_v43  ;;  %v915_v43 = vadd.f32 %v914_v2, %v5399_v26 }
 0x235   :  { %9094 = vst [vmem:[#allocation163_spill] sm:$0xff] %v6024_v16  ;;  %v3466_v23 = vmul.f32 -1.442695, %v895_v49 }
 0x236   :  { %v935_v16 = vadd.f32 %v934_v37, %v915_v43 }
 0x237   :  { %3573 = vpow2.f32 %v3466_v23 }
 0x238   :  { %v974_v51 = vpop.f32.mrf.mxu1  ;;  %v3467_v27 = vmul.f32 -1.442695, %v935_v16 }
 0x239   :  { %v975_v14 = vadd.f32 %v974_v51, %v955_v29 }
 0x23a   :  { %3575 = vpow2.f32 %v3467_v27  ;;  %v1014_v27 = vpop.f32.mrf.mxu3 }
 0x23b   :  { %v3468_v30 = vmul.f32 -1.442695, %v975_v14  ;;  %v1087_v14 = vmul.f32 %v6027_v45, %v8949_v38 }
 0x23d   :  { %v3574_v19 = vpop.eup %3573  ;;  %v1091_v6 = vadd.f32 %v1087_v14, %v8950_v3 }
 0x23e   :  { %v1026_v8 = vadd.f32 1.0, %v3574_v19 }
 0x240   :  { %v1132_v44 = vpop.f32.mrf.mxu1  ;;  %3577 = vrcp.f32 %v1026_v8  ;;  %v3576_v23 = vpop.eup %3575  ;;  %vm1034_vm5 = vweird.f32 %v1026_v8 }
 0x241   :  { %v1176_v63 = vadd.f32 %v1132_v44, %v1092_v41  ;;  %3579 = vpow2.f32 %v3468_v30  ;;  %v1027_v2 = vadd.f32 1.0, %v3576_v23  ;;  %v1015_v30 = vadd.f32 %v1014_v27, %v995_v33 }
 0x242   :  { %v1040_v23 = vand.u32 2147483648, %v1026_v8 }
 0x243   :  { %v3471_v49 = vmul.f32 -1.442695, %v1176_v63  ;;  %v1055_v34 = vand.u32 2147483648, %v1027_v2  ;;  %vm1049_vm8 = vweird.f32 %v1027_v2 }
 0x245   :  { %3581 = vpow2.f32 %v3471_v49  ;;  %v1056_v26 = vor.u32 1.1754944e-38, %v1055_v34 }
 0x246   :  { %v3578_v47 = vpop.eup %3577  ;;  %3583 = vrcp.f32 %v1027_v2 }
 0x247   :  { %v3580_v37 = vpop.eup %3579  ;;  %v1030_v43 = vmul.f32 %v3578_v47, %v1026_v8  ;;  %vm1035_vm4 = vweird.f32 %v3578_v47 }
 0x248   :  { %v6036_v16 = vadd.f32 1.0, %v3580_v37  ;;  %vm6045_vm6 = vmor %vm1034_vm5, %vm1035_vm4 }
 0x249   :  { %v1031_v29 = vsub.f32 1.0, %v1030_v43  ;;  %v1038_v43 = vand.u32 2147483647, %v1026_v8 }
 0x24a   :  { %3585 = vrcp.f32 %v6036_v16  ;;  %v1152_v33 = vpop.f32.mrf.mxu2  ;;  %vm1064_vm13 = vweird.f32 %v6036_v16 }
 0x24b   :  { %v3582_v44 = vpop.eup %3581  ;;  %v1032_v41 = vmul.f32 %v3578_v47, %v1031_v29  ;;  %3587 = vtanh.f32 %v1015_v30  ;;  %v1089_v30 = vmul.f32 %v6027_v45, %v5060_v20  ;;  %vm1039_vm9 = vcmp.eq.f32.partialorder %v1038_v43, 8.507059e+37 }
 0x24c   :  { %v3584_v51 = vpop.eup %3583  ;;  %v6041_v63 = vadd.f32 1.0, %v3582_v44  ;;  %v1053_v44 = vand.u32 2147483647, %v1027_v2 }
 0x24d   :  { %v1045_v19 = vmul.f32 %v3584_v51, %v1027_v2  ;;  %v1033_v49 = vadd.f32 %v3578_v47, %v1032_v41  ;;  %vm1050_vm7 = vweird.f32 %v3584_v51  ;;  %v1112_v41 = vpop.f32.mrf.mxu0  ;;  %v1093_v2 = vadd.f32 %v1089_v30, %v5081_v4  ;;  %v1172_v30 = vpop.f32.mrf.mxu3 }
 0x24e   :  { %3589 = vrcp.f32 %v6041_v63  ;;  %v1175_v8 = vadd.f32 %v1112_v41, %v1091_v6  ;;  %vm1051_vm10 = vmor %vm1049_vm8, %vm1050_vm7  ;;  %vm1054_vm11 = vcmp.eq.f32.partialorder %v1053_v44, 8.507059e+37  ;;  %vm1211_vm1 = vweird.f32 %v6041_v63 }
 0x24f   :  { %v1046_v37 = vsub.f32 1.0, %v1045_v19  ;;  %v1037_v14 = vsel %vm6045_vm6, %v3578_v47, %v1033_v49  ;;  %v1041_v19 = vor.u32 1.1754944e-38, %v1040_v23 }
 0x250   :  { %v3586_v61 = vpop.eup %3585 }
 0x251   :  { %v1047_v29 = vmul.f32 %v3584_v51, %v1046_v37  ;;  %v1060_v27 = vmul.f32 %v3586_v61, %v6036_v16  ;;  %v1042_v25 = vsel %vm1039_vm9, %v1041_v19, %v1037_v14  ;;  %v3470_v37 = vmul.f32 -1.442695, %v1175_v8  ;;  %v3588_v57 = vpop.eup %3587 }
 0x252   :  { %v1076_v6 = vmul.f32 %v3588_v57, %v1042_v25  ;;  %vm1065_vm12 = vweird.f32 %v3586_v61 }
 0x253   :  { %v1061_v3 = vsub.f32 1.0, %v1060_v27  ;;  %v1048_v38 = vadd.f32 %v3584_v51, %v1047_v29  ;;  %3591 = vpow2.f32 %v3470_v37  ;;  %v1177_v29 = vadd.f32 %v1152_v33, %v1093_v2  ;;  %vm1066_vm14 = vmor %vm1064_vm13, %vm1065_vm12 }
 0x254   :  { %v6054_v21 = vpop.eup %3589  ;;  %v1215_v2 = vand.u32 2147483647, %v6041_v63 }
 0x255   :  { %v1052_v55 = vsel %vm1051_vm10, %v3584_v51, %v1048_v38  ;;  %v1062_v49 = vmul.f32 %v3586_v61, %v1061_v3  ;;  %v1207_v34 = vmul.f32 %v6054_v21, %v6041_v63  ;;  %v3472_v38 = vmul.f32 -1.442695, %v1177_v29 }
 0x256   :  { %v1057_v47 = vsel %vm1054_vm11, %v1056_v26, %v1052_v55  ;;  %v1070_v26 = vand.u32 2147483648, %v6036_v16  ;;  %v1090_v55 = vmul.f32 %v6027_v45, %v5115_v42  ;;  %vm1212_vm0 = vweird.f32 %v6054_v21 }
 0x257   :  { %v1075_v23 = vmul.f32 %v1057_v47, %v5435_v0  ;;  %v1063_v27 = vadd.f32 %v3586_v61, %v1062_v49  ;;  %v1068_v0 = vand.u32 2147483647, %v6036_v16  ;;  %v1208_v25 = vsub.f32 1.0, %v1207_v34  ;;  %vm6082_vm2 = vmor %vm1211_vm1, %vm1212_vm0 }
 0x258   :  { %v1071_v44 = vor.u32 1.1754944e-38, %v1070_v26  ;;  %v1094_v41 = vadd.f32 %v1090_v55, %v5141_v58  ;;  %vm1216_vm4 = vcmp.eq.f32.partialorder %v1215_v2, 8.507059e+37  ;;  %v9110_v2 = vld [vmem:[#allocation46_spill] sm:$0xff] }
 0x259   :  { %v6058_v43 = vadd.f32 %v1076_v6, %v1075_v23  ;;  %v3592_v3 = vpop.eup %3591  ;;  %v1067_v51 = vsel %vm1066_vm14, %v3586_v61, %v1063_v27  ;;  %vm1069_vm15 = vcmp.eq.f32.partialorder %v1068_v0, 8.507059e+37  ;;  %v1209_v8 = vmul.f32 %v6054_v21, %v1208_v25  ;;  %v9100_v25 = vld [vmem:[#allocation30_spill] sm:$0xff] }
 0x25a   :  { %v1188_v57 = vadd.f32 1.0, %v3592_v3  ;;  %v1072_v19 = vsel %vm1069_vm15, %v1071_v44, %v1067_v51  ;;  %v1178_v49 = vadd.f32 %v1172_v30, %v1094_v41  ;;  %v1217_v6 = vand.u32 2147483648, %v6041_v63  ;;  %v9104_v41 = vld [vmem:[#allocation34_spill] sm:$0xff]  ;;  %v6179_v30 = vld [vmem:[#allocation6 + $0x100] sm:$0xff] }
 0x25b   :  { %3593 = vtanh.f32 %v6058_v43  ;;  %v1210_v61 = vadd.f32 %v6054_v21, %v1209_v8  ;;  %v9105_v8 = vld [vmem:[#allocation35_spill] sm:$0xff] }
 0x25c   :  { %3595 = vpow2.f32 %v3472_v38  ;;  %v1202_v33 = vand.u32 2147483648, %v1188_v57  ;;  %v1200_v29 = vand.u32 2147483647, %v1188_v57  ;;  %v1218_v34 = vor.u32 1.1754944e-38, %v1217_v6  ;;  %v6195_v6 = vld [vmem:[#allocation6 + $0xc0] sm:$0xff] }
 0x25d   :  { %3597 = vrcp.f32 %v1188_v57  ;;  %vm1196_vm5 = vweird.f32 %v1188_v57 }
 0x25e   :  { %vm1201_vm7 = vcmp.eq.f32.partialorder %v1200_v29, 8.507059e+37  ;;  %v9113_v29 = vld [vmem:[#allocation54_spill] sm:$0xff] }
 0x261   :  { %v3594_v14 = vpop.eup %3593 }
 0x262   :  { %v1079_v37 = vmul.f32 %v3594_v14, %v1072_v19  ;;  %v3596_v16 = vpop.eup %3595  ;;  %v6175_v19 = vld [vmem:[#allocation6 + $0x130] sm:$0xff] }
 0x263   :  { %v6070_v47 = vadd.f32 1.0, %v3596_v16  ;;  %v3598_v45 = vpop.eup %3597  ;;  %v6183_v16 = vld [vmem:[#allocation6 + $0x110] sm:$0xff] }
 0x264   :  { %1278 = vmatmul.f32.vlgmr.msrb.gmra.mxu1 %v1079_v37  ;;  %1318 = vmatmul.f32.vlgmr.msrb.gmra.mxu3 %v1079_v37  ;;  %v1192_v23 = vmul.f32 %v3598_v45, %v1188_v57  ;;  %vm1197_vm3 = vweird.f32 %v3598_v45  ;;  %v9099_v57 = vld [vmem:[#allocation29_spill] sm:$0xff] }
 0x265   :  { %1500 = vmatpush.msrb.mxu1 %v5454_v48  ;;  %1540 = vmatpush.msrb.mxu3 %v5457_v52  ;;  %3599 = vrcp.f32 %v6070_v47  ;;  %vm1198_vm6 = vmor %vm1196_vm5, %vm1197_vm3  ;;  %vm1226_vm9 = vweird.f32 %v6070_v47  ;;  %v9111_v52 = vld [vmem:[#allocation47_spill] sm:$0xff] }
 0x266   :  { %v1193_v48 = vsub.f32 1.0, %v1192_v23  ;;  %3601 = vtanh.f32 %v1178_v49  ;;  %v9108_v49 = vld [vmem:[#allocation42_spill] sm:$0xff]  ;;  %v9109_v23 = vld [vmem:[#allocation43_spill] sm:$0xff] }
 0x267   :  { %1501 = vmatpush.msrb.mxu1 %v5463_v40  ;;  %1541 = vmatpush.msrb.mxu3 %v5466_v17  ;;  %v1214_v40 = vsel %vm6082_vm2, %v6054_v21, %v1210_v61  ;;  %v6191_v61 = vld [vmem:[#allocation6 + $0xf0] sm:$0xff] }
 0x268   :  { %v1194_v17 = vmul.f32 %v3598_v45, %v1193_v48  ;;  %v6199_v48 = vld [vmem:[#allocation6 + $0xd0] sm:$0xff] }
 0x269   :  { %1502 = vmatpush.msrb.mxu1 %v5480_v24  ;;  %1542 = vmatpush.msrb.mxu3 %v5483_v1  ;;  %v1219_v24 = vsel %vm1216_vm4, %v1218_v34, %v1214_v40  ;;  %v1203_v1 = vor.u32 1.1754944e-38, %v1202_v33  ;;  %v6203_v33 = vld [vmem:[#allocation6 + $0xa0] sm:$0xff]  ;;  %v9112_v40 = vld [vmem:[#allocation50_spill] sm:$0xff] }
 0x26a   :  { %v1195_v27 = vadd.f32 %v3598_v45, %v1194_v17  ;;  %v1237_v3 = vmul.f32 %v1219_v24, %v5511_v28  ;;  %v9101_v28 = vld [vmem:[#allocation31_spill] sm:$0xff]  ;;  %v6207_v17 = vld [vmem:[#allocation6 + $0xb0] sm:$0xff]  ;;  %v9116_v24 = vld [vmem:[#allocation62_spill] sm:$0xff] }
 0x26b   :  { %1503 = vmatpush.msrb.mxu1 %v5487_v60  ;;  %1543 = vmatpush.msrb.mxu3 %v5490_v10  ;;  %v3600_v63 = vpop.eup %3599  ;;  %v6211_v34 = vld [vmem:[#allocation6 + $0x80] sm:$0xff] }
 0x26c   :  { %1358 = vmatmul.f32.vlgmr.msra.gmra.mxu1 %v1079_v37  ;;  %1398 = vmatmul.f32.vlgmr.msra.gmra.mxu3 %v1079_v37  ;;  %v1222_v38 = vmul.f32 %v3600_v63, %v6070_v47  ;;  %v1199_v21 = vsel %vm1198_vm6, %v3598_v45, %v1195_v27  ;;  %v3602_v60 = vpop.eup %3601  ;;  %vm1227_vm8 = vweird.f32 %v3600_v63  ;;  %v9106_v37 = vld [vmem:[#allocation38_spill] sm:$0xff]  ;;  %v6187_v45 = vld [vmem:[#allocation6 + $0xe0] sm:$0xff] }
 0x26d   :  { %1504 = vmatpush.msrb.mxu1 %v5495_v5  ;;  %1544 = vmatpush.msrb.mxu3 %v5498_v56  ;;  %v1204_v26 = vsel %vm1201_vm7, %v1203_v1, %v1199_v21  ;;  %vm1228_vm10 = vmor %vm1226_vm9, %vm1227_vm8  ;;  %v9115_v27 = vld [vmem:[#allocation51_spill] sm:$0xff] }
 0x26e   :  { %v1223_v10 = vsub.f32 1.0, %v1222_v38  ;;  %v1238_v0 = vmul.f32 %v3602_v60, %v1204_v26  ;;  %v9117_v1 = vld [vmem:[#allocation55_spill] sm:$0xff]  ;;  %v9118_v38 = vld [vmem:[#allocation16_spill] sm:$0xff]  ;;  %v9120_v60 = vld [vmem:[#allocation17_spill] sm:$0xff] }
 0x26f   :  { %1505 = vmatpush.msrb.mxu1 %v5505_v32  ;;  %1545 = vmatpush.msrb.mxu3 %v5508_v18  ;;  %v1232_v32 = vand.u32 2147483648, %v6070_v47  ;;  %v1230_v18 = vand.u32 2147483647, %v6070_v47  ;;  %v9107_v47 = vld [vmem:[#allocation39_spill] sm:$0xff] }
 0x270   :  { %v1224_v55 = vmul.f32 %v3600_v63, %v1223_v10  ;;  %v6101_v5 = vadd.f32 %v1238_v0, %v1237_v3  ;;  %v9119_v21 = vld [vmem:[#allocation59_spill] sm:$0xff]  ;;  %v9122_v10 = vld [vmem:[#allocation18_spill] sm:$0xff] }
 0x271   :  { %1506 = vmatpush.msrb.mxu1 %v5513_v31  ;;  %1546 = vmatpush.msrb.mxu3 %v5516_v46  ;;  %v1233_v46 = vor.u32 1.1754944e-38, %v1232_v32  ;;  %vm1231_vm11 = vcmp.eq.f32.partialorder %v1230_v18, 8.507059e+37  ;;  %v9121_v26 = vld [vmem:[#allocation63_spill] sm:$0xff]  ;;  %v9123_v3 = vld [vmem:[#allocation66_spill] sm:$0xff] }
 0x272   :  { %v1225_v56 = vadd.f32 %v3600_v63, %v1224_v55  ;;  %3603 = vtanh.f32 %v6101_v5  ;;  %v9124_v0 = vld [vmem:[#allocation19_spill] sm:$0xff] }
 0x273   :  { %1507 = vmatpush.msrb.mxu1 %v9099_v57  ;;  %1547 = vmatpush.msrb.mxu3 %v9100_v25  ;;  %v9125_v55 = vld [vmem:[#allocation67_spill] sm:$0xff]  ;;  %v9127_v57 = vld [vmem:[#allocation70_spill] sm:$0xff]  ;;  %v9128_v25 = vld [vmem:[#allocation21_spill] sm:$0xff] }
 0x274   :  { %v1229_v31 = vsel %vm1228_vm10, %v3600_v63, %v1225_v56  ;;  %v9114_v63 = vld [vmem:[#allocation58_spill] sm:$0xff]  ;;  %v9126_v56 = vld [vmem:[#allocation20_spill] sm:$0xff]  ;;  %v9129_v32 = vld [vmem:[#allocation71_spill] sm:$0xff] }
 0x275   :  { %1508 = vmatpush.msrb.mxu1 %v9101_v28  ;;  %1548 = vmatpush.msrb.mxu3 %v5532_v9  ;;  %v1234_v44 = vsel %vm1231_vm11, %v1233_v46, %v1229_v31  ;;  %v6121_v9 = vld [vmem:[#allocation6 + $0x1e0] sm:$0xff]  ;;  %v9131_v28 = vld [vmem:[#allocation74_spill] sm:$0xff] }
 0x276   :  { %v9130_v18 = vld [vmem:[#allocation75_spill] sm:$0xff]  ;;  %v9132_v31 = vld [vmem:[#allocation78_spill] sm:$0xff] }
 0x277   :  { %1509 = vmatpush.msrb.mxu1 %v5535_v50  ;;  %1549 = vmatpush.msrb.mxu3 %v5538_v15  ;;  %v6124_v50 = vld [vmem:[#allocation6 + $0x1f0] sm:$0xff]  ;;  %v6137_v15 = vld [vmem:[#allocation6 + $0x1a0] sm:$0xff] }
 0x278   :  { %v3604_v51 = vpop.eup %3603  ;;  %v9133_v46 = vld [vmem:[#allocation79_spill] sm:$0xff] }
 0x279   :  { %1510 = vmatpush.msrb.mxu1 %v5541_v22  ;;  %1550 = vmatpush.msrb.mxu3 %v5544_v39  ;;  %v6115_v14 = vmul.f32 %v3604_v51, %v1234_v44  ;;  %v6129_v22 = vld [vmem:[#allocation6 + $0x1c0] sm:$0xff]  ;;  %v6132_v39 = vld [vmem:[#allocation6 + $0x1d0] sm:$0xff]  ;;  %v9134_v51 = vld [vmem:[#allocation22_spill] sm:$0xff] }
 0x27a   :  { %v9135_v44 = vld [vmem:[#allocation36_spill] sm:$0xff] }
 0x27b   :  { %1511 = vmatpush.msrb.mxu1 %v5549_v59  ;;  %1551 = vmatpush.msrb.mxu3 %v5552_v36  ;;  %v6140_v59 = vld [vmem:[#allocation6 + $0x1b0] sm:$0xff]  ;;  %v6145_v36 = vld [vmem:[#allocation6 + $0x180] sm:$0xff] }
 0x27c   :  { %1258 = vmatmul.f32.vlgmr.msrb.gmra.mxu0 %v6115_v14  ;;  %1298 = vmatmul.f32.vlgmr.msrb.gmra.mxu2 %v6115_v14 }
 0x27d   :  { %1480 = vmatpush.msrb.mxu0 %v6121_v9  ;;  %1520 = vmatpush.msrb.mxu2 %v6124_v50 }
 0x27e   :  { %1512 = vmatpush.msrb.mxu1 %v5559_v35  ;;  %1552 = vmatpush.msrb.mxu3 %v5562_v7  ;;  %v6148_v35 = vld [vmem:[#allocation6 + $0x190] sm:$0xff]  ;;  %v6155_v7 = vld [vmem:[#allocation6 + $0x160] sm:$0xff] }
 0x27f   :  { %1481 = vmatpush.msrb.mxu0 %v6129_v22  ;;  %1521 = vmatpush.msrb.mxu2 %v6132_v39 }
 0x280   :  { %1513 = vmatpush.msrb.mxu1 %v5567_v12  ;;  %1553 = vmatpush.msrb.mxu3 %v5570_v53  ;;  %v6159_v12 = vld [vmem:[#allocation6 + $0x170] sm:$0xff]  ;;  %v6163_v53 = vld [vmem:[#allocation6 + $0x140] sm:$0xff] }
 0x281   :  { %1482 = vmatpush.msrb.mxu0 %v6137_v15  ;;  %1522 = vmatpush.msrb.mxu2 %v6140_v59 }
 0x282   :  { %1514 = vmatpush.msrb.mxu1 %v5575_v62  ;;  %1554 = vmatpush.msrb.mxu3 %v5578_v11  ;;  %v9102_v62 = vld [vmem:[#allocation32_spill] sm:$0xff]  ;;  %v6167_v11 = vld [vmem:[#allocation6 + $0x150] sm:$0xff] }
 0x283   :  { %1483 = vmatpush.msrb.mxu0 %v6145_v36  ;;  %1523 = vmatpush.msrb.mxu2 %v6148_v35 }
 0x284   :  { %1515 = vmatpush.msrb.mxu1 %v5583_v54  ;;  %1555 = vmatpush.msrb.mxu3 %v5586_v13  ;;  %v9103_v54 = vld [vmem:[#allocation33_spill] sm:$0xff]  ;;  %v6171_v13 = vld [vmem:[#allocation6 + $0x120] sm:$0xff] }
 0x285   :  { %1338 = vmatmul.f32.vlgmr.msra.gmra.mxu0 %v6115_v14  ;;  %1378 = vmatmul.f32.vlgmr.msra.gmra.mxu2 %v6115_v14 }
 0x286   :  { %1484 = vmatpush.msrb.mxu0 %v6155_v7  ;;  %1516 = vmatmul.f32.vlgmr.msrb.gmra.mxu1 %v6115_v14 }
 0x287   :  { %1524 = vmatpush.msrb.mxu2 %v6159_v12  ;;  %1556 = vmatmul.f32.vlgmr.msrb.gmra.mxu3 %v6115_v14 }
 0x288   :  { %1485 = vmatpush.msrb.mxu0 %v6163_v53  ;;  %1647 = vmatpush.msra.mxu1 %v9102_v62  ;;  %v9136_v62 = vld [vmem:[#allocation23_spill] sm:$0xff] }
 0x289   :  { %1525 = vmatpush.msrb.mxu2 %v6167_v11  ;;  %1687 = vmatpush.msra.mxu3 %v9103_v54  ;;  %v9137_v54 = vld [vmem:[#allocation82_spill] sm:$0xff] }
 0x28a   :  { %1486 = vmatpush.msrb.mxu0 %v6171_v13  ;;  %1648 = vmatpush.msra.mxu1 %v9104_v41  ;;  %v9138_v41 = vld [vmem:[#allocation24_spill] sm:$0xff] }
 0x28b   :  { %1526 = vmatpush.msrb.mxu2 %v6175_v19  ;;  %1688 = vmatpush.msra.mxu3 %v9105_v8  ;;  %v9139_v8 = vld [vmem:[#allocation83_spill] sm:$0xff] }
 0x28c   :  { %1487 = vmatpush.msrb.mxu0 %v6179_v30  ;;  %1649 = vmatpush.msra.mxu1 %v9106_v37  ;;  %v9140_v37 = vld [vmem:[#allocation37_spill] sm:$0xff] }
 0x28d   :  { %1527 = vmatpush.msrb.mxu2 %v6183_v16  ;;  %1689 = vmatpush.msra.mxu3 %v9107_v47  ;;  %v9141_v47 = vld [vmem:[#allocation86_spill] sm:$0xff] }
 0x28e   :  { %1488 = vmatpush.msrb.mxu0 %v6187_v45  ;;  %1650 = vmatpush.msra.mxu1 %v9108_v49  ;;  %v9143_v49 = vld [vmem:[#allocation87_spill] sm:$0xff] }
 0x28f   :  { %1528 = vmatpush.msrb.mxu2 %v6191_v61  ;;  %1690 = vmatpush.msra.mxu3 %v9109_v23  ;;  %v9144_v23 = vld [vmem:[#allocation41_spill] sm:$0xff] }
 0x290   :  { %1489 = vmatpush.msrb.mxu0 %v6195_v6  ;;  %1651 = vmatpush.msra.mxu1 %v9110_v2  ;;  %v9145_v2 = vld [vmem:[#allocation90_spill] sm:$0xff] }
 0x291   :  { %1529 = vmatpush.msrb.mxu2 %v6199_v48  ;;  %1691 = vmatpush.msra.mxu3 %v9111_v52  ;;  %v9146_v52 = vld [vmem:[#allocation44_spill] sm:$0xff] }
 0x292   :  { %1490 = vmatpush.msrb.mxu0 %v6203_v33  ;;  %1652 = vmatpush.msra.mxu1 %v9112_v40  ;;  %v9147_v40 = vld [vmem:[#allocation91_spill] sm:$0xff] }
 0x293   :  { %1530 = vmatpush.msrb.mxu2 %v6207_v17  ;;  %1692 = vmatpush.msra.mxu3 %v9113_v29  ;;  %v9148_v29 = vld [vmem:[#allocation45_spill] sm:$0xff] }
 0x294   :  { %1491 = vmatpush.msrb.mxu0 %v6211_v34  ;;  %1653 = vmatpush.msra.mxu1 %v9114_v63  ;;  %v9149_v63 = vld [vmem:[#allocation52_spill] sm:$0xff] }
 0x295   :  { %1531 = vmatpush.msrb.mxu2 %v9115_v27  ;;  %1693 = vmatpush.msra.mxu3 %v9116_v24  ;;  %v9150_v27 = vld [vmem:[#allocation48_spill] sm:$0xff]  ;;  %v9151_v24 = vld [vmem:[#allocation53_spill] sm:$0xff] }
 0x296   :  { %1492 = vmatpush.msrb.mxu0 %v9117_v1  ;;  %1654 = vmatpush.msra.mxu1 %v9118_v38  ;;  %v9152_v1 = vld [vmem:[#allocation49_spill] sm:$0xff]  ;;  %v9153_v38 = vld [vmem:[#allocation56_spill] sm:$0xff] }
 0x297   :  { %1532 = vmatpush.msrb.mxu2 %v9119_v21  ;;  %1694 = vmatpush.msra.mxu3 %v9120_v60  ;;  %v9154_v21 = vld [vmem:[#allocation57_spill] sm:$0xff]  ;;  %v9155_v60 = vld [vmem:[#allocation94_spill] sm:$0xff] }
 0x298   :  { %1493 = vmatpush.msrb.mxu0 %v9121_v26  ;;  %1655 = vmatpush.msra.mxu1 %v9122_v10  ;;  %v9156_v26 = vld [vmem:[#allocation60_spill] sm:$0xff]  ;;  %v9157_v10 = vld [vmem:[#allocation61_spill] sm:$0xff] }
 0x299   :  { %1533 = vmatpush.msrb.mxu2 %v9123_v3  ;;  %1695 = vmatpush.msra.mxu3 %v9124_v0  ;;  %v9158_v3 = vld [vmem:[#allocation65_spill] sm:$0xff]  ;;  %v9159_v0 = vld [vmem:[#allocation64_spill] sm:$0xff] }
 0x29a   :  { %1494 = vmatpush.msrb.mxu0 %v9125_v55  ;;  %1656 = vmatpush.msra.mxu1 %v9126_v56  ;;  %v9160_v55 = vld [vmem:[#allocation68_spill] sm:$0xff]  ;;  %v9161_v56 = vld [vmem:[#allocation69_spill] sm:$0xff] }
 0x29b   :  { %1534 = vmatpush.msrb.mxu2 %v9127_v57  ;;  %1696 = vmatpush.msra.mxu3 %v9128_v25  ;;  %v9162_v57 = vld [vmem:[#allocation73_spill] sm:$0xff]  ;;  %v9163_v25 = vld [vmem:[#allocation72_spill] sm:$0xff] }
 0x29c   :  { %1495 = vmatpush.msrb.mxu0 %v9129_v32  ;;  %1657 = vmatpush.msra.mxu1 %v9130_v18  ;;  %v9164_v32 = vld [vmem:[#allocation76_spill] sm:$0xff]  ;;  %v9165_v18 = vld [vmem:[#allocation77_spill] sm:$0xff] }
 0x29d   :  { %1535 = vmatpush.msrb.mxu2 %v9131_v28  ;;  %1496 = vmatmul.f32.vlgmr.msrb.gmra.mxu0 %v6115_v14  ;;  %v9166_v28 = vld [vmem:[#allocation81_spill] sm:$0xff] }
 0x29e   :  { %1536 = vmatmul.f32.vlgmr.msrb.gmra.mxu2 %v6115_v14  ;;  %1697 = vmatpush.msra.mxu3 %v9132_v31  ;;  %v9142_v14 = vld [vmem:[#allocation40_spill] sm:$0xff] }
 0x29f   :  { %1658 = vmatpush.msra.mxu1 %v9133_v46  ;;  %1627 = vmatpush.msra.mxu0 %v9134_v51  ;;  %v9167_v31 = vld [vmem:[#allocation80_spill] sm:$0xff]  ;;  %v9169_v51 = vld [vmem:[#allocation85_spill] sm:$0xff] }
 0x2a0   :  { %1698 = vmatpush.msra.mxu3 %v9135_v44  ;;  %1667 = vmatpush.msra.mxu2 %v9136_v62  ;;  %v9168_v46 = vld [vmem:[#allocation84_spill] sm:$0xff]  ;;  %v9170_v44 = vld [vmem:[#allocation89_spill] sm:$0xff] }
 0x2a1   :  { %1659 = vmatpush.msra.mxu1 %v9137_v54  ;;  %1628 = vmatpush.msra.mxu0 %v9138_v41  ;;  %v9171_v62 = vld [vmem:[#allocation88_spill] sm:$0xff]  ;;  %v9173_v41 = vld [vmem:[#allocation93_spill] sm:$0xff] }
 0x2a2   :  { %1699 = vmatpush.msra.mxu3 %v9139_v8  ;;  %1668 = vmatpush.msra.mxu2 %v9140_v37  ;;  %v9172_v54 = vld [vmem:[#allocation92_spill] sm:$0xff]  ;;  %v9175_v37 = vld [vmem:[#allocation95_spill] sm:$0xff] }
 0x2a3   :  { %1660 = vmatpush.msra.mxu1 %v9141_v47  ;;  %1629 = vmatpush.msra.mxu0 %v9142_v14  ;;  %v9174_v8 = vld [vmem:[#allocation96_spill] sm:$0xff]  ;;  %v9176_v47 = vld [vmem:[#allocation97_spill] sm:$0xff]  ;;  %v9177_v14 = vld [vmem:[#allocation98_spill] sm:$0xff] }
 0x2a4   :  { %1700 = vmatpush.msra.mxu3 %v9143_v49  ;;  %1669 = vmatpush.msra.mxu2 %v9144_v23  ;;  %v9178_v49 = vld [vmem:[#allocation100_spill] sm:$0xff]  ;;  %v9179_v23 = vld [vmem:[#allocation99_spill] sm:$0xff] }
 0x2a5   :  { %1661 = vmatpush.msra.mxu1 %v9145_v2  ;;  %1630 = vmatpush.msra.mxu0 %v9146_v52  ;;  %v9180_v2 = vld [vmem:[#allocation101_spill] sm:$0xff]  ;;  %v9181_v52 = vld [vmem:[#allocation102_spill] sm:$0xff] }
 0x2a6   :  { %1701 = vmatpush.msra.mxu3 %v9147_v40  ;;  %1670 = vmatpush.msra.mxu2 %v9148_v29  ;;  %v9182_v40 = vld [vmem:[#allocation106_spill] sm:$0xff]  ;;  %v9183_v29 = vld [vmem:[#allocation103_spill] sm:$0xff] }
 0x2a7   :  { %1662 = vmatpush.msra.mxu1 %v9149_v63  ;;  %1631 = vmatpush.msra.mxu0 %v9150_v27  ;;  %v9184_v63 = vld [vmem:[#allocation107_spill] sm:$0xff]  ;;  %v9185_v27 = vld [vmem:[#allocation110_spill] sm:$0xff] }
 0x2a8   :  { %1702 = vmatpush.msra.mxu3 %v9151_v24  ;;  %1671 = vmatpush.msra.mxu2 %v9152_v1  ;;  %v9186_v24 = vld [vmem:[#allocation112_spill] sm:$0xff]  ;;  %v9187_v1 = vld [vmem:[#allocation111_spill] sm:$0xff] }
 0x2a9   :  { %1727 = vmatpush.msrb.mxu1 %v9153_v38  ;;  %1632 = vmatpush.msra.mxu0 %v9155_v60  ;;  %v9188_v38 = vld [vmem:[#allocation113_spill] sm:$0xff]  ;;  %v9190_v60 = vld [vmem:[#allocation116_spill] sm:$0xff] }
 0x2aa   :  { %1767 = vmatpush.msrb.mxu3 %v9154_v21  ;;  %1672 = vmatpush.msra.mxu2 %v9156_v26  ;;  %v9189_v21 = vld [vmem:[#allocation114_spill] sm:$0xff]  ;;  %v9191_v26 = vld [vmem:[#allocation115_spill] sm:$0xff] }
 0x2ab   :  { %1728 = vmatpush.msrb.mxu1 %v9157_v10  ;;  %1633 = vmatpush.msra.mxu0 %v9159_v0  ;;  %v9192_v10 = vld [vmem:[#allocation117_spill] sm:$0xff]  ;;  %v9194_v0 = vld [vmem:[#allocation120_spill] sm:$0xff] }
 0x2ac   :  { %1768 = vmatpush.msrb.mxu3 %v9158_v3  ;;  %1673 = vmatpush.msra.mxu2 %v9160_v55  ;;  %v9193_v3 = vld [vmem:[#allocation118_spill] sm:$0xff]  ;;  %v9195_v55 = vld [vmem:[#allocation119_spill] sm:$0xff] }
 0x2ad   :  { %1729 = vmatpush.msrb.mxu1 %v9161_v56  ;;  %1634 = vmatpush.msra.mxu0 %v9163_v25  ;;  %v9196_v56 = vld [vmem:[#allocation121_spill] sm:$0xff]  ;;  %v9198_v25 = vld [vmem:[#allocation124_spill] sm:$0xff] }
 0x2ae   :  { %1769 = vmatpush.msrb.mxu3 %v9162_v57  ;;  %1674 = vmatpush.msra.mxu2 %v9164_v32  ;;  %v9197_v57 = vld [vmem:[#allocation122_spill] sm:$0xff]  ;;  %v9199_v32 = vld [vmem:[#allocation123_spill] sm:$0xff] }
 0x2af   :  { %1730 = vmatpush.msrb.mxu1 %v9165_v18  ;;  %1635 = vmatpush.msra.mxu0 %v9167_v31  ;;  %v9200_v18 = vld [vmem:[#allocation125_spill] sm:$0xff]  ;;  %v9202_v31 = vld [vmem:[#allocation128_spill] sm:$0xff] }
 0x2b0   :  { %1770 = vmatpush.msrb.mxu3 %v9166_v28  ;;  %1675 = vmatpush.msra.mxu2 %v9168_v46  ;;  %v9201_v28 = vld [vmem:[#allocation126_spill] sm:$0xff]  ;;  %v9203_v46 = vld [vmem:[#allocation127_spill] sm:$0xff] }
 0x2b1   :  { %1731 = vmatpush.msrb.mxu1 %v9169_v51  ;;  %1636 = vmatpush.msra.mxu0 %v9171_v62  ;;  %v9204_v51 = vld [vmem:[#allocation129_spill] sm:$0xff]  ;;  %v9206_v62 = vld [vmem:[#allocation132_spill] sm:$0xff] }
 0x2b2   :  { %1771 = vmatpush.msrb.mxu3 %v9170_v44  ;;  %1676 = vmatpush.msra.mxu2 %v9172_v54  ;;  %v9205_v44 = vld [vmem:[#allocation130_spill] sm:$0xff]  ;;  %v9207_v54 = vld [vmem:[#allocation131_spill] sm:$0xff] }
 0x2b3   :  { %1732 = vmatpush.msrb.mxu1 %v9173_v41  ;;  %1637 = vmatpush.msra.mxu0 %v9175_v37  ;;  %v9208_v41 = vld [vmem:[#allocation133_spill] sm:$0xff]  ;;  %v9210_v37 = vld [vmem:[#allocation136_spill] sm:$0xff] }
 0x2b4   :  { %1772 = vmatpush.msrb.mxu3 %v9174_v8  ;;  %1677 = vmatpush.msra.mxu2 %v9176_v47  ;;  %v9209_v8 = vld [vmem:[#allocation134_spill] sm:$0xff]  ;;  %v9211_v47 = vld [vmem:[#allocation135_spill] sm:$0xff] }
 0x2b5   :  { %1733 = vmatpush.msrb.mxu1 %v9177_v14  ;;  %1638 = vmatpush.msra.mxu0 %v9179_v23  ;;  %v9212_v14 = vld [vmem:[#allocation137_spill] sm:$0xff]  ;;  %v9214_v23 = vld [vmem:[#allocation140_spill] sm:$0xff] }
 0x2b6   :  { %1773 = vmatpush.msrb.mxu3 %v9178_v49  ;;  %1678 = vmatpush.msra.mxu2 %v9180_v2  ;;  %v9213_v49 = vld [vmem:[#allocation138_spill] sm:$0xff]  ;;  %v9215_v2 = vld [vmem:[#allocation139_spill] sm:$0xff] }
 0x2b7   :  { %1734 = vmatpush.msrb.mxu1 %v9181_v52  ;;  %1639 = vmatpush.msra.mxu0 %v9183_v29  ;;  %v9216_v52 = vld [vmem:[#allocation141_spill] sm:$0xff]  ;;  %v9218_v29 = vld [vmem:[#allocation143_spill] sm:$0xff] }
 0x2b8   :  { %1774 = vmatpush.msrb.mxu3 %v9182_v40  ;;  %1679 = vmatpush.msra.mxu2 %v9184_v63  ;;  %v9217_v40 = vld [vmem:[#allocation142_spill] sm:$0xff]  ;;  %v9219_v63 = vld [vmem:[#allocation144_spill] sm:$0xff] }
 0x2b9   :  { %1735 = vmatpush.msrb.mxu1 %v9185_v27  ;;  %1640 = vmatpush.msra.mxu0 %v9187_v1  ;;  %v9220_v27 = vld [vmem:[#allocation145_spill] sm:$0xff]  ;;  %v9222_v1 = vld [vmem:[#allocation147_spill] sm:$0xff] }
 0x2ba   :  { %1775 = vmatpush.msrb.mxu3 %v9186_v24  ;;  %1680 = vmatpush.msra.mxu2 %v9188_v38  ;;  %v9221_v24 = vld [vmem:[#allocation146_spill] sm:$0xff]  ;;  %v9223_v38 = vld [vmem:[#allocation148_spill] sm:$0xff] }
 0x2bb   :  { %1736 = vmatpush.msrb.mxu1 %v9189_v21  ;;  %1641 = vmatpush.msra.mxu0 %v9191_v26  ;;  %v9224_v21 = vld [vmem:[#allocation149_spill] sm:$0xff]  ;;  %v9226_v26 = vld [vmem:[#allocation151_spill] sm:$0xff] }
 0x2bc   :  { %1776 = vmatpush.msrb.mxu3 %v9190_v60  ;;  %1681 = vmatpush.msra.mxu2 %v9192_v10  ;;  %v9225_v60 = vld [vmem:[#allocation150_spill] sm:$0xff]  ;;  %v9227_v10 = vld [vmem:[#allocation152_spill] sm:$0xff] }
 0x2bd   :  { %1737 = vmatpush.msrb.mxu1 %v9193_v3  ;;  %1642 = vmatpush.msra.mxu0 %v9195_v55  ;;  %v9228_v3 = vld [vmem:[#allocation153_spill] sm:$0xff]  ;;  %v9230_v55 = vld [vmem:[#allocation155_spill] sm:$0xff] }
 0x2be   :  { %1777 = vmatpush.msrb.mxu3 %v9194_v0  ;;  %1682 = vmatpush.msra.mxu2 %v9196_v56  ;;  %v9229_v0 = vld [vmem:[#allocation154_spill] sm:$0xff]  ;;  %v9231_v56 = vld [vmem:[#allocation156_spill] sm:$0xff] }
 0x2bf   :  { %1738 = vmatpush.msrb.mxu1 %v9197_v57  ;;  %1707 = vmatpush.msrb.mxu0 %v9199_v32  ;;  %v9232_v57 = vld [vmem:[#allocation157_spill] sm:$0xff]  ;;  %v9234_v32 = vld [vmem:[#allocation159_spill] sm:$0xff] }
 0x2c0   :  { %1778 = vmatpush.msrb.mxu3 %v9198_v25  ;;  %1747 = vmatpush.msrb.mxu2 %v9200_v18  ;;  %v9233_v25 = vld [vmem:[#allocation158_spill] sm:$0xff]  ;;  %v9235_v18 = vld [vmem:[#allocation160_spill] sm:$0xff] }
 0x2c1   :  { %1739 = vmatpush.msrb.mxu1 %v9201_v28  ;;  %1708 = vmatpush.msrb.mxu0 %v9203_v46  ;;  %v9236_v28 = vld [vmem:[#allocation161_spill] sm:$0xff]  ;;  %v9238_v46 = vld [vmem:[#allocation163_spill] sm:$0xff] }
 0x2c2   :  { %1779 = vmatpush.msrb.mxu3 %v9202_v31  ;;  %1748 = vmatpush.msrb.mxu2 %v9204_v51  ;;  %v9237_v31 = vld [vmem:[#allocation162_spill] sm:$0xff] }
 0x2c3   :  { %1740 = vmatpush.msrb.mxu1 %v9205_v44  ;;  %1709 = vmatpush.msrb.mxu0 %v9207_v54 }
 0x2c4   :  { %1780 = vmatpush.msrb.mxu3 %v9206_v62  ;;  %1749 = vmatpush.msrb.mxu2 %v9208_v41  ;;  %v9239_v62 = vld [vmem:[#allocation25_spill] sm:$0xff] }
 0x2c5   :  { %1741 = vmatpush.msrb.mxu1 %v9209_v8  ;;  %1710 = vmatpush.msrb.mxu0 %v9211_v47 }
 0x2c6   :  { %1781 = vmatpush.msrb.mxu3 %v9210_v37  ;;  %1750 = vmatpush.msrb.mxu2 %v9212_v14  ;;  %v6342_v37 = vpop.permute.xlu1 %1469  ;;  %v9240_v14 = vld [vmem:[#allocation105_spill] sm:$0xff] }
 0x2c7   :  { %1742 = vmatpush.msrb.mxu1 %v9213_v49  ;;  %1711 = vmatpush.msrb.mxu0 %v9215_v2  ;;  %v1473_v49 = vmul.f32 %v6342_v37, %v9240_v14  ;;  %v9241_v2 = vld [vmem:[#allocation26_spill] sm:$0xff] }
 0x2c8   :  { %1782 = vmatpush.msrb.mxu3 %v9214_v23  ;;  %1751 = vmatpush.msrb.mxu2 %v9216_v52 }
 0x2c9   :  { %1712 = vmatpush.msrb.mxu0 %v9217_v40 }
 0x2ca   :  { %1752 = vmatpush.msrb.mxu2 %v9218_v29 }
 0x2cb   :  { %1713 = vmatpush.msrb.mxu0 %v9219_v63 }
 0x2cc   :  { %1753 = vmatpush.msrb.mxu2 %v9220_v27  ;;  %v9242_v27 = vld [vmem:[#allocation109_spill] sm:$0xff] }
 0x2cd   :  { %1714 = vmatpush.msrb.mxu0 %v9221_v24  ;;  %v1477_v24 = vadd.f32 %v1473_v49, %v9242_v27 }
 0x2ce   :  { %1754 = vmatpush.msrb.mxu2 %v9222_v1  ;;  %v9243_v1 = vld [vmem:[#allocation27_spill] sm:$0xff] }
 0x2cf   :  { %1715 = vmatpush.msrb.mxu0 %v9223_v38 }
 0x2d0   :  { %1755 = vmatpush.msrb.mxu2 %v9224_v21 }
 0x2d1   :  { %1716 = vmatpush.msrb.mxu0 %v9225_v60 }
 0x2d2   :  { %1756 = vmatpush.msrb.mxu2 %v9226_v26 }
 0x2d3   :  { %1717 = vmatpush.msrb.mxu0 %v9227_v10 }
 0x2d4   :  { %1757 = vmatpush.msrb.mxu2 %v9228_v3 }
 0x2d5   :  { %1718 = vmatpush.msrb.mxu0 %v9229_v0 }
 0x2d6   :  { %1758 = vmatpush.msrb.mxu2 %v9230_v55 }
 0x2d7   :  { %1719 = vmatpush.msrb.mxu0 %v9231_v56 }
 0x2d8   :  { %1759 = vmatpush.msrb.mxu2 %v9232_v57 }
 0x2d9   :  { %1720 = vmatpush.msrb.mxu0 %v9233_v25 }
 0x2da   :  { %1760 = vmatpush.msrb.mxu2 %v9234_v32 }
 0x2db   :  { %1721 = vmatpush.msrb.mxu0 %v9235_v18 }
 0x2dc   :  { %1761 = vmatpush.msrb.mxu2 %v9236_v28 }
 0x2dd   :  { %1722 = vmatpush.msrb.mxu0 %v9237_v31 }
 0x2de   :  { %1762 = vmatpush.msrb.mxu2 %v9238_v46  ;;  %v9244_v46 = vld [vmem:[#allocation28_spill] sm:$0xff] }
 0x2e1   :  { %v1279_v51 = vpop.f32.mrf.mxu1 }
 0x2e7   :  { %v1319_v40 = vpop.f32.mrf.mxu3 }
 0x2e9   :  { %v1359_v41 = vpop.f32.mrf.mxu1 }
 0x2f9   :  { %v1259_v44 = vpop.f32.mrf.mxu0 }
 0x2fa   :  { %v1260_v54 = vadd.f32 %v1259_v44, %v9239_v62 }
 0x2fc   :  { %v1280_v8 = vadd.f32 %v1279_v51, %v1260_v54 }
 0x2fe   :  { %v3473_v47 = vmul.f32 -1.442695, %v1280_v8  ;;  %v1399_v8 = vpop.f32.mrf.mxu3 }
 0x2ff   :  { %v1299_v23 = vpop.f32.mrf.mxu2 }
 0x300   :  { %3605 = vpow2.f32 %v3473_v47  ;;  %v1300_v52 = vadd.f32 %v1299_v23, %v9241_v2 }
 0x302   :  { %v1320_v29 = vadd.f32 %v1319_v40, %v1300_v52  ;;  %v1339_v63 = vpop.f32.mrf.mxu0  ;;  %v9245_v40 = vld [vmem:[#allocation104_spill] sm:$0xff] }
 0x303   :  { %v1340_v38 = vadd.f32 %v1339_v63, %v9243_v1  ;;  %v1517_v21 = vpop.f32.mrf.mxu1 }
 0x304   :  { %v3474_v60 = vmul.f32 -1.442695, %v1320_v29  ;;  %v1561_v26 = vadd.f32 %v1517_v21, %v1477_v24  ;;  %v1472_v29 = vmul.f32 %v6342_v37, %v9245_v40 }
 0x305   :  { %v1360_v10 = vadd.f32 %v1359_v41, %v1340_v38 }
 0x306   :  { %v3606_v3 = vpop.eup %3605  ;;  %3607 = vpow2.f32 %v3474_v60  ;;  %v3478_v56 = vmul.f32 -1.442695, %v1561_v26 }
 0x307   :  { %v1411_v0 = vadd.f32 1.0, %v3606_v3  ;;  %v3475_v55 = vmul.f32 -1.442695, %v1360_v10 }
 0x308   :  { %v1379_v32 = vpop.f32.mrf.mxu2 }
 0x309   :  { %3609 = vrcp.f32 %v1411_v0  ;;  %v1380_v51 = vadd.f32 %v1379_v32, %v9244_v46  ;;  %v1425_v38 = vand.u32 2147483648, %v1411_v0  ;;  %vm1419_vm13 = vweird.f32 %v1411_v0 }
 0x30a   :  { %3611 = vpow2.f32 %v3475_v55  ;;  %v1423_v60 = vand.u32 2147483647, %v1411_v0 }
 0x30b   :  { %3613 = vpow2.f32 %v3478_v56  ;;  %v1400_v47 = vadd.f32 %v1399_v8, %v1380_v51  ;;  %v9248_v56 = vld [vmem:[#allocation108_spill] sm:$0xff]  ;;  %v1426_v51 = vor.u32 1.1754944e-38, %v1425_v38 }
 0x30c   :  { %v3608_v57 = vpop.eup %3607  ;;  %vm1424_vm1 = vcmp.eq.f32.partialorder %v1423_v60, 8.507059e+37 }
 0x30d   :  { %v1412_v25 = vadd.f32 1.0, %v3608_v57  ;;  %v1476_v57 = vadd.f32 %v1472_v29, %v9248_v56 }
 0x30f   :  { %v3610_v18 = vpop.eup %3609  ;;  %3615 = vrcp.f32 %v1412_v25  ;;  %v1440_v10 = vand.u32 2147483648, %v1412_v25  ;;  %v1438_v55 = vand.u32 2147483647, %v1412_v25  ;;  %vm1434_vm0 = vweird.f32 %v1412_v25 }
 0x310   :  { %v3612_v28 = vpop.eup %3611  ;;  %v1415_v31 = vmul.f32 %v3610_v18, %v1411_v0  ;;  %vm1420_vm12 = vweird.f32 %v3610_v18 }
 0x311   :  { %v6350_v44 = vadd.f32 1.0, %v3612_v28  ;;  %v3614_v54 = vpop.eup %3613  ;;  %vm6358_vm14 = vmor %vm1419_vm13, %vm1420_vm12  ;;  %vm1439_vm3 = vcmp.eq.f32.partialorder %v1438_v55, 8.507059e+37 }
 0x312   :  { %v1416_v41 = vsub.f32 1.0, %v1415_v31  ;;  %v6353_v52 = vadd.f32 1.0, %v3614_v54 }
 0x313   :  { %3617 = vrcp.f32 %v6350_v44  ;;  %v1455_v55 = vand.u32 2147483648, %v6350_v44  ;;  %vm1449_vm5 = vweird.f32 %v6350_v44 }
 0x314   :  { %v1417_v49 = vmul.f32 %v3610_v18, %v1416_v41  ;;  %3619 = vtanh.f32 %v1400_v47  ;;  %v1474_v41 = vmul.f32 %v6342_v37, %v5060_v20  ;;  %vm1596_vm9 = vweird.f32 %v6353_v52 }
 0x315   :  { %v3616_v23 = vpop.eup %3615  ;;  %3621 = vrcp.f32 %v6353_v52 }
 0x316   :  { %v1430_v63 = vmul.f32 %v3616_v23, %v1412_v25  ;;  %v1418_v24 = vadd.f32 %v3610_v18, %v1417_v49  ;;  %vm1435_vm15 = vweird.f32 %v3616_v23  ;;  %v1441_v49 = vor.u32 1.1754944e-38, %v1440_v10 }
 0x317   :  { %vm1436_vm2 = vmor %vm1434_vm0, %vm1435_vm15  ;;  %v1478_v25 = vadd.f32 %v1474_v41, %v5081_v4  ;;  %v1456_v41 = vor.u32 1.1754944e-38, %v1455_v55 }
 0x318   :  { %v1431_v21 = vsub.f32 1.0, %v1430_v63  ;;  %v1422_v31 = vsel %vm6358_vm14, %v3610_v18, %v1418_v24 }
 0x319   :  { %v3618_v26 = vpop.eup %3617  ;;  %v1427_v29 = vsel %vm1424_vm1, %v1426_v51, %v1422_v31 }
 0x31a   :  { %v1432_v32 = vmul.f32 %v3616_v23, %v1431_v21  ;;  %v1445_v28 = vmul.f32 %v3618_v26, %v6350_v44  ;;  %v1497_v0 = vpop.f32.mrf.mxu0  ;;  %v3620_v21 = vpop.eup %3619  ;;  %vm1450_vm4 = vweird.f32 %v3618_v26 }
 0x31b   :  { %v1560_v54 = vadd.f32 %v1497_v0, %v1476_v57  ;;  %v6368_v40 = vpop.eup %3621  ;;  %v1461_v3 = vmul.f32 %v3620_v21, %v1427_v29  ;;  %vm1451_vm6 = vmor %vm1449_vm5, %vm1450_vm4  ;;  %v1557_v29 = vpop.f32.mrf.mxu3 }
 0x31c   :  { %v1446_v8 = vsub.f32 1.0, %v1445_v28  ;;  %v1433_v47 = vadd.f32 %v3616_v23, %v1432_v32  ;;  %v1592_v10 = vmul.f32 %v6368_v40, %v6353_v52  ;;  %vm1597_vm8 = vweird.f32 %v6368_v40 }
 0x31d   :  { %v3477_v63 = vmul.f32 -1.442695, %v1560_v54  ;;  %v1475_v54 = vmul.f32 %v6342_v37, %v5115_v42  ;;  %v6389_v37 = vld [vmem:[#allocation6 + $0x1e8] sm:$0xff]  ;;  %vm6408_vm10 = vmor %vm1596_vm9, %vm1597_vm8 }
 0x31e   :  { %v1437_v56 = vsel %vm1436_vm2, %v3616_v23, %v1433_v47  ;;  %v1447_v24 = vmul.f32 %v3618_v26, %v1446_v8  ;;  %v1593_v0 = vsub.f32 1.0, %v1592_v10  ;;  %v6403_v10 = vld [vmem:[#allocation6 + $0x1d8] sm:$0xff] }
 0x31f   :  { %v1442_v18 = vsel %vm1439_vm3, %v1441_v49, %v1437_v56  ;;  %3623 = vpow2.f32 %v3477_v63  ;;  %v1479_v21 = vadd.f32 %v1475_v54, %v5141_v58 }
 0x320   :  { %v1460_v38 = vmul.f32 %v1442_v18, %v6058_v43  ;;  %v1448_v28 = vadd.f32 %v3618_v26, %v1447_v24  ;;  %v1453_v43 = vand.u32 2147483647, %v6350_v44  ;;  %v1594_v49 = vmul.f32 %v6368_v40, %v1593_v0  ;;  %v6416_v0 = vld [vmem:[#allocation6 + $0x1b8] sm:$0xff] }
 0x321   :  { %v1537_v57 = vpop.f32.mrf.mxu2  ;;  %v1563_v24 = vadd.f32 %v1557_v29, %v1479_v21 }
 0x322   :  { %v6372_v60 = vadd.f32 %v1461_v3, %v1460_v38  ;;  %v1562_v32 = vadd.f32 %v1537_v57, %v1478_v25  ;;  %v1452_v51 = vsel %vm1451_vm6, %v3618_v26, %v1448_v28  ;;  %vm1454_vm7 = vcmp.eq.f32.partialorder %v1453_v43, 8.507059e+37  ;;  %v6392_v38 = vld [vmem:[#allocation6 + $0x1f8] sm:$0xff]  ;;  %v6413_v43 = vld [vmem:[#allocation6 + $0x1a8] sm:$0xff] }
 0x323   :  { %v1457_v47 = vsel %vm1454_vm7, %v1456_v41, %v1452_v51  ;;  %v1595_v3 = vadd.f32 %v6368_v40, %v1594_v49  ;;  %v1602_v57 = vand.u32 2147483648, %v6353_v52  ;;  %v1600_v28 = vand.u32 2147483647, %v6353_v52 }
 0x324   :  { %3625 = vtanh.f32 %v6372_v60  ;;  %v3479_v23 = vmul.f32 -1.442695, %v1562_v32  ;;  %v6400_v32 = vld [vmem:[#allocation6 + $0x1c8] sm:$0xff] }
 0x325   :  { %v3624_v56 = vpop.eup %3623  ;;  %v1599_v52 = vsel %vm6408_vm10, %v6368_v40, %v1595_v3  ;;  %v1603_v41 = vor.u32 1.1754944e-38, %v1602_v57  ;;  %vm1601_vm12 = vcmp.eq.f32.partialorder %v1600_v28, 8.507059e+37  ;;  %v6434_v3 = vld [vmem:[#allocation6 + $0x178] sm:$0xff] }
 0x326   :  { %v6380_v31 = vadd.f32 1.0, %v3624_v56  ;;  %3627 = vpow2.f32 %v3479_v23 }
 0x327   :  { %v1604_v40 = vsel %vm1601_vm12, %v1603_v41, %v1599_v52 }
 0x328   :  { %3629 = vrcp.f32 %v6380_v31  ;;  %v1587_v56 = vand.u32 2147483648, %v6380_v31  ;;  %v1585_v54 = vand.u32 2147483647, %v6380_v31  ;;  %vm1581_vm13 = vweird.f32 %v6380_v31 }
 0x329   :  { %v1622_v55 = vmul.f32 %v1604_v40, %v6101_v5 }
 0x32a   :  { %v3626_v8 = vpop.eup %3625  ;;  %vm1586_vm15 = vcmp.eq.f32.partialorder %v1585_v54, 8.507059e+37 }
 0x32b   :  { %v1464_v63 = vmul.f32 %v3626_v8, %v1457_v47  ;;  %v6423_v8 = vld [vmem:[#allocation6 + $0x188] sm:$0xff]  ;;  %v6426_v47 = vld [vmem:[#allocation6 + $0x198] sm:$0xff] }
 0x32c   :  { %v3628_v44 = vpop.eup %3627 }
 0x32d   :  { %v6387_v18 = vadd.f32 1.0, %v3628_v44  ;;  %1663 = vmatmul.f32.vlgmr.msra.gmra.mxu1 %v1464_v63  ;;  %1703 = vmatmul.f32.vlgmr.msra.gmra.mxu3 %v1464_v63  ;;  %v1588_v44 = vor.u32 1.1754944e-38, %v1587_v56 }
 0x32e   :  { %v3630_v26 = vpop.eup %3629  ;;  %1885 = vmatpush.msra.mxu1 %v6389_v37  ;;  %1925 = vmatpush.msra.mxu3 %v6392_v38 }
 0x32f   :  { %v1577_v25 = vmul.f32 %v3630_v26, %v6380_v31  ;;  %3631 = vrcp.f32 %v6387_v18  ;;  %vm1582_vm11 = vweird.f32 %v3630_v26  ;;  %v1617_v5 = vand.u32 2147483648, %v6387_v18 }
 0x330   :  { %1886 = vmatpush.msra.mxu1 %v6400_v32  ;;  %1926 = vmatpush.msra.mxu3 %v6403_v10  ;;  %3633 = vtanh.f32 %v1563_v24  ;;  %vm1583_vm14 = vmor %vm1581_vm13, %vm1582_vm11  ;;  %v6431_v24 = vld [vmem:[#allocation6 + $0x168] sm:$0xff]  ;;  %vm1611_vm1 = vweird.f32 %v6387_v18  ;;  %v1615_v40 = vand.u32 2147483647, %v6387_v18 }
 0x331   :  { %v1578_v23 = vsub.f32 1.0, %v1577_v25 }
 0x332   :  { %1887 = vmatpush.msra.mxu1 %v6413_v43  ;;  %1927 = vmatpush.msra.mxu3 %v6416_v0  ;;  %vm1616_vm3 = vcmp.eq.f32.partialorder %v1615_v40, 8.507059e+37  ;;  %v6495_v40 = vld [vmem:[#allocation6 + $0x78] sm:$0xff] }
 0x333   :  { %v1579_v51 = vmul.f32 %v3630_v26, %v1578_v23  ;;  %v6437_v23 = vld [vmem:[#allocation6 + $0x148] sm:$0xff] }
 0x334   :  { %1888 = vmatpush.msra.mxu1 %v6423_v8  ;;  %1928 = vmatpush.msra.mxu3 %v6426_v47 }
 0x335   :  { %v3632_v49 = vpop.eup %3631  ;;  %v1580_v29 = vadd.f32 %v3630_v26, %v1579_v51  ;;  %1743 = vmatmul.f32.vlgmr.msrb.gmra.mxu1 %v1464_v63  ;;  %1783 = vmatmul.f32.vlgmr.msrb.gmra.mxu3 %v1464_v63  ;;  %v6440_v63 = vld [vmem:[#allocation6 + $0x158] sm:$0xff]  ;;  %v6444_v51 = vld [vmem:[#allocation6 + $0x128] sm:$0xff] }
 0x336   :  { %v1607_v21 = vmul.f32 %v3632_v49, %v6387_v18  ;;  %1889 = vmatpush.msra.mxu1 %v6431_v24  ;;  %1929 = vmatpush.msra.mxu3 %v6434_v3  ;;  %v3634_v57 = vpop.eup %3633  ;;  %vm1612_vm0 = vweird.f32 %v3632_v49  ;;  %v6474_v18 = vld [vmem:[#allocation6 + $0xa8] sm:$0xff] }
 0x337   :  { %v1584_v25 = vsel %vm1583_vm14, %v3630_v26, %v1580_v29  ;;  %v6447_v26 = vld [vmem:[#allocation6 + $0x138] sm:$0xff]  ;;  %v6452_v29 = vld [vmem:[#allocation6 + $0x108] sm:$0xff]  ;;  %vm1613_vm2 = vmor %vm1611_vm1, %vm1612_vm0 }
 0x338   :  { %v1589_v28 = vsel %vm1586_vm15, %v1588_v44, %v1584_v25  ;;  %v1608_v31 = vsub.f32 1.0, %v1607_v21  ;;  %1890 = vmatpush.msra.mxu1 %v6437_v23  ;;  %1930 = vmatpush.msra.mxu3 %v6440_v63  ;;  %v6455_v44 = vld [vmem:[#allocation6 + $0x118] sm:$0xff]  ;;  %v6462_v21 = vld [vmem:[#allocation6 + $0xe8] sm:$0xff] }
 0x339   :  { %v1623_v56 = vmul.f32 %v3634_v57, %v1589_v28  ;;  %v6465_v25 = vld [vmem:[#allocation6 + $0xf8] sm:$0xff]  ;;  %v6468_v28 = vld [vmem:[#allocation6 + $0xc8] sm:$0xff] }
 0x33a   :  { %v1609_v52 = vmul.f32 %v3632_v49, %v1608_v31  ;;  %1891 = vmatpush.msra.mxu1 %v6444_v51  ;;  %1931 = vmatpush.msra.mxu3 %v6447_v26  ;;  %9251 = vst [vmem:[#allocation29_spill] sm:$0xff] %v6465_v25  ;;  %v6471_v31 = vld [vmem:[#allocation6 + $0xd8] sm:$0xff] }
 0x33b   :  { %v6450_v54 = vadd.f32 %v1623_v56, %v1622_v55  ;;  %9252 = vst [vmem:[#allocation30_spill] sm:$0xff] %v6468_v28  ;;  %v1618_v55 = vor.u32 1.1754944e-38, %v1617_v5  ;;  %v6477_v56 = vld [vmem:[#allocation6 + $0xb8] sm:$0xff]  ;;  %v6492_v5 = vld [vmem:[#allocation6 + $0x68] sm:$0xff] }
 0x33c   :  { %v1610_v41 = vadd.f32 %v3632_v49, %v1609_v52  ;;  %1892 = vmatpush.msra.mxu1 %v6452_v29  ;;  %1932 = vmatpush.msra.mxu3 %v6455_v44 }
 0x33d   :  { %3635 = vtanh.f32 %v6450_v54 }
 0x33e   :  { %1893 = vmatpush.msra.mxu1 %v6462_v21  ;;  %1933 = vmatpush.msra.mxu3 %v6465_v25  ;;  %v1614_v57 = vsel %vm1613_vm2, %v3632_v49, %v1610_v41  ;;  %v6482_v25 = vld [vmem:[#allocation6 + $0x88] sm:$0xff] }
 0x33f   :  { %v1619_v49 = vsel %vm1616_vm3, %v1618_v55, %v1614_v57  ;;  %v6500_v57 = vld [vmem:[#allocation6 + $0x48] sm:$0xff]  ;;  %v6503_v55 = vld [vmem:[#allocation6 + $0x58] sm:$0xff] }
 0x340   :  { %1894 = vmatpush.msra.mxu1 %v6468_v28  ;;  %1934 = vmatpush.msra.mxu3 %v6471_v31  ;;  %v6485_v28 = vld [vmem:[#allocation6 + $0x98] sm:$0xff] }
 0x342   :  { %1895 = vmatpush.msra.mxu1 %v6474_v18  ;;  %1935 = vmatpush.msra.mxu3 %v6477_v56 }
 0x343   :  { %v3636_v52 = vpop.eup %3635 }
 0x344   :  { %v6480_v41 = vmul.f32 %v3636_v52, %v1619_v49  ;;  %1896 = vmatpush.msra.mxu1 %v6482_v25  ;;  %1936 = vmatpush.msra.mxu3 %v6485_v28  ;;  %v6598_v52 = vld [vmem:[#allocation6 + $0x40] sm:$0xff] }
 0x345   :  { %9271 = vst [vmem:[#allocation59_spill] sm:$0xff] %v6598_v52  ;;  %v6601_v49 = vld [vmem:[#allocation9 + $0x300] sm:$0xff] }
 0x346   :  { %1643 = vmatmul.f32.vlgmr.msra.gmra.mxu0 %v6480_v41  ;;  %1683 = vmatmul.f32.vlgmr.msra.gmra.mxu2 %v6480_v41  ;;  %9272 = vst [vmem:[#allocation17_spill] sm:$0xff] %v6601_v49 }
 0x347   :  { %1865 = vmatpush.msra.mxu0 %v6121_v9  ;;  %1905 = vmatpush.msra.mxu2 %v6124_v50  ;;  %v6508_v9 = vld [vmem:[#allocation6 + $0x28] sm:$0xff]  ;;  %v6511_v50 = vld [vmem:[#allocation6 + $0x38] sm:$0xff] }
 0x348   :  { %1897 = vmatpush.msra.mxu1 %v6492_v5  ;;  %1937 = vmatpush.msra.mxu3 %v6495_v40 }
 0x349   :  { %1866 = vmatpush.msra.mxu0 %v6129_v22  ;;  %1906 = vmatpush.msra.mxu2 %v6132_v39  ;;  %v6516_v22 = vld [vmem:[#allocation6 + $0x8] sm:$0xff]  ;;  %v6519_v39 = vld [vmem:[#allocation6 + $0x18] sm:$0xff] }
 0x34a   :  { %1898 = vmatpush.msra.mxu1 %v6500_v57  ;;  %1938 = vmatpush.msra.mxu3 %v6503_v55  ;;  %9253 = vst [vmem:[#allocation31_spill] sm:$0xff] %v6519_v39 }
 0x34b   :  { %1867 = vmatpush.msra.mxu0 %v6137_v15  ;;  %1907 = vmatpush.msra.mxu2 %v6140_v59  ;;  %v3483_v15 = vld [vmem:[%s8199_s0 + $0x20] sm:$0xff] }
 0x34c   :  { %1899 = vmatpush.msra.mxu1 %v6508_v9  ;;  %1939 = vmatpush.msra.mxu3 %v6511_v50  ;;  %v6533_v59 = vld [vmem:[#allocation9 + $0x3e0] sm:$0xff] }
 0x34d   :  { %1868 = vmatpush.msra.mxu0 %v6145_v36  ;;  %1908 = vmatpush.msra.mxu2 %v6148_v35  ;;  %9254 = vst [vmem:[#allocation32_spill] sm:$0xff] %v6533_v59  ;;  %v6537_v36 = vld [vmem:[#allocation9 + $0x3e8] sm:$0xff]  ;;  %v6541_v35 = vld [vmem:[#allocation9 + $0x3c0] sm:$0xff] }
 0x34e   :  { %1900 = vmatpush.msra.mxu1 %v6516_v22  ;;  %1940 = vmatpush.msra.mxu3 %v6519_v39  ;;  %9255 = vst [vmem:[#allocation33_spill] sm:$0xff] %v6537_v36 }
 0x34f   :  { %1723 = vmatmul.f32.vlgmr.msrb.gmra.mxu0 %v6480_v41  ;;  %1763 = vmatmul.f32.vlgmr.msrb.gmra.mxu2 %v6480_v41  ;;  %9256 = vst [vmem:[#allocation34_spill] sm:$0xff] %v6541_v35 }
 0x350   :  { %1869 = vmatpush.msra.mxu0 %v6155_v7  ;;  %1901 = vmatmul.f32.vlgmr.msra.gmra.mxu1 %v6480_v41  ;;  %v6545_v7 = vld [vmem:[#allocation9 + $0x3c8] sm:$0xff] }
 0x351   :  { %1909 = vmatpush.msra.mxu2 %v6159_v12  ;;  %1941 = vmatmul.f32.vlgmr.msra.gmra.mxu3 %v6480_v41  ;;  %9257 = vst [vmem:[#allocation35_spill] sm:$0xff] %v6545_v7  ;;  %v3490_v12 = vld [vmem:[%s8199_s0 + $0x28] sm:$0xff] }
 0x352   :  { %1870 = vmatpush.msra.mxu0 %v6163_v53  ;;  %1854 = vperm.xlu2 %3523, %v3483_v15   ;;  %v6552_v53 = vld [vmem:[#allocation9 + $0x3a0] sm:$0xff]  ;;  %v6604_v15 = vld [vmem:[#allocation6 + $0x50] sm:$0xff] }
 0x353   :  { %1910 = vmatpush.msra.mxu2 %v6167_v11  ;;  %2032 = vmatpush.msrb.mxu1 %v6533_v59  ;;  %9258 = vst [vmem:[#allocation38_spill] sm:$0xff] %v6552_v53  ;;  %v6556_v11 = vld [vmem:[#allocation9 + $0x3a8] sm:$0xff] }
 0x354   :  { %1871 = vmatpush.msra.mxu0 %v6171_v13  ;;  %2072 = vmatpush.msrb.mxu3 %v6537_v36  ;;  %9259 = vst [vmem:[#allocation39_spill] sm:$0xff] %v6556_v11  ;;  %v6560_v13 = vld [vmem:[#allocation9 + $0x380] sm:$0xff] }
 0x355   :  { %1911 = vmatpush.msra.mxu2 %v6175_v19  ;;  %2033 = vmatpush.msrb.mxu1 %v6541_v35  ;;  %9260 = vst [vmem:[#allocation42_spill] sm:$0xff] %v6560_v13  ;;  %v6565_v19 = vld [vmem:[#allocation9 + $0x388] sm:$0xff] }
 0x356   :  { %1872 = vmatpush.msra.mxu0 %v6179_v30  ;;  %2073 = vmatpush.msrb.mxu3 %v6545_v7  ;;  %9261 = vst [vmem:[#allocation43_spill] sm:$0xff] %v6565_v19  ;;  %v6569_v30 = vld [vmem:[#allocation9 + $0x360] sm:$0xff] }
 0x357   :  { %1912 = vmatpush.msra.mxu2 %v6183_v16  ;;  %2034 = vmatpush.msrb.mxu1 %v6552_v53  ;;  %9262 = vst [vmem:[#allocation46_spill] sm:$0xff] %v6569_v30  ;;  %v6573_v16 = vld [vmem:[#allocation9 + $0x368] sm:$0xff] }
 0x358   :  { %1873 = vmatpush.msra.mxu0 %v6187_v45  ;;  %2074 = vmatpush.msrb.mxu3 %v6556_v11  ;;  %9263 = vst [vmem:[#allocation47_spill] sm:$0xff] %v6573_v16  ;;  %v6577_v45 = vld [vmem:[#allocation9 + $0x340] sm:$0xff] }
 0x359   :  { %1913 = vmatpush.msra.mxu2 %v6191_v61  ;;  %2035 = vmatpush.msrb.mxu1 %v6560_v13  ;;  %9264 = vst [vmem:[#allocation50_spill] sm:$0xff] %v6577_v45  ;;  %v6580_v61 = vld [vmem:[#allocation6 + $0x90] sm:$0xff] }
 0x35a   :  { %1874 = vmatpush.msra.mxu0 %v6195_v6  ;;  %2239 = vperm.xlu2 %3523, %v3490_v12   ;;  %9265 = vst [vmem:[#allocation54_spill] sm:$0xff] %v6580_v61  ;;  %v6583_v6 = vld [vmem:[#allocation9 + $0x348] sm:$0xff] }
 0x35b   :  { %1914 = vmatpush.msra.mxu2 %v6199_v48  ;;  %2075 = vmatpush.msrb.mxu3 %v6565_v19  ;;  %9266 = vst [vmem:[#allocation58_spill] sm:$0xff] %v6583_v6  ;;  %v6586_v48 = vld [vmem:[#allocation6 + $0x60] sm:$0xff]  ;;  %v6607_v12 = vld [vmem:[#allocation9 + $0x308] sm:$0xff] }
 0x35c   :  { %1875 = vmatpush.msra.mxu0 %v6203_v33  ;;  %2036 = vmatpush.msrb.mxu1 %v6569_v30  ;;  %9267 = vst [vmem:[#allocation51_spill] sm:$0xff] %v6586_v48  ;;  %v6589_v33 = vld [vmem:[#allocation9 + $0x320] sm:$0xff] }
 0x35d   :  { %1915 = vmatpush.msra.mxu2 %v6207_v17  ;;  %2076 = vmatpush.msrb.mxu3 %v6573_v16  ;;  %9268 = vst [vmem:[#allocation62_spill] sm:$0xff] %v6589_v33  ;;  %v6592_v17 = vld [vmem:[#allocation6 + $0x70] sm:$0xff] }
 0x35e   :  { %1876 = vmatpush.msra.mxu0 %v6211_v34  ;;  %2037 = vmatpush.msrb.mxu1 %v6577_v45  ;;  %9269 = vst [vmem:[#allocation55_spill] sm:$0xff] %v6592_v17  ;;  %v6595_v34 = vld [vmem:[#allocation9 + $0x328] sm:$0xff] }
 0x35f   :  { %1916 = vmatpush.msra.mxu2 %v6580_v61  ;;  %2077 = vmatpush.msrb.mxu3 %v6583_v6  ;;  %9270 = vst [vmem:[#allocation16_spill] sm:$0xff] %v6595_v34 }
 0x360   :  { %1877 = vmatpush.msra.mxu0 %v6586_v48  ;;  %2038 = vmatpush.msrb.mxu1 %v6589_v33  ;;  %9273 = vst [vmem:[#allocation63_spill] sm:$0xff] %v6604_v15  ;;  %v6613_v48 = vld [vmem:[#allocation9 + $0x2e0] sm:$0xff] }
 0x361   :  { %1917 = vmatpush.msra.mxu2 %v6592_v17  ;;  %2078 = vmatpush.msrb.mxu3 %v6595_v34  ;;  %9274 = vst [vmem:[#allocation18_spill] sm:$0xff] %v6607_v12  ;;  %v6610_v17 = vld [vmem:[#allocation6 + $0x20] sm:$0xff] }
 0x362   :  { %1878 = vmatpush.msra.mxu0 %v6598_v52  ;;  %2039 = vmatpush.msrb.mxu1 %v6601_v49  ;;  %9275 = vst [vmem:[#allocation66_spill] sm:$0xff] %v6610_v17  ;;  %v6616_v52 = vld [vmem:[#allocation6 + $0x30] sm:$0xff]  ;;  %v6619_v49 = vld [vmem:[#allocation9 + $0x2e8] sm:$0xff] }
 0x363   :  { %1918 = vmatpush.msra.mxu2 %v6604_v15  ;;  %2079 = vmatpush.msrb.mxu3 %v6607_v12  ;;  %9276 = vst [vmem:[#allocation19_spill] sm:$0xff] %v6613_v48  ;;  %v6622_v15 = vld [vmem:[#allocation6] sm:$0xff] }
 0x364   :  { %1879 = vmatpush.msra.mxu0 %v6610_v17  ;;  %2040 = vmatpush.msrb.mxu1 %v6613_v48  ;;  %9277 = vst [vmem:[#allocation67_spill] sm:$0xff] %v6616_v52  ;;  %v6625_v12 = vld [vmem:[#allocation9 + $0x2c0] sm:$0xff]  ;;  %v6628_v17 = vld [vmem:[#allocation6 + $0x10] sm:$0xff] }
 0x365   :  { %1919 = vmatpush.msra.mxu2 %v6616_v52  ;;  %9278 = vst [vmem:[#allocation20_spill] sm:$0xff] %v6619_v49  ;;  %2080 = vmatpush.msrb.mxu3 %v6619_v49  ;;  %v6633_v52 = vld [vmem:[#allocation9 + $0x2c8] sm:$0xff]  ;;  %v6636_v49 = vld [vmem:[#allocation9 + $0x2a0] sm:$0xff] }
 0x366   :  { %9279 = vst [vmem:[#allocation70_spill] sm:$0xff] %v6622_v15  ;;  %1880 = vmatpush.msra.mxu0 %v6622_v15  ;;  %2041 = vmatpush.msrb.mxu1 %v6625_v12  ;;  %v6639_v15 = vld [vmem:[#allocation9 + $0x1e0] sm:$0xff] }
 0x367   :  { %9280 = vst [vmem:[#allocation21_spill] sm:$0xff] %v6625_v12  ;;  %1920 = vmatpush.msra.mxu2 %v6628_v17  ;;  %1881 = vmatmul.f32.vlgmr.msra.gmra.mxu0 %v6480_v41  ;;  %v6642_v12 = vld [vmem:[#allocation9 + $0x2a8] sm:$0xff] }
 0x368   :  { %9281 = vst [vmem:[#allocation71_spill] sm:$0xff] %v6628_v17  ;;  %1921 = vmatmul.f32.vlgmr.msra.gmra.mxu2 %v6480_v41  ;;  %2081 = vmatpush.msrb.mxu3 %v6633_v52  ;;  %v6645_v17 = vld [vmem:[#allocation9 + $0x1e8] sm:$0xff]  ;;  %v6648_v41 = vld [vmem:[#allocation9 + $0x280] sm:$0xff] }
 0x369   :  { %9282 = vst [vmem:[#allocation75_spill] sm:$0xff] %v6633_v52  ;;  %2042 = vmatpush.msrb.mxu1 %v6636_v49  ;;  %2012 = vmatpush.msrb.mxu0 %v6639_v15  ;;  %v6651_v52 = vld [vmem:[#allocation9 + $0x1c0] sm:$0xff] }
 0x36a   :  { %9283 = vst [vmem:[#allocation74_spill] sm:$0xff] %v6636_v49  ;;  %2082 = vmatpush.msrb.mxu3 %v6642_v12  ;;  %2052 = vmatpush.msrb.mxu2 %v6645_v17  ;;  %v6654_v49 = vld [vmem:[#allocation9 + $0x288] sm:$0xff] }
 0x36b   :  { %9284 = vst [vmem:[#allocation78_spill] sm:$0xff] %v6639_v15  ;;  %2043 = vmatpush.msrb.mxu1 %v6648_v41  ;;  %2013 = vmatpush.msrb.mxu0 %v6651_v52  ;;  %v6657_v15 = vld [vmem:[#allocation9 + $0x1c8] sm:$0xff] }
 0x36c   :  { %9285 = vst [vmem:[#allocation79_spill] sm:$0xff] %v6642_v12  ;;  %2083 = vmatpush.msrb.mxu3 %v6654_v49  ;;  %2053 = vmatpush.msrb.mxu2 %v6657_v15  ;;  %v6660_v12 = vld [vmem:[#allocation9 + $0x260] sm:$0xff] }
 0x36d   :  { %9286 = vst [vmem:[#allocation22_spill] sm:$0xff] %v6645_v17  ;;  %2044 = vmatpush.msrb.mxu1 %v6660_v12  ;;  %v6663_v17 = vld [vmem:[#allocation9 + $0x1a0] sm:$0xff] }
 0x36e   :  { %9287 = vst [vmem:[#allocation36_spill] sm:$0xff] %v6648_v41  ;;  %2014 = vmatpush.msrb.mxu0 %v6663_v17  ;;  %v6666_v41 = vld [vmem:[#allocation9 + $0x268] sm:$0xff] }
 0x36f   :  { %9288 = vst [vmem:[#allocation23_spill] sm:$0xff] %v6651_v52  ;;  %2084 = vmatpush.msrb.mxu3 %v6666_v41  ;;  %v6669_v52 = vld [vmem:[#allocation9 + $0x1a8] sm:$0xff] }
 0x370   :  { %9289 = vst [vmem:[#allocation82_spill] sm:$0xff] %v6654_v49  ;;  %2054 = vmatpush.msrb.mxu2 %v6669_v52  ;;  %v6672_v49 = vld [vmem:[#allocation9 + $0x240] sm:$0xff] }
 0x371   :  { %9290 = vst [vmem:[#allocation24_spill] sm:$0xff] %v6657_v15  ;;  %2045 = vmatpush.msrb.mxu1 %v6672_v49  ;;  %v6675_v15 = vld [vmem:[#allocation9 + $0x180] sm:$0xff] }
 0x372   :  { %9291 = vst [vmem:[#allocation83_spill] sm:$0xff] %v6660_v12  ;;  %2015 = vmatpush.msrb.mxu0 %v6675_v15  ;;  %v6678_v12 = vld [vmem:[#allocation9 + $0x248] sm:$0xff] }
 0x373   :  { %9292 = vst [vmem:[#allocation37_spill] sm:$0xff] %v6663_v17  ;;  %2085 = vmatpush.msrb.mxu3 %v6678_v12  ;;  %v6681_v17 = vld [vmem:[#allocation9 + $0x188] sm:$0xff] }
 0x374   :  { %9293 = vst [vmem:[#allocation86_spill] sm:$0xff] %v6666_v41  ;;  %2055 = vmatpush.msrb.mxu2 %v6681_v17  ;;  %v6684_v41 = vld [vmem:[#allocation9 + $0x220] sm:$0xff] }
 0x375   :  { %9294 = vst [vmem:[#allocation40_spill] sm:$0xff] %v6669_v52  ;;  %2046 = vmatpush.msrb.mxu1 %v6684_v41  ;;  %v6687_v52 = vld [vmem:[#allocation9 + $0x160] sm:$0xff] }
 0x376   :  { %9295 = vst [vmem:[#allocation87_spill] sm:$0xff] %v6672_v49  ;;  %2016 = vmatpush.msrb.mxu0 %v6687_v52  ;;  %v6690_v49 = vld [vmem:[#allocation9 + $0x228] sm:$0xff] }
 0x377   :  { %9296 = vst [vmem:[#allocation41_spill] sm:$0xff] %v6675_v15  ;;  %2086 = vmatpush.msrb.mxu3 %v6690_v49  ;;  %v6693_v15 = vld [vmem:[#allocation9 + $0x168] sm:$0xff] }
 0x378   :  { %9297 = vst [vmem:[#allocation90_spill] sm:$0xff] %v6678_v12  ;;  %2056 = vmatpush.msrb.mxu2 %v6693_v15  ;;  %v6696_v12 = vld [vmem:[#allocation9 + $0x200] sm:$0xff] }
 0x379   :  { %9298 = vst [vmem:[#allocation44_spill] sm:$0xff] %v6681_v17  ;;  %2047 = vmatpush.msrb.mxu1 %v6696_v12  ;;  %v6699_v17 = vld [vmem:[#allocation9 + $0x140] sm:$0xff] }
 0x37a   :  { %9299 = vst [vmem:[#allocation91_spill] sm:$0xff] %v6684_v41  ;;  %2017 = vmatpush.msrb.mxu0 %v6699_v17  ;;  %v6702_v41 = vld [vmem:[#allocation9 + $0x208] sm:$0xff] }
 0x37b   :  { %9300 = vst [vmem:[#allocation45_spill] sm:$0xff] %v6687_v52  ;;  %2087 = vmatpush.msrb.mxu3 %v6702_v41  ;;  %v6705_v52 = vld [vmem:[#allocation9 + $0x3f0] sm:$0xff] }
 0x37c   :  { %9301 = vst [vmem:[#allocation52_spill] sm:$0xff] %v6690_v49  ;;  %2112 = vmatpush.msra.mxu1 %v6705_v52  ;;  %v6708_v49 = vld [vmem:[#allocation9 + $0x3f8] sm:$0xff] }
 0x37d   :  { %9302 = vst [vmem:[#allocation48_spill] sm:$0xff] %v6693_v15  ;;  %2152 = vmatpush.msra.mxu3 %v6708_v49  ;;  %v6711_v15 = vld [vmem:[#allocation9 + $0x148] sm:$0xff] }
 0x37e   :  { %9303 = vst [vmem:[#allocation53_spill] sm:$0xff] %v6696_v12  ;;  %2057 = vmatpush.msrb.mxu2 %v6711_v15  ;;  %v6714_v12 = vld [vmem:[#allocation9 + $0x3d0] sm:$0xff] }
 0x37f   :  { %9304 = vst [vmem:[#allocation49_spill] sm:$0xff] %v6699_v17  ;;  %2113 = vmatpush.msra.mxu1 %v6714_v12  ;;  %v6717_v17 = vld [vmem:[#allocation9 + $0x120] sm:$0xff] }
 0x380   :  { %9305 = vst [vmem:[#allocation56_spill] sm:$0xff] %v6702_v41  ;;  %2018 = vmatpush.msrb.mxu0 %v6717_v17  ;;  %v6720_v41 = vld [vmem:[#allocation9 + $0x3d8] sm:$0xff] }
 0x381   :  { %9306 = vst [vmem:[#allocation57_spill] sm:$0xff] %v6705_v52  ;;  %2153 = vmatpush.msra.mxu3 %v6720_v41  ;;  %v6723_v52 = vld [vmem:[#allocation9 + $0x128] sm:$0xff] }
 0x382   :  { %9307 = vst [vmem:[#allocation94_spill] sm:$0xff] %v6708_v49  ;;  %2058 = vmatpush.msrb.mxu2 %v6723_v52  ;;  %v6726_v49 = vld [vmem:[#allocation9 + $0x3b0] sm:$0xff] }
 0x383   :  { %9308 = vst [vmem:[#allocation60_spill] sm:$0xff] %v6711_v15  ;;  %2114 = vmatpush.msra.mxu1 %v6726_v49  ;;  %v6729_v15 = vld [vmem:[#allocation9 + $0x100] sm:$0xff] }
 0x384   :  { %9309 = vst [vmem:[#allocation61_spill] sm:$0xff] %v6714_v12  ;;  %2019 = vmatpush.msrb.mxu0 %v6729_v15  ;;  %v6732_v12 = vld [vmem:[#allocation9 + $0x3b8] sm:$0xff] }
 0x385   :  { %9310 = vst [vmem:[#allocation65_spill] sm:$0xff] %v6717_v17  ;;  %2154 = vmatpush.msra.mxu3 %v6732_v12  ;;  %v6735_v17 = vld [vmem:[#allocation9 + $0x108] sm:$0xff] }
 0x386   :  { %9311 = vst [vmem:[#allocation64_spill] sm:$0xff] %v6720_v41  ;;  %2059 = vmatpush.msrb.mxu2 %v6735_v17  ;;  %v6738_v41 = vld [vmem:[#allocation9 + $0x390] sm:$0xff] }
 0x387   :  { %9312 = vst [vmem:[#allocation68_spill] sm:$0xff] %v6723_v52  ;;  %2115 = vmatpush.msra.mxu1 %v6738_v41  ;;  %v6741_v52 = vld [vmem:[#allocation9 + $0xe0] sm:$0xff] }
 0x388   :  { %9313 = vst [vmem:[#allocation69_spill] sm:$0xff] %v6726_v49  ;;  %2020 = vmatpush.msrb.mxu0 %v6741_v52  ;;  %v6744_v49 = vld [vmem:[#allocation9 + $0x398] sm:$0xff] }
 0x389   :  { %9314 = vst [vmem:[#allocation73_spill] sm:$0xff] %v6729_v15  ;;  %2155 = vmatpush.msra.mxu3 %v6744_v49  ;;  %v6747_v15 = vld [vmem:[#allocation9 + $0xe8] sm:$0xff] }
 0x38a   :  { %9315 = vst [vmem:[#allocation72_spill] sm:$0xff] %v6732_v12  ;;  %2060 = vmatpush.msrb.mxu2 %v6747_v15  ;;  %v6750_v12 = vld [vmem:[#allocation9 + $0x370] sm:$0xff] }
 0x38b   :  { %9316 = vst [vmem:[#allocation76_spill] sm:$0xff] %v6735_v17  ;;  %2116 = vmatpush.msra.mxu1 %v6750_v12  ;;  %v6753_v17 = vld [vmem:[#allocation9 + $0xc0] sm:$0xff] }
 0x38c   :  { %9317 = vst [vmem:[#allocation77_spill] sm:$0xff] %v6738_v41  ;;  %2021 = vmatpush.msrb.mxu0 %v6753_v17  ;;  %v6756_v41 = vld [vmem:[#allocation9 + $0x378] sm:$0xff] }
 0x38d   :  { %9318 = vst [vmem:[#allocation81_spill] sm:$0xff] %v6741_v52  ;;  %2156 = vmatpush.msra.mxu3 %v6756_v41  ;;  %v6759_v52 = vld [vmem:[#allocation9 + $0xc8] sm:$0xff] }
 0x38e   :  { %9319 = vst [vmem:[#allocation80_spill] sm:$0xff] %v6744_v49  ;;  %2061 = vmatpush.msrb.mxu2 %v6759_v52  ;;  %v6762_v49 = vld [vmem:[#allocation9 + $0x350] sm:$0xff] }
 0x38f   :  { %9320 = vst [vmem:[#allocation84_spill] sm:$0xff] %v6747_v15  ;;  %2117 = vmatpush.msra.mxu1 %v6762_v49  ;;  %v6765_v15 = vld [vmem:[#allocation9 + $0xa0] sm:$0xff] }
 0x390   :  { %9321 = vst [vmem:[#allocation85_spill] sm:$0xff] %v6750_v12  ;;  %2022 = vmatpush.msrb.mxu0 %v6765_v15  ;;  %v6768_v12 = vld [vmem:[#allocation9 + $0x358] sm:$0xff] }
 0x391   :  { %9322 = vst [vmem:[#allocation89_spill] sm:$0xff] %v6753_v17  ;;  %2157 = vmatpush.msra.mxu3 %v6768_v12  ;;  %v6771_v17 = vld [vmem:[#allocation9 + $0xa8] sm:$0xff] }
 0x392   :  { %9323 = vst [vmem:[#allocation88_spill] sm:$0xff] %v6756_v41  ;;  %2062 = vmatpush.msrb.mxu2 %v6771_v17  ;;  %v6774_v41 = vld [vmem:[#allocation9 + $0x330] sm:$0xff] }
 0x393   :  { %9324 = vst [vmem:[#allocation92_spill] sm:$0xff] %v6759_v52  ;;  %2118 = vmatpush.msra.mxu1 %v6774_v41  ;;  %v6777_v52 = vld [vmem:[#allocation9 + $0x80] sm:$0xff] }
 0x394   :  { %9325 = vst [vmem:[#allocation93_spill] sm:$0xff] %v6762_v49  ;;  %2023 = vmatpush.msrb.mxu0 %v6777_v52  ;;  %v6780_v49 = vld [vmem:[#allocation9 + $0x338] sm:$0xff] }
 0x395   :  { %9326 = vst [vmem:[#allocation96_spill] sm:$0xff] %v6765_v15  ;;  %2158 = vmatpush.msra.mxu3 %v6780_v49  ;;  %v6783_v15 = vld [vmem:[#allocation9 + $0x88] sm:$0xff] }
 0x396   :  { %9327 = vst [vmem:[#allocation95_spill] sm:$0xff] %v6768_v12  ;;  %2063 = vmatpush.msrb.mxu2 %v6783_v15  ;;  %v6786_v12 = vld [vmem:[#allocation9 + $0x310] sm:$0xff] }
 0x397   :  { %9328 = vst [vmem:[#allocation97_spill] sm:$0xff] %v6771_v17  ;;  %2119 = vmatpush.msra.mxu1 %v6786_v12  ;;  %v6789_v17 = vld [vmem:[#allocation9 + $0x60] sm:$0xff] }
 0x398   :  { %9329 = vst [vmem:[#allocation98_spill] sm:$0xff] %v6774_v41  ;;  %2024 = vmatpush.msrb.mxu0 %v6789_v17  ;;  %v6792_v41 = vld [vmem:[#allocation9 + $0x318] sm:$0xff] }
 0x399   :  { %9330 = vst [vmem:[#allocation100_spill] sm:$0xff] %v6777_v52  ;;  %2159 = vmatpush.msra.mxu3 %v6792_v41  ;;  %v6795_v52 = vld [vmem:[#allocation9 + $0x68] sm:$0xff] }
 0x39a   :  { %9331 = vst [vmem:[#allocation99_spill] sm:$0xff] %v6780_v49  ;;  %2064 = vmatpush.msrb.mxu2 %v6795_v52  ;;  %v6798_v49 = vld [vmem:[#allocation9 + $0x2f0] sm:$0xff] }
 0x39b   :  { %9332 = vst [vmem:[#allocation101_spill] sm:$0xff] %v6783_v15  ;;  %2120 = vmatpush.msra.mxu1 %v6798_v49  ;;  %v6801_v15 = vld [vmem:[#allocation9 + $0x40] sm:$0xff] }
 0x39c   :  { %9333 = vst [vmem:[#allocation102_spill] sm:$0xff] %v6786_v12  ;;  %2025 = vmatpush.msrb.mxu0 %v6801_v15  ;;  %v6804_v12 = vld [vmem:[#allocation9 + $0x2f8] sm:$0xff] }
 0x39d   :  { %9334 = vst [vmem:[#allocation106_spill] sm:$0xff] %v6789_v17  ;;  %2160 = vmatpush.msra.mxu3 %v6804_v12  ;;  %v6807_v17 = vld [vmem:[#allocation9 + $0x48] sm:$0xff] }
 0x39e   :  { %9335 = vst [vmem:[#allocation103_spill] sm:$0xff] %v6792_v41  ;;  %2065 = vmatpush.msrb.mxu2 %v6807_v17  ;;  %v6810_v41 = vld [vmem:[#allocation9 + $0x2d0] sm:$0xff] }
 0x39f   :  { %9336 = vst [vmem:[#allocation107_spill] sm:$0xff] %v6795_v52  ;;  %2121 = vmatpush.msra.mxu1 %v6810_v41  ;;  %v6813_v52 = vld [vmem:[#allocation9 + $0x20] sm:$0xff] }
 0x3a0   :  { %9337 = vst [vmem:[#allocation110_spill] sm:$0xff] %v6798_v49  ;;  %2026 = vmatpush.msrb.mxu0 %v6813_v52  ;;  %v6816_v49 = vld [vmem:[#allocation9 + $0x2d8] sm:$0xff] }
 0x3a1   :  { %9338 = vst [vmem:[#allocation112_spill] sm:$0xff] %v6801_v15  ;;  %2161 = vmatpush.msra.mxu3 %v6816_v49  ;;  %v6819_v15 = vld [vmem:[#allocation9 + $0x28] sm:$0xff] }
 0x3a2   :  { %9339 = vst [vmem:[#allocation111_spill] sm:$0xff] %v6804_v12  ;;  %2066 = vmatpush.msrb.mxu2 %v6819_v15  ;;  %v6822_v12 = vld [vmem:[#allocation9 + $0x2b0] sm:$0xff] }
 0x3a3   :  { %9340 = vst [vmem:[#allocation113_spill] sm:$0xff] %v6807_v17  ;;  %2122 = vmatpush.msra.mxu1 %v6822_v12  ;;  %v6825_v17 = vld [vmem:[#allocation9] sm:$0xff] }
 0x3a4   :  { %9341 = vst [vmem:[#allocation114_spill] sm:$0xff] %v6810_v41  ;;  %2027 = vmatpush.msrb.mxu0 %v6825_v17  ;;  %v6828_v41 = vld [vmem:[#allocation9 + $0x2b8] sm:$0xff] }
 0x3a5   :  { %9342 = vst [vmem:[#allocation116_spill] sm:$0xff] %v6813_v52  ;;  %2162 = vmatpush.msra.mxu3 %v6828_v41  ;;  %v6831_v52 = vld [vmem:[#allocation9 + $0x8] sm:$0xff] }
 0x3a6   :  { %9343 = vst [vmem:[#allocation115_spill] sm:$0xff] %v6816_v49  ;;  %2067 = vmatpush.msrb.mxu2 %v6831_v52  ;;  %v6834_v49 = vld [vmem:[#allocation9 + $0x290] sm:$0xff] }
 0x3a7   :  { %9344 = vst [vmem:[#allocation117_spill] sm:$0xff] %v6819_v15  ;;  %2123 = vmatpush.msra.mxu1 %v6834_v49  ;;  %v6837_v15 = vld [vmem:[#allocation9 + $0x1f0] sm:$0xff] }
 0x3a8   :  { %9345 = vst [vmem:[#allocation118_spill] sm:$0xff] %v6822_v12  ;;  %2092 = vmatpush.msra.mxu0 %v6837_v15  ;;  %v6840_v12 = vld [vmem:[#allocation9 + $0x298] sm:$0xff] }
 0x3a9   :  { %9346 = vst [vmem:[#allocation120_spill] sm:$0xff] %v6825_v17  ;;  %2163 = vmatpush.msra.mxu3 %v6840_v12  ;;  %v6843_v17 = vld [vmem:[#allocation9 + $0x1f8] sm:$0xff] }
 0x3aa   :  { %9347 = vst [vmem:[#allocation119_spill] sm:$0xff] %v6828_v41  ;;  %2132 = vmatpush.msra.mxu2 %v6843_v17  ;;  %v6846_v41 = vld [vmem:[#allocation9 + $0x270] sm:$0xff] }
 0x3ab   :  { %9348 = vst [vmem:[#allocation121_spill] sm:$0xff] %v6831_v52  ;;  %2124 = vmatpush.msra.mxu1 %v6846_v41  ;;  %v6849_v52 = vld [vmem:[#allocation9 + $0x1d0] sm:$0xff] }
 0x3ac   :  { %9349 = vst [vmem:[#allocation122_spill] sm:$0xff] %v6834_v49  ;;  %2093 = vmatpush.msra.mxu0 %v6849_v52  ;;  %v6852_v49 = vld [vmem:[#allocation9 + $0x278] sm:$0xff]  ;;  %v6960_v34 = vpop.permute.xlu2 %1854 }
 0x3ad   :  { %9350 = vst [vmem:[#allocation124_spill] sm:$0xff] %v6837_v15  ;;  %2164 = vmatpush.msra.mxu3 %v6852_v49  ;;  %v6855_v15 = vld [vmem:[#allocation9 + $0x1d8] sm:$0xff]  ;;  %v1858_v33 = vmul.f32 %v6960_v34, %v9240_v14 }
 0x3ae   :  { %9351 = vst [vmem:[#allocation123_spill] sm:$0xff] %v6840_v12  ;;  %2133 = vmatpush.msra.mxu2 %v6855_v15  ;;  %v6858_v12 = vld [vmem:[#allocation9 + $0x250] sm:$0xff] }
 0x3af   :  { %9352 = vst [vmem:[#allocation125_spill] sm:$0xff] %v6843_v17  ;;  %2125 = vmatpush.msra.mxu1 %v6858_v12  ;;  %v6861_v17 = vld [vmem:[#allocation9 + $0x1b0] sm:$0xff]  ;;  %v1862_v45 = vadd.f32 %v1858_v33, %v9242_v27 }
 0x3b0   :  { %9353 = vst [vmem:[#allocation126_spill] sm:$0xff] %v6846_v41  ;;  %2094 = vmatpush.msra.mxu0 %v6861_v17  ;;  %v6864_v41 = vld [vmem:[#allocation9 + $0x258] sm:$0xff]  ;;  %v1704_v16 = vpop.f32.mrf.mxu3 }
 0x3b1   :  { %9354 = vst [vmem:[#allocation128_spill] sm:$0xff] %v6849_v52  ;;  %2165 = vmatpush.msra.mxu3 %v6864_v41  ;;  %v6867_v52 = vld [vmem:[#allocation9 + $0x1b8] sm:$0xff] }
 0x3b2   :  { %9355 = vst [vmem:[#allocation127_spill] sm:$0xff] %v6852_v49  ;;  %2134 = vmatpush.msra.mxu2 %v6867_v52  ;;  %v6870_v49 = vld [vmem:[#allocation9 + $0x230] sm:$0xff] }
 0x3b3   :  { %9356 = vst [vmem:[#allocation129_spill] sm:$0xff] %v6855_v15  ;;  %2126 = vmatpush.msra.mxu1 %v6870_v49  ;;  %v6873_v15 = vld [vmem:[#allocation9 + $0x190] sm:$0xff] }
 0x3b4   :  { %9357 = vst [vmem:[#allocation130_spill] sm:$0xff] %v6858_v12  ;;  %2095 = vmatpush.msra.mxu0 %v6873_v15  ;;  %v6876_v12 = vld [vmem:[#allocation9 + $0x238] sm:$0xff] }
 0x3b5   :  { %9358 = vst [vmem:[#allocation132_spill] sm:$0xff] %v6861_v17  ;;  %2166 = vmatpush.msra.mxu3 %v6876_v12  ;;  %v6879_v17 = vld [vmem:[#allocation9 + $0x198] sm:$0xff] }
 0x3b6   :  { %9359 = vst [vmem:[#allocation131_spill] sm:$0xff] %v6864_v41  ;;  %2135 = vmatpush.msra.mxu2 %v6879_v17  ;;  %v6882_v41 = vld [vmem:[#allocation9 + $0x210] sm:$0xff] }
 0x3b7   :  { %9360 = vst [vmem:[#allocation133_spill] sm:$0xff] %v6867_v52  ;;  %2127 = vmatpush.msra.mxu1 %v6882_v41  ;;  %v6885_v52 = vld [vmem:[#allocation9 + $0x170] sm:$0xff] }
 0x3b8   :  { %9361 = vst [vmem:[#allocation134_spill] sm:$0xff] %v6870_v49  ;;  %2096 = vmatpush.msra.mxu0 %v6885_v52  ;;  %v6888_v49 = vld [vmem:[#allocation9 + $0x218] sm:$0xff] }
 0x3b9   :  { %9362 = vst [vmem:[#allocation136_spill] sm:$0xff] %v6873_v15  ;;  %2167 = vmatpush.msra.mxu3 %v6888_v49  ;;  %v6891_v15 = vld [vmem:[#allocation9 + $0x178] sm:$0xff] }
 0x3ba   :  { %9363 = vst [vmem:[#allocation135_spill] sm:$0xff] %v6876_v12  ;;  %2136 = vmatpush.msra.mxu2 %v6891_v15  ;;  %v6894_v12 = vld [vmem:[#allocation9 + $0x150] sm:$0xff] }
 0x3bb   :  { %9364 = vst [vmem:[#allocation137_spill] sm:$0xff] %v6879_v17  ;;  %2097 = vmatpush.msra.mxu0 %v6894_v12  ;;  %v6897_v17 = vld [vmem:[#allocation9 + $0x158] sm:$0xff] }
 0x3bc   :  { %9365 = vst [vmem:[#allocation138_spill] sm:$0xff] %v6882_v41  ;;  %2137 = vmatpush.msra.mxu2 %v6897_v17  ;;  %v6900_v41 = vld [vmem:[#allocation9 + $0x130] sm:$0xff] }
 0x3bd   :  { %9366 = vst [vmem:[#allocation140_spill] sm:$0xff] %v6885_v52  ;;  %2098 = vmatpush.msra.mxu0 %v6900_v41  ;;  %v6903_v52 = vld [vmem:[#allocation9 + $0x138] sm:$0xff] }
 0x3be   :  { %9367 = vst [vmem:[#allocation139_spill] sm:$0xff] %v6888_v49  ;;  %2138 = vmatpush.msra.mxu2 %v6903_v52  ;;  %v6906_v49 = vld [vmem:[#allocation9 + $0x110] sm:$0xff] }
 0x3bf   :  { %9368 = vst [vmem:[#allocation141_spill] sm:$0xff] %v6891_v15  ;;  %2099 = vmatpush.msra.mxu0 %v6906_v49  ;;  %v6909_v15 = vld [vmem:[#allocation9 + $0x118] sm:$0xff] }
 0x3c0   :  { %9369 = vst [vmem:[#allocation142_spill] sm:$0xff] %v6894_v12  ;;  %2139 = vmatpush.msra.mxu2 %v6909_v15  ;;  %v6912_v12 = vld [vmem:[#allocation9 + $0xf0] sm:$0xff] }
 0x3c1   :  { %9370 = vst [vmem:[#allocation143_spill] sm:$0xff] %v6897_v17  ;;  %2100 = vmatpush.msra.mxu0 %v6912_v12  ;;  %v6915_v17 = vld [vmem:[#allocation9 + $0xf8] sm:$0xff] }
 0x3c2   :  { %9371 = vst [vmem:[#allocation144_spill] sm:$0xff] %v6900_v41  ;;  %2140 = vmatpush.msra.mxu2 %v6915_v17  ;;  %v6918_v41 = vld [vmem:[#allocation9 + $0xd0] sm:$0xff] }
 0x3c3   :  { %9372 = vst [vmem:[#allocation145_spill] sm:$0xff] %v6903_v52  ;;  %2101 = vmatpush.msra.mxu0 %v6918_v41  ;;  %v6921_v52 = vld [vmem:[#allocation9 + $0xd8] sm:$0xff]  ;;  %v1644_v48 = vpop.f32.mrf.mxu0 }
 0x3c4   :  { %9373 = vst [vmem:[#allocation146_spill] sm:$0xff] %v6906_v49  ;;  %2141 = vmatpush.msra.mxu2 %v6921_v52  ;;  %v6924_v49 = vld [vmem:[#allocation9 + $0xb0] sm:$0xff] }
 0x3c5   :  { %9374 = vst [vmem:[#allocation147_spill] sm:$0xff] %v6909_v15  ;;  %2102 = vmatpush.msra.mxu0 %v6924_v49  ;;  %v6927_v15 = vld [vmem:[#allocation9 + $0xb8] sm:$0xff] }
 0x3c6   :  { %9375 = vst [vmem:[#allocation148_spill] sm:$0xff] %v6912_v12  ;;  %2142 = vmatpush.msra.mxu2 %v6927_v15  ;;  %v6930_v12 = vld [vmem:[#allocation9 + $0x90] sm:$0xff] }
 0x3c7   :  { %9376 = vst [vmem:[#allocation149_spill] sm:$0xff] %v6915_v17  ;;  %2103 = vmatpush.msra.mxu0 %v6930_v12  ;;  %v6933_v17 = vld [vmem:[#allocation9 + $0x98] sm:$0xff] }
 0x3c8   :  { %9377 = vst [vmem:[#allocation150_spill] sm:$0xff] %v6918_v41  ;;  %2143 = vmatpush.msra.mxu2 %v6933_v17  ;;  %v6936_v41 = vld [vmem:[#allocation9 + $0x70] sm:$0xff] }
 0x3c9   :  { %9378 = vst [vmem:[#allocation151_spill] sm:$0xff] %v6921_v52  ;;  %2104 = vmatpush.msra.mxu0 %v6936_v41  ;;  %v6939_v52 = vld [vmem:[#allocation9 + $0x78] sm:$0xff]  ;;  %v1684_v6 = vpop.f32.mrf.mxu2 }
 0x3ca   :  { %9379 = vst [vmem:[#allocation152_spill] sm:$0xff] %v6924_v49  ;;  %2144 = vmatpush.msra.mxu2 %v6939_v52  ;;  %v6942_v49 = vld [vmem:[#allocation9 + $0x50] sm:$0xff] }
 0x3cb   :  { %9380 = vst [vmem:[#allocation153_spill] sm:$0xff] %v6927_v15  ;;  %2105 = vmatpush.msra.mxu0 %v6942_v49  ;;  %v6945_v15 = vld [vmem:[#allocation9 + $0x58] sm:$0xff] }
 0x3cc   :  { %9381 = vst [vmem:[#allocation154_spill] sm:$0xff] %v6930_v12  ;;  %2145 = vmatpush.msra.mxu2 %v6945_v15  ;;  %v6948_v12 = vld [vmem:[#allocation9 + $0x30] sm:$0xff]  ;;  %v1724_v30 = vpop.f32.mrf.mxu0 }
 0x3cd   :  { %9382 = vst [vmem:[#allocation155_spill] sm:$0xff] %v6933_v17  ;;  %2106 = vmatpush.msra.mxu0 %v6948_v12  ;;  %v6951_v17 = vld [vmem:[#allocation9 + $0x38] sm:$0xff]  ;;  %v1725_v19 = vadd.f32 %v1724_v30, %v9243_v1 }
 0x3ce   :  { %9383 = vst [vmem:[#allocation156_spill] sm:$0xff] %v6936_v41  ;;  %2146 = vmatpush.msra.mxu2 %v6951_v17  ;;  %v6954_v41 = vld [vmem:[#allocation9 + $0x10] sm:$0xff] }
 0x3cf   :  { %9384 = vst [vmem:[#allocation157_spill] sm:$0xff] %v6939_v52  ;;  %2107 = vmatpush.msra.mxu0 %v6954_v41  ;;  %v6957_v52 = vld [vmem:[#allocation9 + $0x18] sm:$0xff] }
 0x3d0   :  { %9385 = vst [vmem:[#allocation158_spill] sm:$0xff] %v6942_v49  ;;  %2147 = vmatpush.msra.mxu2 %v6957_v52  ;;  %v1664_v49 = vpop.f32.mrf.mxu1 }
 0x3d1   :  { %9386 = vst [vmem:[#allocation159_spill] sm:$0xff] %v6945_v15  ;;  %v1645_v15 = vadd.f32 %v1644_v48, %v9239_v62 }
 0x3d2   :  { %9387 = vst [vmem:[#allocation160_spill] sm:$0xff] %v6948_v12  ;;  %v1764_v33 = vpop.f32.mrf.mxu2 }
 0x3d3   :  { %9388 = vst [vmem:[#allocation161_spill] sm:$0xff] %v6951_v17  ;;  %v1665_v12 = vadd.f32 %v1664_v49, %v1645_v15  ;;  %v1765_v30 = vadd.f32 %v1764_v33, %v9244_v46  ;;  %v9392_v33 = vld [vmem:[#allocation108_spill] sm:$0xff] }
 0x3d4   :  { %9389 = vst [vmem:[#allocation162_spill] sm:$0xff] %v6954_v41  ;;  %v1685_v41 = vadd.f32 %v1684_v6, %v9241_v2 }
 0x3d5   :  { %9390 = vst [vmem:[#allocation163_spill] sm:$0xff] %v6957_v52  ;;  %v3480_v17 = vmul.f32 -1.442695, %v1665_v12 }
 0x3d6   :  { %v1705_v52 = vadd.f32 %v1704_v16, %v1685_v41 }
 0x3d7   :  { %3637 = vpow2.f32 %v3480_v17 }
 0x3d8   :  { %v1744_v61 = vpop.f32.mrf.mxu1  ;;  %v3481_v11 = vmul.f32 -1.442695, %v1705_v52 }
 0x3d9   :  { %v1745_v62 = vadd.f32 %v1744_v61, %v1725_v19 }
 0x3da   :  { %3639 = vpow2.f32 %v3481_v11  ;;  %v1784_v11 = vpop.f32.mrf.mxu3 }
 0x3db   :  { %v3482_v14 = vmul.f32 -1.442695, %v1745_v62  ;;  %v9391_v62 = vld [vmem:[#allocation104_spill] sm:$0xff] }
 0x3dd   :  { %v3638_v49 = vpop.eup %3637 }
 0x3de   :  { %v1796_v15 = vadd.f32 1.0, %v3638_v49 }
 0x3e0   :  { %v1902_v13 = vpop.f32.mrf.mxu1  ;;  %3641 = vrcp.f32 %v1796_v15  ;;  %v3640_v17 = vpop.eup %3639  ;;  %v1810_v1 = vand.u32 2147483648, %v1796_v15  ;;  %vm1804_vm5 = vweird.f32 %v1796_v15 }
 0x3e1   :  { %v1946_v48 = vadd.f32 %v1902_v13, %v1862_v45  ;;  %3643 = vpow2.f32 %v3482_v14  ;;  %v1797_v6 = vadd.f32 1.0, %v3640_v17  ;;  %v1857_v14 = vmul.f32 %v6960_v34, %v9391_v62 }
 0x3e2   :  { %v1785_v45 = vadd.f32 %v1784_v11, %v1765_v30 }
 0x3e3   :  { %v3485_v12 = vmul.f32 -1.442695, %v1946_v48  ;;  %v1825_v53 = vand.u32 2147483648, %v1797_v6  ;;  %vm1819_vm8 = vweird.f32 %v1797_v6 }
 0x3e5   :  { %3645 = vpow2.f32 %v3485_v12  ;;  %v1826_v7 = vor.u32 1.1754944e-38, %v1825_v53 }
 0x3e6   :  { %v3642_v27 = vpop.eup %3641  ;;  %3647 = vrcp.f32 %v1797_v6 }
 0x3e7   :  { %v3644_v16 = vpop.eup %3643  ;;  %v1800_v41 = vmul.f32 %v3642_v27, %v1796_v15  ;;  %vm1805_vm4 = vweird.f32 %v3642_v27 }
 0x3e8   :  { %v6969_v52 = vadd.f32 1.0, %v3644_v16  ;;  %v1861_v16 = vadd.f32 %v1857_v14, %v9392_v33  ;;  %vm6978_vm6 = vmor %vm1804_vm5, %vm1805_vm4 }
 0x3e9   :  { %v1801_v19 = vsub.f32 1.0, %v1800_v41  ;;  %v1808_v41 = vand.u32 2147483647, %v1796_v15 }
 0x3ea   :  { %3649 = vrcp.f32 %v6969_v52  ;;  %vm1834_vm13 = vweird.f32 %v6969_v52 }
 0x3eb   :  { %v3646_v13 = vpop.eup %3645  ;;  %v1802_v61 = vmul.f32 %v3642_v27, %v1801_v19  ;;  %3651 = vtanh.f32 %v1785_v45  ;;  %v1859_v45 = vmul.f32 %v6960_v34, %v5060_v20  ;;  %vm1809_vm9 = vcmp.eq.f32.partialorder %v1808_v41, 8.507059e+37  ;;  %v1922_v30 = vpop.f32.mrf.mxu2 }
 0x3ec   :  { %v3648_v48 = vpop.eup %3647  ;;  %v6974_v49 = vadd.f32 1.0, %v3646_v13  ;;  %v1823_v13 = vand.u32 2147483647, %v1797_v6 }
 0x3ed   :  { %v1815_v12 = vmul.f32 %v3648_v48, %v1797_v6  ;;  %v1803_v17 = vadd.f32 %v3642_v27, %v1802_v61  ;;  %vm1820_vm7 = vweird.f32 %v3648_v48  ;;  %v1882_v61 = vpop.f32.mrf.mxu0  ;;  %v1863_v6 = vadd.f32 %v1859_v45, %v5081_v4  ;;  %v1942_v45 = vpop.f32.mrf.mxu3 }
 0x3ee   :  { %3653 = vrcp.f32 %v6974_v49  ;;  %v1945_v15 = vadd.f32 %v1882_v61, %v1861_v16  ;;  %vm1821_vm10 = vmor %vm1819_vm8, %vm1820_vm7  ;;  %vm1824_vm11 = vcmp.eq.f32.partialorder %v1823_v13, 8.507059e+37  ;;  %vm1981_vm1 = vweird.f32 %v6974_v49 }
 0x3ef   :  { %v1816_v46 = vsub.f32 1.0, %v1815_v12  ;;  %v1807_v14 = vsel %vm6978_vm6, %v3642_v27, %v1803_v17  ;;  %v1811_v12 = vor.u32 1.1754944e-38, %v1810_v1 }
 0x3f0   :  { %v3650_v2 = vpop.eup %3649 }
 0x3f1   :  { %v1817_v19 = vmul.f32 %v3648_v48, %v1816_v46  ;;  %v1830_v11 = vmul.f32 %v3650_v2, %v6969_v52  ;;  %v1812_v35 = vsel %vm1809_vm9, %v1811_v12, %v1807_v14  ;;  %v3484_v46 = vmul.f32 -1.442695, %v1945_v15  ;;  %v3652_v36 = vpop.eup %3651 }
 0x3f2   :  { %v1846_v16 = vmul.f32 %v3652_v36, %v1812_v35  ;;  %vm1835_vm12 = vweird.f32 %v3650_v2  ;;  %v1860_v36 = vmul.f32 %v6960_v34, %v5115_v42 }
 0x3f3   :  { %v1831_v33 = vsub.f32 1.0, %v1830_v11  ;;  %v1818_v62 = vadd.f32 %v3648_v48, %v1817_v19  ;;  %3655 = vpow2.f32 %v3484_v46  ;;  %v1947_v19 = vadd.f32 %v1922_v30, %v1863_v6  ;;  %vm1836_vm14 = vmor %vm1834_vm13, %vm1835_vm12 }
 0x3f4   :  { %v6987_v39 = vpop.eup %3653  ;;  %v1864_v61 = vadd.f32 %v1860_v36, %v5141_v58  ;;  %v1985_v6 = vand.u32 2147483647, %v6974_v49 }
 0x3f5   :  { %v1822_v59 = vsel %vm1821_vm10, %v3648_v48, %v1818_v62  ;;  %v1832_v1 = vmul.f32 %v3650_v2, %v1831_v33  ;;  %v1977_v53 = vmul.f32 %v6987_v39, %v6974_v49  ;;  %v3486_v62 = vmul.f32 -1.442695, %v1947_v19 }
 0x3f6   :  { %v1827_v27 = vsel %vm1824_vm11, %v1826_v7, %v1822_v59  ;;  %v1840_v59 = vand.u32 2147483648, %v6969_v52  ;;  %vm1982_vm0 = vweird.f32 %v6987_v39  ;;  %vm1986_vm4 = vcmp.eq.f32.partialorder %v1985_v6, 8.507059e+37  ;;  %v9408_v6 = vld [vmem:[#allocation46_spill] sm:$0xff] }
 0x3f7   :  { %v1845_v17 = vmul.f32 %v1827_v27, %v6372_v60  ;;  %v1833_v11 = vadd.f32 %v3650_v2, %v1832_v1  ;;  %v1838_v60 = vand.u32 2147483647, %v6969_v52  ;;  %v1978_v48 = vsub.f32 1.0, %v1977_v53  ;;  %vm7015_vm2 = vmor %vm1981_vm1, %vm1982_vm0 }
 0x3f8   :  { %v1841_v13 = vor.u32 1.1754944e-38, %v1840_v59  ;;  %v1948_v1 = vadd.f32 %v1942_v45, %v1864_v61  ;;  %v9402_v61 = vld [vmem:[#allocation34_spill] sm:$0xff]  ;;  %v7112_v45 = vld [vmem:[#allocation6 + $0x100] sm:$0xff] }
 0x3f9   :  { %v6991_v41 = vadd.f32 %v1846_v16, %v1845_v17  ;;  %v3656_v7 = vpop.eup %3655  ;;  %v1837_v33 = vsel %vm1836_vm14, %v3650_v2, %v1833_v11  ;;  %vm1839_vm15 = vcmp.eq.f32.partialorder %v1838_v60, 8.507059e+37  ;;  %v1979_v15 = vmul.f32 %v6987_v39, %v1978_v48 }
 0x3fa   :  { %v1958_v35 = vadd.f32 1.0, %v3656_v7  ;;  %v1842_v12 = vsel %vm1839_vm15, %v1841_v13, %v1837_v33  ;;  %v1987_v16 = vand.u32 2147483648, %v6974_v49  ;;  %v7100_v33 = vld [vmem:[#allocation6 + $0x150] sm:$0xff] }
 0x3fb   :  { %3657 = vtanh.f32 %v6991_v41  ;;  %v1980_v2 = vadd.f32 %v6987_v39, %v1979_v15  ;;  %v9401_v13 = vld [vmem:[#allocation33_spill] sm:$0xff]  ;;  %v9403_v15 = vld [vmem:[#allocation35_spill] sm:$0xff] }
 0x3fc   :  { %3659 = vpow2.f32 %v3486_v62  ;;  %v1972_v30 = vand.u32 2147483648, %v1958_v35  ;;  %v1970_v19 = vand.u32 2147483647, %v1958_v35  ;;  %v1988_v53 = vor.u32 1.1754944e-38, %v1987_v16  ;;  %v7128_v16 = vld [vmem:[#allocation6 + $0xc0] sm:$0xff] }
 0x3fd   :  { %3661 = vrcp.f32 %v1958_v35  ;;  %vm1966_vm5 = vweird.f32 %v1958_v35 }
 0x3fe   :  { %vm1971_vm7 = vcmp.eq.f32.partialorder %v1970_v19, 8.507059e+37  ;;  %v9411_v19 = vld [vmem:[#allocation58_spill] sm:$0xff] }
 0x401   :  { %v3658_v14 = vpop.eup %3657 }
 0x402   :  { %v1849_v46 = vmul.f32 %v3658_v14, %v1842_v12  ;;  %v3660_v52 = vpop.eup %3659  ;;  %v7104_v14 = vld [vmem:[#allocation6 + $0x120] sm:$0xff]  ;;  %v7108_v12 = vld [vmem:[#allocation6 + $0x130] sm:$0xff] }
 0x403   :  { %v7003_v27 = vadd.f32 1.0, %v3660_v52  ;;  %v3662_v34 = vpop.eup %3661  ;;  %v7116_v52 = vld [vmem:[#allocation6 + $0x110] sm:$0xff] }
 0x404   :  { %2048 = vmatmul.f32.vlgmr.msrb.gmra.mxu1 %v1849_v46  ;;  %2088 = vmatmul.f32.vlgmr.msrb.gmra.mxu3 %v1849_v46  ;;  %v1962_v17 = vmul.f32 %v3662_v34, %v1958_v35  ;;  %vm1967_vm3 = vweird.f32 %v3662_v34 }
 0x405   :  { %2270 = vmatpush.msrb.mxu1 %v6389_v37  ;;  %2310 = vmatpush.msrb.mxu3 %v6392_v38  ;;  %3663 = vrcp.f32 %v7003_v27  ;;  %vm1968_vm6 = vmor %vm1966_vm5, %vm1967_vm3  ;;  %vm1996_vm9 = vweird.f32 %v7003_v27  ;;  %v9409_v38 = vld [vmem:[#allocation47_spill] sm:$0xff] }
 0x406   :  { %v1963_v37 = vsub.f32 1.0, %v1962_v17  ;;  %3665 = vtanh.f32 %v1948_v1  ;;  %v9406_v1 = vld [vmem:[#allocation42_spill] sm:$0xff]  ;;  %v9407_v17 = vld [vmem:[#allocation43_spill] sm:$0xff] }
 0x407   :  { %2271 = vmatpush.msrb.mxu1 %v6400_v32  ;;  %2311 = vmatpush.msrb.mxu3 %v6403_v10  ;;  %v1984_v32 = vsel %vm7015_vm2, %v6987_v39, %v1980_v2  ;;  %v7124_v2 = vld [vmem:[#allocation6 + $0xf0] sm:$0xff] }
 0x408   :  { %v1964_v10 = vmul.f32 %v3662_v34, %v1963_v37  ;;  %v7132_v37 = vld [vmem:[#allocation6 + $0xd0] sm:$0xff] }
 0x409   :  { %2272 = vmatpush.msrb.mxu1 %v6413_v43  ;;  %2312 = vmatpush.msrb.mxu3 %v6416_v0  ;;  %v1989_v43 = vsel %vm1986_vm4, %v1988_v53, %v1984_v32  ;;  %v1973_v0 = vor.u32 1.1754944e-38, %v1972_v30  ;;  %v7136_v30 = vld [vmem:[#allocation6 + $0xa0] sm:$0xff]  ;;  %v9410_v32 = vld [vmem:[#allocation50_spill] sm:$0xff] }
 0x40a   :  { %v1965_v11 = vadd.f32 %v3662_v34, %v1964_v10  ;;  %v2007_v7 = vmul.f32 %v1989_v43, %v6450_v54  ;;  %v9398_v54 = vld [vmem:[#allocation30_spill] sm:$0xff]  ;;  %v7140_v10 = vld [vmem:[#allocation6 + $0xb0] sm:$0xff]  ;;  %v7144_v53 = vld [vmem:[#allocation6 + $0x80] sm:$0xff] }
 0x40b   :  { %2273 = vmatpush.msrb.mxu1 %v6423_v8  ;;  %2313 = vmatpush.msrb.mxu3 %v6426_v47  ;;  %v3664_v49 = vpop.eup %3663  ;;  %v9414_v43 = vld [vmem:[#allocation16_spill] sm:$0xff] }
 0x40c   :  { %2128 = vmatmul.f32.vlgmr.msra.gmra.mxu1 %v1849_v46  ;;  %2168 = vmatmul.f32.vlgmr.msra.gmra.mxu3 %v1849_v46  ;;  %v1992_v62 = vmul.f32 %v3664_v49, %v7003_v27  ;;  %v1969_v39 = vsel %vm1968_vm6, %v3662_v34, %v1965_v11  ;;  %v3666_v8 = vpop.eup %3665  ;;  %vm1997_vm8 = vweird.f32 %v3664_v49  ;;  %v9404_v46 = vld [vmem:[#allocation38_spill] sm:$0xff]  ;;  %v7120_v34 = vld [vmem:[#allocation6 + $0xe0] sm:$0xff] }
 0x40d   :  { %2274 = vmatpush.msrb.mxu1 %v6431_v24  ;;  %2314 = vmatpush.msrb.mxu3 %v6434_v3  ;;  %v1974_v59 = vsel %vm1971_vm7, %v1973_v0, %v1969_v39  ;;  %vm1998_vm10 = vmor %vm1996_vm9, %vm1997_vm8  ;;  %v9413_v11 = vld [vmem:[#allocation54_spill] sm:$0xff]  ;;  %v9415_v0 = vld [vmem:[#allocation51_spill] sm:$0xff] }
 0x40e   :  { %v1993_v47 = vsub.f32 1.0, %v1992_v62  ;;  %v2008_v60 = vmul.f32 %v3666_v8, %v1974_v59  ;;  %v9416_v62 = vld [vmem:[#allocation17_spill] sm:$0xff]  ;;  %v9417_v39 = vld [vmem:[#allocation55_spill] sm:$0xff]  ;;  %v9418_v8 = vld [vmem:[#allocation18_spill] sm:$0xff] }
 0x40f   :  { %2275 = vmatpush.msrb.mxu1 %v6437_v23  ;;  %2315 = vmatpush.msrb.mxu3 %v6440_v63  ;;  %v2002_v23 = vand.u32 2147483648, %v7003_v27  ;;  %v2000_v63 = vand.u32 2147483647, %v7003_v27  ;;  %v9405_v27 = vld [vmem:[#allocation39_spill] sm:$0xff] }
 0x410   :  { %v1994_v36 = vmul.f32 %v3664_v49, %v1993_v47  ;;  %v7034_v24 = vadd.f32 %v2008_v60, %v2007_v7  ;;  %v9419_v59 = vld [vmem:[#allocation59_spill] sm:$0xff]  ;;  %v9422_v60 = vld [vmem:[#allocation20_spill] sm:$0xff] }
 0x411   :  { %2276 = vmatpush.msrb.mxu1 %v6444_v51  ;;  %2316 = vmatpush.msrb.mxu3 %v6447_v26  ;;  %v9397_v51 = vld [vmem:[#allocation29_spill] sm:$0xff]  ;;  %vm2001_vm11 = vcmp.eq.f32.partialorder %v2000_v63, 8.507059e+37  ;;  %v9420_v47 = vld [vmem:[#allocation19_spill] sm:$0xff] }
 0x412   :  { %v1995_v3 = vadd.f32 %v3664_v49, %v1994_v36  ;;  %3667 = vtanh.f32 %v7034_v24  ;;  %v9421_v7 = vld [vmem:[#allocation63_spill] sm:$0xff]  ;;  %v9423_v36 = vld [vmem:[#allocation66_spill] sm:$0xff] }
 0x413   :  { %2277 = vmatpush.msrb.mxu1 %v6452_v29  ;;  %2317 = vmatpush.msrb.mxu3 %v6455_v44  ;;  %v2003_v29 = vor.u32 1.1754944e-38, %v2002_v23  ;;  %v9425_v23 = vld [vmem:[#allocation67_spill] sm:$0xff] }
 0x414   :  { %v1999_v26 = vsel %vm1998_vm10, %v3664_v49, %v1995_v3  ;;  %v9412_v49 = vld [vmem:[#allocation62_spill] sm:$0xff]  ;;  %v9424_v3 = vld [vmem:[#allocation21_spill] sm:$0xff]  ;;  %v9426_v63 = vld [vmem:[#allocation75_spill] sm:$0xff] }
 0x415   :  { %2278 = vmatpush.msrb.mxu1 %v6462_v21  ;;  %2318 = vmatpush.msrb.mxu3 %v9397_v51  ;;  %v2004_v35 = vsel %vm2001_vm11, %v2003_v29, %v1999_v26  ;;  %v7054_v21 = vld [vmem:[#allocation6 + $0x1e0] sm:$0xff]  ;;  %v9427_v51 = vld [vmem:[#allocation70_spill] sm:$0xff] }
 0x416   :  { %v9428_v26 = vld [vmem:[#allocation74_spill] sm:$0xff]  ;;  %v9430_v29 = vld [vmem:[#allocation79_spill] sm:$0xff] }
 0x417   :  { %2279 = vmatpush.msrb.mxu1 %v9398_v54  ;;  %2319 = vmatpush.msrb.mxu3 %v6471_v31  ;;  %v7057_v31 = vld [vmem:[#allocation6 + $0x1f0] sm:$0xff]  ;;  %v9429_v54 = vld [vmem:[#allocation71_spill] sm:$0xff] }
 0x418   :  { %v3668_v44 = vpop.eup %3667 }
 0x419   :  { %2280 = vmatpush.msrb.mxu1 %v6474_v18  ;;  %2320 = vmatpush.msrb.mxu3 %v6477_v56  ;;  %v7048_v48 = vmul.f32 %v3668_v44, %v2004_v35  ;;  %v7062_v18 = vld [vmem:[#allocation6 + $0x1c0] sm:$0xff]  ;;  %v7073_v56 = vld [vmem:[#allocation6 + $0x1b0] sm:$0xff]  ;;  %v9431_v44 = vld [vmem:[#allocation36_spill] sm:$0xff] }
 0x41a   :  { %v9432_v35 = vld [vmem:[#allocation78_spill] sm:$0xff] }
 0x41b   :  { %2281 = vmatpush.msrb.mxu1 %v6482_v25  ;;  %2321 = vmatpush.msrb.mxu3 %v6485_v28  ;;  %v7065_v25 = vld [vmem:[#allocation6 + $0x1d0] sm:$0xff]  ;;  %v7070_v28 = vld [vmem:[#allocation6 + $0x1a0] sm:$0xff] }
 0x41c   :  { %2028 = vmatmul.f32.vlgmr.msrb.gmra.mxu0 %v7048_v48  ;;  %2068 = vmatmul.f32.vlgmr.msrb.gmra.mxu2 %v7048_v48 }
 0x41d   :  { %2250 = vmatpush.msrb.mxu0 %v7054_v21  ;;  %2290 = vmatpush.msrb.mxu2 %v7057_v31 }
 0x41e   :  { %2282 = vmatpush.msrb.mxu1 %v6492_v5  ;;  %2322 = vmatpush.msrb.mxu3 %v6495_v40  ;;  %v7078_v5 = vld [vmem:[#allocation6 + $0x180] sm:$0xff]  ;;  %v7081_v40 = vld [vmem:[#allocation6 + $0x190] sm:$0xff] }
 0x41f   :  { %2251 = vmatpush.msrb.mxu0 %v7062_v18  ;;  %2291 = vmatpush.msrb.mxu2 %v7065_v25 }
 0x420   :  { %2283 = vmatpush.msrb.mxu1 %v6500_v57  ;;  %2323 = vmatpush.msrb.mxu3 %v6503_v55  ;;  %v9399_v57 = vld [vmem:[#allocation31_spill] sm:$0xff] }
 0x421   :  { %2252 = vmatpush.msrb.mxu0 %v7070_v28  ;;  %2292 = vmatpush.msrb.mxu2 %v7073_v56  ;;  %v7088_v55 = vld [vmem:[#allocation6 + $0x160] sm:$0xff] }
 0x422   :  { %2284 = vmatpush.msrb.mxu1 %v6508_v9  ;;  %2324 = vmatpush.msrb.mxu3 %v6511_v50  ;;  %v7092_v9 = vld [vmem:[#allocation6 + $0x170] sm:$0xff]  ;;  %v7096_v50 = vld [vmem:[#allocation6 + $0x140] sm:$0xff] }
 0x423   :  { %2253 = vmatpush.msrb.mxu0 %v7078_v5  ;;  %2293 = vmatpush.msrb.mxu2 %v7081_v40 }
 0x424   :  { %2285 = vmatpush.msrb.mxu1 %v6516_v22  ;;  %2325 = vmatpush.msrb.mxu3 %v9399_v57  ;;  %v9400_v22 = vld [vmem:[#allocation32_spill] sm:$0xff]  ;;  %v9433_v57 = vld [vmem:[#allocation82_spill] sm:$0xff] }
 0x425   :  { %2108 = vmatmul.f32.vlgmr.msra.gmra.mxu0 %v7048_v48  ;;  %2148 = vmatmul.f32.vlgmr.msra.gmra.mxu2 %v7048_v48 }
 0x426   :  { %2254 = vmatpush.msrb.mxu0 %v7088_v55  ;;  %2286 = vmatmul.f32.vlgmr.msrb.gmra.mxu1 %v7048_v48 }
 0x427   :  { %2294 = vmatpush.msrb.mxu2 %v7092_v9  ;;  %2326 = vmatmul.f32.vlgmr.msrb.gmra.mxu3 %v7048_v48 }
 0x428   :  { %2255 = vmatpush.msrb.mxu0 %v7096_v50  ;;  %2417 = vmatpush.msra.mxu1 %v9400_v22  ;;  %v9434_v22 = vld [vmem:[#allocation22_spill] sm:$0xff] }
 0x429   :  { %2295 = vmatpush.msrb.mxu2 %v7100_v33  ;;  %2457 = vmatpush.msra.mxu3 %v9401_v13  ;;  %v9435_v13 = vld [vmem:[#allocation83_spill] sm:$0xff] }
 0x42a   :  { %2256 = vmatpush.msrb.mxu0 %v7104_v14  ;;  %2418 = vmatpush.msra.mxu1 %v9402_v61  ;;  %v9436_v61 = vld [vmem:[#allocation23_spill] sm:$0xff] }
 0x42b   :  { %2296 = vmatpush.msrb.mxu2 %v7108_v12  ;;  %2458 = vmatpush.msra.mxu3 %v9403_v15  ;;  %v9437_v15 = vld [vmem:[#allocation86_spill] sm:$0xff] }
 0x42c   :  { %2257 = vmatpush.msrb.mxu0 %v7112_v45  ;;  %2419 = vmatpush.msra.mxu1 %v9404_v46  ;;  %v9438_v46 = vld [vmem:[#allocation24_spill] sm:$0xff] }
 0x42d   :  { %2297 = vmatpush.msrb.mxu2 %v7116_v52  ;;  %2459 = vmatpush.msra.mxu3 %v9405_v27  ;;  %v9439_v27 = vld [vmem:[#allocation87_spill] sm:$0xff] }
 0x42e   :  { %2258 = vmatpush.msrb.mxu0 %v7120_v34  ;;  %2420 = vmatpush.msra.mxu1 %v9406_v1  ;;  %v9441_v1 = vld [vmem:[#allocation90_spill] sm:$0xff] }
 0x42f   :  { %2298 = vmatpush.msrb.mxu2 %v7124_v2  ;;  %2460 = vmatpush.msra.mxu3 %v9407_v17  ;;  %v9442_v17 = vld [vmem:[#allocation40_spill] sm:$0xff] }
 0x430   :  { %2259 = vmatpush.msrb.mxu0 %v7128_v16  ;;  %2421 = vmatpush.msra.mxu1 %v9408_v6  ;;  %v9443_v6 = vld [vmem:[#allocation91_spill] sm:$0xff] }
 0x431   :  { %2299 = vmatpush.msrb.mxu2 %v7132_v37  ;;  %2461 = vmatpush.msra.mxu3 %v9409_v38  ;;  %v9444_v38 = vld [vmem:[#allocation41_spill] sm:$0xff] }
 0x432   :  { %2260 = vmatpush.msrb.mxu0 %v7136_v30  ;;  %2422 = vmatpush.msra.mxu1 %v9410_v32  ;;  %v9445_v32 = vld [vmem:[#allocation52_spill] sm:$0xff] }
 0x433   :  { %2300 = vmatpush.msrb.mxu2 %v7140_v10  ;;  %2462 = vmatpush.msra.mxu3 %v9411_v19  ;;  %v9446_v19 = vld [vmem:[#allocation44_spill] sm:$0xff] }
 0x434   :  { %2261 = vmatpush.msrb.mxu0 %v7144_v53  ;;  %2423 = vmatpush.msra.mxu1 %v9412_v49  ;;  %v9447_v49 = vld [vmem:[#allocation53_spill] sm:$0xff] }
 0x435   :  { %2301 = vmatpush.msrb.mxu2 %v9413_v11  ;;  %2463 = vmatpush.msra.mxu3 %v9414_v43  ;;  %v9448_v11 = vld [vmem:[#allocation45_spill] sm:$0xff]  ;;  %v9449_v43 = vld [vmem:[#allocation56_spill] sm:$0xff] }
 0x436   :  { %2262 = vmatpush.msrb.mxu0 %v9415_v0  ;;  %2424 = vmatpush.msra.mxu1 %v9416_v62  ;;  %v9450_v0 = vld [vmem:[#allocation48_spill] sm:$0xff]  ;;  %v9451_v62 = vld [vmem:[#allocation57_spill] sm:$0xff] }
 0x437   :  { %2302 = vmatpush.msrb.mxu2 %v9417_v39  ;;  %2464 = vmatpush.msra.mxu3 %v9418_v8  ;;  %v9452_v39 = vld [vmem:[#allocation94_spill] sm:$0xff]  ;;  %v9453_v8 = vld [vmem:[#allocation49_spill] sm:$0xff] }
 0x438   :  { %2263 = vmatpush.msrb.mxu0 %v9419_v59  ;;  %2425 = vmatpush.msra.mxu1 %v9420_v47  ;;  %v9454_v59 = vld [vmem:[#allocation60_spill] sm:$0xff]  ;;  %v9455_v47 = vld [vmem:[#allocation61_spill] sm:$0xff] }
 0x439   :  { %2303 = vmatpush.msrb.mxu2 %v9421_v7  ;;  %2465 = vmatpush.msra.mxu3 %v9422_v60  ;;  %v9456_v7 = vld [vmem:[#allocation64_spill] sm:$0xff]  ;;  %v9457_v60 = vld [vmem:[#allocation65_spill] sm:$0xff] }
 0x43a   :  { %2264 = vmatpush.msrb.mxu0 %v9423_v36  ;;  %2426 = vmatpush.msra.mxu1 %v9424_v3  ;;  %v9458_v36 = vld [vmem:[#allocation68_spill] sm:$0xff]  ;;  %v9459_v3 = vld [vmem:[#allocation69_spill] sm:$0xff] }
 0x43b   :  { %2304 = vmatpush.msrb.mxu2 %v9425_v23  ;;  %2466 = vmatpush.msra.mxu3 %v9426_v63  ;;  %v9460_v23 = vld [vmem:[#allocation72_spill] sm:$0xff]  ;;  %v9461_v63 = vld [vmem:[#allocation73_spill] sm:$0xff] }
 0x43c   :  { %2265 = vmatpush.msrb.mxu0 %v9427_v51  ;;  %2427 = vmatpush.msra.mxu1 %v9428_v26  ;;  %v9462_v51 = vld [vmem:[#allocation76_spill] sm:$0xff]  ;;  %v9463_v26 = vld [vmem:[#allocation77_spill] sm:$0xff] }
 0x43d   :  { %2305 = vmatpush.msrb.mxu2 %v9429_v54  ;;  %2266 = vmatmul.f32.vlgmr.msrb.gmra.mxu0 %v7048_v48  ;;  %v9464_v54 = vld [vmem:[#allocation80_spill] sm:$0xff] }
 0x43e   :  { %2306 = vmatmul.f32.vlgmr.msrb.gmra.mxu2 %v7048_v48  ;;  %2467 = vmatpush.msra.mxu3 %v9430_v29  ;;  %v9440_v48 = vld [vmem:[#allocation37_spill] sm:$0xff] }
 0x43f   :  { %2428 = vmatpush.msra.mxu1 %v9431_v44  ;;  %2397 = vmatpush.msra.mxu0 %v9432_v35  ;;  %v9465_v29 = vld [vmem:[#allocation81_spill] sm:$0xff]  ;;  %v9466_v44 = vld [vmem:[#allocation84_spill] sm:$0xff] }
 0x440   :  { %2468 = vmatpush.msra.mxu3 %v9433_v57  ;;  %2437 = vmatpush.msra.mxu2 %v9434_v22  ;;  %v9467_v35 = vld [vmem:[#allocation85_spill] sm:$0xff]  ;;  %v9468_v57 = vld [vmem:[#allocation88_spill] sm:$0xff] }
 0x441   :  { %2429 = vmatpush.msra.mxu1 %v9435_v13  ;;  %2398 = vmatpush.msra.mxu0 %v9436_v61  ;;  %v9469_v22 = vld [vmem:[#allocation89_spill] sm:$0xff]  ;;  %v9470_v13 = vld [vmem:[#allocation92_spill] sm:$0xff] }
 0x442   :  { %2469 = vmatpush.msra.mxu3 %v9437_v15  ;;  %2438 = vmatpush.msra.mxu2 %v9438_v46  ;;  %v9471_v61 = vld [vmem:[#allocation93_spill] sm:$0xff]  ;;  %v9472_v15 = vld [vmem:[#allocation95_spill] sm:$0xff]  ;;  %v9473_v46 = vld [vmem:[#allocation96_spill] sm:$0xff] }
 0x443   :  { %2430 = vmatpush.msra.mxu1 %v9439_v27  ;;  %2399 = vmatpush.msra.mxu0 %v9440_v48  ;;  %v9474_v27 = vld [vmem:[#allocation97_spill] sm:$0xff]  ;;  %v9475_v48 = vld [vmem:[#allocation98_spill] sm:$0xff] }
 0x444   :  { %2470 = vmatpush.msra.mxu3 %v9441_v1  ;;  %2439 = vmatpush.msra.mxu2 %v9442_v17  ;;  %v9476_v1 = vld [vmem:[#allocation99_spill] sm:$0xff]  ;;  %v9477_v17 = vld [vmem:[#allocation100_spill] sm:$0xff] }
 0x445   :  { %2431 = vmatpush.msra.mxu1 %v9443_v6  ;;  %2400 = vmatpush.msra.mxu0 %v9444_v38  ;;  %v9478_v6 = vld [vmem:[#allocation101_spill] sm:$0xff]  ;;  %v9479_v38 = vld [vmem:[#allocation102_spill] sm:$0xff] }
 0x446   :  { %2471 = vmatpush.msra.mxu3 %v9445_v32  ;;  %2440 = vmatpush.msra.mxu2 %v9446_v19  ;;  %v9480_v32 = vld [vmem:[#allocation103_spill] sm:$0xff]  ;;  %v9481_v19 = vld [vmem:[#allocation106_spill] sm:$0xff] }
 0x447   :  { %2432 = vmatpush.msra.mxu1 %v9447_v49  ;;  %2401 = vmatpush.msra.mxu0 %v9448_v11  ;;  %v9482_v49 = vld [vmem:[#allocation107_spill] sm:$0xff]  ;;  %v9483_v11 = vld [vmem:[#allocation110_spill] sm:$0xff] }
 0x448   :  { %2472 = vmatpush.msra.mxu3 %v9449_v43  ;;  %2441 = vmatpush.msra.mxu2 %v9450_v0  ;;  %v9484_v43 = vld [vmem:[#allocation111_spill] sm:$0xff]  ;;  %v9485_v0 = vld [vmem:[#allocation112_spill] sm:$0xff] }
 0x449   :  { %2497 = vmatpush.msrb.mxu1 %v9451_v62  ;;  %2402 = vmatpush.msra.mxu0 %v9453_v8  ;;  %v9486_v62 = vld [vmem:[#allocation113_spill] sm:$0xff]  ;;  %v9488_v8 = vld [vmem:[#allocation115_spill] sm:$0xff] }
 0x44a   :  { %2537 = vmatpush.msrb.mxu3 %v9452_v39  ;;  %2442 = vmatpush.msra.mxu2 %v9454_v59  ;;  %v9487_v39 = vld [vmem:[#allocation114_spill] sm:$0xff]  ;;  %v9489_v59 = vld [vmem:[#allocation116_spill] sm:$0xff] }
 0x44b   :  { %2498 = vmatpush.msrb.mxu1 %v9455_v47  ;;  %2403 = vmatpush.msra.mxu0 %v9457_v60  ;;  %v9490_v47 = vld [vmem:[#allocation117_spill] sm:$0xff]  ;;  %v9492_v60 = vld [vmem:[#allocation119_spill] sm:$0xff] }
 0x44c   :  { %2538 = vmatpush.msrb.mxu3 %v9456_v7  ;;  %2443 = vmatpush.msra.mxu2 %v9458_v36  ;;  %v9491_v7 = vld [vmem:[#allocation118_spill] sm:$0xff]  ;;  %v9493_v36 = vld [vmem:[#allocation120_spill] sm:$0xff] }
 0x44d   :  { %2499 = vmatpush.msrb.mxu1 %v9459_v3  ;;  %2404 = vmatpush.msra.mxu0 %v9461_v63  ;;  %v9494_v3 = vld [vmem:[#allocation121_spill] sm:$0xff]  ;;  %v9496_v63 = vld [vmem:[#allocation123_spill] sm:$0xff] }
 0x44e   :  { %2539 = vmatpush.msrb.mxu3 %v9460_v23  ;;  %2444 = vmatpush.msra.mxu2 %v9462_v51  ;;  %v9495_v23 = vld [vmem:[#allocation122_spill] sm:$0xff]  ;;  %v9497_v51 = vld [vmem:[#allocation124_spill] sm:$0xff] }
 0x44f   :  { %2500 = vmatpush.msrb.mxu1 %v9463_v26  ;;  %2405 = vmatpush.msra.mxu0 %v9465_v29  ;;  %v9498_v26 = vld [vmem:[#allocation125_spill] sm:$0xff]  ;;  %v9500_v29 = vld [vmem:[#allocation127_spill] sm:$0xff] }
 0x450   :  { %2540 = vmatpush.msrb.mxu3 %v9464_v54  ;;  %2445 = vmatpush.msra.mxu2 %v9466_v44  ;;  %v9499_v54 = vld [vmem:[#allocation126_spill] sm:$0xff]  ;;  %v9501_v44 = vld [vmem:[#allocation128_spill] sm:$0xff] }
 0x451   :  { %2501 = vmatpush.msrb.mxu1 %v9467_v35  ;;  %2406 = vmatpush.msra.mxu0 %v9469_v22  ;;  %v9502_v35 = vld [vmem:[#allocation129_spill] sm:$0xff]  ;;  %v9504_v22 = vld [vmem:[#allocation131_spill] sm:$0xff] }
 0x452   :  { %2541 = vmatpush.msrb.mxu3 %v9468_v57  ;;  %2446 = vmatpush.msra.mxu2 %v9470_v13  ;;  %v9503_v57 = vld [vmem:[#allocation130_spill] sm:$0xff]  ;;  %v9505_v13 = vld [vmem:[#allocation132_spill] sm:$0xff] }
 0x453   :  { %2502 = vmatpush.msrb.mxu1 %v9471_v61  ;;  %2407 = vmatpush.msra.mxu0 %v9473_v46  ;;  %v9506_v61 = vld [vmem:[#allocation133_spill] sm:$0xff]  ;;  %v9508_v46 = vld [vmem:[#allocation135_spill] sm:$0xff] }
 0x454   :  { %2542 = vmatpush.msrb.mxu3 %v9472_v15  ;;  %2447 = vmatpush.msra.mxu2 %v9474_v27  ;;  %v9507_v15 = vld [vmem:[#allocation134_spill] sm:$0xff]  ;;  %v9509_v27 = vld [vmem:[#allocation136_spill] sm:$0xff] }
 0x455   :  { %2503 = vmatpush.msrb.mxu1 %v9475_v48  ;;  %2408 = vmatpush.msra.mxu0 %v9477_v17  ;;  %v9510_v48 = vld [vmem:[#allocation137_spill] sm:$0xff]  ;;  %v9512_v17 = vld [vmem:[#allocation139_spill] sm:$0xff] }
 0x456   :  { %2543 = vmatpush.msrb.mxu3 %v9476_v1  ;;  %2448 = vmatpush.msra.mxu2 %v9478_v6  ;;  %v9511_v1 = vld [vmem:[#allocation138_spill] sm:$0xff]  ;;  %v9513_v6 = vld [vmem:[#allocation140_spill] sm:$0xff] }
 0x457   :  { %2504 = vmatpush.msrb.mxu1 %v9479_v38  ;;  %2409 = vmatpush.msra.mxu0 %v9481_v19  ;;  %v9514_v38 = vld [vmem:[#allocation141_spill] sm:$0xff]  ;;  %v9516_v19 = vld [vmem:[#allocation143_spill] sm:$0xff] }
 0x458   :  { %2544 = vmatpush.msrb.mxu3 %v9480_v32  ;;  %2449 = vmatpush.msra.mxu2 %v9482_v49  ;;  %v9515_v32 = vld [vmem:[#allocation142_spill] sm:$0xff]  ;;  %v9517_v49 = vld [vmem:[#allocation144_spill] sm:$0xff] }
 0x459   :  { %2505 = vmatpush.msrb.mxu1 %v9483_v11  ;;  %2410 = vmatpush.msra.mxu0 %v9485_v0  ;;  %v9518_v11 = vld [vmem:[#allocation145_spill] sm:$0xff]  ;;  %v9520_v0 = vld [vmem:[#allocation147_spill] sm:$0xff] }
 0x45a   :  { %2545 = vmatpush.msrb.mxu3 %v9484_v43  ;;  %2450 = vmatpush.msra.mxu2 %v9486_v62  ;;  %v9519_v43 = vld [vmem:[#allocation146_spill] sm:$0xff]  ;;  %v9521_v62 = vld [vmem:[#allocation148_spill] sm:$0xff] }
 0x45b   :  { %2506 = vmatpush.msrb.mxu1 %v9487_v39  ;;  %2411 = vmatpush.msra.mxu0 %v9489_v59  ;;  %v9522_v39 = vld [vmem:[#allocation149_spill] sm:$0xff]  ;;  %v9524_v59 = vld [vmem:[#allocation151_spill] sm:$0xff] }
 0x45c   :  { %2546 = vmatpush.msrb.mxu3 %v9488_v8  ;;  %2451 = vmatpush.msra.mxu2 %v9490_v47  ;;  %v9523_v8 = vld [vmem:[#allocation150_spill] sm:$0xff]  ;;  %v9525_v47 = vld [vmem:[#allocation152_spill] sm:$0xff] }
 0x45d   :  { %2507 = vmatpush.msrb.mxu1 %v9491_v7  ;;  %2412 = vmatpush.msra.mxu0 %v9493_v36  ;;  %v9526_v7 = vld [vmem:[#allocation153_spill] sm:$0xff]  ;;  %v9528_v36 = vld [vmem:[#allocation155_spill] sm:$0xff] }
 0x45e   :  { %2547 = vmatpush.msrb.mxu3 %v9492_v60  ;;  %2452 = vmatpush.msra.mxu2 %v9494_v3  ;;  %v9527_v60 = vld [vmem:[#allocation154_spill] sm:$0xff]  ;;  %v9529_v3 = vld [vmem:[#allocation156_spill] sm:$0xff] }
 0x45f   :  { %2508 = vmatpush.msrb.mxu1 %v9495_v23  ;;  %2477 = vmatpush.msrb.mxu0 %v9497_v51  ;;  %v9530_v23 = vld [vmem:[#allocation157_spill] sm:$0xff]  ;;  %v9532_v51 = vld [vmem:[#allocation159_spill] sm:$0xff] }
 0x460   :  { %2548 = vmatpush.msrb.mxu3 %v9496_v63  ;;  %2517 = vmatpush.msrb.mxu2 %v9498_v26  ;;  %v9531_v63 = vld [vmem:[#allocation158_spill] sm:$0xff]  ;;  %v9533_v26 = vld [vmem:[#allocation160_spill] sm:$0xff] }
 0x461   :  { %2509 = vmatpush.msrb.mxu1 %v9499_v54  ;;  %2478 = vmatpush.msrb.mxu0 %v9501_v44  ;;  %v9534_v54 = vld [vmem:[#allocation161_spill] sm:$0xff]  ;;  %v9536_v44 = vld [vmem:[#allocation163_spill] sm:$0xff] }
 0x462   :  { %2549 = vmatpush.msrb.mxu3 %v9500_v29  ;;  %2518 = vmatpush.msrb.mxu2 %v9502_v35  ;;  %v9535_v29 = vld [vmem:[#allocation162_spill] sm:$0xff] }
 0x463   :  { %2510 = vmatpush.msrb.mxu1 %v9503_v57  ;;  %2479 = vmatpush.msrb.mxu0 %v9505_v13 }
 0x464   :  { %2550 = vmatpush.msrb.mxu3 %v9504_v22  ;;  %2519 = vmatpush.msrb.mxu2 %v9506_v61  ;;  %v9537_v22 = vld [vmem:[#allocation25_spill] sm:$0xff]  ;;  %v7275_v61 = vpop.permute.xlu2 %2239 }
 0x465   :  { %2511 = vmatpush.msrb.mxu1 %v9507_v15  ;;  %2480 = vmatpush.msrb.mxu0 %v9509_v27  ;;  %v9538_v27 = vld [vmem:[#allocation105_spill] sm:$0xff] }
 0x466   :  { %2551 = vmatpush.msrb.mxu3 %v9508_v46  ;;  %2520 = vmatpush.msrb.mxu2 %v9510_v48  ;;  %v2243_v48 = vmul.f32 %v7275_v61, %v9538_v27 }
 0x467   :  { %2512 = vmatpush.msrb.mxu1 %v9511_v1  ;;  %2481 = vmatpush.msrb.mxu0 %v9513_v6  ;;  %v9539_v6 = vld [vmem:[#allocation26_spill] sm:$0xff] }
 0x468   :  { %2552 = vmatpush.msrb.mxu3 %v9512_v17  ;;  %2521 = vmatpush.msrb.mxu2 %v9514_v38 }
 0x469   :  { %2482 = vmatpush.msrb.mxu0 %v9515_v32 }
 0x46a   :  { %2522 = vmatpush.msrb.mxu2 %v9516_v19 }
 0x46b   :  { %2483 = vmatpush.msrb.mxu0 %v9517_v49 }
 0x46c   :  { %2523 = vmatpush.msrb.mxu2 %v9518_v11  ;;  %v9540_v11 = vld [vmem:[#allocation109_spill] sm:$0xff] }
 0x46d   :  { %2484 = vmatpush.msrb.mxu0 %v9519_v43  ;;  %v2247_v43 = vadd.f32 %v2243_v48, %v9540_v11 }
 0x46e   :  { %2524 = vmatpush.msrb.mxu2 %v9520_v0  ;;  %v9541_v0 = vld [vmem:[#allocation27_spill] sm:$0xff] }
 0x46f   :  { %2485 = vmatpush.msrb.mxu0 %v9521_v62 }
 0x470   :  { %2525 = vmatpush.msrb.mxu2 %v9522_v39 }
 0x471   :  { %2486 = vmatpush.msrb.mxu0 %v9523_v8 }
 0x472   :  { %2526 = vmatpush.msrb.mxu2 %v9524_v59 }
 0x473   :  { %2487 = vmatpush.msrb.mxu0 %v9525_v47 }
 0x474   :  { %2527 = vmatpush.msrb.mxu2 %v9526_v7 }
 0x475   :  { %2488 = vmatpush.msrb.mxu0 %v9527_v60 }
 0x476   :  { %2528 = vmatpush.msrb.mxu2 %v9528_v36 }
 0x477   :  { %2489 = vmatpush.msrb.mxu0 %v9529_v3 }
 0x478   :  { %2529 = vmatpush.msrb.mxu2 %v9530_v23 }
 0x479   :  { %2490 = vmatpush.msrb.mxu0 %v9531_v63 }
 0x47a   :  { %2530 = vmatpush.msrb.mxu2 %v9532_v51 }
 0x47b   :  { %2491 = vmatpush.msrb.mxu0 %v9533_v26 }
 0x47c   :  { %2531 = vmatpush.msrb.mxu2 %v9534_v54 }
 0x47d   :  { %2492 = vmatpush.msrb.mxu0 %v9535_v29 }
 0x47e   :  { %2532 = vmatpush.msrb.mxu2 %v9536_v44  ;;  %v9542_v44 = vld [vmem:[#allocation28_spill] sm:$0xff] }
 0x481   :  { %v2049_v35 = vpop.f32.mrf.mxu1 }
 0x487   :  { %v2089_v32 = vpop.f32.mrf.mxu3 }
 0x489   :  { %v2129_v15 = vpop.f32.mrf.mxu1 }
 0x499   :  { %v2029_v57 = vpop.f32.mrf.mxu0 }
 0x49a   :  { %v2030_v13 = vadd.f32 %v2029_v57, %v9537_v22 }
 0x49c   :  { %v2050_v46 = vadd.f32 %v2049_v35, %v2030_v13 }
 0x49e   :  { %v3487_v1 = vmul.f32 -1.442695, %v2050_v46  ;;  %v2169_v46 = vpop.f32.mrf.mxu3 }
 0x49f   :  { %v2069_v17 = vpop.f32.mrf.mxu2 }
 0x4a0   :  { %3669 = vpow2.f32 %v3487_v1  ;;  %v2070_v38 = vadd.f32 %v2069_v17, %v9539_v6 }
 0x4a2   :  { %v2090_v19 = vadd.f32 %v2089_v32, %v2070_v38  ;;  %v2109_v49 = vpop.f32.mrf.mxu0  ;;  %v9543_v38 = vld [vmem:[#allocation104_spill] sm:$0xff] }
 0x4a3   :  { %v2110_v62 = vadd.f32 %v2109_v49, %v9541_v0  ;;  %v2287_v39 = vpop.f32.mrf.mxu1  ;;  %v2242_v32 = vmul.f32 %v7275_v61, %v9543_v38 }
 0x4a4   :  { %v3488_v8 = vmul.f32 -1.442695, %v2090_v19  ;;  %v2331_v59 = vadd.f32 %v2287_v39, %v2247_v43 }
 0x4a5   :  { %v2130_v47 = vadd.f32 %v2129_v15, %v2110_v62 }
 0x4a6   :  { %v3670_v7 = vpop.eup %3669  ;;  %3671 = vpow2.f32 %v3488_v8  ;;  %v3492_v3 = vmul.f32 -1.442695, %v2331_v59 }
 0x4a7   :  { %v2181_v60 = vadd.f32 1.0, %v3670_v7  ;;  %v3489_v36 = vmul.f32 -1.442695, %v2130_v47 }
 0x4a8   :  { %v2149_v51 = vpop.f32.mrf.mxu2 }
 0x4a9   :  { %3673 = vrcp.f32 %v2181_v60  ;;  %v2150_v35 = vadd.f32 %v2149_v51, %v9542_v44  ;;  %v2195_v62 = vand.u32 2147483648, %v2181_v60  ;;  %vm2189_vm13 = vweird.f32 %v2181_v60 }
 0x4aa   :  { %3675 = vpow2.f32 %v3489_v36  ;;  %v2193_v8 = vand.u32 2147483647, %v2181_v60 }
 0x4ab   :  { %3677 = vpow2.f32 %v3492_v3  ;;  %v2170_v48 = vadd.f32 %v2169_v46, %v2150_v35  ;;  %v9546_v3 = vld [vmem:[#allocation108_spill] sm:$0xff]  ;;  %v2244_v35 = vmul.f32 %v7275_v61, %v5060_v20 }
 0x4ac   :  { %v3672_v23 = vpop.eup %3671  ;;  %vm2194_vm1 = vcmp.eq.f32.partialorder %v2193_v8, 8.507059e+37 }
 0x4ad   :  { %v2182_v63 = vadd.f32 1.0, %v3672_v23  ;;  %v2246_v23 = vadd.f32 %v2242_v32, %v9546_v3 }
 0x4af   :  { %v3674_v26 = vpop.eup %3673  ;;  %3679 = vrcp.f32 %v2182_v63  ;;  %v2210_v47 = vand.u32 2147483648, %v2182_v63  ;;  %v2208_v36 = vand.u32 2147483647, %v2182_v63  ;;  %vm2204_vm0 = vweird.f32 %v2182_v63 }
 0x4b0   :  { %v3676_v54 = vpop.eup %3675  ;;  %v2185_v29 = vmul.f32 %v3674_v26, %v2181_v60  ;;  %vm2190_vm12 = vweird.f32 %v3674_v26 }
 0x4b1   :  { %v7283_v57 = vadd.f32 1.0, %v3676_v54  ;;  %v3678_v13 = vpop.eup %3677  ;;  %vm7291_vm14 = vmor %vm2189_vm13, %vm2190_vm12  ;;  %vm2209_vm3 = vcmp.eq.f32.partialorder %v2208_v36, 8.507059e+37 }
 0x4b2   :  { %v2186_v15 = vsub.f32 1.0, %v2185_v29  ;;  %v7288_v19 = vadd.f32 1.0, %v3678_v13  ;;  %v2196_v13 = vor.u32 1.1754944e-38, %v2195_v62 }
 0x4b3   :  { %3681 = vrcp.f32 %v7283_v57  ;;  %v2225_v36 = vand.u32 2147483648, %v7283_v57  ;;  %vm2219_vm5 = vweird.f32 %v7283_v57 }
 0x4b4   :  { %v2187_v1 = vmul.f32 %v3674_v26, %v2186_v15  ;;  %3683 = vtanh.f32 %v2170_v48  ;;  %vm2366_vm9 = vweird.f32 %v7288_v19 }
 0x4b5   :  { %v3680_v17 = vpop.eup %3679  ;;  %3685 = vrcp.f32 %v7288_v19 }
 0x4b6   :  { %v2200_v49 = vmul.f32 %v3680_v17, %v2182_v63  ;;  %v2188_v43 = vadd.f32 %v3674_v26, %v2187_v1  ;;  %vm2205_vm15 = vweird.f32 %v3680_v17  ;;  %v2211_v1 = vor.u32 1.1754944e-38, %v2210_v47 }
 0x4b7   :  { %vm2206_vm2 = vmor %vm2204_vm0, %vm2205_vm15  ;;  %v2248_v63 = vadd.f32 %v2244_v35, %v5081_v4 }
 0x4b8   :  { %v2201_v39 = vsub.f32 1.0, %v2200_v49  ;;  %v2192_v29 = vsel %vm7291_vm14, %v3674_v26, %v2188_v43 }
 0x4b9   :  { %v3682_v59 = vpop.eup %3681  ;;  %v2197_v32 = vsel %vm2194_vm1, %v2196_v13, %v2192_v29  ;;  %v2245_v13 = vmul.f32 %v7275_v61, %v5115_v42  ;;  %v7322_v61 = vld [vmem:[#allocation6 + $0x1e8] sm:$0xff] }
 0x4ba   :  { %v2202_v51 = vmul.f32 %v3680_v17, %v2201_v39  ;;  %v2215_v54 = vmul.f32 %v3682_v59, %v7283_v57  ;;  %v2267_v60 = vpop.f32.mrf.mxu0  ;;  %v3684_v39 = vpop.eup %3683  ;;  %vm2220_vm4 = vweird.f32 %v3682_v59 }
 0x4bb   :  { %v2330_v15 = vadd.f32 %v2267_v60, %v2246_v23  ;;  %v7301_v38 = vpop.eup %3685  ;;  %v2231_v62 = vmul.f32 %v3684_v39, %v2197_v32  ;;  %vm2221_vm6 = vmor %vm2219_vm5, %vm2220_vm4  ;;  %v2327_v32 = vpop.f32.mrf.mxu3  ;;  %v2249_v39 = vadd.f32 %v2245_v13, %v5141_v58 }
 0x4bc   :  { %v2216_v46 = vsub.f32 1.0, %v2215_v54  ;;  %v2203_v48 = vadd.f32 %v3680_v17, %v2202_v51  ;;  %v2362_v47 = vmul.f32 %v7301_v38, %v7288_v19  ;;  %vm2367_vm8 = vweird.f32 %v7301_v38 }
 0x4bd   :  { %v3491_v49 = vmul.f32 -1.442695, %v2330_v15  ;;  %v2226_v15 = vor.u32 1.1754944e-38, %v2225_v36  ;;  %vm7341_vm10 = vmor %vm2366_vm9, %vm2367_vm8 }
 0x4be   :  { %v2207_v3 = vsel %vm2206_vm2, %v3680_v17, %v2203_v48  ;;  %v2217_v43 = vmul.f32 %v3682_v59, %v2216_v46  ;;  %v2363_v60 = vsub.f32 1.0, %v2362_v47  ;;  %v7336_v47 = vld [vmem:[#allocation6 + $0x1d8] sm:$0xff] }
 0x4bf   :  { %v2212_v26 = vsel %vm2209_vm3, %v2211_v1, %v2207_v3  ;;  %3687 = vpow2.f32 %v3491_v49 }
 0x4c0   :  { %v2230_v7 = vmul.f32 %v2212_v26, %v6991_v41  ;;  %v2218_v54 = vadd.f32 %v3682_v59, %v2217_v43  ;;  %v2223_v41 = vand.u32 2147483647, %v7283_v57  ;;  %v2364_v1 = vmul.f32 %v7301_v38, %v2363_v60  ;;  %v7349_v60 = vld [vmem:[#allocation6 + $0x1b8] sm:$0xff] }
 0x4c1   :  { %v2307_v23 = vpop.f32.mrf.mxu2  ;;  %v2333_v43 = vadd.f32 %v2327_v32, %v2249_v39 }
 0x4c2   :  { %v7305_v8 = vadd.f32 %v2231_v62, %v2230_v7  ;;  %v2332_v51 = vadd.f32 %v2307_v23, %v2248_v63  ;;  %v2222_v35 = vsel %vm2221_vm6, %v3682_v59, %v2218_v54  ;;  %vm2224_vm7 = vcmp.eq.f32.partialorder %v2223_v41, 8.507059e+37  ;;  %v7325_v7 = vld [vmem:[#allocation6 + $0x1f8] sm:$0xff]  ;;  %v7346_v41 = vld [vmem:[#allocation6 + $0x1a8] sm:$0xff] }
 0x4c3   :  { %v2227_v48 = vsel %vm2224_vm7, %v2226_v15, %v2222_v35  ;;  %v2365_v62 = vadd.f32 %v7301_v38, %v2364_v1  ;;  %v2372_v23 = vand.u32 2147483648, %v7288_v19  ;;  %v2370_v54 = vand.u32 2147483647, %v7288_v19 }
 0x4c4   :  { %3689 = vtanh.f32 %v7305_v8  ;;  %v3493_v17 = vmul.f32 -1.442695, %v2332_v51  ;;  %v7333_v51 = vld [vmem:[#allocation6 + $0x1c8] sm:$0xff] }
 0x4c5   :  { %v3688_v3 = vpop.eup %3687  ;;  %v2369_v19 = vsel %vm7341_vm10, %v7301_v38, %v2365_v62  ;;  %v2373_v15 = vor.u32 1.1754944e-38, %v2372_v23  ;;  %vm2371_vm12 = vcmp.eq.f32.partialorder %v2370_v54, 8.507059e+37  ;;  %v7367_v62 = vld [vmem:[#allocation6 + $0x178] sm:$0xff] }
 0x4c6   :  { %v7313_v29 = vadd.f32 1.0, %v3688_v3  ;;  %3691 = vpow2.f32 %v3493_v17 }
 0x4c7   :  { %v2374_v38 = vsel %vm2371_vm12, %v2373_v15, %v2369_v19 }
 0x4c8   :  { %3693 = vrcp.f32 %v7313_v29  ;;  %v2357_v3 = vand.u32 2147483648, %v7313_v29  ;;  %v2355_v13 = vand.u32 2147483647, %v7313_v29  ;;  %vm2351_vm13 = vweird.f32 %v7313_v29 }
 0x4c9   :  { %v2392_v36 = vmul.f32 %v2374_v38, %v7034_v24 }
 0x4ca   :  { %v3690_v46 = vpop.eup %3689  ;;  %vm2356_vm15 = vcmp.eq.f32.partialorder %v2355_v13, 8.507059e+37 }
 0x4cb   :  { %v2234_v49 = vmul.f32 %v3690_v46, %v2227_v48  ;;  %v7356_v46 = vld [vmem:[#allocation6 + $0x188] sm:$0xff]  ;;  %v7359_v48 = vld [vmem:[#allocation6 + $0x198] sm:$0xff] }
 0x4cc   :  { %v3692_v57 = vpop.eup %3691 }
 0x4cd   :  { %v7320_v26 = vadd.f32 1.0, %v3692_v57  ;;  %2433 = vmatmul.f32.vlgmr.msra.gmra.mxu1 %v2234_v49  ;;  %2473 = vmatmul.f32.vlgmr.msra.gmra.mxu3 %v2234_v49  ;;  %v2358_v57 = vor.u32 1.1754944e-38, %v2357_v3 }
 0x4ce   :  { %v3694_v59 = vpop.eup %3693  ;;  %2655 = vmatpush.msra.mxu1 %v7322_v61  ;;  %2695 = vmatpush.msra.mxu3 %v7325_v7 }
 0x4cf   :  { %v2347_v63 = vmul.f32 %v3694_v59, %v7313_v29  ;;  %3695 = vrcp.f32 %v7320_v26  ;;  %vm2352_vm11 = vweird.f32 %v3694_v59  ;;  %v2387_v24 = vand.u32 2147483648, %v7320_v26 }
 0x4d0   :  { %2656 = vmatpush.msra.mxu1 %v7333_v51  ;;  %2696 = vmatpush.msra.mxu3 %v7336_v47  ;;  %3697 = vtanh.f32 %v2333_v43  ;;  %vm2353_vm14 = vmor %vm2351_vm13, %vm2352_vm11  ;;  %v7364_v43 = vld [vmem:[#allocation6 + $0x168] sm:$0xff]  ;;  %vm2381_vm1 = vweird.f32 %v7320_v26  ;;  %v2385_v38 = vand.u32 2147483647, %v7320_v26 }
 0x4d1   :  { %v2348_v17 = vsub.f32 1.0, %v2347_v63 }
 0x4d2   :  { %2657 = vmatpush.msra.mxu1 %v7346_v41  ;;  %2697 = vmatpush.msra.mxu3 %v7349_v60  ;;  %vm2386_vm3 = vcmp.eq.f32.partialorder %v2385_v38, 8.507059e+37  ;;  %v7428_v38 = vld [vmem:[#allocation6 + $0x78] sm:$0xff] }
 0x4d3   :  { %v2349_v35 = vmul.f32 %v3694_v59, %v2348_v17  ;;  %v7370_v17 = vld [vmem:[#allocation6 + $0x148] sm:$0xff] }
 0x4d4   :  { %2658 = vmatpush.msra.mxu1 %v7356_v46  ;;  %2698 = vmatpush.msra.mxu3 %v7359_v48 }
 0x4d5   :  { %v3696_v1 = vpop.eup %3695  ;;  %v2350_v32 = vadd.f32 %v3694_v59, %v2349_v35  ;;  %2513 = vmatmul.f32.vlgmr.msrb.gmra.mxu1 %v2234_v49  ;;  %2553 = vmatmul.f32.vlgmr.msrb.gmra.mxu3 %v2234_v49  ;;  %v7373_v49 = vld [vmem:[#allocation6 + $0x158] sm:$0xff]  ;;  %v7377_v35 = vld [vmem:[#allocation6 + $0x128] sm:$0xff] }
 0x4d6   :  { %v2377_v39 = vmul.f32 %v3696_v1, %v7320_v26  ;;  %2659 = vmatpush.msra.mxu1 %v7364_v43  ;;  %2699 = vmatpush.msra.mxu3 %v7367_v62  ;;  %v3698_v23 = vpop.eup %3697  ;;  %vm2382_vm0 = vweird.f32 %v3696_v1  ;;  %v7407_v26 = vld [vmem:[#allocation6 + $0xa8] sm:$0xff] }
 0x4d7   :  { %v2354_v63 = vsel %vm2353_vm14, %v3694_v59, %v2350_v32  ;;  %v7380_v59 = vld [vmem:[#allocation6 + $0x138] sm:$0xff]  ;;  %v7385_v32 = vld [vmem:[#allocation6 + $0x108] sm:$0xff]  ;;  %vm2383_vm2 = vmor %vm2381_vm1, %vm2382_vm0 }
 0x4d8   :  { %v2359_v54 = vsel %vm2356_vm15, %v2358_v57, %v2354_v63  ;;  %v2378_v29 = vsub.f32 1.0, %v2377_v39  ;;  %2660 = vmatpush.msra.mxu1 %v7370_v17  ;;  %2700 = vmatpush.msra.mxu3 %v7373_v49  ;;  %v7388_v57 = vld [vmem:[#allocation6 + $0x118] sm:$0xff]  ;;  %v7395_v39 = vld [vmem:[#allocation6 + $0xe8] sm:$0xff] }
 0x4d9   :  { %v2393_v3 = vmul.f32 %v3698_v23, %v2359_v54  ;;  %v7398_v63 = vld [vmem:[#allocation6 + $0xf8] sm:$0xff]  ;;  %v7401_v54 = vld [vmem:[#allocation6 + $0xc8] sm:$0xff] }
 0x4da   :  { %v2379_v19 = vmul.f32 %v3696_v1, %v2378_v29  ;;  %2661 = vmatpush.msra.mxu1 %v7377_v35  ;;  %2701 = vmatpush.msra.mxu3 %v7380_v59  ;;  %9549 = vst [vmem:[#allocation29_spill] sm:$0xff] %v7398_v63  ;;  %v7404_v29 = vld [vmem:[#allocation6 + $0xd8] sm:$0xff] }
 0x4db   :  { %v7383_v13 = vadd.f32 %v2393_v3, %v2392_v36  ;;  %9550 = vst [vmem:[#allocation30_spill] sm:$0xff] %v7401_v54  ;;  %v2388_v36 = vor.u32 1.1754944e-38, %v2387_v24  ;;  %v7410_v3 = vld [vmem:[#allocation6 + $0xb8] sm:$0xff]  ;;  %v7425_v24 = vld [vmem:[#allocation6 + $0x68] sm:$0xff] }
 0x4dc   :  { %v2380_v15 = vadd.f32 %v3696_v1, %v2379_v19  ;;  %2662 = vmatpush.msra.mxu1 %v7385_v32  ;;  %2702 = vmatpush.msra.mxu3 %v7388_v57 }
 0x4dd   :  { %3699 = vtanh.f32 %v7383_v13 }
 0x4de   :  { %2663 = vmatpush.msra.mxu1 %v7395_v39  ;;  %2703 = vmatpush.msra.mxu3 %v7398_v63  ;;  %v2384_v23 = vsel %vm2383_vm2, %v3696_v1, %v2380_v15  ;;  %v7415_v63 = vld [vmem:[#allocation6 + $0x88] sm:$0xff] }
 0x4df   :  { %v2389_v1 = vsel %vm2386_vm3, %v2388_v36, %v2384_v23  ;;  %v7433_v23 = vld [vmem:[#allocation6 + $0x48] sm:$0xff]  ;;  %v7436_v36 = vld [vmem:[#allocation6 + $0x58] sm:$0xff] }
 0x4e0   :  { %2664 = vmatpush.msra.mxu1 %v7401_v54  ;;  %2704 = vmatpush.msra.mxu3 %v7404_v29  ;;  %v7418_v54 = vld [vmem:[#allocation6 + $0x98] sm:$0xff] }
 0x4e2   :  { %2665 = vmatpush.msra.mxu1 %v7407_v26  ;;  %2705 = vmatpush.msra.mxu3 %v7410_v3 }
 0x4e3   :  { %v3700_v19 = vpop.eup %3699 }
 0x4e4   :  { %v7413_v15 = vmul.f32 %v3700_v19, %v2389_v1  ;;  %2666 = vmatpush.msra.mxu1 %v7415_v63  ;;  %2706 = vmatpush.msra.mxu3 %v7418_v54  ;;  %v7531_v19 = vld [vmem:[#allocation6 + $0x40] sm:$0xff] }
 0x4e5   :  { %9571 = vst [vmem:[#allocation59_spill] sm:$0xff] %v7531_v19  ;;  %v7534_v1 = vld [vmem:[#allocation9 + $0x2e0] sm:$0xff] }
 0x4e6   :  { %2413 = vmatmul.f32.vlgmr.msra.gmra.mxu0 %v7413_v15  ;;  %2453 = vmatmul.f32.vlgmr.msra.gmra.mxu2 %v7413_v15  ;;  %9572 = vst [vmem:[#allocation19_spill] sm:$0xff] %v7534_v1 }
 0x4e7   :  { %2635 = vmatpush.msra.mxu0 %v7054_v21  ;;  %2675 = vmatpush.msra.mxu2 %v7057_v31  ;;  %v7441_v21 = vld [vmem:[#allocation6 + $0x28] sm:$0xff]  ;;  %v7444_v31 = vld [vmem:[#allocation6 + $0x38] sm:$0xff] }
 0x4e8   :  { %2667 = vmatpush.msra.mxu1 %v7425_v24  ;;  %2707 = vmatpush.msra.mxu3 %v7428_v38 }
 0x4e9   :  { %2636 = vmatpush.msra.mxu0 %v7062_v18  ;;  %2676 = vmatpush.msra.mxu2 %v7065_v25  ;;  %v7449_v18 = vld [vmem:[#allocation6 + $0x8] sm:$0xff]  ;;  %v7452_v25 = vld [vmem:[#allocation6 + $0x18] sm:$0xff] }
 0x4ea   :  { %2668 = vmatpush.msra.mxu1 %v7433_v23  ;;  %2708 = vmatpush.msra.mxu3 %v7436_v36  ;;  %9551 = vst [vmem:[#allocation31_spill] sm:$0xff] %v7452_v25 }
 0x4eb   :  { %2637 = vmatpush.msra.mxu0 %v7070_v28  ;;  %2677 = vmatpush.msra.mxu2 %v7073_v56  ;;  %v7462_v28 = vld [vmem:[#allocation9 + $0x3e0] sm:$0xff]  ;;  %v7466_v56 = vld [vmem:[#allocation9 + $0x3e8] sm:$0xff] }
 0x4ec   :  { %2669 = vmatpush.msra.mxu1 %v7441_v21  ;;  %2709 = vmatpush.msra.mxu3 %v7444_v31  ;;  %9552 = vst [vmem:[#allocation32_spill] sm:$0xff] %v7462_v28 }
 0x4ed   :  { %2638 = vmatpush.msra.mxu0 %v7078_v5  ;;  %2678 = vmatpush.msra.mxu2 %v7081_v40  ;;  %9553 = vst [vmem:[#allocation33_spill] sm:$0xff] %v7466_v56  ;;  %v7470_v5 = vld [vmem:[#allocation9 + $0x3c0] sm:$0xff]  ;;  %v7474_v40 = vld [vmem:[#allocation9 + $0x3c8] sm:$0xff] }
 0x4ee   :  { %2670 = vmatpush.msra.mxu1 %v7449_v18  ;;  %2710 = vmatpush.msra.mxu3 %v7452_v25  ;;  %9554 = vst [vmem:[#allocation34_spill] sm:$0xff] %v7470_v5 }
 0x4ef   :  { %2493 = vmatmul.f32.vlgmr.msrb.gmra.mxu0 %v7413_v15  ;;  %2533 = vmatmul.f32.vlgmr.msrb.gmra.mxu2 %v7413_v15  ;;  %9555 = vst [vmem:[#allocation35_spill] sm:$0xff] %v7474_v40 }
 0x4f0   :  { %2639 = vmatpush.msra.mxu0 %v7088_v55  ;;  %2671 = vmatmul.f32.vlgmr.msra.gmra.mxu1 %v7413_v15  ;;  %v7478_v55 = vld [vmem:[#allocation9 + $0x3a0] sm:$0xff] }
 0x4f1   :  { %2679 = vmatpush.msra.mxu2 %v7092_v9  ;;  %2711 = vmatmul.f32.vlgmr.msra.gmra.mxu3 %v7413_v15  ;;  %9556 = vst [vmem:[#allocation38_spill] sm:$0xff] %v7478_v55  ;;  %v7482_v9 = vld [vmem:[#allocation9 + $0x3a8] sm:$0xff] }
 0x4f2   :  { %2640 = vmatpush.msra.mxu0 %v7096_v50  ;;  %2802 = vmatpush.msrb.mxu1 %v7462_v28  ;;  %9557 = vst [vmem:[#allocation39_spill] sm:$0xff] %v7482_v9  ;;  %v7486_v50 = vld [vmem:[#allocation9 + $0x380] sm:$0xff] }
 0x4f3   :  { %2680 = vmatpush.msra.mxu2 %v7100_v33  ;;  %2842 = vmatpush.msrb.mxu3 %v7466_v56  ;;  %9558 = vst [vmem:[#allocation42_spill] sm:$0xff] %v7486_v50  ;;  %v7490_v33 = vld [vmem:[#allocation9 + $0x388] sm:$0xff] }
 0x4f4   :  { %2641 = vmatpush.msra.mxu0 %v7104_v14  ;;  %2803 = vmatpush.msrb.mxu1 %v7470_v5  ;;  %9559 = vst [vmem:[#allocation43_spill] sm:$0xff] %v7490_v33  ;;  %v7494_v14 = vld [vmem:[#allocation9 + $0x360] sm:$0xff] }
 0x4f5   :  { %2681 = vmatpush.msra.mxu2 %v7108_v12  ;;  %2843 = vmatpush.msrb.mxu3 %v7474_v40  ;;  %9560 = vst [vmem:[#allocation46_spill] sm:$0xff] %v7494_v14  ;;  %v7498_v12 = vld [vmem:[#allocation9 + $0x368] sm:$0xff] }
 0x4f6   :  { %2642 = vmatpush.msra.mxu0 %v7112_v45  ;;  %2804 = vmatpush.msrb.mxu1 %v7478_v55  ;;  %9561 = vst [vmem:[#allocation47_spill] sm:$0xff] %v7498_v12  ;;  %v7502_v45 = vld [vmem:[#allocation9 + $0x340] sm:$0xff] }
 0x4f7   :  { %2682 = vmatpush.msra.mxu2 %v7116_v52  ;;  %2844 = vmatpush.msrb.mxu3 %v7482_v9  ;;  %9562 = vst [vmem:[#allocation50_spill] sm:$0xff] %v7502_v45  ;;  %v7506_v52 = vld [vmem:[#allocation9 + $0x348] sm:$0xff] }
 0x4f8   :  { %2643 = vmatpush.msra.mxu0 %v7120_v34  ;;  %2805 = vmatpush.msrb.mxu1 %v7486_v50  ;;  %9563 = vst [vmem:[#allocation58_spill] sm:$0xff] %v7506_v52  ;;  %v7510_v34 = vld [vmem:[#allocation9 + $0x320] sm:$0xff] }
 0x4f9   :  { %2683 = vmatpush.msra.mxu2 %v7124_v2  ;;  %2845 = vmatpush.msrb.mxu3 %v7490_v33  ;;  %9564 = vst [vmem:[#allocation62_spill] sm:$0xff] %v7510_v34  ;;  %v7513_v2 = vld [vmem:[#allocation6 + $0x90] sm:$0xff] }
 0x4fa   :  { %2644 = vmatpush.msra.mxu0 %v7128_v16  ;;  %2806 = vmatpush.msrb.mxu1 %v7494_v14  ;;  %9565 = vst [vmem:[#allocation54_spill] sm:$0xff] %v7513_v2  ;;  %v7516_v16 = vld [vmem:[#allocation9 + $0x328] sm:$0xff] }
 0x4fb   :  { %2684 = vmatpush.msra.mxu2 %v7132_v37  ;;  %2846 = vmatpush.msrb.mxu3 %v7498_v12  ;;  %9566 = vst [vmem:[#allocation16_spill] sm:$0xff] %v7516_v16  ;;  %v7519_v37 = vld [vmem:[#allocation6 + $0x60] sm:$0xff] }
 0x4fc   :  { %2645 = vmatpush.msra.mxu0 %v7136_v30  ;;  %2807 = vmatpush.msrb.mxu1 %v7502_v45  ;;  %9567 = vst [vmem:[#allocation51_spill] sm:$0xff] %v7519_v37  ;;  %v7522_v30 = vld [vmem:[#allocation9 + $0x300] sm:$0xff] }
 0x4fd   :  { %2685 = vmatpush.msra.mxu2 %v7140_v10  ;;  %2847 = vmatpush.msrb.mxu3 %v7506_v52  ;;  %9568 = vst [vmem:[#allocation17_spill] sm:$0xff] %v7522_v30  ;;  %v7525_v10 = vld [vmem:[#allocation6 + $0x70] sm:$0xff] }
 0x4fe   :  { %2646 = vmatpush.msra.mxu0 %v7144_v53  ;;  %2808 = vmatpush.msrb.mxu1 %v7510_v34  ;;  %9569 = vst [vmem:[#allocation55_spill] sm:$0xff] %v7525_v10  ;;  %v7528_v53 = vld [vmem:[#allocation9 + $0x308] sm:$0xff] }
 0x4ff   :  { %2686 = vmatpush.msra.mxu2 %v7513_v2  ;;  %2848 = vmatpush.msrb.mxu3 %v7516_v16  ;;  %9570 = vst [vmem:[#allocation18_spill] sm:$0xff] %v7528_v53  ;;  %v7888_v16 = vpop.permute.xlu0 %2624 }
 0x500   :  { %2647 = vmatpush.msra.mxu0 %v7519_v37  ;;  %2809 = vmatpush.msrb.mxu1 %v7522_v30  ;;  %v7537_v37 = vld [vmem:[#allocation6 + $0x50] sm:$0xff]  ;;  %v7540_v30 = vld [vmem:[#allocation9 + $0x2e8] sm:$0xff]  ;;  %v2628_v34 = vmul.f32 %v7888_v16, %v9538_v27 }
 0x501   :  { %2687 = vmatpush.msra.mxu2 %v7525_v10  ;;  %2849 = vmatpush.msrb.mxu3 %v7528_v53  ;;  %9573 = vst [vmem:[#allocation63_spill] sm:$0xff] %v7537_v37  ;;  %v7543_v10 = vld [vmem:[#allocation6 + $0x20] sm:$0xff] }
 0x502   :  { %2648 = vmatpush.msra.mxu0 %v7531_v19  ;;  %2810 = vmatpush.msrb.mxu1 %v7534_v1  ;;  %9574 = vst [vmem:[#allocation20_spill] sm:$0xff] %v7540_v30  ;;  %v7546_v53 = vld [vmem:[#allocation9 + $0x2c0] sm:$0xff]  ;;  %v7549_v19 = vld [vmem:[#allocation6 + $0x30] sm:$0xff]  ;;  %v7552_v1 = vld [vmem:[#allocation9 + $0x2c8] sm:$0xff] }
 0x503   :  { %2688 = vmatpush.msra.mxu2 %v7537_v37  ;;  %2850 = vmatpush.msrb.mxu3 %v7540_v30  ;;  %9575 = vst [vmem:[#allocation66_spill] sm:$0xff] %v7543_v10  ;;  %v7555_v37 = vld [vmem:[#allocation6] sm:$0xff] }
 0x504   :  { %2649 = vmatpush.msra.mxu0 %v7543_v10  ;;  %9576 = vst [vmem:[#allocation21_spill] sm:$0xff] %v7546_v53  ;;  %2811 = vmatpush.msrb.mxu1 %v7546_v53  ;;  %v7558_v30 = vld [vmem:[#allocation9 + $0x2a0] sm:$0xff]  ;;  %v7561_v10 = vld [vmem:[#allocation6 + $0x10] sm:$0xff] }
 0x505   :  { %9577 = vst [vmem:[#allocation67_spill] sm:$0xff] %v7549_v19  ;;  %2689 = vmatpush.msra.mxu2 %v7549_v19  ;;  %2851 = vmatpush.msrb.mxu3 %v7552_v1  ;;  %v7566_v19 = vld [vmem:[#allocation9 + $0x2a8] sm:$0xff] }
 0x506   :  { %9578 = vst [vmem:[#allocation75_spill] sm:$0xff] %v7552_v1  ;;  %2650 = vmatpush.msra.mxu0 %v7555_v37  ;;  %2812 = vmatpush.msrb.mxu1 %v7558_v30  ;;  %v7569_v1 = vld [vmem:[#allocation9 + $0x280] sm:$0xff] }
 0x507   :  { %9579 = vst [vmem:[#allocation70_spill] sm:$0xff] %v7555_v37  ;;  %2690 = vmatpush.msra.mxu2 %v7561_v10  ;;  %2651 = vmatmul.f32.vlgmr.msra.gmra.mxu0 %v7413_v15  ;;  %v7572_v37 = vld [vmem:[#allocation9 + $0x1e0] sm:$0xff] }
 0x508   :  { %9580 = vst [vmem:[#allocation74_spill] sm:$0xff] %v7558_v30  ;;  %2691 = vmatmul.f32.vlgmr.msra.gmra.mxu2 %v7413_v15  ;;  %2852 = vmatpush.msrb.mxu3 %v7566_v19  ;;  %v7575_v30 = vld [vmem:[#allocation9 + $0x288] sm:$0xff]  ;;  %v7581_v15 = vld [vmem:[#allocation9 + $0x260] sm:$0xff] }
 0x509   :  { %9581 = vst [vmem:[#allocation71_spill] sm:$0xff] %v7561_v10  ;;  %2813 = vmatpush.msrb.mxu1 %v7569_v1  ;;  %2782 = vmatpush.msrb.mxu0 %v7572_v37  ;;  %v7578_v10 = vld [vmem:[#allocation9 + $0x1e8] sm:$0xff] }
 0x50a   :  { %9582 = vst [vmem:[#allocation79_spill] sm:$0xff] %v7566_v19  ;;  %2853 = vmatpush.msrb.mxu3 %v7575_v30  ;;  %2822 = vmatpush.msrb.mxu2 %v7578_v10  ;;  %v7584_v19 = vld [vmem:[#allocation9 + $0x1c0] sm:$0xff] }
 0x50b   :  { %9583 = vst [vmem:[#allocation36_spill] sm:$0xff] %v7569_v1  ;;  %2814 = vmatpush.msrb.mxu1 %v7581_v15  ;;  %2783 = vmatpush.msrb.mxu0 %v7584_v19  ;;  %v7587_v1 = vld [vmem:[#allocation9 + $0x268] sm:$0xff] }
 0x50c   :  { %9584 = vst [vmem:[#allocation78_spill] sm:$0xff] %v7572_v37  ;;  %2854 = vmatpush.msrb.mxu3 %v7587_v1  ;;  %v7590_v37 = vld [vmem:[#allocation9 + $0x1c8] sm:$0xff] }
 0x50d   :  { %9585 = vst [vmem:[#allocation82_spill] sm:$0xff] %v7575_v30  ;;  %2823 = vmatpush.msrb.mxu2 %v7590_v37  ;;  %v7593_v30 = vld [vmem:[#allocation9 + $0x240] sm:$0xff] }
 0x50e   :  { %9586 = vst [vmem:[#allocation22_spill] sm:$0xff] %v7578_v10  ;;  %2815 = vmatpush.msrb.mxu1 %v7593_v30  ;;  %v7596_v10 = vld [vmem:[#allocation9 + $0x1a0] sm:$0xff] }
 0x50f   :  { %9587 = vst [vmem:[#allocation83_spill] sm:$0xff] %v7581_v15  ;;  %2784 = vmatpush.msrb.mxu0 %v7596_v10  ;;  %v7599_v15 = vld [vmem:[#allocation9 + $0x248] sm:$0xff] }
 0x510   :  { %9588 = vst [vmem:[#allocation23_spill] sm:$0xff] %v7584_v19  ;;  %2855 = vmatpush.msrb.mxu3 %v7599_v15  ;;  %v7602_v19 = vld [vmem:[#allocation9 + $0x1a8] sm:$0xff] }
 0x511   :  { %9589 = vst [vmem:[#allocation86_spill] sm:$0xff] %v7587_v1  ;;  %2824 = vmatpush.msrb.mxu2 %v7602_v19  ;;  %v7605_v1 = vld [vmem:[#allocation9 + $0x220] sm:$0xff] }
 0x512   :  { %9590 = vst [vmem:[#allocation24_spill] sm:$0xff] %v7590_v37  ;;  %2816 = vmatpush.msrb.mxu1 %v7605_v1  ;;  %v7608_v37 = vld [vmem:[#allocation9 + $0x180] sm:$0xff] }
 0x513   :  { %9591 = vst [vmem:[#allocation87_spill] sm:$0xff] %v7593_v30  ;;  %2785 = vmatpush.msrb.mxu0 %v7608_v37  ;;  %v7611_v30 = vld [vmem:[#allocation9 + $0x228] sm:$0xff] }
 0x514   :  { %9592 = vst [vmem:[#allocation37_spill] sm:$0xff] %v7596_v10  ;;  %2856 = vmatpush.msrb.mxu3 %v7611_v30  ;;  %v7614_v10 = vld [vmem:[#allocation9 + $0x188] sm:$0xff] }
 0x515   :  { %9593 = vst [vmem:[#allocation90_spill] sm:$0xff] %v7599_v15  ;;  %2825 = vmatpush.msrb.mxu2 %v7614_v10  ;;  %v7617_v15 = vld [vmem:[#allocation9 + $0x200] sm:$0xff] }
 0x516   :  { %9594 = vst [vmem:[#allocation40_spill] sm:$0xff] %v7602_v19  ;;  %2817 = vmatpush.msrb.mxu1 %v7617_v15  ;;  %v7620_v19 = vld [vmem:[#allocation9 + $0x160] sm:$0xff] }
 0x517   :  { %9595 = vst [vmem:[#allocation91_spill] sm:$0xff] %v7605_v1  ;;  %2786 = vmatpush.msrb.mxu0 %v7620_v19  ;;  %v7623_v1 = vld [vmem:[#allocation9 + $0x208] sm:$0xff] }
 0x518   :  { %9596 = vst [vmem:[#allocation41_spill] sm:$0xff] %v7608_v37  ;;  %2857 = vmatpush.msrb.mxu3 %v7623_v1  ;;  %v7626_v37 = vld [vmem:[#allocation9 + $0x168] sm:$0xff] }
 0x519   :  { %9597 = vst [vmem:[#allocation52_spill] sm:$0xff] %v7611_v30  ;;  %2826 = vmatpush.msrb.mxu2 %v7626_v37  ;;  %v7629_v30 = vld [vmem:[#allocation9 + $0x3f0] sm:$0xff] }
 0x51a   :  { %9598 = vst [vmem:[#allocation44_spill] sm:$0xff] %v7614_v10  ;;  %2882 = vmatpush.msra.mxu1 %v7629_v30  ;;  %v7632_v10 = vld [vmem:[#allocation9 + $0x3f8] sm:$0xff] }
 0x51b   :  { %9599 = vst [vmem:[#allocation53_spill] sm:$0xff] %v7617_v15  ;;  %2922 = vmatpush.msra.mxu3 %v7632_v10  ;;  %v7635_v15 = vld [vmem:[#allocation9 + $0x140] sm:$0xff] }
 0x51c   :  { %9600 = vst [vmem:[#allocation45_spill] sm:$0xff] %v7620_v19  ;;  %2787 = vmatpush.msrb.mxu0 %v7635_v15  ;;  %v7638_v19 = vld [vmem:[#allocation9 + $0x148] sm:$0xff] }
 0x51d   :  { %9601 = vst [vmem:[#allocation56_spill] sm:$0xff] %v7623_v1  ;;  %2827 = vmatpush.msrb.mxu2 %v7638_v19  ;;  %v7641_v1 = vld [vmem:[#allocation9 + $0x3d0] sm:$0xff] }
 0x51e   :  { %9602 = vst [vmem:[#allocation48_spill] sm:$0xff] %v7626_v37  ;;  %2883 = vmatpush.msra.mxu1 %v7641_v1  ;;  %v7644_v37 = vld [vmem:[#allocation9 + $0x3d8] sm:$0xff] }
 0x51f   :  { %9603 = vst [vmem:[#allocation57_spill] sm:$0xff] %v7629_v30  ;;  %2923 = vmatpush.msra.mxu3 %v7644_v37  ;;  %v7647_v30 = vld [vmem:[#allocation9 + $0x120] sm:$0xff] }
 0x520   :  { %9604 = vst [vmem:[#allocation94_spill] sm:$0xff] %v7632_v10  ;;  %2788 = vmatpush.msrb.mxu0 %v7647_v30  ;;  %v7650_v10 = vld [vmem:[#allocation9 + $0x128] sm:$0xff] }
 0x521   :  { %9605 = vst [vmem:[#allocation49_spill] sm:$0xff] %v7635_v15  ;;  %2828 = vmatpush.msrb.mxu2 %v7650_v10  ;;  %v7653_v15 = vld [vmem:[#allocation9 + $0x3b0] sm:$0xff] }
 0x522   :  { %9606 = vst [vmem:[#allocation60_spill] sm:$0xff] %v7638_v19  ;;  %2884 = vmatpush.msra.mxu1 %v7653_v15  ;;  %v7656_v19 = vld [vmem:[#allocation9 + $0x3b8] sm:$0xff] }
 0x523   :  { %9607 = vst [vmem:[#allocation61_spill] sm:$0xff] %v7641_v1  ;;  %2924 = vmatpush.msra.mxu3 %v7656_v19  ;;  %v7659_v1 = vld [vmem:[#allocation9 + $0x100] sm:$0xff] }
 0x524   :  { %9608 = vst [vmem:[#allocation64_spill] sm:$0xff] %v7644_v37  ;;  %2789 = vmatpush.msrb.mxu0 %v7659_v1  ;;  %v7662_v37 = vld [vmem:[#allocation9 + $0x108] sm:$0xff] }
 0x525   :  { %9609 = vst [vmem:[#allocation65_spill] sm:$0xff] %v7647_v30  ;;  %2829 = vmatpush.msrb.mxu2 %v7662_v37  ;;  %v7665_v30 = vld [vmem:[#allocation9 + $0x390] sm:$0xff] }
 0x526   :  { %9610 = vst [vmem:[#allocation68_spill] sm:$0xff] %v7650_v10  ;;  %2885 = vmatpush.msra.mxu1 %v7665_v30  ;;  %v7668_v10 = vld [vmem:[#allocation9 + $0x398] sm:$0xff] }
 0x527   :  { %9611 = vst [vmem:[#allocation69_spill] sm:$0xff] %v7653_v15  ;;  %2925 = vmatpush.msra.mxu3 %v7668_v10  ;;  %v7671_v15 = vld [vmem:[#allocation9 + $0xe0] sm:$0xff] }
 0x528   :  { %9612 = vst [vmem:[#allocation72_spill] sm:$0xff] %v7656_v19  ;;  %2790 = vmatpush.msrb.mxu0 %v7671_v15  ;;  %v7674_v19 = vld [vmem:[#allocation9 + $0xe8] sm:$0xff] }
 0x529   :  { %9613 = vst [vmem:[#allocation73_spill] sm:$0xff] %v7659_v1  ;;  %2830 = vmatpush.msrb.mxu2 %v7674_v19  ;;  %v7677_v1 = vld [vmem:[#allocation9 + $0x370] sm:$0xff] }
 0x52a   :  { %9614 = vst [vmem:[#allocation76_spill] sm:$0xff] %v7662_v37  ;;  %2886 = vmatpush.msra.mxu1 %v7677_v1  ;;  %v7680_v37 = vld [vmem:[#allocation9 + $0x378] sm:$0xff] }
 0x52b   :  { %9615 = vst [vmem:[#allocation77_spill] sm:$0xff] %v7665_v30  ;;  %2926 = vmatpush.msra.mxu3 %v7680_v37  ;;  %v7683_v30 = vld [vmem:[#allocation9 + $0xc0] sm:$0xff] }
 0x52c   :  { %9616 = vst [vmem:[#allocation80_spill] sm:$0xff] %v7668_v10  ;;  %2791 = vmatpush.msrb.mxu0 %v7683_v30  ;;  %v7686_v10 = vld [vmem:[#allocation9 + $0xc8] sm:$0xff] }
 0x52d   :  { %9617 = vst [vmem:[#allocation81_spill] sm:$0xff] %v7671_v15  ;;  %2831 = vmatpush.msrb.mxu2 %v7686_v10  ;;  %v7689_v15 = vld [vmem:[#allocation9 + $0x350] sm:$0xff] }
 0x52e   :  { %9618 = vst [vmem:[#allocation84_spill] sm:$0xff] %v7674_v19  ;;  %2887 = vmatpush.msra.mxu1 %v7689_v15  ;;  %v7692_v19 = vld [vmem:[#allocation9 + $0x358] sm:$0xff] }
 0x52f   :  { %9619 = vst [vmem:[#allocation85_spill] sm:$0xff] %v7677_v1  ;;  %2927 = vmatpush.msra.mxu3 %v7692_v19  ;;  %v7695_v1 = vld [vmem:[#allocation9 + $0xa0] sm:$0xff] }
 0x530   :  { %9620 = vst [vmem:[#allocation88_spill] sm:$0xff] %v7680_v37  ;;  %2792 = vmatpush.msrb.mxu0 %v7695_v1  ;;  %v7698_v37 = vld [vmem:[#allocation9 + $0xa8] sm:$0xff] }
 0x531   :  { %9621 = vst [vmem:[#allocation89_spill] sm:$0xff] %v7683_v30  ;;  %2832 = vmatpush.msrb.mxu2 %v7698_v37  ;;  %v7701_v30 = vld [vmem:[#allocation9 + $0x330] sm:$0xff] }
 0x532   :  { %9622 = vst [vmem:[#allocation92_spill] sm:$0xff] %v7686_v10  ;;  %2888 = vmatpush.msra.mxu1 %v7701_v30  ;;  %v7704_v10 = vld [vmem:[#allocation9 + $0x338] sm:$0xff] }
 0x533   :  { %9623 = vst [vmem:[#allocation93_spill] sm:$0xff] %v7689_v15  ;;  %2928 = vmatpush.msra.mxu3 %v7704_v10  ;;  %v7707_v15 = vld [vmem:[#allocation9 + $0x80] sm:$0xff] }
 0x534   :  { %9624 = vst [vmem:[#allocation95_spill] sm:$0xff] %v7692_v19  ;;  %2793 = vmatpush.msrb.mxu0 %v7707_v15  ;;  %v7710_v19 = vld [vmem:[#allocation9 + $0x88] sm:$0xff] }
 0x535   :  { %9625 = vst [vmem:[#allocation96_spill] sm:$0xff] %v7695_v1  ;;  %2833 = vmatpush.msrb.mxu2 %v7710_v19  ;;  %v7713_v1 = vld [vmem:[#allocation9 + $0x310] sm:$0xff] }
 0x536   :  { %9626 = vst [vmem:[#allocation97_spill] sm:$0xff] %v7698_v37  ;;  %2889 = vmatpush.msra.mxu1 %v7713_v1  ;;  %v7716_v37 = vld [vmem:[#allocation9 + $0x318] sm:$0xff] }
 0x537   :  { %9627 = vst [vmem:[#allocation98_spill] sm:$0xff] %v7701_v30  ;;  %2929 = vmatpush.msra.mxu3 %v7716_v37  ;;  %v7719_v30 = vld [vmem:[#allocation9 + $0x60] sm:$0xff] }
 0x538   :  { %9628 = vst [vmem:[#allocation99_spill] sm:$0xff] %v7704_v10  ;;  %2794 = vmatpush.msrb.mxu0 %v7719_v30  ;;  %v7722_v10 = vld [vmem:[#allocation9 + $0x68] sm:$0xff] }
 0x539   :  { %9629 = vst [vmem:[#allocation100_spill] sm:$0xff] %v7707_v15  ;;  %2834 = vmatpush.msrb.mxu2 %v7722_v10  ;;  %v7725_v15 = vld [vmem:[#allocation9 + $0x2f0] sm:$0xff] }
 0x53a   :  { %9630 = vst [vmem:[#allocation101_spill] sm:$0xff] %v7710_v19  ;;  %2890 = vmatpush.msra.mxu1 %v7725_v15  ;;  %v7728_v19 = vld [vmem:[#allocation9 + $0x2f8] sm:$0xff] }
 0x53b   :  { %9631 = vst [vmem:[#allocation102_spill] sm:$0xff] %v7713_v1  ;;  %2930 = vmatpush.msra.mxu3 %v7728_v19  ;;  %v7731_v1 = vld [vmem:[#allocation9 + $0x40] sm:$0xff] }
 0x53c   :  { %9632 = vst [vmem:[#allocation103_spill] sm:$0xff] %v7716_v37  ;;  %2795 = vmatpush.msrb.mxu0 %v7731_v1  ;;  %v7734_v37 = vld [vmem:[#allocation9 + $0x48] sm:$0xff] }
 0x53d   :  { %9633 = vst [vmem:[#allocation106_spill] sm:$0xff] %v7719_v30  ;;  %2835 = vmatpush.msrb.mxu2 %v7734_v37  ;;  %v7737_v30 = vld [vmem:[#allocation9 + $0x2d0] sm:$0xff] }
 0x53e   :  { %9634 = vst [vmem:[#allocation107_spill] sm:$0xff] %v7722_v10  ;;  %2891 = vmatpush.msra.mxu1 %v7737_v30  ;;  %v7740_v10 = vld [vmem:[#allocation9 + $0x2d8] sm:$0xff] }
 0x53f   :  { %9635 = vst [vmem:[#allocation110_spill] sm:$0xff] %v7725_v15  ;;  %2931 = vmatpush.msra.mxu3 %v7740_v10  ;;  %v7743_v15 = vld [vmem:[#allocation9 + $0x20] sm:$0xff] }
 0x540   :  { %9636 = vst [vmem:[#allocation111_spill] sm:$0xff] %v7728_v19  ;;  %2796 = vmatpush.msrb.mxu0 %v7743_v15  ;;  %v7746_v19 = vld [vmem:[#allocation9 + $0x28] sm:$0xff] }
 0x541   :  { %9637 = vst [vmem:[#allocation112_spill] sm:$0xff] %v7731_v1  ;;  %2836 = vmatpush.msrb.mxu2 %v7746_v19  ;;  %v7749_v1 = vld [vmem:[#allocation9 + $0x2b0] sm:$0xff] }
 0x542   :  { %9638 = vst [vmem:[#allocation113_spill] sm:$0xff] %v7734_v37  ;;  %2892 = vmatpush.msra.mxu1 %v7749_v1  ;;  %v7752_v37 = vld [vmem:[#allocation9 + $0x2b8] sm:$0xff] }
 0x543   :  { %9639 = vst [vmem:[#allocation114_spill] sm:$0xff] %v7737_v30  ;;  %2932 = vmatpush.msra.mxu3 %v7752_v37  ;;  %v7755_v30 = vld [vmem:[#allocation9] sm:$0xff] }
 0x544   :  { %9640 = vst [vmem:[#allocation115_spill] sm:$0xff] %v7740_v10  ;;  %2797 = vmatpush.msrb.mxu0 %v7755_v30  ;;  %v7758_v10 = vld [vmem:[#allocation9 + $0x8] sm:$0xff] }
 0x545   :  { %9641 = vst [vmem:[#allocation116_spill] sm:$0xff] %v7743_v15  ;;  %2837 = vmatpush.msrb.mxu2 %v7758_v10  ;;  %v7761_v15 = vld [vmem:[#allocation9 + $0x290] sm:$0xff] }
 0x546   :  { %9642 = vst [vmem:[#allocation117_spill] sm:$0xff] %v7746_v19  ;;  %2893 = vmatpush.msra.mxu1 %v7761_v15  ;;  %v7764_v19 = vld [vmem:[#allocation9 + $0x298] sm:$0xff] }
 0x547   :  { %9643 = vst [vmem:[#allocation118_spill] sm:$0xff] %v7749_v1  ;;  %2933 = vmatpush.msra.mxu3 %v7764_v19  ;;  %v7767_v1 = vld [vmem:[#allocation9 + $0x1f0] sm:$0xff] }
 0x548   :  { %9644 = vst [vmem:[#allocation119_spill] sm:$0xff] %v7752_v37  ;;  %2862 = vmatpush.msra.mxu0 %v7767_v1  ;;  %v7770_v37 = vld [vmem:[#allocation9 + $0x1f8] sm:$0xff] }
 0x549   :  { %9645 = vst [vmem:[#allocation120_spill] sm:$0xff] %v7755_v30  ;;  %2902 = vmatpush.msra.mxu2 %v7770_v37  ;;  %v7773_v30 = vld [vmem:[#allocation9 + $0x270] sm:$0xff] }
 0x54a   :  { %9646 = vst [vmem:[#allocation121_spill] sm:$0xff] %v7758_v10  ;;  %2894 = vmatpush.msra.mxu1 %v7773_v30  ;;  %v7776_v10 = vld [vmem:[#allocation9 + $0x278] sm:$0xff] }
 0x54b   :  { %9647 = vst [vmem:[#allocation122_spill] sm:$0xff] %v7761_v15  ;;  %2934 = vmatpush.msra.mxu3 %v7776_v10  ;;  %v7779_v15 = vld [vmem:[#allocation9 + $0x1d0] sm:$0xff] }
 0x54c   :  { %9648 = vst [vmem:[#allocation123_spill] sm:$0xff] %v7764_v19  ;;  %2863 = vmatpush.msra.mxu0 %v7779_v15  ;;  %v7782_v19 = vld [vmem:[#allocation9 + $0x1d8] sm:$0xff] }
 0x54d   :  { %9649 = vst [vmem:[#allocation124_spill] sm:$0xff] %v7767_v1  ;;  %2903 = vmatpush.msra.mxu2 %v7782_v19  ;;  %v7785_v1 = vld [vmem:[#allocation9 + $0x250] sm:$0xff] }
 0x54e   :  { %9650 = vst [vmem:[#allocation125_spill] sm:$0xff] %v7770_v37  ;;  %2895 = vmatpush.msra.mxu1 %v7785_v1  ;;  %v7788_v37 = vld [vmem:[#allocation9 + $0x258] sm:$0xff] }
 0x54f   :  { %9651 = vst [vmem:[#allocation126_spill] sm:$0xff] %v7773_v30  ;;  %2935 = vmatpush.msra.mxu3 %v7788_v37  ;;  %v7791_v30 = vld [vmem:[#allocation9 + $0x1b0] sm:$0xff] }
 0x550   :  { %9652 = vst [vmem:[#allocation127_spill] sm:$0xff] %v7776_v10  ;;  %2864 = vmatpush.msra.mxu0 %v7791_v30  ;;  %v7794_v10 = vld [vmem:[#allocation9 + $0x1b8] sm:$0xff]  ;;  %v2474_v45 = vpop.f32.mrf.mxu3 }
 0x551   :  { %9653 = vst [vmem:[#allocation128_spill] sm:$0xff] %v7779_v15  ;;  %2904 = vmatpush.msra.mxu2 %v7794_v10  ;;  %v7797_v15 = vld [vmem:[#allocation9 + $0x230] sm:$0xff] }
 0x552   :  { %9654 = vst [vmem:[#allocation129_spill] sm:$0xff] %v7782_v19  ;;  %2896 = vmatpush.msra.mxu1 %v7797_v15  ;;  %v7800_v19 = vld [vmem:[#allocation9 + $0x238] sm:$0xff] }
 0x553   :  { %9655 = vst [vmem:[#allocation130_spill] sm:$0xff] %v7785_v1  ;;  %2936 = vmatpush.msra.mxu3 %v7800_v19  ;;  %v7803_v1 = vld [vmem:[#allocation9 + $0x190] sm:$0xff] }
 0x554   :  { %9656 = vst [vmem:[#allocation131_spill] sm:$0xff] %v7788_v37  ;;  %2865 = vmatpush.msra.mxu0 %v7803_v1  ;;  %v7806_v37 = vld [vmem:[#allocation9 + $0x198] sm:$0xff] }
 0x555   :  { %9657 = vst [vmem:[#allocation132_spill] sm:$0xff] %v7791_v30  ;;  %2905 = vmatpush.msra.mxu2 %v7806_v37  ;;  %v7809_v30 = vld [vmem:[#allocation9 + $0x210] sm:$0xff] }
 0x556   :  { %9658 = vst [vmem:[#allocation133_spill] sm:$0xff] %v7794_v10  ;;  %2897 = vmatpush.msra.mxu1 %v7809_v30  ;;  %v7812_v10 = vld [vmem:[#allocation9 + $0x218] sm:$0xff] }
 0x557   :  { %9659 = vst [vmem:[#allocation134_spill] sm:$0xff] %v7797_v15  ;;  %2937 = vmatpush.msra.mxu3 %v7812_v10  ;;  %v7815_v15 = vld [vmem:[#allocation9 + $0x170] sm:$0xff] }
 0x558   :  { %9660 = vst [vmem:[#allocation135_spill] sm:$0xff] %v7800_v19  ;;  %2866 = vmatpush.msra.mxu0 %v7815_v15  ;;  %v7818_v19 = vld [vmem:[#allocation9 + $0x178] sm:$0xff] }
 0x559   :  { %9661 = vst [vmem:[#allocation136_spill] sm:$0xff] %v7803_v1  ;;  %2906 = vmatpush.msra.mxu2 %v7818_v19  ;;  %v7821_v1 = vld [vmem:[#allocation9 + $0x150] sm:$0xff] }
 0x55a   :  { %9662 = vst [vmem:[#allocation137_spill] sm:$0xff] %v7806_v37  ;;  %2867 = vmatpush.msra.mxu0 %v7821_v1  ;;  %v7824_v37 = vld [vmem:[#allocation9 + $0x158] sm:$0xff] }
 0x55b   :  { %9663 = vst [vmem:[#allocation138_spill] sm:$0xff] %v7809_v30  ;;  %2907 = vmatpush.msra.mxu2 %v7824_v37  ;;  %v7827_v30 = vld [vmem:[#allocation9 + $0x130] sm:$0xff] }
 0x55c   :  { %9664 = vst [vmem:[#allocation139_spill] sm:$0xff] %v7812_v10  ;;  %2868 = vmatpush.msra.mxu0 %v7827_v30  ;;  %v7830_v10 = vld [vmem:[#allocation9 + $0x138] sm:$0xff] }
 0x55d   :  { %9665 = vst [vmem:[#allocation140_spill] sm:$0xff] %v7815_v15  ;;  %2908 = vmatpush.msra.mxu2 %v7830_v10  ;;  %v7833_v15 = vld [vmem:[#allocation9 + $0x110] sm:$0xff] }
 0x55e   :  { %9666 = vst [vmem:[#allocation141_spill] sm:$0xff] %v7818_v19  ;;  %2869 = vmatpush.msra.mxu0 %v7833_v15  ;;  %v7836_v19 = vld [vmem:[#allocation9 + $0x118] sm:$0xff] }
 0x55f   :  { %9667 = vst [vmem:[#allocation142_spill] sm:$0xff] %v7821_v1  ;;  %2909 = vmatpush.msra.mxu2 %v7836_v19  ;;  %v7839_v1 = vld [vmem:[#allocation9 + $0xf0] sm:$0xff] }
 0x560   :  { %9668 = vst [vmem:[#allocation143_spill] sm:$0xff] %v7824_v37  ;;  %2870 = vmatpush.msra.mxu0 %v7839_v1  ;;  %v7842_v37 = vld [vmem:[#allocation9 + $0xf8] sm:$0xff] }
 0x561   :  { %9669 = vst [vmem:[#allocation144_spill] sm:$0xff] %v7827_v30  ;;  %2910 = vmatpush.msra.mxu2 %v7842_v37  ;;  %v7845_v30 = vld [vmem:[#allocation9 + $0xd0] sm:$0xff] }
 0x562   :  { %9670 = vst [vmem:[#allocation145_spill] sm:$0xff] %v7830_v10  ;;  %2871 = vmatpush.msra.mxu0 %v7845_v30  ;;  %v7848_v10 = vld [vmem:[#allocation9 + $0xd8] sm:$0xff] }
 0x563   :  { %9671 = vst [vmem:[#allocation146_spill] sm:$0xff] %v7833_v15  ;;  %2911 = vmatpush.msra.mxu2 %v7848_v10  ;;  %v7851_v15 = vld [vmem:[#allocation9 + $0xb0] sm:$0xff]  ;;  %v2414_v53 = vpop.f32.mrf.mxu0 }
 0x564   :  { %9672 = vst [vmem:[#allocation147_spill] sm:$0xff] %v7836_v19  ;;  %2872 = vmatpush.msra.mxu0 %v7851_v15  ;;  %v7854_v19 = vld [vmem:[#allocation9 + $0xb8] sm:$0xff] }
 0x565   :  { %9673 = vst [vmem:[#allocation148_spill] sm:$0xff] %v7839_v1  ;;  %2912 = vmatpush.msra.mxu2 %v7854_v19  ;;  %v7857_v1 = vld [vmem:[#allocation9 + $0x90] sm:$0xff] }
 0x566   :  { %9674 = vst [vmem:[#allocation149_spill] sm:$0xff] %v7842_v37  ;;  %2873 = vmatpush.msra.mxu0 %v7857_v1  ;;  %v7860_v37 = vld [vmem:[#allocation9 + $0x98] sm:$0xff] }
 0x567   :  { %9675 = vst [vmem:[#allocation150_spill] sm:$0xff] %v7845_v30  ;;  %2913 = vmatpush.msra.mxu2 %v7860_v37  ;;  %v7863_v30 = vld [vmem:[#allocation9 + $0x70] sm:$0xff] }
 0x568   :  { %9676 = vst [vmem:[#allocation151_spill] sm:$0xff] %v7848_v10  ;;  %2874 = vmatpush.msra.mxu0 %v7863_v30  ;;  %v7866_v10 = vld [vmem:[#allocation9 + $0x78] sm:$0xff] }
 0x569   :  { %9677 = vst [vmem:[#allocation152_spill] sm:$0xff] %v7851_v15  ;;  %2914 = vmatpush.msra.mxu2 %v7866_v10  ;;  %v7869_v15 = vld [vmem:[#allocation9 + $0x50] sm:$0xff]  ;;  %v2454_v52 = vpop.f32.mrf.mxu2 }
 0x56a   :  { %9678 = vst [vmem:[#allocation153_spill] sm:$0xff] %v7854_v19  ;;  %2875 = vmatpush.msra.mxu0 %v7869_v15  ;;  %v7872_v19 = vld [vmem:[#allocation9 + $0x58] sm:$0xff] }
 0x56b   :  { %9679 = vst [vmem:[#allocation154_spill] sm:$0xff] %v7857_v1  ;;  %2915 = vmatpush.msra.mxu2 %v7872_v19  ;;  %v7875_v1 = vld [vmem:[#allocation9 + $0x30] sm:$0xff] }
 0x56c   :  { %9680 = vst [vmem:[#allocation155_spill] sm:$0xff] %v7860_v37  ;;  %2876 = vmatpush.msra.mxu0 %v7875_v1  ;;  %v7878_v37 = vld [vmem:[#allocation9 + $0x38] sm:$0xff]  ;;  %v2494_v14 = vpop.f32.mrf.mxu0 }
 0x56d   :  { %9681 = vst [vmem:[#allocation156_spill] sm:$0xff] %v7863_v30  ;;  %2916 = vmatpush.msra.mxu2 %v7878_v37  ;;  %v7881_v30 = vld [vmem:[#allocation9 + $0x10] sm:$0xff]  ;;  %v2495_v33 = vadd.f32 %v2494_v14, %v9541_v0 }
 0x56e   :  { %9682 = vst [vmem:[#allocation157_spill] sm:$0xff] %v7866_v10  ;;  %2877 = vmatpush.msra.mxu0 %v7881_v30  ;;  %v7884_v10 = vld [vmem:[#allocation9 + $0x18] sm:$0xff] }
 0x56f   :  { %9683 = vst [vmem:[#allocation158_spill] sm:$0xff] %v7869_v15  ;;  %2917 = vmatpush.msra.mxu2 %v7884_v10  ;;  %v2434_v15 = vpop.f32.mrf.mxu1 }
 0x570   :  { %9684 = vst [vmem:[#allocation159_spill] sm:$0xff] %v7872_v19  ;;  %v2415_v19 = vadd.f32 %v2414_v53, %v9537_v22 }
 0x571   :  { %9685 = vst [vmem:[#allocation160_spill] sm:$0xff] %v7875_v1 }
 0x572   :  { %9686 = vst [vmem:[#allocation161_spill] sm:$0xff] %v7878_v37  ;;  %v2435_v1 = vadd.f32 %v2434_v15, %v2415_v19 }
 0x573   :  { %9687 = vst [vmem:[#allocation162_spill] sm:$0xff] %v7881_v30  ;;  %v2455_v30 = vadd.f32 %v2454_v52, %v9539_v6 }
 0x574   :  { %9688 = vst [vmem:[#allocation163_spill] sm:$0xff] %v7884_v10  ;;  %v3494_v37 = vmul.f32 -1.442695, %v2435_v1  ;;  %v2632_v10 = vadd.f32 %v2628_v34, %v9540_v11 }
 0x575   :  { %v2475_v12 = vadd.f32 %v2474_v45, %v2455_v30  ;;  %v2534_v45 = vpop.f32.mrf.mxu2 }
 0x576   :  { %3701 = vpow2.f32 %v3494_v37  ;;  %v2535_v14 = vadd.f32 %v2534_v45, %v9542_v44 }
 0x577   :  { %v2514_v2 = vpop.f32.mrf.mxu1  ;;  %v3495_v22 = vmul.f32 -1.442695, %v2475_v12 }
 0x578   :  { %v2515_v9 = vadd.f32 %v2514_v2, %v2495_v33 }
 0x579   :  { %3703 = vpow2.f32 %v3495_v22  ;;  %v2554_v22 = vpop.f32.mrf.mxu3 }
 0x57a   :  { %v3496_v27 = vmul.f32 -1.442695, %v2515_v9  ;;  %v2555_v9 = vadd.f32 %v2554_v22, %v2535_v14  ;;  %v9692_v22 = vld [vmem:[#allocation108_spill] sm:$0xff] }
 0x57c   :  { %v3702_v19 = vpop.eup %3701 }
 0x57d   :  { %v2566_v15 = vadd.f32 1.0, %v3702_v19 }
 0x57f   :  { %v2672_v53 = vpop.f32.mrf.mxu1  ;;  %3705 = vrcp.f32 %v2566_v15  ;;  %v3704_v37 = vpop.eup %3703  ;;  %v2580_v0 = vand.u32 2147483648, %v2566_v15  ;;  %vm2574_vm5 = vweird.f32 %v2566_v15 }
 0x580   :  { %v2716_v50 = vadd.f32 %v2672_v53, %v2632_v10  ;;  %3707 = vpow2.f32 %v3496_v27  ;;  %v2567_v52 = vadd.f32 1.0, %v3704_v37  ;;  %v9689_v10 = vld [vmem:[#allocation104_spill] sm:$0xff] }
 0x581   :  { %v2627_v53 = vmul.f32 %v7888_v16, %v9689_v10  ;;  %v2581_v6 = vor.u32 1.1754944e-38, %v2580_v0 }
 0x582   :  { %v3499_v1 = vmul.f32 -1.442695, %v2716_v50  ;;  %v2595_v44 = vand.u32 2147483648, %v2567_v52  ;;  %vm2589_vm8 = vweird.f32 %v2567_v52 }
 0x584   :  { %3709 = vpow2.f32 %v3499_v1  ;;  %v2596_v56 = vor.u32 1.1754944e-38, %v2595_v44 }
 0x585   :  { %v3706_v30 = vpop.eup %3705  ;;  %3711 = vrcp.f32 %v2567_v52 }
 0x586   :  { %v3708_v34 = vpop.eup %3707  ;;  %v2570_v11 = vmul.f32 %v3706_v30, %v2566_v15  ;;  %vm2575_vm4 = vweird.f32 %v3706_v30 }
 0x587   :  { %v7896_v12 = vadd.f32 1.0, %v3708_v34  ;;  %v2578_v34 = vand.u32 2147483647, %v2566_v15  ;;  %vm7904_vm6 = vmor %vm2574_vm5, %vm2575_vm4  ;;  %v2652_v15 = vpop.f32.mrf.mxu0 }
 0x588   :  { %v2571_v2 = vsub.f32 1.0, %v2570_v11 }
 0x589   :  { %3713 = vrcp.f32 %v7896_v12  ;;  %vm2579_vm9 = vcmp.eq.f32.partialorder %v2578_v34, 8.507059e+37  ;;  %vm2604_vm13 = vweird.f32 %v7896_v12 }
 0x58a   :  { %v3710_v33 = vpop.eup %3709  ;;  %v2572_v50 = vmul.f32 %v3706_v30, %v2571_v2  ;;  %3715 = vtanh.f32 %v2555_v9  ;;  %v2593_v2 = vand.u32 2147483647, %v2567_v52  ;;  %v2629_v9 = vmul.f32 %v7888_v16, %v5060_v20 }
 0x58b   :  { %v3712_v27 = vpop.eup %3711  ;;  %v7901_v19 = vadd.f32 1.0, %v3710_v33  ;;  %v2631_v33 = vadd.f32 %v2627_v53, %v9692_v22 }
 0x58c   :  { %v2585_v1 = vmul.f32 %v3712_v27, %v2567_v52  ;;  %v2573_v37 = vadd.f32 %v3706_v30, %v2572_v50  ;;  %vm2590_vm7 = vweird.f32 %v3712_v27  ;;  %vm2594_vm11 = vcmp.eq.f32.partialorder %v2593_v2, 8.507059e+37 }
 0x58d   :  { %3717 = vrcp.f32 %v7901_v19  ;;  %v2715_v55 = vadd.f32 %v2652_v15, %v2631_v33  ;;  %vm2591_vm10 = vmor %vm2589_vm8, %vm2590_vm7  ;;  %v2633_v52 = vadd.f32 %v2629_v9, %v5081_v4  ;;  %v2692_v33 = vpop.f32.mrf.mxu2  ;;  %v2630_v2 = vmul.f32 %v7888_v16, %v5115_v42  ;;  %v2712_v9 = vpop.f32.mrf.mxu3 }
 0x58e   :  { %v2586_v45 = vsub.f32 1.0, %v2585_v1  ;;  %v2577_v1 = vsel %vm7904_vm6, %v3706_v30, %v2573_v37  ;;  %vm2751_vm1 = vweird.f32 %v7901_v19 }
 0x58f   :  { %v3714_v11 = vpop.eup %3713  ;;  %v2582_v53 = vsel %vm2579_vm9, %v2581_v6, %v2577_v1 }
 0x590   :  { %v2587_v10 = vmul.f32 %v3712_v27, %v2586_v45  ;;  %v2600_v50 = vmul.f32 %v3714_v11, %v7896_v12  ;;  %v3498_v45 = vmul.f32 -1.442695, %v2715_v55  ;;  %v3716_v22 = vpop.eup %3715  ;;  %vm2605_vm12 = vweird.f32 %v3714_v11 }
 0x591   :  { %v2616_v0 = vmul.f32 %v3716_v22, %v2582_v53  ;;  %vm2606_vm14 = vmor %vm2604_vm13, %vm2605_vm12 }
 0x592   :  { %v2601_v40 = vsub.f32 1.0, %v2600_v50  ;;  %v2588_v5 = vadd.f32 %v3712_v27, %v2587_v10  ;;  %3719 = vpow2.f32 %v3498_v45  ;;  %v2717_v10 = vadd.f32 %v2692_v33, %v2633_v52 }
 0x593   :  { %v7914_v25 = vpop.eup %3717  ;;  %v2755_v52 = vand.u32 2147483647, %v7901_v19 }
 0x594   :  { %v2592_v28 = vsel %vm2591_vm10, %v3712_v27, %v2588_v5  ;;  %v2602_v37 = vmul.f32 %v3714_v11, %v2601_v40  ;;  %v2747_v6 = vmul.f32 %v7914_v25, %v7901_v19  ;;  %v3500_v5 = vmul.f32 -1.442695, %v2717_v10 }
 0x595   :  { %v2597_v30 = vsel %vm2594_vm11, %v2596_v56, %v2592_v28  ;;  %v2610_v28 = vand.u32 2147483648, %v7896_v12  ;;  %vm2752_vm0 = vweird.f32 %v7914_v25  ;;  %vm2756_vm4 = vcmp.eq.f32.partialorder %v2755_v52, 8.507059e+37  ;;  %v9706_v52 = vld [vmem:[#allocation46_spill] sm:$0xff] }
 0x596   :  { %v2615_v14 = vmul.f32 %v2597_v30, %v7305_v8  ;;  %v2603_v44 = vadd.f32 %v3714_v11, %v2602_v37  ;;  %v2608_v8 = vand.u32 2147483647, %v7896_v12  ;;  %v2748_v55 = vsub.f32 1.0, %v2747_v6  ;;  %vm7942_vm2 = vmor %vm2751_vm1, %vm2752_vm0 }
 0x597   :  { %v2611_v22 = vor.u32 1.1754944e-38, %v2610_v28  ;;  %v2634_v12 = vadd.f32 %v2630_v2, %v5141_v58  ;;  %v4363_v2 = vld [vmem:[#allocation6 + $0x180] sm:$0xff] }
 0x598   :  { %v7918_v34 = vadd.f32 %v2616_v0, %v2615_v14  ;;  %v3720_v56 = vpop.eup %3719  ;;  %v2607_v27 = vsel %vm2606_vm14, %v3714_v11, %v2603_v44  ;;  %vm2609_vm15 = vcmp.eq.f32.partialorder %v2608_v8, 8.507059e+37  ;;  %v2749_v15 = vmul.f32 %v7914_v25, %v2748_v55 }
 0x599   :  { %v2728_v40 = vadd.f32 1.0, %v3720_v56  ;;  %v2612_v1 = vsel %vm2609_vm15, %v2611_v22, %v2607_v27  ;;  %v2718_v37 = vadd.f32 %v2712_v9, %v2634_v12  ;;  %v2757_v0 = vand.u32 2147483648, %v7901_v19  ;;  %v4368_v22 = vld [vmem:[#allocation6 + $0x150] sm:$0xff]  ;;  %v9701_v9 = vld [vmem:[#allocation35_spill] sm:$0xff] }
 0x59a   :  { %3721 = vtanh.f32 %v7918_v34  ;;  %v2750_v16 = vadd.f32 %v7914_v25, %v2749_v15  ;;  %v4370_v15 = vld [vmem:[#allocation6 + $0x130] sm:$0xff] }
 0x59b   :  { %3723 = vpow2.f32 %v3500_v5  ;;  %v2742_v33 = vand.u32 2147483648, %v2728_v40  ;;  %v2740_v10 = vand.u32 2147483647, %v2728_v40  ;;  %v2758_v6 = vor.u32 1.1754944e-38, %v2757_v0  ;;  %v4372_v12 = vld [vmem:[#allocation6 + $0x110] sm:$0xff]  ;;  %v4375_v0 = vld [vmem:[#allocation6 + $0xc0] sm:$0xff] }
 0x59c   :  { %3725 = vrcp.f32 %v2728_v40  ;;  %vm2736_vm5 = vweird.f32 %v2728_v40 }
 0x59d   :  { %vm2741_vm7 = vcmp.eq.f32.partialorder %v2740_v10, 8.507059e+37  ;;  %v9709_v10 = vld [vmem:[#allocation58_spill] sm:$0xff] }
 0x5a0   :  { %v3722_v50 = vpop.eup %3721 }
 0x5a1   :  { %v2619_v53 = vmul.f32 %v3722_v50, %v2612_v1  ;;  %v3724_v45 = vpop.eup %3723  ;;  %v4369_v50 = vld [vmem:[#allocation6 + $0x120] sm:$0xff]  ;;  %v9700_v1 = vld [vmem:[#allocation34_spill] sm:$0xff] }
 0x5a2   :  { %v7930_v30 = vadd.f32 1.0, %v3724_v45  ;;  %v3726_v11 = vpop.eup %3725  ;;  %v9702_v45 = vld [vmem:[#allocation38_spill] sm:$0xff] }
 0x5a3   :  { %2818 = vmatmul.f32.vlgmr.msrb.gmra.mxu1 %v2619_v53  ;;  %2858 = vmatmul.f32.vlgmr.msrb.gmra.mxu3 %v2619_v53  ;;  %v2732_v14 = vmul.f32 %v3726_v11, %v2728_v40  ;;  %vm2737_vm3 = vweird.f32 %v3726_v11 }
 0x5a4   :  { %3040 = vmatpush.msrb.mxu1 %v7322_v61  ;;  %3080 = vmatpush.msrb.mxu3 %v7325_v7  ;;  %3727 = vrcp.f32 %v7930_v30  ;;  %vm2738_vm6 = vmor %vm2736_vm5, %vm2737_vm3  ;;  %vm2766_vm9 = vweird.f32 %v7930_v30  ;;  %v9707_v7 = vld [vmem:[#allocation47_spill] sm:$0xff] }
 0x5a5   :  { %v2733_v61 = vsub.f32 1.0, %v2732_v14  ;;  %3729 = vtanh.f32 %v2718_v37  ;;  %v9704_v37 = vld [vmem:[#allocation42_spill] sm:$0xff]  ;;  %v9705_v14 = vld [vmem:[#allocation43_spill] sm:$0xff] }
 0x5a6   :  { %3041 = vmatpush.msrb.mxu1 %v7333_v51  ;;  %3081 = vmatpush.msrb.mxu3 %v7336_v47  ;;  %v2754_v51 = vsel %vm7942_vm2, %v7914_v25, %v2750_v16  ;;  %v4374_v16 = vld [vmem:[#allocation6 + $0xf0] sm:$0xff] }
 0x5a7   :  { %v2734_v47 = vmul.f32 %v3726_v11, %v2733_v61  ;;  %v4376_v61 = vld [vmem:[#allocation6 + $0xd0] sm:$0xff] }
 0x5a8   :  { %3042 = vmatpush.msrb.mxu1 %v7346_v41  ;;  %3082 = vmatpush.msrb.mxu3 %v7349_v60  ;;  %v2759_v41 = vsel %vm2756_vm4, %v2758_v6, %v2754_v51  ;;  %v2743_v60 = vor.u32 1.1754944e-38, %v2742_v33  ;;  %v4377_v33 = vld [vmem:[#allocation6 + $0xa0] sm:$0xff]  ;;  %v9708_v51 = vld [vmem:[#allocation50_spill] sm:$0xff] }
 0x5a9   :  { %v2735_v44 = vadd.f32 %v3726_v11, %v2734_v47  ;;  %v2777_v56 = vmul.f32 %v2759_v41, %v7383_v13  ;;  %v9696_v13 = vld [vmem:[#allocation30_spill] sm:$0xff]  ;;  %v4378_v47 = vld [vmem:[#allocation6 + $0xb0] sm:$0xff]  ;;  %v4379_v6 = vld [vmem:[#allocation6 + $0x80] sm:$0xff] }
 0x5aa   :  { %3043 = vmatpush.msrb.mxu1 %v7356_v46  ;;  %3083 = vmatpush.msrb.mxu3 %v7359_v48  ;;  %v3728_v19 = vpop.eup %3727  ;;  %v9712_v41 = vld [vmem:[#allocation16_spill] sm:$0xff] }
 0x5ab   :  { %2898 = vmatmul.f32.vlgmr.msra.gmra.mxu1 %v2619_v53  ;;  %2938 = vmatmul.f32.vlgmr.msra.gmra.mxu3 %v2619_v53  ;;  %v2762_v5 = vmul.f32 %v3728_v19, %v7930_v30  ;;  %v2739_v25 = vsel %vm2738_vm6, %v3726_v11, %v2735_v44  ;;  %v3730_v46 = vpop.eup %3729  ;;  %vm2767_vm8 = vweird.f32 %v3728_v19  ;;  %v4371_v53 = vld [vmem:[#allocation6 + $0x100] sm:$0xff]  ;;  %v9711_v44 = vld [vmem:[#allocation54_spill] sm:$0xff] }
 0x5ac   :  { %3044 = vmatpush.msrb.mxu1 %v7364_v43  ;;  %3084 = vmatpush.msrb.mxu3 %v7367_v62  ;;  %v2744_v28 = vsel %vm2741_vm7, %v2743_v60, %v2739_v25  ;;  %vm2768_vm10 = vmor %vm2766_vm9, %vm2767_vm8  ;;  %v4373_v11 = vld [vmem:[#allocation6 + $0xe0] sm:$0xff] }
 0x5ad   :  { %v2763_v48 = vsub.f32 1.0, %v2762_v5  ;;  %v2778_v8 = vmul.f32 %v3730_v46, %v2744_v28  ;;  %v9713_v60 = vld [vmem:[#allocation51_spill] sm:$0xff]  ;;  %v9714_v5 = vld [vmem:[#allocation17_spill] sm:$0xff]  ;;  %v9716_v46 = vld [vmem:[#allocation18_spill] sm:$0xff] }
 0x5ae   :  { %3045 = vmatpush.msrb.mxu1 %v7370_v17  ;;  %3085 = vmatpush.msrb.mxu3 %v7373_v49  ;;  %v2772_v17 = vand.u32 2147483648, %v7930_v30  ;;  %v2770_v49 = vand.u32 2147483647, %v7930_v30  ;;  %v9703_v30 = vld [vmem:[#allocation39_spill] sm:$0xff] }
 0x5af   :  { %v2764_v40 = vmul.f32 %v3728_v19, %v2763_v48  ;;  %v7961_v43 = vadd.f32 %v2778_v8, %v2777_v56  ;;  %v9715_v25 = vld [vmem:[#allocation55_spill] sm:$0xff]  ;;  %v9720_v8 = vld [vmem:[#allocation20_spill] sm:$0xff] }
 0x5b0   :  { %3046 = vmatpush.msrb.mxu1 %v7377_v35  ;;  %3086 = vmatpush.msrb.mxu3 %v7380_v59  ;;  %v9695_v35 = vld [vmem:[#allocation29_spill] sm:$0xff]  ;;  %vm2771_vm11 = vcmp.eq.f32.partialorder %v2770_v49, 8.507059e+37  ;;  %v9717_v28 = vld [vmem:[#allocation59_spill] sm:$0xff] }
 0x5b1   :  { %v2765_v62 = vadd.f32 %v3728_v19, %v2764_v40  ;;  %3731 = vtanh.f32 %v7961_v43  ;;  %v9718_v48 = vld [vmem:[#allocation19_spill] sm:$0xff]  ;;  %v9721_v40 = vld [vmem:[#allocation66_spill] sm:$0xff] }
 0x5b2   :  { %3047 = vmatpush.msrb.mxu1 %v7385_v32  ;;  %3087 = vmatpush.msrb.mxu3 %v7388_v57  ;;  %v2773_v32 = vor.u32 1.1754944e-38, %v2772_v17  ;;  %v9719_v56 = vld [vmem:[#allocation63_spill] sm:$0xff] }
 0x5b3   :  { %v2769_v59 = vsel %vm2768_vm10, %v3728_v19, %v2765_v62  ;;  %v9710_v19 = vld [vmem:[#allocation62_spill] sm:$0xff]  ;;  %v9722_v62 = vld [vmem:[#allocation21_spill] sm:$0xff]  ;;  %v9723_v17 = vld [vmem:[#allocation67_spill] sm:$0xff] }
 0x5b4   :  { %3048 = vmatpush.msrb.mxu1 %v7395_v39  ;;  %3088 = vmatpush.msrb.mxu3 %v9695_v35  ;;  %v2774_v55 = vsel %vm2771_vm11, %v2773_v32, %v2769_v59  ;;  %v4357_v39 = vld [vmem:[#allocation6 + $0x1e0] sm:$0xff]  ;;  %v9725_v35 = vld [vmem:[#allocation70_spill] sm:$0xff] }
 0x5b5   :  { %v9724_v49 = vld [vmem:[#allocation75_spill] sm:$0xff]  ;;  %v9726_v59 = vld [vmem:[#allocation74_spill] sm:$0xff] }
 0x5b6   :  { %3049 = vmatpush.msrb.mxu1 %v9696_v13  ;;  %3089 = vmatpush.msrb.mxu3 %v7404_v29  ;;  %v4358_v29 = vld [vmem:[#allocation6 + $0x1f0] sm:$0xff]  ;;  %v9727_v13 = vld [vmem:[#allocation71_spill] sm:$0xff] }
 0x5b7   :  { %v3732_v57 = vpop.eup %3731  ;;  %v9728_v32 = vld [vmem:[#allocation79_spill] sm:$0xff] }
 0x5b8   :  { %3050 = vmatpush.msrb.mxu1 %v7407_v26  ;;  %3090 = vmatpush.msrb.mxu3 %v7410_v3  ;;  %v7975_v27 = vmul.f32 %v3732_v57, %v2774_v55  ;;  %v4359_v26 = vld [vmem:[#allocation6 + $0x1c0] sm:$0xff]  ;;  %v4360_v3 = vld [vmem:[#allocation6 + $0x1d0] sm:$0xff]  ;;  %v9729_v57 = vld [vmem:[#allocation36_spill] sm:$0xff] }
 0x5b9   :  { %v9730_v55 = vld [vmem:[#allocation78_spill] sm:$0xff] }
 0x5ba   :  { %3051 = vmatpush.msrb.mxu1 %v7415_v63  ;;  %3091 = vmatpush.msrb.mxu3 %v7418_v54  ;;  %v4361_v63 = vld [vmem:[#allocation6 + $0x1a0] sm:$0xff]  ;;  %v4362_v54 = vld [vmem:[#allocation6 + $0x1b0] sm:$0xff] }
 0x5bb   :  { %2798 = vmatmul.f32.vlgmr.msrb.gmra.mxu0 %v7975_v27  ;;  %2838 = vmatmul.f32.vlgmr.msrb.gmra.mxu2 %v7975_v27 }
 0x5bc   :  { %3020 = vmatpush.msrb.mxu0 %v4357_v39  ;;  %3060 = vmatpush.msrb.mxu2 %v4358_v29  ;;  %v9731_v39 = vld [vmem:[#allocation82_spill] sm:$0xff] }
 0x5bd   :  { %3052 = vmatpush.msrb.mxu1 %v7425_v24  ;;  %3092 = vmatpush.msrb.mxu3 %v7428_v38  ;;  %v4364_v24 = vld [vmem:[#allocation6 + $0x190] sm:$0xff]  ;;  %v9697_v38 = vld [vmem:[#allocation31_spill] sm:$0xff]  ;;  %v9732_v29 = vld [vmem:[#allocation22_spill] sm:$0xff] }
 0x5be   :  { %3021 = vmatpush.msrb.mxu0 %v4359_v26  ;;  %3061 = vmatpush.msrb.mxu2 %v4360_v3  ;;  %v9733_v26 = vld [vmem:[#allocation83_spill] sm:$0xff] }
 0x5bf   :  { %3053 = vmatpush.msrb.mxu1 %v7433_v23  ;;  %3093 = vmatpush.msrb.mxu3 %v7436_v36  ;;  %v4365_v23 = vld [vmem:[#allocation6 + $0x160] sm:$0xff]  ;;  %v4366_v36 = vld [vmem:[#allocation6 + $0x170] sm:$0xff] }
 0x5c0   :  { %3022 = vmatpush.msrb.mxu0 %v4361_v63  ;;  %3062 = vmatpush.msrb.mxu2 %v4362_v54  ;;  %v9734_v3 = vld [vmem:[#allocation23_spill] sm:$0xff]  ;;  %v9735_v63 = vld [vmem:[#allocation86_spill] sm:$0xff]  ;;  %v9736_v54 = vld [vmem:[#allocation24_spill] sm:$0xff] }
 0x5c1   :  { %3054 = vmatpush.msrb.mxu1 %v7441_v21  ;;  %3094 = vmatpush.msrb.mxu3 %v7444_v31  ;;  %v4367_v21 = vld [vmem:[#allocation6 + $0x140] sm:$0xff]  ;;  %v9698_v31 = vld [vmem:[#allocation32_spill] sm:$0xff] }
 0x5c2   :  { %3023 = vmatpush.msrb.mxu0 %v4363_v2  ;;  %3063 = vmatpush.msrb.mxu2 %v4364_v24  ;;  %v9737_v2 = vld [vmem:[#allocation87_spill] sm:$0xff]  ;;  %v9739_v24 = vld [vmem:[#allocation90_spill] sm:$0xff] }
 0x5c3   :  { %3055 = vmatpush.msrb.mxu1 %v7449_v18  ;;  %3095 = vmatpush.msrb.mxu3 %v9697_v38  ;;  %v9699_v18 = vld [vmem:[#allocation33_spill] sm:$0xff]  ;;  %v9740_v38 = vld [vmem:[#allocation40_spill] sm:$0xff] }
 0x5c4   :  { %2878 = vmatmul.f32.vlgmr.msra.gmra.mxu0 %v7975_v27  ;;  %2918 = vmatmul.f32.vlgmr.msra.gmra.mxu2 %v7975_v27 }
 0x5c5   :  { %3024 = vmatpush.msrb.mxu0 %v4365_v23  ;;  %3056 = vmatmul.f32.vlgmr.msrb.gmra.mxu1 %v7975_v27  ;;  %v9741_v23 = vld [vmem:[#allocation91_spill] sm:$0xff] }
 0x5c6   :  { %3064 = vmatpush.msrb.mxu2 %v4366_v36  ;;  %3096 = vmatmul.f32.vlgmr.msrb.gmra.mxu3 %v7975_v27  ;;  %v9742_v36 = vld [vmem:[#allocation41_spill] sm:$0xff] }
 0x5c7   :  { %3025 = vmatpush.msrb.mxu0 %v4367_v21  ;;  %3187 = vmatpush.msra.mxu1 %v9698_v31  ;;  %v9743_v21 = vld [vmem:[#allocation52_spill] sm:$0xff] }
 0x5c8   :  { %3065 = vmatpush.msrb.mxu2 %v4368_v22  ;;  %3227 = vmatpush.msra.mxu3 %v9699_v18  ;;  %v9744_v31 = vld [vmem:[#allocation44_spill] sm:$0xff]  ;;  %v9745_v22 = vld [vmem:[#allocation53_spill] sm:$0xff] }
 0x5c9   :  { %3026 = vmatpush.msrb.mxu0 %v4369_v50  ;;  %3188 = vmatpush.msra.mxu1 %v9700_v1  ;;  %v9746_v18 = vld [vmem:[#allocation45_spill] sm:$0xff]  ;;  %v9747_v50 = vld [vmem:[#allocation56_spill] sm:$0xff] }
 0x5ca   :  { %3066 = vmatpush.msrb.mxu2 %v4370_v15  ;;  %3228 = vmatpush.msra.mxu3 %v9701_v9  ;;  %v9748_v1 = vld [vmem:[#allocation48_spill] sm:$0xff]  ;;  %v9749_v15 = vld [vmem:[#allocation57_spill] sm:$0xff]  ;;  %v9750_v9 = vld [vmem:[#allocation94_spill] sm:$0xff] }
 0x5cb   :  { %3027 = vmatpush.msrb.mxu0 %v4371_v53  ;;  %3189 = vmatpush.msra.mxu1 %v9702_v45  ;;  %v9751_v53 = vld [vmem:[#allocation49_spill] sm:$0xff]  ;;  %v9752_v45 = vld [vmem:[#allocation60_spill] sm:$0xff] }
 0x5cc   :  { %3067 = vmatpush.msrb.mxu2 %v4372_v12  ;;  %3229 = vmatpush.msra.mxu3 %v9703_v30  ;;  %v9753_v12 = vld [vmem:[#allocation61_spill] sm:$0xff]  ;;  %v9754_v30 = vld [vmem:[#allocation64_spill] sm:$0xff] }
 0x5cd   :  { %3028 = vmatpush.msrb.mxu0 %v4373_v11  ;;  %3190 = vmatpush.msra.mxu1 %v9704_v37  ;;  %v9755_v11 = vld [vmem:[#allocation65_spill] sm:$0xff]  ;;  %v9756_v37 = vld [vmem:[#allocation68_spill] sm:$0xff] }
 0x5ce   :  { %3068 = vmatpush.msrb.mxu2 %v4374_v16  ;;  %3230 = vmatpush.msra.mxu3 %v9705_v14  ;;  %v9757_v16 = vld [vmem:[#allocation69_spill] sm:$0xff]  ;;  %v9758_v14 = vld [vmem:[#allocation72_spill] sm:$0xff] }
 0x5cf   :  { %3029 = vmatpush.msrb.mxu0 %v4375_v0  ;;  %3191 = vmatpush.msra.mxu1 %v9706_v52  ;;  %v9759_v0 = vld [vmem:[#allocation73_spill] sm:$0xff]  ;;  %v9760_v52 = vld [vmem:[#allocation76_spill] sm:$0xff] }
 0x5d0   :  { %3069 = vmatpush.msrb.mxu2 %v4376_v61  ;;  %3231 = vmatpush.msra.mxu3 %v9707_v7  ;;  %v9761_v61 = vld [vmem:[#allocation77_spill] sm:$0xff]  ;;  %v9762_v7 = vld [vmem:[#allocation80_spill] sm:$0xff] }
 0x5d1   :  { %3030 = vmatpush.msrb.mxu0 %v4377_v33  ;;  %3192 = vmatpush.msra.mxu1 %v9708_v51  ;;  %v9763_v33 = vld [vmem:[#allocation81_spill] sm:$0xff]  ;;  %v9764_v51 = vld [vmem:[#allocation84_spill] sm:$0xff] }
 0x5d2   :  { %3070 = vmatpush.msrb.mxu2 %v4378_v47  ;;  %3232 = vmatpush.msra.mxu3 %v9709_v10  ;;  %v9765_v47 = vld [vmem:[#allocation85_spill] sm:$0xff]  ;;  %v9766_v10 = vld [vmem:[#allocation88_spill] sm:$0xff] }
 0x5d3   :  { %3031 = vmatpush.msrb.mxu0 %v4379_v6  ;;  %3193 = vmatpush.msra.mxu1 %v9710_v19  ;;  %v9767_v6 = vld [vmem:[#allocation89_spill] sm:$0xff]  ;;  %v9768_v19 = vld [vmem:[#allocation92_spill] sm:$0xff] }
 0x5d4   :  { %3071 = vmatpush.msrb.mxu2 %v9711_v44  ;;  %3233 = vmatpush.msra.mxu3 %v9712_v41  ;;  %v9769_v44 = vld [vmem:[#allocation93_spill] sm:$0xff]  ;;  %v9770_v41 = vld [vmem:[#allocation95_spill] sm:$0xff] }
 0x5d5   :  { %3032 = vmatpush.msrb.mxu0 %v9713_v60  ;;  %3194 = vmatpush.msra.mxu1 %v9714_v5  ;;  %v9771_v60 = vld [vmem:[#allocation96_spill] sm:$0xff]  ;;  %v9772_v5 = vld [vmem:[#allocation97_spill] sm:$0xff] }
 0x5d6   :  { %3072 = vmatpush.msrb.mxu2 %v9715_v25  ;;  %3234 = vmatpush.msra.mxu3 %v9716_v46  ;;  %v9773_v25 = vld [vmem:[#allocation98_spill] sm:$0xff]  ;;  %v9774_v46 = vld [vmem:[#allocation99_spill] sm:$0xff] }
 0x5d7   :  { %3033 = vmatpush.msrb.mxu0 %v9717_v28  ;;  %3195 = vmatpush.msra.mxu1 %v9718_v48  ;;  %v9775_v28 = vld [vmem:[#allocation100_spill] sm:$0xff]  ;;  %v9776_v48 = vld [vmem:[#allocation101_spill] sm:$0xff] }
 0x5d8   :  { %3073 = vmatpush.msrb.mxu2 %v9719_v56  ;;  %3235 = vmatpush.msra.mxu3 %v9720_v8  ;;  %v9777_v56 = vld [vmem:[#allocation102_spill] sm:$0xff]  ;;  %v9778_v8 = vld [vmem:[#allocation103_spill] sm:$0xff] }
 0x5d9   :  { %3034 = vmatpush.msrb.mxu0 %v9721_v40  ;;  %3196 = vmatpush.msra.mxu1 %v9722_v62  ;;  %v9779_v40 = vld [vmem:[#allocation106_spill] sm:$0xff]  ;;  %v9780_v62 = vld [vmem:[#allocation107_spill] sm:$0xff] }
 0x5da   :  { %3074 = vmatpush.msrb.mxu2 %v9723_v17  ;;  %3236 = vmatpush.msra.mxu3 %v9724_v49  ;;  %v9781_v17 = vld [vmem:[#allocation110_spill] sm:$0xff]  ;;  %v9782_v49 = vld [vmem:[#allocation111_spill] sm:$0xff] }
 0x5db   :  { %3035 = vmatpush.msrb.mxu0 %v9725_v35  ;;  %3197 = vmatpush.msra.mxu1 %v9726_v59  ;;  %v9783_v35 = vld [vmem:[#allocation112_spill] sm:$0xff]  ;;  %v9784_v59 = vld [vmem:[#allocation113_spill] sm:$0xff] }
 0x5dc   :  { %3075 = vmatpush.msrb.mxu2 %v9727_v13  ;;  %3036 = vmatmul.f32.vlgmr.msrb.gmra.mxu0 %v7975_v27  ;;  %v9785_v13 = vld [vmem:[#allocation114_spill] sm:$0xff] }
 0x5dd   :  { %3076 = vmatmul.f32.vlgmr.msrb.gmra.mxu2 %v7975_v27  ;;  %3237 = vmatpush.msra.mxu3 %v9728_v32  ;;  %v9738_v27 = vld [vmem:[#allocation37_spill] sm:$0xff]  ;;  %v9786_v32 = vld [vmem:[#allocation115_spill] sm:$0xff] }
 0x5de   :  { %3198 = vmatpush.msra.mxu1 %v9729_v57  ;;  %3167 = vmatpush.msra.mxu0 %v9730_v55  ;;  %v9787_v57 = vld [vmem:[#allocation116_spill] sm:$0xff]  ;;  %v9788_v55 = vld [vmem:[#allocation117_spill] sm:$0xff] }
 0x5df   :  { %3238 = vmatpush.msra.mxu3 %v9731_v39  ;;  %3207 = vmatpush.msra.mxu2 %v9732_v29  ;;  %v9789_v39 = vld [vmem:[#allocation118_spill] sm:$0xff]  ;;  %v9790_v29 = vld [vmem:[#allocation119_spill] sm:$0xff] }
 0x5e0   :  { %3199 = vmatpush.msra.mxu1 %v9733_v26  ;;  %3168 = vmatpush.msra.mxu0 %v9734_v3  ;;  %v9791_v26 = vld [vmem:[#allocation120_spill] sm:$0xff]  ;;  %v9792_v3 = vld [vmem:[#allocation121_spill] sm:$0xff] }
 0x5e1   :  { %3239 = vmatpush.msra.mxu3 %v9735_v63  ;;  %3208 = vmatpush.msra.mxu2 %v9736_v54  ;;  %v9793_v63 = vld [vmem:[#allocation122_spill] sm:$0xff]  ;;  %v9794_v54 = vld [vmem:[#allocation123_spill] sm:$0xff] }
 0x5e2   :  { %3200 = vmatpush.msra.mxu1 %v9737_v2  ;;  %3169 = vmatpush.msra.mxu0 %v9738_v27  ;;  %v9795_v2 = vld [vmem:[#allocation124_spill] sm:$0xff]  ;;  %v9796_v27 = vld [vmem:[#allocation125_spill] sm:$0xff] }
 0x5e3   :  { %3240 = vmatpush.msra.mxu3 %v9739_v24  ;;  %3209 = vmatpush.msra.mxu2 %v9740_v38  ;;  %v9797_v24 = vld [vmem:[#allocation126_spill] sm:$0xff]  ;;  %v9798_v38 = vld [vmem:[#allocation127_spill] sm:$0xff] }
 0x5e4   :  { %3201 = vmatpush.msra.mxu1 %v9741_v23  ;;  %3170 = vmatpush.msra.mxu0 %v9742_v36  ;;  %v9799_v23 = vld [vmem:[#allocation128_spill] sm:$0xff]  ;;  %v9800_v36 = vld [vmem:[#allocation129_spill] sm:$0xff] }
 0x5e5   :  { %3241 = vmatpush.msra.mxu3 %v9743_v21  ;;  %3210 = vmatpush.msra.mxu2 %v9744_v31  ;;  %v9801_v21 = vld [vmem:[#allocation130_spill] sm:$0xff]  ;;  %v9802_v31 = vld [vmem:[#allocation131_spill] sm:$0xff] }
 0x5e6   :  { %3202 = vmatpush.msra.mxu1 %v9745_v22  ;;  %3171 = vmatpush.msra.mxu0 %v9746_v18  ;;  %v9803_v22 = vld [vmem:[#allocation132_spill] sm:$0xff]  ;;  %v9804_v18 = vld [vmem:[#allocation133_spill] sm:$0xff] }
 0x5e7   :  { %3242 = vmatpush.msra.mxu3 %v9747_v50  ;;  %3211 = vmatpush.msra.mxu2 %v9748_v1  ;;  %v9805_v50 = vld [vmem:[#allocation134_spill] sm:$0xff]  ;;  %v9806_v1 = vld [vmem:[#allocation135_spill] sm:$0xff] }
 0x5e8   :  { %3267 = vmatpush.msrb.mxu1 %v9749_v15  ;;  %3172 = vmatpush.msra.mxu0 %v9751_v53  ;;  %v9807_v15 = vld [vmem:[#allocation136_spill] sm:$0xff]  ;;  %v9809_v53 = vld [vmem:[#allocation138_spill] sm:$0xff] }
 0x5e9   :  { %3307 = vmatpush.msrb.mxu3 %v9750_v9  ;;  %3212 = vmatpush.msra.mxu2 %v9752_v45  ;;  %v9808_v9 = vld [vmem:[#allocation137_spill] sm:$0xff]  ;;  %v9810_v45 = vld [vmem:[#allocation139_spill] sm:$0xff] }
 0x5ea   :  { %3268 = vmatpush.msrb.mxu1 %v9753_v12  ;;  %3173 = vmatpush.msra.mxu0 %v9755_v11  ;;  %v9811_v12 = vld [vmem:[#allocation140_spill] sm:$0xff]  ;;  %v9813_v11 = vld [vmem:[#allocation142_spill] sm:$0xff] }
 0x5eb   :  { %3308 = vmatpush.msrb.mxu3 %v9754_v30  ;;  %3213 = vmatpush.msra.mxu2 %v9756_v37  ;;  %v9812_v30 = vld [vmem:[#allocation141_spill] sm:$0xff]  ;;  %v9814_v37 = vld [vmem:[#allocation143_spill] sm:$0xff] }
 0x5ec   :  { %3269 = vmatpush.msrb.mxu1 %v9757_v16  ;;  %3174 = vmatpush.msra.mxu0 %v9759_v0  ;;  %v9815_v16 = vld [vmem:[#allocation144_spill] sm:$0xff]  ;;  %v9817_v0 = vld [vmem:[#allocation146_spill] sm:$0xff] }
 0x5ed   :  { %3309 = vmatpush.msrb.mxu3 %v9758_v14  ;;  %3214 = vmatpush.msra.mxu2 %v9760_v52  ;;  %v9816_v14 = vld [vmem:[#allocation145_spill] sm:$0xff]  ;;  %v9818_v52 = vld [vmem:[#allocation147_spill] sm:$0xff] }
 0x5ee   :  { %3270 = vmatpush.msrb.mxu1 %v9761_v61  ;;  %3175 = vmatpush.msra.mxu0 %v9763_v33  ;;  %v9819_v61 = vld [vmem:[#allocation148_spill] sm:$0xff]  ;;  %v9821_v33 = vld [vmem:[#allocation150_spill] sm:$0xff] }
 0x5ef   :  { %3310 = vmatpush.msrb.mxu3 %v9762_v7  ;;  %3215 = vmatpush.msra.mxu2 %v9764_v51  ;;  %v9820_v7 = vld [vmem:[#allocation149_spill] sm:$0xff]  ;;  %v9822_v51 = vld [vmem:[#allocation151_spill] sm:$0xff] }
 0x5f0   :  { %3271 = vmatpush.msrb.mxu1 %v9765_v47  ;;  %3176 = vmatpush.msra.mxu0 %v9767_v6  ;;  %v9823_v47 = vld [vmem:[#allocation152_spill] sm:$0xff]  ;;  %v9825_v6 = vld [vmem:[#allocation154_spill] sm:$0xff] }
 0x5f1   :  { %3311 = vmatpush.msrb.mxu3 %v9766_v10  ;;  %3216 = vmatpush.msra.mxu2 %v9768_v19  ;;  %v9824_v10 = vld [vmem:[#allocation153_spill] sm:$0xff]  ;;  %v9826_v19 = vld [vmem:[#allocation155_spill] sm:$0xff] }
 0x5f2   :  { %3272 = vmatpush.msrb.mxu1 %v9769_v44  ;;  %3177 = vmatpush.msra.mxu0 %v9771_v60  ;;  %v9827_v44 = vld [vmem:[#allocation156_spill] sm:$0xff]  ;;  %v9829_v60 = vld [vmem:[#allocation158_spill] sm:$0xff] }
 0x5f3   :  { %3312 = vmatpush.msrb.mxu3 %v9770_v41  ;;  %3217 = vmatpush.msra.mxu2 %v9772_v5  ;;  %v9828_v41 = vld [vmem:[#allocation157_spill] sm:$0xff]  ;;  %v9830_v5 = vld [vmem:[#allocation159_spill] sm:$0xff] }
 0x5f4   :  { %3273 = vmatpush.msrb.mxu1 %v9773_v25  ;;  %3178 = vmatpush.msra.mxu0 %v9775_v28  ;;  %v9831_v25 = vld [vmem:[#allocation160_spill] sm:$0xff]  ;;  %v9833_v28 = vld [vmem:[#allocation162_spill] sm:$0xff] }
 0x5f5   :  { %3313 = vmatpush.msrb.mxu3 %v9774_v46  ;;  %3218 = vmatpush.msra.mxu2 %v9776_v48  ;;  %v9832_v46 = vld [vmem:[#allocation161_spill] sm:$0xff]  ;;  %v9834_v48 = vld [vmem:[#allocation163_spill] sm:$0xff] }
 0x5f6   :  { %3274 = vmatpush.msrb.mxu1 %v9777_v56  ;;  %3179 = vmatpush.msra.mxu0 %v9779_v40  ;;  %v9835_v40 = vld [vmem:[#allocation25_spill] sm:$0xff] }
 0x5f7   :  { %3314 = vmatpush.msrb.mxu3 %v9778_v8  ;;  %3219 = vmatpush.msra.mxu2 %v9780_v62 }
 0x5f8   :  { %3275 = vmatpush.msrb.mxu1 %v9781_v17  ;;  %3180 = vmatpush.msra.mxu0 %v9783_v35  ;;  %v8133_v17 = vpop.permute.xlu1 %3009 }
 0x5f9   :  { %3315 = vmatpush.msrb.mxu3 %v9782_v49  ;;  %3220 = vmatpush.msra.mxu2 %v9784_v59  ;;  %v9836_v59 = vld [vmem:[#allocation105_spill] sm:$0xff] }
 0x5fa   :  { %3276 = vmatpush.msrb.mxu1 %v9785_v13  ;;  %3181 = vmatpush.msra.mxu0 %v9787_v57  ;;  %v3013_v13 = vmul.f32 %v8133_v17, %v9836_v59 }
 0x5fb   :  { %3316 = vmatpush.msrb.mxu3 %v9786_v32  ;;  %3221 = vmatpush.msra.mxu2 %v9788_v55  ;;  %v9837_v55 = vld [vmem:[#allocation26_spill] sm:$0xff] }
 0x5fc   :  { %3277 = vmatpush.msrb.mxu1 %v9789_v39  ;;  %3182 = vmatpush.msra.mxu0 %v9791_v26 }
 0x5fd   :  { %3317 = vmatpush.msrb.mxu3 %v9790_v29  ;;  %3222 = vmatpush.msra.mxu2 %v9792_v3 }
 0x5fe   :  { %3278 = vmatpush.msrb.mxu1 %v9793_v63  ;;  %3247 = vmatpush.msrb.mxu0 %v9795_v2  ;;  %v9838_v63 = vld [vmem:[#allocation109_spill] sm:$0xff]  ;;  %v9839_v2 = vld [vmem:[#allocation27_spill] sm:$0xff] }
 0x5ff   :  { %3318 = vmatpush.msrb.mxu3 %v9794_v54  ;;  %3287 = vmatpush.msrb.mxu2 %v9796_v27  ;;  %v3017_v54 = vadd.f32 %v3013_v13, %v9838_v63 }
 0x600   :  { %3279 = vmatpush.msrb.mxu1 %v9797_v24  ;;  %3248 = vmatpush.msrb.mxu0 %v9799_v23 }
 0x601   :  { %3319 = vmatpush.msrb.mxu3 %v9798_v38  ;;  %3288 = vmatpush.msrb.mxu2 %v9800_v36 }
 0x602   :  { %3280 = vmatpush.msrb.mxu1 %v9801_v21  ;;  %3249 = vmatpush.msrb.mxu0 %v9803_v22 }
 0x603   :  { %3320 = vmatpush.msrb.mxu3 %v9802_v31  ;;  %3289 = vmatpush.msrb.mxu2 %v9804_v18 }
 0x604   :  { %3281 = vmatpush.msrb.mxu1 %v9805_v50  ;;  %3250 = vmatpush.msrb.mxu0 %v9807_v15 }
 0x605   :  { %3321 = vmatpush.msrb.mxu3 %v9806_v1  ;;  %3290 = vmatpush.msrb.mxu2 %v9808_v9 }
 0x606   :  { %3282 = vmatpush.msrb.mxu1 %v9809_v53  ;;  %3251 = vmatpush.msrb.mxu0 %v9811_v12  ;;  %v9840_v12 = vld [vmem:[#allocation28_spill] sm:$0xff] }
 0x607   :  { %3322 = vmatpush.msrb.mxu3 %v9810_v45  ;;  %3291 = vmatpush.msrb.mxu2 %v9812_v30 }
 0x608   :  { %3252 = vmatpush.msrb.mxu0 %v9813_v11 }
 0x609   :  { %3292 = vmatpush.msrb.mxu2 %v9814_v37 }
 0x60a   :  { %3253 = vmatpush.msrb.mxu0 %v9815_v16 }
 0x60b   :  { %3293 = vmatpush.msrb.mxu2 %v9816_v14 }
 0x60c   :  { %3254 = vmatpush.msrb.mxu0 %v9817_v0 }
 0x60d   :  { %3294 = vmatpush.msrb.mxu2 %v9818_v52 }
 0x60e   :  { %3255 = vmatpush.msrb.mxu0 %v9819_v61 }
 0x60f   :  { %3295 = vmatpush.msrb.mxu2 %v9820_v7  ;;  %v9841_v7 = vld [vmem:[#allocation104_spill] sm:$0xff] }
 0x610   :  { %3256 = vmatpush.msrb.mxu0 %v9821_v33  ;;  %v3012_v33 = vmul.f32 %v8133_v17, %v9841_v7 }
 0x611   :  { %3296 = vmatpush.msrb.mxu2 %v9822_v51 }
 0x612   :  { %3257 = vmatpush.msrb.mxu0 %v9823_v47 }
 0x613   :  { %3297 = vmatpush.msrb.mxu2 %v9824_v10 }
 0x614   :  { %3258 = vmatpush.msrb.mxu0 %v9825_v6 }
 0x615   :  { %3298 = vmatpush.msrb.mxu2 %v9826_v19 }
 0x616   :  { %3259 = vmatpush.msrb.mxu0 %v9827_v44 }
 0x617   :  { %3299 = vmatpush.msrb.mxu2 %v9828_v41 }
 0x618   :  { %3260 = vmatpush.msrb.mxu0 %v9829_v60 }
 0x619   :  { %3300 = vmatpush.msrb.mxu2 %v9830_v5 }
 0x61a   :  { %3261 = vmatpush.msrb.mxu0 %v9831_v25 }
 0x61b   :  { %3301 = vmatpush.msrb.mxu2 %v9832_v46  ;;  %v9844_v46 = vld [vmem:[#allocation108_spill] sm:$0xff] }
 0x61c   :  { %3262 = vmatpush.msrb.mxu0 %v9833_v28  ;;  %v3016_v28 = vadd.f32 %v3012_v33, %v9844_v46 }
 0x61d   :  { %3302 = vmatpush.msrb.mxu2 %v9834_v48 }
 0x620   :  { %v2819_v56 = vpop.f32.mrf.mxu1 }
 0x626   :  { %v2859_v29 = vpop.f32.mrf.mxu3 }
 0x628   :  { %v2899_v49 = vpop.f32.mrf.mxu1 }
 0x62e   :  { %v2939_v14 = vpop.f32.mrf.mxu3 }
 0x638   :  { %v2799_v8 = vpop.f32.mrf.mxu0 }
 0x639   :  { %v2800_v62 = vadd.f32 %v2799_v8, %v9835_v40 }
 0x63b   :  { %v2820_v35 = vadd.f32 %v2819_v56, %v2800_v62 }
 0x63d   :  { %v3501_v32 = vmul.f32 -1.442695, %v2820_v35 }
 0x63e   :  { %v2839_v57 = vpop.f32.mrf.mxu2 }
 0x63f   :  { %3733 = vpow2.f32 %v3501_v32  ;;  %v2840_v39 = vadd.f32 %v2839_v57, %v9837_v55 }
 0x641   :  { %v2860_v26 = vadd.f32 %v2859_v29, %v2840_v39  ;;  %v2879_v3 = vpop.f32.mrf.mxu0 }
 0x642   :  { %v2880_v27 = vadd.f32 %v2879_v3, %v9839_v2  ;;  %v3057_v24 = vpop.f32.mrf.mxu1 }
 0x643   :  { %v3502_v38 = vmul.f32 -1.442695, %v2860_v26  ;;  %v3101_v23 = vadd.f32 %v3057_v24, %v3017_v54 }
 0x644   :  { %v2900_v36 = vadd.f32 %v2899_v49, %v2880_v27  ;;  %v3014_v49 = vmul.f32 %v8133_v17, %v5060_v20 }
 0x645   :  { %v3734_v21 = vpop.eup %3733  ;;  %3735 = vpow2.f32 %v3502_v38  ;;  %v3506_v18 = vmul.f32 -1.442695, %v3101_v23 }
 0x646   :  { %v2951_v31 = vadd.f32 1.0, %v3734_v21  ;;  %v3503_v22 = vmul.f32 -1.442695, %v2900_v36  ;;  %v3018_v38 = vadd.f32 %v3014_v49, %v5081_v4 }
 0x647   :  { %v2919_v15 = vpop.f32.mrf.mxu2 }
 0x648   :  { %3737 = vrcp.f32 %v2951_v31  ;;  %v2920_v30 = vadd.f32 %v2919_v15, %v9840_v12  ;;  %v2965_v6 = vand.u32 2147483648, %v2951_v31  ;;  %vm2959_vm13 = vweird.f32 %v2951_v31 }
 0x649   :  { %3739 = vpow2.f32 %v3503_v22  ;;  %v2963_v44 = vand.u32 2147483647, %v2951_v31 }
 0x64a   :  { %3741 = vpow2.f32 %v3506_v18  ;;  %v2940_v0 = vadd.f32 %v2939_v14, %v2920_v30  ;;  %v2966_v35 = vor.u32 1.1754944e-38, %v2965_v6  ;;  %v3097_v14 = vpop.f32.mrf.mxu3 }
 0x64b   :  { %v3736_v50 = vpop.eup %3735  ;;  %vm2964_vm1 = vcmp.eq.f32.partialorder %v2963_v44, 8.507059e+37 }
 0x64c   :  { %v2952_v1 = vadd.f32 1.0, %v3736_v50 }
 0x64e   :  { %v3738_v9 = vpop.eup %3737  ;;  %3743 = vrcp.f32 %v2952_v1  ;;  %v2980_v60 = vand.u32 2147483648, %v2952_v1  ;;  %v2978_v25 = vand.u32 2147483647, %v2952_v1  ;;  %vm2974_vm0 = vweird.f32 %v2952_v1 }
 0x64f   :  { %v3740_v53 = vpop.eup %3739  ;;  %v2955_v45 = vmul.f32 %v3738_v9, %v2951_v31  ;;  %vm2960_vm12 = vweird.f32 %v3738_v9 }
 0x650   :  { %v8141_v11 = vadd.f32 1.0, %v3740_v53  ;;  %v3742_v37 = vpop.eup %3741  ;;  %vm8149_vm14 = vmor %vm2959_vm13, %vm2960_vm12  ;;  %v2981_v57 = vor.u32 1.1754944e-38, %v2980_v60  ;;  %vm2979_vm3 = vcmp.eq.f32.partialorder %v2978_v25, 8.507059e+37  ;;  %v3015_v53 = vmul.f32 %v8133_v17, %v5115_v42 }
 0x651   :  { %v2956_v16 = vsub.f32 1.0, %v2955_v45  ;;  %v8146_v51 = vadd.f32 1.0, %v3742_v37 }
 0x652   :  { %3745 = vrcp.f32 %v8141_v11  ;;  %v2995_v50 = vand.u32 2147483648, %v8141_v11  ;;  %vm2989_vm5 = vweird.f32 %v8141_v11 }
 0x653   :  { %v2957_v52 = vmul.f32 %v3738_v9, %v2956_v16  ;;  %3747 = vtanh.f32 %v2940_v0  ;;  %v3142_v17 = vand.u32 2147483648, %v8146_v51  ;;  %vm3136_vm9 = vweird.f32 %v8146_v51 }
 0x654   :  { %v3744_v61 = vpop.eup %3743  ;;  %3749 = vrcp.f32 %v8146_v51  ;;  %v2996_v45 = vor.u32 1.1754944e-38, %v2995_v50  ;;  %v3406_v50 = vld [vmem:[#allocation11 + $0x48] sm:$0xff] }
 0x655   :  { %v2970_v47 = vmul.f32 %v3744_v61, %v2952_v1  ;;  %v2958_v10 = vadd.f32 %v3738_v9, %v2957_v52  ;;  %vm2975_vm15 = vweird.f32 %v3744_v61  ;;  %v3143_v5 = vor.u32 1.1754944e-38, %v3142_v17  ;;  %v3398_v17 = vld [vmem:[#allocation11 + $0x8] sm:$0xff] }
 0x656   :  { %vm2976_vm2 = vmor %vm2974_vm0, %vm2975_vm15 }
 0x657   :  { %v2971_v19 = vsub.f32 1.0, %v2970_v47  ;;  %v2962_v8 = vsel %vm8149_vm14, %v3738_v9, %v2958_v10  ;;  %v3140_v10 = vand.u32 2147483647, %v8146_v51 }
 0x658   :  { %v3746_v41 = vpop.eup %3745  ;;  %v2967_v39 = vsel %vm2964_vm1, %v2966_v35, %v2962_v8 }
 0x659   :  { %v2972_v48 = vmul.f32 %v3744_v61, %v2971_v19  ;;  %v2985_v56 = vmul.f32 %v3746_v41, %v8141_v11  ;;  %v3037_v62 = vpop.f32.mrf.mxu0  ;;  %v3748_v26 = vpop.eup %3747  ;;  %vm2990_vm4 = vweird.f32 %v3746_v41  ;;  %vm3141_vm12 = vcmp.eq.f32.partialorder %v3140_v10, 8.507059e+37 }
 0x65a   :  { %v3100_v59 = vadd.f32 %v3037_v62, %v3016_v28  ;;  %v8159_v63 = vpop.eup %3749  ;;  %v3001_v24 = vmul.f32 %v3748_v26, %v2967_v39  ;;  %vm2991_vm6 = vmor %vm2989_vm5, %vm2990_vm4 }
 0x65b   :  { %v2986_v13 = vsub.f32 1.0, %v2985_v56  ;;  %v2973_v32 = vadd.f32 %v3744_v61, %v2972_v48  ;;  %v3132_v31 = vmul.f32 %v8159_v63, %v8146_v51  ;;  %vm3137_vm8 = vweird.f32 %v8159_v63 }
 0x65c   :  { %v3505_v29 = vmul.f32 -1.442695, %v3100_v59  ;;  %vm8180_vm10 = vmor %vm3136_vm9, %vm3137_vm8 }
 0x65d   :  { %v2977_v3 = vsel %vm2976_vm2, %v3744_v61, %v2973_v32  ;;  %v2987_v27 = vmul.f32 %v3746_v41, %v2986_v13  ;;  %v3133_v15 = vsub.f32 1.0, %v3132_v31 }
 0x65e   :  { %v2982_v54 = vsel %vm2979_vm3, %v2981_v57, %v2977_v3  ;;  %3751 = vpow2.f32 %v3505_v29 }
 0x65f   :  { %v3000_v20 = vmul.f32 %v2982_v54, %v7918_v34  ;;  %v2988_v22 = vadd.f32 %v3746_v41, %v2987_v27  ;;  %v2993_v34 = vand.u32 2147483647, %v8141_v11  ;;  %v3134_v16 = vmul.f32 %v8159_v63, %v3133_v15 }
 0x660   :  { %v3077_v23 = vpop.f32.mrf.mxu2  ;;  %v3019_v11 = vadd.f32 %v3015_v53, %v5141_v58 }
 0x661   :  { %v8163_v36 = vadd.f32 %v3001_v24, %v3000_v20  ;;  %v3102_v21 = vadd.f32 %v3077_v23, %v3018_v38  ;;  %v2992_v9 = vsel %vm2991_vm6, %v3746_v41, %v2988_v22  ;;  %vm2994_vm7 = vcmp.eq.f32.partialorder %v2993_v34, 8.507059e+37  ;;  %v3411_v20 = vld [vmem:[#allocation11 + $0x70] sm:$0xff]  ;;  %v3410_v24 = vld [vmem:[#allocation11 + $0x68] sm:$0xff]  ;;  %v3409_v38 = vld [vmem:[#allocation11 + $0x60] sm:$0xff] }
 0x662   :  { %v2997_v37 = vsel %vm2994_vm7, %v2996_v45, %v2992_v9  ;;  %v3103_v33 = vadd.f32 %v3097_v14, %v3019_v11  ;;  %v3135_v47 = vadd.f32 %v8159_v63, %v3134_v16  ;;  %v3408_v23 = vld [vmem:[#allocation11 + $0x58] sm:$0xff]  ;;  %v3407_v22 = vld [vmem:[#allocation11 + $0x50] sm:$0xff]  ;;  %v3405_v34 = vld [vmem:[#allocation11 + $0x40] sm:$0xff] }
 0x663   :  { %3753 = vtanh.f32 %v8163_v36  ;;  %v3507_v18 = vmul.f32 -1.442695, %v3102_v21  ;;  %v3404_v9 = vld [vmem:[#allocation11 + $0x38] sm:$0xff] }
 0x664   :  { %v3752_v1 = vpop.eup %3751  ;;  %v3139_v44 = vsel %vm8180_vm10, %v8159_v63, %v3135_v47 }
 0x665   :  { %v3113_v4 = vadd.f32 1.0, %v3752_v1  ;;  %3755 = vpow2.f32 %v3507_v18  ;;  %v3144_v48 = vsel %vm3141_vm12, %v3143_v5, %v3139_v44 }
 0x666   :  { %v3162_v35 = vmul.f32 %v3144_v48, %v7961_v43  ;;  %v3412_v43 = vld [vmem:[#allocation11 + $0x78] sm:$0xff] }
 0x667   :  { %3757 = vrcp.f32 %v3113_v4  ;;  %v3127_v19 = vand.u32 2147483648, %v3113_v4  ;;  %v3125_v60 = vand.u32 2147483647, %v3113_v4  ;;  %vm3121_vm13 = vweird.f32 %v3113_v4 }
 0x669   :  { %v3754_v30 = vpop.eup %3753  ;;  %v3128_v51 = vor.u32 1.1754944e-38, %v3127_v19  ;;  %vm3126_vm15 = vcmp.eq.f32.partialorder %v3125_v60, 8.507059e+37 }
 0x66a   :  { %v3004_v0 = vmul.f32 %v3754_v30, %v2997_v37  ;;  %v3403_v37 = vld [vmem:[#allocation11 + $0x30] sm:$0xff] }
 0x66b   :  { %v3756_v52 = vpop.eup %3755 }
 0x66c   :  { %v3115_v61 = vadd.f32 1.0, %v3756_v52  ;;  %3203 = vmatmul.f32.vlgmr.msra.gmra.mxu1 %v3004_v0  ;;  %3243 = vmatmul.f32.vlgmr.msra.gmra.mxu3 %v3004_v0 }
 0x66d   :  { %v3758_v7 = vpop.eup %3757 }
 0x66e   :  { %v3117_v42 = vmul.f32 %v3758_v7, %v3113_v4  ;;  %3759 = vrcp.f32 %v3115_v61  ;;  %vm3122_vm11 = vweird.f32 %v3758_v7  ;;  %v3157_v39 = vand.u32 2147483648, %v3115_v61 }
 0x66f   :  { %3761 = vtanh.f32 %v3103_v33  ;;  %vm3123_vm14 = vmor %vm3121_vm13, %vm3122_vm11  ;;  %vm3151_vm1 = vweird.f32 %v3115_v61  ;;  %v3155_v29 = vand.u32 2147483647, %v3115_v61 }
 0x670   :  { %v3118_v6 = vsub.f32 1.0, %v3117_v42  ;;  %v3158_v3 = vor.u32 1.1754944e-38, %v3157_v39  ;;  %v3399_v42 = vld [vmem:[#allocation11 + $0x10] sm:$0xff] }
 0x671   :  { %vm3156_vm3 = vcmp.eq.f32.partialorder %v3155_v29, 8.507059e+37 }
 0x672   :  { %v3119_v41 = vmul.f32 %v3758_v7, %v3118_v6 }
 0x674   :  { %v3760_v25 = vpop.eup %3759  ;;  %v3120_v46 = vadd.f32 %v3758_v7, %v3119_v41  ;;  %3283 = vmatmul.f32.vlgmr.msrb.gmra.mxu1 %v3004_v0  ;;  %3323 = vmatmul.f32.vlgmr.msrb.gmra.mxu3 %v3004_v0  ;;  %v3402_v0 = vld [vmem:[#allocation11 + $0x28] sm:$0xff] }
 0x675   :  { %v3147_v28 = vmul.f32 %v3760_v25, %v3115_v61  ;;  %v3762_v8 = vpop.eup %3761  ;;  %vm3152_vm0 = vweird.f32 %v3760_v25  ;;  %v3401_v61 = vld [vmem:[#allocation11 + $0x20] sm:$0xff] }
 0x676   :  { %v3124_v56 = vsel %vm3123_vm14, %v3758_v7, %v3120_v46  ;;  %vm3153_vm2 = vmor %vm3151_vm1, %vm3152_vm0  ;;  %v3400_v7 = vld [vmem:[#allocation11 + $0x18] sm:$0xff] }
 0x677   :  { %v3148_v62 = vsub.f32 1.0, %v3147_v28  ;;  %v3129_v49 = vsel %vm3126_vm15, %v3128_v51, %v3124_v56 }
 0x678   :  { %v3163_v59 = vmul.f32 %v3762_v8, %v3129_v49 }
 0x679   :  { %v3149_v13 = vmul.f32 %v3760_v25, %v3148_v62 }
 0x67a   :  { %v3164_v32 = vadd.f32 %v3163_v59, %v3162_v35 }
 0x67b   :  { %v3150_v57 = vadd.f32 %v3760_v25, %v3149_v13 }
 0x67c   :  { %3763 = vtanh.f32 %v3164_v32 }
 0x67d   :  { %v3154_v26 = vsel %vm3153_vm2, %v3760_v25, %v3150_v57 }
 0x67e   :  { %v3159_v54 = vsel %vm3156_vm3, %v3158_v3, %v3154_v26 }
 0x682   :  { %v3764_v63 = vpop.eup %3763 }
 0x683   :  { %v3166_v27 = vmul.f32 %v3764_v63, %v3159_v54 }
 0x685   :  { %3183 = vmatmul.f32.vlgmr.msra.gmra.mxu0 %v3166_v27  ;;  %3223 = vmatmul.f32.vlgmr.msra.gmra.mxu2 %v3166_v27 }
 0x686   :  { %3417 = vmatpush.msra.mxu0 %v3412_v43 }
 0x688   :  { %3418 = vmatpush.msra.mxu0 %v3411_v20 }
 0x68a   :  { %3419 = vmatpush.msra.mxu0 %v3410_v24 }
 0x68c   :  { %3420 = vmatpush.msra.mxu0 %v3409_v38 }
 0x68d   :  { %3263 = vmatmul.f32.vlgmr.msrb.gmra.mxu0 %v3166_v27  ;;  %3303 = vmatmul.f32.vlgmr.msrb.gmra.mxu2 %v3166_v27 }
 0x68e   :  { %3421 = vmatpush.msra.mxu0 %v3408_v23 }
 0x690   :  { %3422 = vmatpush.msra.mxu0 %v3407_v22 }
 0x692   :  { %3423 = vmatpush.msra.mxu0 %v3406_v50 }
 0x694   :  { %3424 = vmatpush.msra.mxu0 %v3405_v34 }
 0x696   :  { %3425 = vmatpush.msra.mxu0 %v3404_v9 }
 0x698   :  { %3426 = vmatpush.msra.mxu0 %v3403_v37 }
 0x69a   :  { %3427 = vmatpush.msra.mxu0 %v3402_v0 }
 0x69c   :  { %3428 = vmatpush.msra.mxu0 %v3401_v61 }
 0x69e   :  { %3429 = vmatpush.msra.mxu0 %v3400_v7 }
 0x6a0   :  { %3430 = vmatpush.msra.mxu0 %v3399_v42 }
 0x6a2   :  { %3431 = vmatpush.msra.mxu0 %v3398_v17 }
 0x6e9   :  { %v3204_v21 = vpop.f32.mrf.mxu1 }
 0x6ef   :  { %v3244_v45 = vpop.f32.mrf.mxu3 }
 0x6f7   :  { %v3324_v46 = vpop.f32.mrf.mxu3 }
 0x702   :  { %v3184_v31 = vpop.f32.mrf.mxu0 }
 0x703   :  { %v3185_v18 = vadd.f32 %v3184_v31, %v9835_v40  ;;  %v3284_v40 = vpop.f32.mrf.mxu1 }
 0x705   :  { %v3205_v1 = vadd.f32 %v3204_v21, %v3185_v18 }
 0x707   :  { %v3508_v4 = vmul.f32 -1.442695, %v3205_v1 }
 0x708   :  { %v3224_v15 = vpop.f32.mrf.mxu2 }
 0x709   :  { %3765 = vpow2.f32 %v3508_v4  ;;  %v3225_v53 = vadd.f32 %v3224_v15, %v9837_v55 }
 0x70a   :  { %v3264_v30 = vpop.f32.mrf.mxu0 }
 0x70b   :  { %v3245_v16 = vadd.f32 %v3244_v45, %v3225_v53  ;;  %v3265_v14 = vadd.f32 %v3264_v30, %v9839_v2  ;;  %v3397_v2 = vld [vmem:[#allocation11] sm:$0xff] }
 0x70c   :  { %3432 = vmatpush.msra.mxu0 %v3397_v2 }
 0x70d   :  { %v3509_v52 = vmul.f32 -1.442695, %v3245_v16  ;;  %v3285_v11 = vadd.f32 %v3284_v40, %v3265_v14 }
 0x70f   :  { %v3766_v33 = vpop.eup %3765  ;;  %3767 = vpow2.f32 %v3509_v52  ;;  %v3510_v47 = vmul.f32 -1.442695, %v3285_v11 }
 0x710   :  { %v3336_v55 = vadd.f32 1.0, %v3766_v33  ;;  %v3304_v19 = vpop.f32.mrf.mxu2 }
 0x711   :  { %3769 = vpow2.f32 %v3510_v47  ;;  %v3305_v5 = vadd.f32 %v3304_v19, %v9840_v12 }
 0x712   :  { %3771 = vrcp.f32 %v3336_v55  ;;  %v3350_v49 = vand.u32 2147483648, %v3336_v55  ;;  %vm3344_vm5 = vweird.f32 %v3336_v55  ;;  %v3348_v13 = vand.u32 2147483647, %v3336_v55 }
 0x713   :  { %v3325_v48 = vadd.f32 %v3324_v46, %v3305_v5 }
 0x714   :  { %v3351_v26 = vor.u32 1.1754944e-38, %v3350_v49  ;;  %vm3349_vm9 = vcmp.eq.f32.partialorder %v3348_v13, 8.507059e+37 }
 0x715   :  { %v3768_v10 = vpop.eup %3767 }
 0x716   :  { %v3337_v6 = vadd.f32 1.0, %v3768_v10 }
 0x717   :  { %v3770_v58 = vpop.eup %3769 }
 0x718   :  { %v3772_v44 = vpop.eup %3771  ;;  %3773 = vrcp.f32 %v3337_v6  ;;  %v3338_v41 = vadd.f32 1.0, %v3770_v58  ;;  %v3365_v32 = vand.u32 2147483648, %v3337_v6  ;;  %v3363_v39 = vand.u32 2147483647, %v3337_v6 }
 0x719   :  { %v3340_v60 = vmul.f32 %v3772_v44, %v3336_v55  ;;  %vm3345_vm4 = vweird.f32 %v3772_v44  ;;  %vm3359_vm8 = vweird.f32 %v3337_v6 }
 0x71a   :  { %3775 = vrcp.f32 %v3338_v41  ;;  %vm3346_vm6 = vmor %vm3344_vm5, %vm3345_vm4  ;;  %v3366_v63 = vor.u32 1.1754944e-38, %v3365_v32  ;;  %vm3364_vm11 = vcmp.eq.f32.partialorder %v3363_v39, 8.507059e+37  ;;  %v3380_v22 = vand.u32 2147483648, %v3338_v41 }
 0x71b   :  { %v3341_v25 = vsub.f32 1.0, %v3340_v60  ;;  %3777 = vtanh.f32 %v3325_v48  ;;  %vm3374_vm13 = vweird.f32 %v3338_v41  ;;  %v3378_v18 = vand.u32 2147483647, %v3338_v41 }
 0x71c   :  { %v3381_v1 = vor.u32 1.1754944e-38, %v3380_v22 }
 0x71d   :  { %v3342_v51 = vmul.f32 %v3772_v44, %v3341_v25  ;;  %vm3379_vm15 = vcmp.eq.f32.partialorder %v3378_v18, 8.507059e+37 }
 0x71e   :  { %v3774_v28 = vpop.eup %3773 }
 0x71f   :  { %v3355_v56 = vmul.f32 %v3774_v28, %v3337_v6  ;;  %v3343_v8 = vadd.f32 %v3772_v44, %v3342_v51  ;;  %vm3360_vm7 = vweird.f32 %v3774_v28 }
 0x720   :  { %v3776_v62 = vpop.eup %3775  ;;  %vm3361_vm10 = vmor %vm3359_vm8, %vm3360_vm7 }
 0x721   :  { %v3356_v35 = vsub.f32 1.0, %v3355_v56  ;;  %v3370_v59 = vmul.f32 %v3776_v62, %v3338_v41  ;;  %v3347_v12 = vsel %vm3346_vm6, %v3772_v44, %v3343_v8  ;;  %v3778_v43 = vpop.eup %3777  ;;  %vm3375_vm12 = vweird.f32 %v3776_v62 }
 0x722   :  { %v3352_v54 = vsel %vm3349_vm9, %v3351_v26, %v3347_v12  ;;  %vm3376_vm14 = vmor %vm3374_vm13, %vm3375_vm12 }
 0x723   :  { %v3357_v57 = vmul.f32 %v3774_v28, %v3356_v35  ;;  %v3371_v29 = vsub.f32 1.0, %v3370_v59  ;;  %v3386_v23 = vmul.f32 %v3778_v43, %v3352_v54 }
 0x725   :  { %v3358_v3 = vadd.f32 %v3774_v28, %v3357_v57  ;;  %v3372_v20 = vmul.f32 %v3776_v62, %v3371_v29 }
 0x727   :  { %v3362_v27 = vsel %vm3361_vm10, %v3774_v28, %v3358_v3  ;;  %v3373_v31 = vadd.f32 %v3776_v62, %v3372_v20 }
 0x728   :  { %v3367_v24 = vsel %vm3364_vm11, %v3366_v63, %v3362_v27 }
 0x729   :  { %v3385_v38 = vmul.f32 %v3367_v24, %v8163_v36  ;;  %v3377_v50 = vsel %vm3376_vm14, %v3776_v62, %v3373_v31  ;;  %v3524_v36 = vld [vmem:[%s8206_s7] ss:$0 sm:$0xff] }
 0x72a   :  { %v3382_v4 = vsel %vm3379_vm15, %v3381_v1, %v3377_v50 }
 0x72b   :  { %v3387_v21 = vadd.f32 %v3386_v23, %v3385_v38 }
 0x72d   :  { %3779 = vtanh.f32 %v3387_v21 }
 0x733   :  { %v3780_v34 = vpop.eup %3779 }
 0x734   :  { %v3389_v15 = vmul.f32 %v3780_v34, %v3382_v4 }
 0x736   :  { %3433 = vmatmul.f32.vlgmr.msra.gmra.mxu0 %v3389_v15 }
 0x7b3   :  { %v3434_v9 = vpop.f32.mrf.mxu0 }
 0x7b4   :  { %v3435_v53 = vadd.f32 %v3524_v36, %v3434_v9 }
 0x7b6   :  { %3437 = vst [vmem:[#allocation12] sm:$0xff] %v3435_v53 }
 0x7b7   :  { %3448 = dma.vmem_to_hbm [thread:$0]  %s3444_s4, 128, %s3446_s22, [#allocation8]  }
 0x7b8   :  { %4480 = dma.done.wait [#allocation8], 128  }
 0x7b9   :  { %4481 = vsyncadd [#allocation8], 4294967168 }
 0x7ba   :  { %3453 = vsyncpa [#allocation7], 1 }
 0x7bb   :  { %3454 = vsyncpa [#allocation10], 1 }
 0x7bc   :  { %3455 = vsyncpa [#allocation8], 1 }

</bundles_post_ra>
